<compile_context>
chip_gen: v7x
topology: tpu7x:2x2x1
jax: 0.10.0
libtpu: 0.0.40
codegen_flags: <defaults>
</compile_context>

<pallas_src>
import functools
import math

import jax
import jax.numpy as jnp
from jax.experimental import pallas as pl
from jax.experimental.pallas import tpu as pltpu

D_MODEL = 64
N_HEADS = 4
D_HEAD = D_MODEL // N_HEADS      # == d_feature = 16
D_FF = 256
N_BLOCKS = 2
VOCAB = 28
MAX_LEN = 512
LN_EPS = 1e-5                    # PyTorch LayerNorm default
NEG_INF = -1e30


# --------------------------- in-kernel helpers (traced inside the Pallas body) ------

def _layernorm(x, gamma, beta):
    mean = jnp.mean(x, axis=-1, keepdims=True)
    cent = x - mean
    var = jnp.mean(cent * cent, axis=-1, keepdims=True)
    return cent * jax.lax.rsqrt(var + LN_EPS) * gamma + beta


def _attn_bias(batch, lq, lk, causal, col_start):
    """Additive attention bias for batch-folded scores of shape (batch*lq, batch*lk).

    Rows/cols are batch-major.  A score is valid iff query-row and key-col belong to
    the same batch element, the key's local position is >= col_start (used to drop the
    first memory row in cross-attention, i.e. mem = enc_out[1:]), and - if causal -
    local_col <= local_row.  Built from broadcasted_iota: never DMA'd from HBM.
    Returns 0.0 where valid and NEG_INF where masked (added to raw scores).
    """
    r = jax.lax.broadcasted_iota(jnp.int32, (batch * lq, batch * lk), 0)
    c = jax.lax.broadcasted_iota(jnp.int32, (batch * lq, batch * lk), 1)
    mask = None
    for b in range(batch):
        lr = r - b * lq
        lc = c - b * lk
        m = (lr >= 0) & (lr < lq) & (lc >= col_start) & (lc < lk)
        if causal:
            m = m & (lc <= lr)
        mask = m if mask is None else (mask | m)
    return jnp.where(mask, 0.0, NEG_INF).astype(jnp.float32)


def _mha_core(q, k, v, w_o, bias):
    """Multi-head attention on batch-folded 2D activations.

    q: (batch*lq, D_MODEL), k/v: (batch*lk, D_MODEL).  All heads handled in this single
    invocation; each head's context is folded directly into the output projection via
    ctx_h @ w_o[h*dh:(h+1)*dh, :], so head outputs are never concatenated.
    Returns (batch*lq, D_MODEL) WITHOUT the output-projection bias.
    """
    scale = 1.0 / math.sqrt(D_HEAD)
    out = None
    for h in range(N_HEADS):
        sl = slice(h * D_HEAD, (h + 1) * D_HEAD)
        qh = q[:, sl] * scale                       # scale the thin (M,16) tile
        kh, vh = k[:, sl], v[:, sl]
        s = jax.lax.dot_general(qh, kh, (((1,), (1,)), ((), ())),
                                preferred_element_type=jnp.float32) + bias
        m = jnp.max(s, axis=-1, keepdims=True)
        e = jnp.exp(s - m)
        p = e * pl.reciprocal(jnp.sum(e, axis=-1, keepdims=True), approx=True)
        ctx = jnp.dot(p, vh, preferred_element_type=jnp.float32)            # (B*lq, dh)
        contrib = jnp.dot(ctx, w_o[sl, :], preferred_element_type=jnp.float32)
        out = contrib if out is None else out + contrib
    return out


def _self_attn_sublayer(x, w_qkv, b_qkv, w_o, b_o, ln_g, ln_b, bias):
    # Fused QKV projection: one (B*L,64) x (64,192) matmul.
    qkv = jnp.dot(x, w_qkv, preferred_element_type=jnp.float32) + b_qkv
    q = qkv[:, 0:D_MODEL]
    k = qkv[:, D_MODEL:2 * D_MODEL]
    v = qkv[:, 2 * D_MODEL:3 * D_MODEL]
    attn = _mha_core(q, k, v, w_o, bias)
    return _layernorm(x + attn + b_o, ln_g, ln_b)          # fused residual + LN epilogue


def _cross_attn_sublayer(x, mem, w_q, b_q, w_kv, b_kv, w_o, b_o, ln_g, ln_b, bias):
    q = jnp.dot(x, w_q, preferred_element_type=jnp.float32) + b_q
    kv = jnp.dot(mem, w_kv, preferred_element_type=jnp.float32) + b_kv       # fused K|V
    k = kv[:, 0:D_MODEL]
    v = kv[:, D_MODEL:2 * D_MODEL]
    attn = _mha_core(q, k, v, w_o, bias)
    return _layernorm(x + attn + b_o, ln_g, ln_b)


def _ffn_sublayer(x, w1, b1, w2, b2, ln_g, ln_b):
    h = jnp.maximum(jnp.dot(x, w1, preferred_element_type=jnp.float32) + b1, 0.0)
    o = jnp.dot(h, w2, preferred_element_type=jnp.float32) + b2
    return _layernorm(x + o, ln_g, ln_b)


# --------------------------- the fused kernel ----------------------------------------

def _fused_transformer_kernel(*refs, batch, seq):
    """Whole encoder+decoder stack in one Pallas invocation.

    refs = (g_ref, p_ref, <flat params in prepare_kernel_params() order>, out_ref).
    Activations are (batch*seq, D_MODEL) with batch-major rows; everything stays in
    VMEM for the entire forward.
    """
    g_ref, p_ref = refs[0], refs[1]
    out_ref = refs[-1]
    param_iter = iter(refs[2:-1])

    def take():
        return next(param_iter)[...]

    def take_n(n):
        return tuple(take() for _ in range(n))

    # Build each distinct attention bias exactly once (reused across blocks & heads).
    enc_bias = _attn_bias(batch, seq, seq, causal=False, col_start=0)
    dec_bias = _attn_bias(batch, seq, seq, causal=True, col_start=0)
    # Decoder memory = encoder_output[1:]; realized by biasing each batch's first
    # memory column to -inf (col_start=1) instead of slicing/concatenating.
    xat_bias = _attn_bias(batch, seq, seq, causal=False, col_start=1)

    # ----- encoder: N_BLOCKS x (self-attn -> add&norm -> ffn -> add&norm) -----
    x = g_ref[...]
    for _ in range(N_BLOCKS):
        w_qkv, b_qkv, w_o, b_o, ln1_g, ln1_b = take_n(6)
        x = _self_attn_sublayer(x, w_qkv, b_qkv, w_o, b_o, ln1_g, ln1_b, enc_bias)
        w1, b1, w2, b2, ln2_g, ln2_b = take_n(6)
        x = _ffn_sublayer(x, w1, b1, w2, b2, ln2_g, ln2_b)

    mem = x

    # ----- decoder: N_BLOCKS x (causal self-attn -> cross-attn -> ffn), each +add&norm
    y = p_ref[...]
    for _ in range(N_BLOCKS):
        w_qkv, b_qkv, w_o, b_o, ln1_g, ln1_b = take_n(6)
        y = _self_attn_sublayer(y, w_qkv, b_qkv, w_o, b_o, ln1_g, ln1_b, dec_bias)
        w_q, b_q, w_kv, b_kv, cw_o, cb_o, ln2_g, ln2_b = take_n(8)
        y = _cross_attn_sublayer(y, mem, w_q, b_q, w_kv, b_kv, cw_o, cb_o,
                                 ln2_g, ln2_b, xat_bias)
        w1, b1, w2, b2, ln3_g, ln3_b = take_n(6)
        y = _ffn_sublayer(y, w1, b1, w2, b2, ln3_g, ln3_b)

    out_ref[...] = y        # single store of the final result


# --------------------------- parameter packing (once, outside jit) -------------------

def _row(v):
    return v.reshape(1, -1)


def prepare_kernel_params(params):
    """Fuse QKV / KV weights and flatten into the exact order the kernel consumes."""
    flat = []
    for blk in params["encoder"]:
        a = blk["attn"]
        flat += [jnp.concatenate([a["wq"], a["wk"], a["wv"]], axis=1),
                 _row(jnp.concatenate([a["bq"], a["bk"], a["bv"]])),
                 a["wo"], _row(a["bo"]),
                 _row(blk["ln1"]["g"]), _row(blk["ln1"]["b"])]
        f = blk["ffn"]
        flat += [f["w1"], _row(f["b1"]), f["w2"], _row(f["b2"]),
                 _row(blk["ln2"]["g"]), _row(blk["ln2"]["b"])]
    for blk in params["decoder"]:
        a = blk["self_attn"]
        flat += [jnp.concatenate([a["wq"], a["wk"], a["wv"]], axis=1),
                 _row(jnp.concatenate([a["bq"], a["bk"], a["bv"]])),
                 a["wo"], _row(a["bo"]),
                 _row(blk["ln1"]["g"]), _row(blk["ln1"]["b"])]
        c = blk["cross_attn"]
        flat += [c["wq"], _row(c["bq"]),
                 jnp.concatenate([c["wk"], c["wv"]], axis=1),
                 _row(jnp.concatenate([c["bk"], c["bv"]])),
                 c["wo"], _row(c["bo"]),
                 _row(blk["ln2"]["g"]), _row(blk["ln2"]["b"])]
        f = blk["ffn"]
        flat += [f["w1"], _row(f["b1"]), f["w2"], _row(f["b2"]),
                 _row(blk["ln3"]["g"]), _row(blk["ln3"]["b"])]
    return tuple(flat)


# --------------------------- forward (glue + one pallas_call) ------------------------

def transformer_forward(emb_params, kernel_params, tokens):
    """tokens: (SEQ, B) int32, seq-first.  Returns (SEQ-1, B, D_MODEL) float32."""
    seq = tokens.shape[0] - 1
    batch = tokens.shape[1]

    def embed(tok):  # (L, B) int32 -> (B*L, D_MODEL), batch-major rows
        we = emb_params["word"][tok]                  # gather stays in plain-JAX glue
        pe = emb_params["pos"][: tok.shape[0]]
        e = we + pe[:, None, :]
        return e.transpose(1, 0, 2).reshape(tok.shape[1] * tok.shape[0], D_MODEL)

    g = embed(tokens[:-1])          # encoder input
    # TODO(synk): the reference forward calls self.emb(x[1:]) where x has been
    # reassigned to the *float* encoder output (nn.Embedding would raise on it);
    # interpreted here as embedding the shifted input tokens, with the decoder memory
    # being encoder_output[1:] (realized via the col_start=1 cross-attention bias).
    p = embed(tokens[1:])           # decoder input

    kernel = functools.partial(_fused_transformer_kernel, batch=batch, seq=seq)
    vmem = pl.BlockSpec(memory_space=pltpu.MemorySpace.VMEM)
    y2d = pl.pallas_call(
        kernel,
        out_shape=jax.ShapeDtypeStruct((batch * seq, D_MODEL), jnp.float32),
        in_specs=[vmem] * (2 + len(kernel_params)),
        out_specs=vmem,
        compiler_params=pltpu.CompilerParams(vmem_limit_bytes=32 * 1024 * 1024),
    )(g, p, *kernel_params)
    return y2d.reshape(batch, seq, D_MODEL).transpose(1, 0, 2)


# --------------------------- parameter init ------------------------------------------

def _dense(key, din, dout):
    kw, = jax.random.split(key, 1)
    return {"w": jax.random.normal(kw, (din, dout), jnp.float32) * 0.02,
            "b": jnp.zeros((dout,), jnp.float32)}


def _init_mha(key):
    ks = jax.random.split(key, 4)
    dq, dk, dv, do = (_dense(k, D_MODEL, D_MODEL) for k in ks)
    return {"wq": dq["w"], "bq": dq["b"], "wk": dk["w"], "bk": dk["b"],
            "wv": dv["w"], "bv": dv["b"], "wo": do["w"], "bo": do["b"]}


def _init_ffn(key):
    k1, k2 = jax.random.split(key)
    d1, d2 = _dense(k1, D_MODEL, D_FF), _dense(k2, D_FF, D_MODEL)
    return {"w1": d1["w"], "b1": d1["b"], "w2": d2["w"], "b2": d2["b"]}


def _init_ln():
    return {"g": jnp.ones((D_MODEL,), jnp.float32),
            "b": jnp.zeros((D_MODEL,), jnp.float32)}


def init_params(key):
    k_emb, k_pos, k_enc, k_dec = jax.random.split(key, 4)
    emb = {"word": jax.random.normal(k_emb, (VOCAB, D_MODEL), jnp.float32) * 0.1,
           "pos": jax.random.normal(k_pos, (MAX_LEN, D_MODEL), jnp.float32) * 0.1}
    enc_blocks = []
    for k in jax.random.split(k_enc, N_BLOCKS):
        ka, kf = jax.random.split(k)
        enc_blocks.append({"attn": _init_mha(ka), "ln1": _init_ln(),
                           "ffn": _init_ffn(kf), "ln2": _init_ln()})
    dec_blocks = []
    for k in jax.random.split(k_dec, N_BLOCKS):
        ks, kc, kf = jax.random.split(k, 3)
        dec_blocks.append({"self_attn": _init_mha(ks), "ln1": _init_ln(),
                           "cross_attn": _init_mha(kc), "ln2": _init_ln(),
                           "ffn": _init_ffn(kf), "ln3": _init_ln()})
    return {"emb": emb, "encoder": enc_blocks, "decoder": dec_blocks}


# --------------------------- main -----------------------------------------------------

if __name__ == "__main__":
    key = jax.random.PRNGKey(0)
    k_params, k_tok = jax.random.split(key)
    params = init_params(k_params)
    kernel_params = prepare_kernel_params(params)   # fuse/flatten weights once, outside jit

    SEQ, BATCH = 10, 2
    tokens = jax.random.randint(k_tok, (SEQ, BATCH), 0, VOCAB, dtype=jnp.int32)

    fwd = jax.jit(transformer_forward)
    y = fwd(params["emb"], kernel_params, tokens)
    y = jax.block_until_ready(y)

    assert y.shape == (SEQ - 1, BATCH, D_MODEL), y.shape
    assert bool(jnp.isfinite(y).all())
    print("KERNEL_OK")
</pallas_src>

<mosaic_0001>
module attributes {stable_mosaic.version = 11 : i64} {
  func.func @_fused_transformer_kernel(%arg0: memref<18x64xf32, #tpu.memory_space<vmem>>, %arg1: memref<18x64xf32, #tpu.memory_space<vmem>>, %arg2: memref<64x192xf32, #tpu.memory_space<vmem>>, %arg3: memref<1x192xf32, #tpu.memory_space<vmem>>, %arg4: memref<64x64xf32, #tpu.memory_space<vmem>>, %arg5: memref<1x64xf32, #tpu.memory_space<vmem>>, %arg6: memref<1x64xf32, #tpu.memory_space<vmem>>, %arg7: memref<1x64xf32, #tpu.memory_space<vmem>>, %arg8: memref<64x256xf32, #tpu.memory_space<vmem>>, %arg9: memref<1x256xf32, #tpu.memory_space<vmem>>, %arg10: memref<256x64xf32, #tpu.memory_space<vmem>>, %arg11: memref<1x64xf32, #tpu.memory_space<vmem>>, %arg12: memref<1x64xf32, #tpu.memory_space<vmem>>, %arg13: memref<1x64xf32, #tpu.memory_space<vmem>>, %arg14: memref<64x192xf32, #tpu.memory_space<vmem>>, %arg15: memref<1x192xf32, #tpu.memory_space<vmem>>, %arg16: memref<64x64xf32, #tpu.memory_space<vmem>>, %arg17: memref<1x64xf32, #tpu.memory_space<vmem>>, %arg18: memref<1x64xf32, #tpu.memory_space<vmem>>, %arg19: memref<1x64xf32, #tpu.memory_space<vmem>>, %arg20: memref<64x256xf32, #tpu.memory_space<vmem>>, %arg21: memref<1x256xf32, #tpu.memory_space<vmem>>, %arg22: memref<256x64xf32, #tpu.memory_space<vmem>>, %arg23: memref<1x64xf32, #tpu.memory_space<vmem>>, %arg24: memref<1x64xf32, #tpu.memory_space<vmem>>, %arg25: memref<1x64xf32, #tpu.memory_space<vmem>>, %arg26: memref<64x192xf32, #tpu.memory_space<vmem>>, %arg27: memref<1x192xf32, #tpu.memory_space<vmem>>, %arg28: memref<64x64xf32, #tpu.memory_space<vmem>>, %arg29: memref<1x64xf32, #tpu.memory_space<vmem>>, %arg30: memref<1x64xf32, #tpu.memory_space<vmem>>, %arg31: memref<1x64xf32, #tpu.memory_space<vmem>>, %arg32: memref<64x64xf32, #tpu.memory_space<vmem>>, %arg33: memref<1x64xf32, #tpu.memory_space<vmem>>, %arg34: memref<64x128xf32, #tpu.memory_space<vmem>>, %arg35: memref<1x128xf32, #tpu.memory_space<vmem>>, %arg36: memref<64x64xf32, #tpu.memory_space<vmem>>, %arg37: memref<1x64xf32, #tpu.memory_space<vmem>>, %arg38: memref<1x64xf32, #tpu.memory_space<vmem>>, %arg39: memref<1x64xf32, #tpu.memory_space<vmem>>, %arg40: memref<64x256xf32, #tpu.memory_space<vmem>>, %arg41: memref<1x256xf32, #tpu.memory_space<vmem>>, %arg42: memref<256x64xf32, #tpu.memory_space<vmem>>, %arg43: memref<1x64xf32, #tpu.memory_space<vmem>>, %arg44: memref<1x64xf32, #tpu.memory_space<vmem>>, %arg45: memref<1x64xf32, #tpu.memory_space<vmem>>, %arg46: memref<64x192xf32, #tpu.memory_space<vmem>>, %arg47: memref<1x192xf32, #tpu.memory_space<vmem>>, %arg48: memref<64x64xf32, #tpu.memory_space<vmem>>, %arg49: memref<1x64xf32, #tpu.memory_space<vmem>>, %arg50: memref<1x64xf32, #tpu.memory_space<vmem>>, %arg51: memref<1x64xf32, #tpu.memory_space<vmem>>, %arg52: memref<64x64xf32, #tpu.memory_space<vmem>>, %arg53: memref<1x64xf32, #tpu.memory_space<vmem>>, %arg54: memref<64x128xf32, #tpu.memory_space<vmem>>, %arg55: memref<1x128xf32, #tpu.memory_space<vmem>>, %arg56: memref<64x64xf32, #tpu.memory_space<vmem>>, %arg57: memref<1x64xf32, #tpu.memory_space<vmem>>, %arg58: memref<1x64xf32, #tpu.memory_space<vmem>>, %arg59: memref<1x64xf32, #tpu.memory_space<vmem>>, %arg60: memref<64x256xf32, #tpu.memory_space<vmem>>, %arg61: memref<1x256xf32, #tpu.memory_space<vmem>>, %arg62: memref<256x64xf32, #tpu.memory_space<vmem>>, %arg63: memref<1x64xf32, #tpu.memory_space<vmem>>, %arg64: memref<1x64xf32, #tpu.memory_space<vmem>>, %arg65: memref<1x64xf32, #tpu.memory_space<vmem>>, %arg66: memref<18x64xf32, #tpu.memory_space<vmem>>) attributes {dimension_semantics = [], scalar_prefetch = 0 : i64, scratch_operands = 0 : i64, tpu.core_type = #tpu.core_type<tc>} {
    %0 = tpu.iota {dimensions = array<i32: 0>} : vector<18x18xi32>
    %1 = tpu.iota {dimensions = array<i32: 1>} : vector<18x18xi32>
    %c0_i32 = arith.constant 0 : i32
    %2 = vector.broadcast %c0_i32 : i32 to vector<18x18xi32>
    %3 = arith.subi %0, %2 : vector<18x18xi32>
    %c0_i32_0 = arith.constant 0 : i32
    %4 = vector.broadcast %c0_i32_0 : i32 to vector<18x18xi32>
    %5 = arith.subi %1, %4 : vector<18x18xi32>
    %c0_i32_1 = arith.constant 0 : i32
    %6 = vector.broadcast %c0_i32_1 : i32 to vector<18x18xi32>
    %7 = arith.cmpi sge, %3, %6 : vector<18x18xi32>
    %c9_i32 = arith.constant 9 : i32
    %8 = vector.broadcast %c9_i32 : i32 to vector<18x18xi32>
    %9 = arith.cmpi slt, %3, %8 : vector<18x18xi32>
    %10 = arith.andi %7, %9 : vector<18x18xi1>
    %c0_i32_2 = arith.constant 0 : i32
    %11 = vector.broadcast %c0_i32_2 : i32 to vector<18x18xi32>
    %12 = arith.cmpi sge, %5, %11 : vector<18x18xi32>
    %13 = arith.andi %10, %12 : vector<18x18xi1>
    %c9_i32_3 = arith.constant 9 : i32
    %14 = vector.broadcast %c9_i32_3 : i32 to vector<18x18xi32>
    %15 = arith.cmpi slt, %5, %14 : vector<18x18xi32>
    %16 = arith.andi %13, %15 : vector<18x18xi1>
    %c9_i32_4 = arith.constant 9 : i32
    %17 = vector.broadcast %c9_i32_4 : i32 to vector<18x18xi32>
    %18 = arith.subi %0, %17 : vector<18x18xi32>
    %c9_i32_5 = arith.constant 9 : i32
    %19 = vector.broadcast %c9_i32_5 : i32 to vector<18x18xi32>
    %20 = arith.subi %1, %19 : vector<18x18xi32>
    %c0_i32_6 = arith.constant 0 : i32
    %21 = vector.broadcast %c0_i32_6 : i32 to vector<18x18xi32>
    %22 = arith.cmpi sge, %18, %21 : vector<18x18xi32>
    %c9_i32_7 = arith.constant 9 : i32
    %23 = vector.broadcast %c9_i32_7 : i32 to vector<18x18xi32>
    %24 = arith.cmpi slt, %18, %23 : vector<18x18xi32>
    %25 = arith.andi %22, %24 : vector<18x18xi1>
    %c0_i32_8 = arith.constant 0 : i32
    %26 = vector.broadcast %c0_i32_8 : i32 to vector<18x18xi32>
    %27 = arith.cmpi sge, %20, %26 : vector<18x18xi32>
    %28 = arith.andi %25, %27 : vector<18x18xi1>
    %c9_i32_9 = arith.constant 9 : i32
    %29 = vector.broadcast %c9_i32_9 : i32 to vector<18x18xi32>
    %30 = arith.cmpi slt, %20, %29 : vector<18x18xi32>
    %31 = arith.andi %28, %30 : vector<18x18xi1>
    %32 = arith.ori %16, %31 : vector<18x18xi1>
    %cst = arith.constant 0.000000e+00 : f32
    %cst_10 = arith.constant -1.000000e+30 : f32
    %33 = vector.broadcast %cst : f32 to vector<18x18xf32>
    %34 = vector.broadcast %cst_10 : f32 to vector<18x18xf32>
    %35 = arith.select %32, %33, %34 : vector<18x18xi1>, vector<18x18xf32>
    %36 = tpu.iota {dimensions = array<i32: 0>} : vector<18x18xi32>
    %37 = tpu.iota {dimensions = array<i32: 1>} : vector<18x18xi32>
    %c0_i32_11 = arith.constant 0 : i32
    %38 = vector.broadcast %c0_i32_11 : i32 to vector<18x18xi32>
    %39 = arith.subi %36, %38 : vector<18x18xi32>
    %c0_i32_12 = arith.constant 0 : i32
    %40 = vector.broadcast %c0_i32_12 : i32 to vector<18x18xi32>
    %41 = arith.subi %37, %40 : vector<18x18xi32>
    %c0_i32_13 = arith.constant 0 : i32
    %42 = vector.broadcast %c0_i32_13 : i32 to vector<18x18xi32>
    %43 = arith.cmpi sge, %39, %42 : vector<18x18xi32>
    %c9_i32_14 = arith.constant 9 : i32
    %44 = vector.broadcast %c9_i32_14 : i32 to vector<18x18xi32>
    %45 = arith.cmpi slt, %39, %44 : vector<18x18xi32>
    %46 = arith.andi %43, %45 : vector<18x18xi1>
    %c0_i32_15 = arith.constant 0 : i32
    %47 = vector.broadcast %c0_i32_15 : i32 to vector<18x18xi32>
    %48 = arith.cmpi sge, %41, %47 : vector<18x18xi32>
    %49 = arith.andi %46, %48 : vector<18x18xi1>
    %c9_i32_16 = arith.constant 9 : i32
    %50 = vector.broadcast %c9_i32_16 : i32 to vector<18x18xi32>
    %51 = arith.cmpi slt, %41, %50 : vector<18x18xi32>
    %52 = arith.andi %49, %51 : vector<18x18xi1>
    %53 = arith.cmpi sle, %41, %39 : vector<18x18xi32>
    %54 = arith.andi %52, %53 : vector<18x18xi1>
    %c9_i32_17 = arith.constant 9 : i32
    %55 = vector.broadcast %c9_i32_17 : i32 to vector<18x18xi32>
    %56 = arith.subi %36, %55 : vector<18x18xi32>
    %c9_i32_18 = arith.constant 9 : i32
    %57 = vector.broadcast %c9_i32_18 : i32 to vector<18x18xi32>
    %58 = arith.subi %37, %57 : vector<18x18xi32>
    %c0_i32_19 = arith.constant 0 : i32
    %59 = vector.broadcast %c0_i32_19 : i32 to vector<18x18xi32>
    %60 = arith.cmpi sge, %56, %59 : vector<18x18xi32>
    %c9_i32_20 = arith.constant 9 : i32
    %61 = vector.broadcast %c9_i32_20 : i32 to vector<18x18xi32>
    %62 = arith.cmpi slt, %56, %61 : vector<18x18xi32>
    %63 = arith.andi %60, %62 : vector<18x18xi1>
    %c0_i32_21 = arith.constant 0 : i32
    %64 = vector.broadcast %c0_i32_21 : i32 to vector<18x18xi32>
    %65 = arith.cmpi sge, %58, %64 : vector<18x18xi32>
    %66 = arith.andi %63, %65 : vector<18x18xi1>
    %c9_i32_22 = arith.constant 9 : i32
    %67 = vector.broadcast %c9_i32_22 : i32 to vector<18x18xi32>
    %68 = arith.cmpi slt, %58, %67 : vector<18x18xi32>
    %69 = arith.andi %66, %68 : vector<18x18xi1>
    %70 = arith.cmpi sle, %58, %56 : vector<18x18xi32>
    %71 = arith.andi %69, %70 : vector<18x18xi1>
    %72 = arith.ori %54, %71 : vector<18x18xi1>
    %cst_23 = arith.constant 0.000000e+00 : f32
    %cst_24 = arith.constant -1.000000e+30 : f32
    %73 = vector.broadcast %cst_23 : f32 to vector<18x18xf32>
    %74 = vector.broadcast %cst_24 : f32 to vector<18x18xf32>
    %75 = arith.select %72, %73, %74 : vector<18x18xi1>, vector<18x18xf32>
    %76 = tpu.iota {dimensions = array<i32: 0>} : vector<18x18xi32>
    %77 = tpu.iota {dimensions = array<i32: 1>} : vector<18x18xi32>
    %c0_i32_25 = arith.constant 0 : i32
    %78 = vector.broadcast %c0_i32_25 : i32 to vector<18x18xi32>
    %79 = arith.subi %76, %78 : vector<18x18xi32>
    %c0_i32_26 = arith.constant 0 : i32
    %80 = vector.broadcast %c0_i32_26 : i32 to vector<18x18xi32>
    %81 = arith.subi %77, %80 : vector<18x18xi32>
    %c0_i32_27 = arith.constant 0 : i32
    %82 = vector.broadcast %c0_i32_27 : i32 to vector<18x18xi32>
    %83 = arith.cmpi sge, %79, %82 : vector<18x18xi32>
    %c9_i32_28 = arith.constant 9 : i32
    %84 = vector.broadcast %c9_i32_28 : i32 to vector<18x18xi32>
    %85 = arith.cmpi slt, %79, %84 : vector<18x18xi32>
    %86 = arith.andi %83, %85 : vector<18x18xi1>
    %c1_i32 = arith.constant 1 : i32
    %87 = vector.broadcast %c1_i32 : i32 to vector<18x18xi32>
    %88 = arith.cmpi sge, %81, %87 : vector<18x18xi32>
    %89 = arith.andi %86, %88 : vector<18x18xi1>
    %c9_i32_29 = arith.constant 9 : i32
    %90 = vector.broadcast %c9_i32_29 : i32 to vector<18x18xi32>
    %91 = arith.cmpi slt, %81, %90 : vector<18x18xi32>
    %92 = arith.andi %89, %91 : vector<18x18xi1>
    %c9_i32_30 = arith.constant 9 : i32
    %93 = vector.broadcast %c9_i32_30 : i32 to vector<18x18xi32>
    %94 = arith.subi %76, %93 : vector<18x18xi32>
    %c9_i32_31 = arith.constant 9 : i32
    %95 = vector.broadcast %c9_i32_31 : i32 to vector<18x18xi32>
    %96 = arith.subi %77, %95 : vector<18x18xi32>
    %c0_i32_32 = arith.constant 0 : i32
    %97 = vector.broadcast %c0_i32_32 : i32 to vector<18x18xi32>
    %98 = arith.cmpi sge, %94, %97 : vector<18x18xi32>
    %c9_i32_33 = arith.constant 9 : i32
    %99 = vector.broadcast %c9_i32_33 : i32 to vector<18x18xi32>
    %100 = arith.cmpi slt, %94, %99 : vector<18x18xi32>
    %101 = arith.andi %98, %100 : vector<18x18xi1>
    %c1_i32_34 = arith.constant 1 : i32
    %102 = vector.broadcast %c1_i32_34 : i32 to vector<18x18xi32>
    %103 = arith.cmpi sge, %96, %102 : vector<18x18xi32>
    %104 = arith.andi %101, %103 : vector<18x18xi1>
    %c9_i32_35 = arith.constant 9 : i32
    %105 = vector.broadcast %c9_i32_35 : i32 to vector<18x18xi32>
    %106 = arith.cmpi slt, %96, %105 : vector<18x18xi32>
    %107 = arith.andi %104, %106 : vector<18x18xi1>
    %108 = arith.ori %92, %107 : vector<18x18xi1>
    %cst_36 = arith.constant 0.000000e+00 : f32
    %cst_37 = arith.constant -1.000000e+30 : f32
    %109 = vector.broadcast %cst_36 : f32 to vector<18x18xf32>
    %110 = vector.broadcast %cst_37 : f32 to vector<18x18xf32>
    %111 = arith.select %108, %109, %110 : vector<18x18xi1>, vector<18x18xf32>
    %c0 = arith.constant 0 : index
    %c0_38 = arith.constant 0 : index
    %112 = vector.load %arg0[%c0, %c0_38] : memref<18x64xf32, #tpu.memory_space<vmem>>, vector<18x64xf32>
    %c0_39 = arith.constant 0 : index
    %c0_40 = arith.constant 0 : index
    %113 = vector.load %arg2[%c0_39, %c0_40] : memref<64x192xf32, #tpu.memory_space<vmem>>, vector<64x192xf32>
    %c0_41 = arith.constant 0 : index
    %c0_42 = arith.constant 0 : index
    %114 = vector.load %arg3[%c0_41, %c0_42] : memref<1x192xf32, #tpu.memory_space<vmem>>, vector<1x192xf32>
    %c0_43 = arith.constant 0 : index
    %c0_44 = arith.constant 0 : index
    %115 = vector.load %arg4[%c0_43, %c0_44] : memref<64x64xf32, #tpu.memory_space<vmem>>, vector<64x64xf32>
    %c0_45 = arith.constant 0 : index
    %c0_46 = arith.constant 0 : index
    %116 = vector.load %arg5[%c0_45, %c0_46] : memref<1x64xf32, #tpu.memory_space<vmem>>, vector<1x64xf32>
    %c0_47 = arith.constant 0 : index
    %c0_48 = arith.constant 0 : index
    %117 = vector.load %arg6[%c0_47, %c0_48] : memref<1x64xf32, #tpu.memory_space<vmem>>, vector<1x64xf32>
    %c0_49 = arith.constant 0 : index
    %c0_50 = arith.constant 0 : index
    %118 = vector.load %arg7[%c0_49, %c0_50] : memref<1x64xf32, #tpu.memory_space<vmem>>, vector<1x64xf32>
    %cst_51 = arith.constant dense<0.000000e+00> : vector<18x192xf32>
    %119 = tpu.matmul %112, %113, %cst_51 {dimension_numbers = #tpu.dot_dimension_numbers<[1], [0], [0], [1], [0, 0, 1, 1], [], []>} : vector<18x64xf32>, vector<64x192xf32>, vector<18x192xf32> -> vector<18x192xf32>
    %120 = vector.broadcast %114 : vector<1x192xf32> to vector<18x192xf32>
    %121 = arith.addf %119, %120 : vector<18x192xf32>
    %122 = vector.extract_strided_slice %121 {offsets = [0, 0], sizes = [18, 64], strides = [1, 1]} : vector<18x192xf32> to vector<18x64xf32>
    %123 = vector.extract_strided_slice %121 {offsets = [0, 64], sizes = [18, 64], strides = [1, 1]} : vector<18x192xf32> to vector<18x64xf32>
    %124 = vector.extract_strided_slice %121 {offsets = [0, 128], sizes = [18, 64], strides = [1, 1]} : vector<18x192xf32> to vector<18x64xf32>
    %125 = vector.extract_strided_slice %122 {offsets = [0, 0], sizes = [18, 16], strides = [1, 1]} : vector<18x64xf32> to vector<18x16xf32>
    %cst_52 = arith.constant 2.500000e-01 : f32
    %126 = vector.broadcast %cst_52 : f32 to vector<18x16xf32>
    %127 = arith.mulf %125, %126 : vector<18x16xf32>
    %128 = vector.extract_strided_slice %123 {offsets = [0, 0], sizes = [18, 16], strides = [1, 1]} : vector<18x64xf32> to vector<18x16xf32>
    %129 = vector.extract_strided_slice %124 {offsets = [0, 0], sizes = [18, 16], strides = [1, 1]} : vector<18x64xf32> to vector<18x16xf32>
    %cst_53 = arith.constant dense<0.000000e+00> : vector<18x18xf32>
    %130 = tpu.matmul %127, %128, %cst_53 {dimension_numbers = #tpu.dot_dimension_numbers<[1], [1], [0], [0], [0, 0, 1, 0], [], []>} : vector<18x16xf32>, vector<18x16xf32>, vector<18x18xf32> -> vector<18x18xf32>
    %131 = arith.addf %130, %35 : vector<18x18xf32>
    %cst_54 = arith.constant dense<0xFF800000> : vector<18xf32>
    %132 = vector.multi_reduction <maximumf>, %131, %cst_54 [1] : vector<18x18xf32> to vector<18xf32>
    %133 = vector.shape_cast %132 : vector<18xf32> to vector<18x1xf32>
    %134 = vector.broadcast %133 : vector<18x1xf32> to vector<18x18xf32>
    %135 = arith.subf %131, %134 : vector<18x18xf32>
    %136 = math.exp %135 : vector<18x18xf32>
    %cst_55 = arith.constant dense<0.000000e+00> : vector<18xf32>
    %137 = vector.multi_reduction <add>, %136, %cst_55 [1] : vector<18x18xf32> to vector<18xf32>
    %138 = vector.shape_cast %137 : vector<18xf32> to vector<18x1xf32>
    %139 = tpu.reciprocal %138 {approx = true} : vector<18x1xf32> -> vector<18x1xf32>
    %140 = vector.broadcast %139 : vector<18x1xf32> to vector<18x18xf32>
    %141 = arith.mulf %136, %140 : vector<18x18xf32>
    %cst_56 = arith.constant dense<0.000000e+00> : vector<18x16xf32>
    %142 = tpu.matmul %141, %129, %cst_56 {dimension_numbers = #tpu.dot_dimension_numbers<[1], [0], [0], [1], [0, 0, 1, 1], [], []>} : vector<18x18xf32>, vector<18x16xf32>, vector<18x16xf32> -> vector<18x16xf32>
    %143 = vector.extract_strided_slice %115 {offsets = [0, 0], sizes = [16, 64], strides = [1, 1]} : vector<64x64xf32> to vector<16x64xf32>
    %cst_57 = arith.constant dense<0.000000e+00> : vector<18x64xf32>
    %144 = tpu.matmul %142, %143, %cst_57 {dimension_numbers = #tpu.dot_dimension_numbers<[1], [0], [0], [1], [0, 0, 1, 1], [], []>} : vector<18x16xf32>, vector<16x64xf32>, vector<18x64xf32> -> vector<18x64xf32>
    %145 = vector.extract_strided_slice %122 {offsets = [0, 16], sizes = [18, 16], strides = [1, 1]} : vector<18x64xf32> to vector<18x16xf32>
    %cst_58 = arith.constant 2.500000e-01 : f32
    %146 = vector.broadcast %cst_58 : f32 to vector<18x16xf32>
    %147 = arith.mulf %145, %146 : vector<18x16xf32>
    %148 = vector.extract_strided_slice %123 {offsets = [0, 16], sizes = [18, 16], strides = [1, 1]} : vector<18x64xf32> to vector<18x16xf32>
    %149 = vector.extract_strided_slice %124 {offsets = [0, 16], sizes = [18, 16], strides = [1, 1]} : vector<18x64xf32> to vector<18x16xf32>
    %cst_59 = arith.constant dense<0.000000e+00> : vector<18x18xf32>
    %150 = tpu.matmul %147, %148, %cst_59 {dimension_numbers = #tpu.dot_dimension_numbers<[1], [1], [0], [0], [0, 0, 1, 0], [], []>} : vector<18x16xf32>, vector<18x16xf32>, vector<18x18xf32> -> vector<18x18xf32>
    %151 = arith.addf %150, %35 : vector<18x18xf32>
    %cst_60 = arith.constant dense<0xFF800000> : vector<18xf32>
    %152 = vector.multi_reduction <maximumf>, %151, %cst_60 [1] : vector<18x18xf32> to vector<18xf32>
    %153 = vector.shape_cast %152 : vector<18xf32> to vector<18x1xf32>
    %154 = vector.broadcast %153 : vector<18x1xf32> to vector<18x18xf32>
    %155 = arith.subf %151, %154 : vector<18x18xf32>
    %156 = math.exp %155 : vector<18x18xf32>
    %cst_61 = arith.constant dense<0.000000e+00> : vector<18xf32>
    %157 = vector.multi_reduction <add>, %156, %cst_61 [1] : vector<18x18xf32> to vector<18xf32>
    %158 = vector.shape_cast %157 : vector<18xf32> to vector<18x1xf32>
    %159 = tpu.reciprocal %158 {approx = true} : vector<18x1xf32> -> vector<18x1xf32>
    %160 = vector.broadcast %159 : vector<18x1xf32> to vector<18x18xf32>
    %161 = arith.mulf %156, %160 : vector<18x18xf32>
    %cst_62 = arith.constant dense<0.000000e+00> : vector<18x16xf32>
    %162 = tpu.matmul %161, %149, %cst_62 {dimension_numbers = #tpu.dot_dimension_numbers<[1], [0], [0], [1], [0, 0, 1, 1], [], []>} : vector<18x18xf32>, vector<18x16xf32>, vector<18x16xf32> -> vector<18x16xf32>
    %163 = vector.extract_strided_slice %115 {offsets = [16, 0], sizes = [16, 64], strides = [1, 1]} : vector<64x64xf32> to vector<16x64xf32>
    %cst_63 = arith.constant dense<0.000000e+00> : vector<18x64xf32>
    %164 = tpu.matmul %162, %163, %cst_63 {dimension_numbers = #tpu.dot_dimension_numbers<[1], [0], [0], [1], [0, 0, 1, 1], [], []>} : vector<18x16xf32>, vector<16x64xf32>, vector<18x64xf32> -> vector<18x64xf32>
    %165 = arith.addf %144, %164 : vector<18x64xf32>
    %166 = vector.extract_strided_slice %122 {offsets = [0, 32], sizes = [18, 16], strides = [1, 1]} : vector<18x64xf32> to vector<18x16xf32>
    %cst_64 = arith.constant 2.500000e-01 : f32
    %167 = vector.broadcast %cst_64 : f32 to vector<18x16xf32>
    %168 = arith.mulf %166, %167 : vector<18x16xf32>
    %169 = vector.extract_strided_slice %123 {offsets = [0, 32], sizes = [18, 16], strides = [1, 1]} : vector<18x64xf32> to vector<18x16xf32>
    %170 = vector.extract_strided_slice %124 {offsets = [0, 32], sizes = [18, 16], strides = [1, 1]} : vector<18x64xf32> to vector<18x16xf32>
    %cst_65 = arith.constant dense<0.000000e+00> : vector<18x18xf32>
    %171 = tpu.matmul %168, %169, %cst_65 {dimension_numbers = #tpu.dot_dimension_numbers<[1], [1], [0], [0], [0, 0, 1, 0], [], []>} : vector<18x16xf32>, vector<18x16xf32>, vector<18x18xf32> -> vector<18x18xf32>
    %172 = arith.addf %171, %35 : vector<18x18xf32>
    %cst_66 = arith.constant dense<0xFF800000> : vector<18xf32>
    %173 = vector.multi_reduction <maximumf>, %172, %cst_66 [1] : vector<18x18xf32> to vector<18xf32>
    %174 = vector.shape_cast %173 : vector<18xf32> to vector<18x1xf32>
    %175 = vector.broadcast %174 : vector<18x1xf32> to vector<18x18xf32>
    %176 = arith.subf %172, %175 : vector<18x18xf32>
    %177 = math.exp %176 : vector<18x18xf32>
    %cst_67 = arith.constant dense<0.000000e+00> : vector<18xf32>
    %178 = vector.multi_reduction <add>, %177, %cst_67 [1] : vector<18x18xf32> to vector<18xf32>
    %179 = vector.shape_cast %178 : vector<18xf32> to vector<18x1xf32>
    %180 = tpu.reciprocal %179 {approx = true} : vector<18x1xf32> -> vector<18x1xf32>
    %181 = vector.broadcast %180 : vector<18x1xf32> to vector<18x18xf32>
    %182 = arith.mulf %177, %181 : vector<18x18xf32>
    %cst_68 = arith.constant dense<0.000000e+00> : vector<18x16xf32>
    %183 = tpu.matmul %182, %170, %cst_68 {dimension_numbers = #tpu.dot_dimension_numbers<[1], [0], [0], [1], [0, 0, 1, 1], [], []>} : vector<18x18xf32>, vector<18x16xf32>, vector<18x16xf32> -> vector<18x16xf32>
    %184 = vector.extract_strided_slice %115 {offsets = [32, 0], sizes = [16, 64], strides = [1, 1]} : vector<64x64xf32> to vector<16x64xf32>
    %cst_69 = arith.constant dense<0.000000e+00> : vector<18x64xf32>
    %185 = tpu.matmul %183, %184, %cst_69 {dimension_numbers = #tpu.dot_dimension_numbers<[1], [0], [0], [1], [0, 0, 1, 1], [], []>} : vector<18x16xf32>, vector<16x64xf32>, vector<18x64xf32> -> vector<18x64xf32>
    %186 = arith.addf %165, %185 : vector<18x64xf32>
    %187 = vector.extract_strided_slice %122 {offsets = [0, 48], sizes = [18, 16], strides = [1, 1]} : vector<18x64xf32> to vector<18x16xf32>
    %cst_70 = arith.constant 2.500000e-01 : f32
    %188 = vector.broadcast %cst_70 : f32 to vector<18x16xf32>
    %189 = arith.mulf %187, %188 : vector<18x16xf32>
    %190 = vector.extract_strided_slice %123 {offsets = [0, 48], sizes = [18, 16], strides = [1, 1]} : vector<18x64xf32> to vector<18x16xf32>
    %191 = vector.extract_strided_slice %124 {offsets = [0, 48], sizes = [18, 16], strides = [1, 1]} : vector<18x64xf32> to vector<18x16xf32>
    %cst_71 = arith.constant dense<0.000000e+00> : vector<18x18xf32>
    %192 = tpu.matmul %189, %190, %cst_71 {dimension_numbers = #tpu.dot_dimension_numbers<[1], [1], [0], [0], [0, 0, 1, 0], [], []>} : vector<18x16xf32>, vector<18x16xf32>, vector<18x18xf32> -> vector<18x18xf32>
    %193 = arith.addf %192, %35 : vector<18x18xf32>
    %cst_72 = arith.constant dense<0xFF800000> : vector<18xf32>
    %194 = vector.multi_reduction <maximumf>, %193, %cst_72 [1] : vector<18x18xf32> to vector<18xf32>
    %195 = vector.shape_cast %194 : vector<18xf32> to vector<18x1xf32>
    %196 = vector.broadcast %195 : vector<18x1xf32> to vector<18x18xf32>
    %197 = arith.subf %193, %196 : vector<18x18xf32>
    %198 = math.exp %197 : vector<18x18xf32>
    %cst_73 = arith.constant dense<0.000000e+00> : vector<18xf32>
    %199 = vector.multi_reduction <add>, %198, %cst_73 [1] : vector<18x18xf32> to vector<18xf32>
    %200 = vector.shape_cast %199 : vector<18xf32> to vector<18x1xf32>
    %201 = tpu.reciprocal %200 {approx = true} : vector<18x1xf32> -> vector<18x1xf32>
    %202 = vector.broadcast %201 : vector<18x1xf32> to vector<18x18xf32>
    %203 = arith.mulf %198, %202 : vector<18x18xf32>
    %cst_74 = arith.constant dense<0.000000e+00> : vector<18x16xf32>
    %204 = tpu.matmul %203, %191, %cst_74 {dimension_numbers = #tpu.dot_dimension_numbers<[1], [0], [0], [1], [0, 0, 1, 1], [], []>} : vector<18x18xf32>, vector<18x16xf32>, vector<18x16xf32> -> vector<18x16xf32>
    %205 = vector.extract_strided_slice %115 {offsets = [48, 0], sizes = [16, 64], strides = [1, 1]} : vector<64x64xf32> to vector<16x64xf32>
    %cst_75 = arith.constant dense<0.000000e+00> : vector<18x64xf32>
    %206 = tpu.matmul %204, %205, %cst_75 {dimension_numbers = #tpu.dot_dimension_numbers<[1], [0], [0], [1], [0, 0, 1, 1], [], []>} : vector<18x16xf32>, vector<16x64xf32>, vector<18x64xf32> -> vector<18x64xf32>
    %207 = arith.addf %186, %206 : vector<18x64xf32>
    %208 = arith.addf %112, %207 : vector<18x64xf32>
    %209 = vector.broadcast %116 : vector<1x64xf32> to vector<18x64xf32>
    %210 = arith.addf %208, %209 : vector<18x64xf32>
    %cst_76 = arith.constant dense<0.000000e+00> : vector<18xf32>
    %211 = vector.multi_reduction <add>, %210, %cst_76 [1] : vector<18x64xf32> to vector<18xf32>
    %212 = vector.shape_cast %211 : vector<18xf32> to vector<18x1xf32>
    %cst_77 = arith.constant 6.400000e+01 : f32
    %213 = vector.broadcast %cst_77 : f32 to vector<18x1xf32>
    %214 = arith.divf %212, %213 : vector<18x1xf32>
    %215 = vector.broadcast %214 : vector<18x1xf32> to vector<18x64xf32>
    %216 = arith.subf %210, %215 : vector<18x64xf32>
    %217 = arith.mulf %216, %216 : vector<18x64xf32>
    %cst_78 = arith.constant dense<0.000000e+00> : vector<18xf32>
    %218 = vector.multi_reduction <add>, %217, %cst_78 [1] : vector<18x64xf32> to vector<18xf32>
    %219 = vector.shape_cast %218 : vector<18xf32> to vector<18x1xf32>
    %cst_79 = arith.constant 6.400000e+01 : f32
    %220 = vector.broadcast %cst_79 : f32 to vector<18x1xf32>
    %221 = arith.divf %219, %220 : vector<18x1xf32>
    %cst_80 = arith.constant 9.99999974E-6 : f32
    %222 = vector.broadcast %cst_80 : f32 to vector<18x1xf32>
    %223 = arith.addf %221, %222 : vector<18x1xf32>
    %224 = math.rsqrt %223 : vector<18x1xf32>
    %225 = vector.broadcast %224 : vector<18x1xf32> to vector<18x64xf32>
    %226 = arith.mulf %216, %225 : vector<18x64xf32>
    %227 = vector.broadcast %117 : vector<1x64xf32> to vector<18x64xf32>
    %228 = arith.mulf %226, %227 : vector<18x64xf32>
    %229 = vector.broadcast %118 : vector<1x64xf32> to vector<18x64xf32>
    %230 = arith.addf %228, %229 : vector<18x64xf32>
    %c0_81 = arith.constant 0 : index
    %c0_82 = arith.constant 0 : index
    %231 = vector.load %arg8[%c0_81, %c0_82] : memref<64x256xf32, #tpu.memory_space<vmem>>, vector<64x256xf32>
    %c0_83 = arith.constant 0 : index
    %c0_84 = arith.constant 0 : index
    %232 = vector.load %arg9[%c0_83, %c0_84] : memref<1x256xf32, #tpu.memory_space<vmem>>, vector<1x256xf32>
    %c0_85 = arith.constant 0 : index
    %c0_86 = arith.constant 0 : index
    %233 = vector.load %arg10[%c0_85, %c0_86] : memref<256x64xf32, #tpu.memory_space<vmem>>, vector<256x64xf32>
    %c0_87 = arith.constant 0 : index
    %c0_88 = arith.constant 0 : index
    %234 = vector.load %arg11[%c0_87, %c0_88] : memref<1x64xf32, #tpu.memory_space<vmem>>, vector<1x64xf32>
    %c0_89 = arith.constant 0 : index
    %c0_90 = arith.constant 0 : index
    %235 = vector.load %arg12[%c0_89, %c0_90] : memref<1x64xf32, #tpu.memory_space<vmem>>, vector<1x64xf32>
    %c0_91 = arith.constant 0 : index
    %c0_92 = arith.constant 0 : index
    %236 = vector.load %arg13[%c0_91, %c0_92] : memref<1x64xf32, #tpu.memory_space<vmem>>, vector<1x64xf32>
    %cst_93 = arith.constant dense<0.000000e+00> : vector<18x256xf32>
    %237 = tpu.matmul %230, %231, %cst_93 {dimension_numbers = #tpu.dot_dimension_numbers<[1], [0], [0], [1], [0, 0, 1, 1], [], []>} : vector<18x64xf32>, vector<64x256xf32>, vector<18x256xf32> -> vector<18x256xf32>
    %238 = vector.broadcast %232 : vector<1x256xf32> to vector<18x256xf32>
    %239 = arith.addf %237, %238 : vector<18x256xf32>
    %cst_94 = arith.constant 0.000000e+00 : f32
    %240 = vector.broadcast %cst_94 : f32 to vector<18x256xf32>
    %241 = arith.maximumf %239, %240 : vector<18x256xf32>
    %cst_95 = arith.constant dense<0.000000e+00> : vector<18x64xf32>
    %242 = tpu.matmul %241, %233, %cst_95 {dimension_numbers = #tpu.dot_dimension_numbers<[1], [0], [0], [1], [0, 0, 1, 1], [], []>} : vector<18x256xf32>, vector<256x64xf32>, vector<18x64xf32> -> vector<18x64xf32>
    %243 = vector.broadcast %234 : vector<1x64xf32> to vector<18x64xf32>
    %244 = arith.addf %242, %243 : vector<18x64xf32>
    %245 = arith.addf %230, %244 : vector<18x64xf32>
    %cst_96 = arith.constant dense<0.000000e+00> : vector<18xf32>
    %246 = vector.multi_reduction <add>, %245, %cst_96 [1] : vector<18x64xf32> to vector<18xf32>
    %247 = vector.shape_cast %246 : vector<18xf32> to vector<18x1xf32>
    %cst_97 = arith.constant 6.400000e+01 : f32
    %248 = vector.broadcast %cst_97 : f32 to vector<18x1xf32>
    %249 = arith.divf %247, %248 : vector<18x1xf32>
    %250 = vector.broadcast %249 : vector<18x1xf32> to vector<18x64xf32>
    %251 = arith.subf %245, %250 : vector<18x64xf32>
    %252 = arith.mulf %251, %251 : vector<18x64xf32>
    %cst_98 = arith.constant dense<0.000000e+00> : vector<18xf32>
    %253 = vector.multi_reduction <add>, %252, %cst_98 [1] : vector<18x64xf32> to vector<18xf32>
    %254 = vector.shape_cast %253 : vector<18xf32> to vector<18x1xf32>
    %cst_99 = arith.constant 6.400000e+01 : f32
    %255 = vector.broadcast %cst_99 : f32 to vector<18x1xf32>
    %256 = arith.divf %254, %255 : vector<18x1xf32>
    %cst_100 = arith.constant 9.99999974E-6 : f32
    %257 = vector.broadcast %cst_100 : f32 to vector<18x1xf32>
    %258 = arith.addf %256, %257 : vector<18x1xf32>
    %259 = math.rsqrt %258 : vector<18x1xf32>
    %260 = vector.broadcast %259 : vector<18x1xf32> to vector<18x64xf32>
    %261 = arith.mulf %251, %260 : vector<18x64xf32>
    %262 = vector.broadcast %235 : vector<1x64xf32> to vector<18x64xf32>
    %263 = arith.mulf %261, %262 : vector<18x64xf32>
    %264 = vector.broadcast %236 : vector<1x64xf32> to vector<18x64xf32>
    %265 = arith.addf %263, %264 : vector<18x64xf32>
    %c0_101 = arith.constant 0 : index
    %c0_102 = arith.constant 0 : index
    %266 = vector.load %arg14[%c0_101, %c0_102] : memref<64x192xf32, #tpu.memory_space<vmem>>, vector<64x192xf32>
    %c0_103 = arith.constant 0 : index
    %c0_104 = arith.constant 0 : index
    %267 = vector.load %arg15[%c0_103, %c0_104] : memref<1x192xf32, #tpu.memory_space<vmem>>, vector<1x192xf32>
    %c0_105 = arith.constant 0 : index
    %c0_106 = arith.constant 0 : index
    %268 = vector.load %arg16[%c0_105, %c0_106] : memref<64x64xf32, #tpu.memory_space<vmem>>, vector<64x64xf32>
    %c0_107 = arith.constant 0 : index
    %c0_108 = arith.constant 0 : index
    %269 = vector.load %arg17[%c0_107, %c0_108] : memref<1x64xf32, #tpu.memory_space<vmem>>, vector<1x64xf32>
    %c0_109 = arith.constant 0 : index
    %c0_110 = arith.constant 0 : index
    %270 = vector.load %arg18[%c0_109, %c0_110] : memref<1x64xf32, #tpu.memory_space<vmem>>, vector<1x64xf32>
    %c0_111 = arith.constant 0 : index
    %c0_112 = arith.constant 0 : index
    %271 = vector.load %arg19[%c0_111, %c0_112] : memref<1x64xf32, #tpu.memory_space<vmem>>, vector<1x64xf32>
    %cst_113 = arith.constant dense<0.000000e+00> : vector<18x192xf32>
    %272 = tpu.matmul %265, %266, %cst_113 {dimension_numbers = #tpu.dot_dimension_numbers<[1], [0], [0], [1], [0, 0, 1, 1], [], []>} : vector<18x64xf32>, vector<64x192xf32>, vector<18x192xf32> -> vector<18x192xf32>
    %273 = vector.broadcast %267 : vector<1x192xf32> to vector<18x192xf32>
    %274 = arith.addf %272, %273 : vector<18x192xf32>
    %275 = vector.extract_strided_slice %274 {offsets = [0, 0], sizes = [18, 64], strides = [1, 1]} : vector<18x192xf32> to vector<18x64xf32>
    %276 = vector.extract_strided_slice %274 {offsets = [0, 64], sizes = [18, 64], strides = [1, 1]} : vector<18x192xf32> to vector<18x64xf32>
    %277 = vector.extract_strided_slice %274 {offsets = [0, 128], sizes = [18, 64], strides = [1, 1]} : vector<18x192xf32> to vector<18x64xf32>
    %278 = vector.extract_strided_slice %275 {offsets = [0, 0], sizes = [18, 16], strides = [1, 1]} : vector<18x64xf32> to vector<18x16xf32>
    %cst_114 = arith.constant 2.500000e-01 : f32
    %279 = vector.broadcast %cst_114 : f32 to vector<18x16xf32>
    %280 = arith.mulf %278, %279 : vector<18x16xf32>
    %281 = vector.extract_strided_slice %276 {offsets = [0, 0], sizes = [18, 16], strides = [1, 1]} : vector<18x64xf32> to vector<18x16xf32>
    %282 = vector.extract_strided_slice %277 {offsets = [0, 0], sizes = [18, 16], strides = [1, 1]} : vector<18x64xf32> to vector<18x16xf32>
    %cst_115 = arith.constant dense<0.000000e+00> : vector<18x18xf32>
    %283 = tpu.matmul %280, %281, %cst_115 {dimension_numbers = #tpu.dot_dimension_numbers<[1], [1], [0], [0], [0, 0, 1, 0], [], []>} : vector<18x16xf32>, vector<18x16xf32>, vector<18x18xf32> -> vector<18x18xf32>
    %284 = arith.addf %283, %35 : vector<18x18xf32>
    %cst_116 = arith.constant dense<0xFF800000> : vector<18xf32>
    %285 = vector.multi_reduction <maximumf>, %284, %cst_116 [1] : vector<18x18xf32> to vector<18xf32>
    %286 = vector.shape_cast %285 : vector<18xf32> to vector<18x1xf32>
    %287 = vector.broadcast %286 : vector<18x1xf32> to vector<18x18xf32>
    %288 = arith.subf %284, %287 : vector<18x18xf32>
    %289 = math.exp %288 : vector<18x18xf32>
    %cst_117 = arith.constant dense<0.000000e+00> : vector<18xf32>
    %290 = vector.multi_reduction <add>, %289, %cst_117 [1] : vector<18x18xf32> to vector<18xf32>
    %291 = vector.shape_cast %290 : vector<18xf32> to vector<18x1xf32>
    %292 = tpu.reciprocal %291 {approx = true} : vector<18x1xf32> -> vector<18x1xf32>
    %293 = vector.broadcast %292 : vector<18x1xf32> to vector<18x18xf32>
    %294 = arith.mulf %289, %293 : vector<18x18xf32>
    %cst_118 = arith.constant dense<0.000000e+00> : vector<18x16xf32>
    %295 = tpu.matmul %294, %282, %cst_118 {dimension_numbers = #tpu.dot_dimension_numbers<[1], [0], [0], [1], [0, 0, 1, 1], [], []>} : vector<18x18xf32>, vector<18x16xf32>, vector<18x16xf32> -> vector<18x16xf32>
    %296 = vector.extract_strided_slice %268 {offsets = [0, 0], sizes = [16, 64], strides = [1, 1]} : vector<64x64xf32> to vector<16x64xf32>
    %cst_119 = arith.constant dense<0.000000e+00> : vector<18x64xf32>
    %297 = tpu.matmul %295, %296, %cst_119 {dimension_numbers = #tpu.dot_dimension_numbers<[1], [0], [0], [1], [0, 0, 1, 1], [], []>} : vector<18x16xf32>, vector<16x64xf32>, vector<18x64xf32> -> vector<18x64xf32>
    %298 = vector.extract_strided_slice %275 {offsets = [0, 16], sizes = [18, 16], strides = [1, 1]} : vector<18x64xf32> to vector<18x16xf32>
    %cst_120 = arith.constant 2.500000e-01 : f32
    %299 = vector.broadcast %cst_120 : f32 to vector<18x16xf32>
    %300 = arith.mulf %298, %299 : vector<18x16xf32>
    %301 = vector.extract_strided_slice %276 {offsets = [0, 16], sizes = [18, 16], strides = [1, 1]} : vector<18x64xf32> to vector<18x16xf32>
    %302 = vector.extract_strided_slice %277 {offsets = [0, 16], sizes = [18, 16], strides = [1, 1]} : vector<18x64xf32> to vector<18x16xf32>
    %cst_121 = arith.constant dense<0.000000e+00> : vector<18x18xf32>
    %303 = tpu.matmul %300, %301, %cst_121 {dimension_numbers = #tpu.dot_dimension_numbers<[1], [1], [0], [0], [0, 0, 1, 0], [], []>} : vector<18x16xf32>, vector<18x16xf32>, vector<18x18xf32> -> vector<18x18xf32>
    %304 = arith.addf %303, %35 : vector<18x18xf32>
    %cst_122 = arith.constant dense<0xFF800000> : vector<18xf32>
    %305 = vector.multi_reduction <maximumf>, %304, %cst_122 [1] : vector<18x18xf32> to vector<18xf32>
    %306 = vector.shape_cast %305 : vector<18xf32> to vector<18x1xf32>
    %307 = vector.broadcast %306 : vector<18x1xf32> to vector<18x18xf32>
    %308 = arith.subf %304, %307 : vector<18x18xf32>
    %309 = math.exp %308 : vector<18x18xf32>
    %cst_123 = arith.constant dense<0.000000e+00> : vector<18xf32>
    %310 = vector.multi_reduction <add>, %309, %cst_123 [1] : vector<18x18xf32> to vector<18xf32>
    %311 = vector.shape_cast %310 : vector<18xf32> to vector<18x1xf32>
    %312 = tpu.reciprocal %311 {approx = true} : vector<18x1xf32> -> vector<18x1xf32>
    %313 = vector.broadcast %312 : vector<18x1xf32> to vector<18x18xf32>
    %314 = arith.mulf %309, %313 : vector<18x18xf32>
    %cst_124 = arith.constant dense<0.000000e+00> : vector<18x16xf32>
    %315 = tpu.matmul %314, %302, %cst_124 {dimension_numbers = #tpu.dot_dimension_numbers<[1], [0], [0], [1], [0, 0, 1, 1], [], []>} : vector<18x18xf32>, vector<18x16xf32>, vector<18x16xf32> -> vector<18x16xf32>
    %316 = vector.extract_strided_slice %268 {offsets = [16, 0], sizes = [16, 64], strides = [1, 1]} : vector<64x64xf32> to vector<16x64xf32>
    %cst_125 = arith.constant dense<0.000000e+00> : vector<18x64xf32>
    %317 = tpu.matmul %315, %316, %cst_125 {dimension_numbers = #tpu.dot_dimension_numbers<[1], [0], [0], [1], [0, 0, 1, 1], [], []>} : vector<18x16xf32>, vector<16x64xf32>, vector<18x64xf32> -> vector<18x64xf32>
    %318 = arith.addf %297, %317 : vector<18x64xf32>
    %319 = vector.extract_strided_slice %275 {offsets = [0, 32], sizes = [18, 16], strides = [1, 1]} : vector<18x64xf32> to vector<18x16xf32>
    %cst_126 = arith.constant 2.500000e-01 : f32
    %320 = vector.broadcast %cst_126 : f32 to vector<18x16xf32>
    %321 = arith.mulf %319, %320 : vector<18x16xf32>
    %322 = vector.extract_strided_slice %276 {offsets = [0, 32], sizes = [18, 16], strides = [1, 1]} : vector<18x64xf32> to vector<18x16xf32>
    %323 = vector.extract_strided_slice %277 {offsets = [0, 32], sizes = [18, 16], strides = [1, 1]} : vector<18x64xf32> to vector<18x16xf32>
    %cst_127 = arith.constant dense<0.000000e+00> : vector<18x18xf32>
    %324 = tpu.matmul %321, %322, %cst_127 {dimension_numbers = #tpu.dot_dimension_numbers<[1], [1], [0], [0], [0, 0, 1, 0], [], []>} : vector<18x16xf32>, vector<18x16xf32>, vector<18x18xf32> -> vector<18x18xf32>
    %325 = arith.addf %324, %35 : vector<18x18xf32>
    %cst_128 = arith.constant dense<0xFF800000> : vector<18xf32>
    %326 = vector.multi_reduction <maximumf>, %325, %cst_128 [1] : vector<18x18xf32> to vector<18xf32>
    %327 = vector.shape_cast %326 : vector<18xf32> to vector<18x1xf32>
    %328 = vector.broadcast %327 : vector<18x1xf32> to vector<18x18xf32>
    %329 = arith.subf %325, %328 : vector<18x18xf32>
    %330 = math.exp %329 : vector<18x18xf32>
    %cst_129 = arith.constant dense<0.000000e+00> : vector<18xf32>
    %331 = vector.multi_reduction <add>, %330, %cst_129 [1] : vector<18x18xf32> to vector<18xf32>
    %332 = vector.shape_cast %331 : vector<18xf32> to vector<18x1xf32>
    %333 = tpu.reciprocal %332 {approx = true} : vector<18x1xf32> -> vector<18x1xf32>
    %334 = vector.broadcast %333 : vector<18x1xf32> to vector<18x18xf32>
    %335 = arith.mulf %330, %334 : vector<18x18xf32>
    %cst_130 = arith.constant dense<0.000000e+00> : vector<18x16xf32>
    %336 = tpu.matmul %335, %323, %cst_130 {dimension_numbers = #tpu.dot_dimension_numbers<[1], [0], [0], [1], [0, 0, 1, 1], [], []>} : vector<18x18xf32>, vector<18x16xf32>, vector<18x16xf32> -> vector<18x16xf32>
    %337 = vector.extract_strided_slice %268 {offsets = [32, 0], sizes = [16, 64], strides = [1, 1]} : vector<64x64xf32> to vector<16x64xf32>
    %cst_131 = arith.constant dense<0.000000e+00> : vector<18x64xf32>
    %338 = tpu.matmul %336, %337, %cst_131 {dimension_numbers = #tpu.dot_dimension_numbers<[1], [0], [0], [1], [0, 0, 1, 1], [], []>} : vector<18x16xf32>, vector<16x64xf32>, vector<18x64xf32> -> vector<18x64xf32>
    %339 = arith.addf %318, %338 : vector<18x64xf32>
    %340 = vector.extract_strided_slice %275 {offsets = [0, 48], sizes = [18, 16], strides = [1, 1]} : vector<18x64xf32> to vector<18x16xf32>
    %cst_132 = arith.constant 2.500000e-01 : f32
    %341 = vector.broadcast %cst_132 : f32 to vector<18x16xf32>
    %342 = arith.mulf %340, %341 : vector<18x16xf32>
    %343 = vector.extract_strided_slice %276 {offsets = [0, 48], sizes = [18, 16], strides = [1, 1]} : vector<18x64xf32> to vector<18x16xf32>
    %344 = vector.extract_strided_slice %277 {offsets = [0, 48], sizes = [18, 16], strides = [1, 1]} : vector<18x64xf32> to vector<18x16xf32>
    %cst_133 = arith.constant dense<0.000000e+00> : vector<18x18xf32>
    %345 = tpu.matmul %342, %343, %cst_133 {dimension_numbers = #tpu.dot_dimension_numbers<[1], [1], [0], [0], [0, 0, 1, 0], [], []>} : vector<18x16xf32>, vector<18x16xf32>, vector<18x18xf32> -> vector<18x18xf32>
    %346 = arith.addf %345, %35 : vector<18x18xf32>
    %cst_134 = arith.constant dense<0xFF800000> : vector<18xf32>
    %347 = vector.multi_reduction <maximumf>, %346, %cst_134 [1] : vector<18x18xf32> to vector<18xf32>
    %348 = vector.shape_cast %347 : vector<18xf32> to vector<18x1xf32>
    %349 = vector.broadcast %348 : vector<18x1xf32> to vector<18x18xf32>
    %350 = arith.subf %346, %349 : vector<18x18xf32>
    %351 = math.exp %350 : vector<18x18xf32>
    %cst_135 = arith.constant dense<0.000000e+00> : vector<18xf32>
    %352 = vector.multi_reduction <add>, %351, %cst_135 [1] : vector<18x18xf32> to vector<18xf32>
    %353 = vector.shape_cast %352 : vector<18xf32> to vector<18x1xf32>
    %354 = tpu.reciprocal %353 {approx = true} : vector<18x1xf32> -> vector<18x1xf32>
    %355 = vector.broadcast %354 : vector<18x1xf32> to vector<18x18xf32>
    %356 = arith.mulf %351, %355 : vector<18x18xf32>
    %cst_136 = arith.constant dense<0.000000e+00> : vector<18x16xf32>
    %357 = tpu.matmul %356, %344, %cst_136 {dimension_numbers = #tpu.dot_dimension_numbers<[1], [0], [0], [1], [0, 0, 1, 1], [], []>} : vector<18x18xf32>, vector<18x16xf32>, vector<18x16xf32> -> vector<18x16xf32>
    %358 = vector.extract_strided_slice %268 {offsets = [48, 0], sizes = [16, 64], strides = [1, 1]} : vector<64x64xf32> to vector<16x64xf32>
    %cst_137 = arith.constant dense<0.000000e+00> : vector<18x64xf32>
    %359 = tpu.matmul %357, %358, %cst_137 {dimension_numbers = #tpu.dot_dimension_numbers<[1], [0], [0], [1], [0, 0, 1, 1], [], []>} : vector<18x16xf32>, vector<16x64xf32>, vector<18x64xf32> -> vector<18x64xf32>
    %360 = arith.addf %339, %359 : vector<18x64xf32>
    %361 = arith.addf %265, %360 : vector<18x64xf32>
    %362 = vector.broadcast %269 : vector<1x64xf32> to vector<18x64xf32>
    %363 = arith.addf %361, %362 : vector<18x64xf32>
    %cst_138 = arith.constant dense<0.000000e+00> : vector<18xf32>
    %364 = vector.multi_reduction <add>, %363, %cst_138 [1] : vector<18x64xf32> to vector<18xf32>
    %365 = vector.shape_cast %364 : vector<18xf32> to vector<18x1xf32>
    %cst_139 = arith.constant 6.400000e+01 : f32
    %366 = vector.broadcast %cst_139 : f32 to vector<18x1xf32>
    %367 = arith.divf %365, %366 : vector<18x1xf32>
    %368 = vector.broadcast %367 : vector<18x1xf32> to vector<18x64xf32>
    %369 = arith.subf %363, %368 : vector<18x64xf32>
    %370 = arith.mulf %369, %369 : vector<18x64xf32>
    %cst_140 = arith.constant dense<0.000000e+00> : vector<18xf32>
    %371 = vector.multi_reduction <add>, %370, %cst_140 [1] : vector<18x64xf32> to vector<18xf32>
    %372 = vector.shape_cast %371 : vector<18xf32> to vector<18x1xf32>
    %cst_141 = arith.constant 6.400000e+01 : f32
    %373 = vector.broadcast %cst_141 : f32 to vector<18x1xf32>
    %374 = arith.divf %372, %373 : vector<18x1xf32>
    %cst_142 = arith.constant 9.99999974E-6 : f32
    %375 = vector.broadcast %cst_142 : f32 to vector<18x1xf32>
    %376 = arith.addf %374, %375 : vector<18x1xf32>
    %377 = math.rsqrt %376 : vector<18x1xf32>
    %378 = vector.broadcast %377 : vector<18x1xf32> to vector<18x64xf32>
    %379 = arith.mulf %369, %378 : vector<18x64xf32>
    %380 = vector.broadcast %270 : vector<1x64xf32> to vector<18x64xf32>
    %381 = arith.mulf %379, %380 : vector<18x64xf32>
    %382 = vector.broadcast %271 : vector<1x64xf32> to vector<18x64xf32>
    %383 = arith.addf %381, %382 : vector<18x64xf32>
    %c0_143 = arith.constant 0 : index
    %c0_144 = arith.constant 0 : index
    %384 = vector.load %arg20[%c0_143, %c0_144] : memref<64x256xf32, #tpu.memory_space<vmem>>, vector<64x256xf32>
    %c0_145 = arith.constant 0 : index
    %c0_146 = arith.constant 0 : index
    %385 = vector.load %arg21[%c0_145, %c0_146] : memref<1x256xf32, #tpu.memory_space<vmem>>, vector<1x256xf32>
    %c0_147 = arith.constant 0 : index
    %c0_148 = arith.constant 0 : index
    %386 = vector.load %arg22[%c0_147, %c0_148] : memref<256x64xf32, #tpu.memory_space<vmem>>, vector<256x64xf32>
    %c0_149 = arith.constant 0 : index
    %c0_150 = arith.constant 0 : index
    %387 = vector.load %arg23[%c0_149, %c0_150] : memref<1x64xf32, #tpu.memory_space<vmem>>, vector<1x64xf32>
    %c0_151 = arith.constant 0 : index
    %c0_152 = arith.constant 0 : index
    %388 = vector.load %arg24[%c0_151, %c0_152] : memref<1x64xf32, #tpu.memory_space<vmem>>, vector<1x64xf32>
    %c0_153 = arith.constant 0 : index
    %c0_154 = arith.constant 0 : index
    %389 = vector.load %arg25[%c0_153, %c0_154] : memref<1x64xf32, #tpu.memory_space<vmem>>, vector<1x64xf32>
    %cst_155 = arith.constant dense<0.000000e+00> : vector<18x256xf32>
    %390 = tpu.matmul %383, %384, %cst_155 {dimension_numbers = #tpu.dot_dimension_numbers<[1], [0], [0], [1], [0, 0, 1, 1], [], []>} : vector<18x64xf32>, vector<64x256xf32>, vector<18x256xf32> -> vector<18x256xf32>
    %391 = vector.broadcast %385 : vector<1x256xf32> to vector<18x256xf32>
    %392 = arith.addf %390, %391 : vector<18x256xf32>
    %cst_156 = arith.constant 0.000000e+00 : f32
    %393 = vector.broadcast %cst_156 : f32 to vector<18x256xf32>
    %394 = arith.maximumf %392, %393 : vector<18x256xf32>
    %cst_157 = arith.constant dense<0.000000e+00> : vector<18x64xf32>
    %395 = tpu.matmul %394, %386, %cst_157 {dimension_numbers = #tpu.dot_dimension_numbers<[1], [0], [0], [1], [0, 0, 1, 1], [], []>} : vector<18x256xf32>, vector<256x64xf32>, vector<18x64xf32> -> vector<18x64xf32>
    %396 = vector.broadcast %387 : vector<1x64xf32> to vector<18x64xf32>
    %397 = arith.addf %395, %396 : vector<18x64xf32>
    %398 = arith.addf %383, %397 : vector<18x64xf32>
    %cst_158 = arith.constant dense<0.000000e+00> : vector<18xf32>
    %399 = vector.multi_reduction <add>, %398, %cst_158 [1] : vector<18x64xf32> to vector<18xf32>
    %400 = vector.shape_cast %399 : vector<18xf32> to vector<18x1xf32>
    %cst_159 = arith.constant 6.400000e+01 : f32
    %401 = vector.broadcast %cst_159 : f32 to vector<18x1xf32>
    %402 = arith.divf %400, %401 : vector<18x1xf32>
    %403 = vector.broadcast %402 : vector<18x1xf32> to vector<18x64xf32>
    %404 = arith.subf %398, %403 : vector<18x64xf32>
    %405 = arith.mulf %404, %404 : vector<18x64xf32>
    %cst_160 = arith.constant dense<0.000000e+00> : vector<18xf32>
    %406 = vector.multi_reduction <add>, %405, %cst_160 [1] : vector<18x64xf32> to vector<18xf32>
    %407 = vector.shape_cast %406 : vector<18xf32> to vector<18x1xf32>
    %cst_161 = arith.constant 6.400000e+01 : f32
    %408 = vector.broadcast %cst_161 : f32 to vector<18x1xf32>
    %409 = arith.divf %407, %408 : vector<18x1xf32>
    %cst_162 = arith.constant 9.99999974E-6 : f32
    %410 = vector.broadcast %cst_162 : f32 to vector<18x1xf32>
    %411 = arith.addf %409, %410 : vector<18x1xf32>
    %412 = math.rsqrt %411 : vector<18x1xf32>
    %413 = vector.broadcast %412 : vector<18x1xf32> to vector<18x64xf32>
    %414 = arith.mulf %404, %413 : vector<18x64xf32>
    %415 = vector.broadcast %388 : vector<1x64xf32> to vector<18x64xf32>
    %416 = arith.mulf %414, %415 : vector<18x64xf32>
    %417 = vector.broadcast %389 : vector<1x64xf32> to vector<18x64xf32>
    %418 = arith.addf %416, %417 : vector<18x64xf32>
    %c0_163 = arith.constant 0 : index
    %c0_164 = arith.constant 0 : index
    %419 = vector.load %arg1[%c0_163, %c0_164] : memref<18x64xf32, #tpu.memory_space<vmem>>, vector<18x64xf32>
    %c0_165 = arith.constant 0 : index
    %c0_166 = arith.constant 0 : index
    %420 = vector.load %arg26[%c0_165, %c0_166] : memref<64x192xf32, #tpu.memory_space<vmem>>, vector<64x192xf32>
    %c0_167 = arith.constant 0 : index
    %c0_168 = arith.constant 0 : index
    %421 = vector.load %arg27[%c0_167, %c0_168] : memref<1x192xf32, #tpu.memory_space<vmem>>, vector<1x192xf32>
    %c0_169 = arith.constant 0 : index
    %c0_170 = arith.constant 0 : index
    %422 = vector.load %arg28[%c0_169, %c0_170] : memref<64x64xf32, #tpu.memory_space<vmem>>, vector<64x64xf32>
    %c0_171 = arith.constant 0 : index
    %c0_172 = arith.constant 0 : index
    %423 = vector.load %arg29[%c0_171, %c0_172] : memref<1x64xf32, #tpu.memory_space<vmem>>, vector<1x64xf32>
    %c0_173 = arith.constant 0 : index
    %c0_174 = arith.constant 0 : index
    %424 = vector.load %arg30[%c0_173, %c0_174] : memref<1x64xf32, #tpu.memory_space<vmem>>, vector<1x64xf32>
    %c0_175 = arith.constant 0 : index
    %c0_176 = arith.constant 0 : index
    %425 = vector.load %arg31[%c0_175, %c0_176] : memref<1x64xf32, #tpu.memory_space<vmem>>, vector<1x64xf32>
    %cst_177 = arith.constant dense<0.000000e+00> : vector<18x192xf32>
    %426 = tpu.matmul %419, %420, %cst_177 {dimension_numbers = #tpu.dot_dimension_numbers<[1], [0], [0], [1], [0, 0, 1, 1], [], []>} : vector<18x64xf32>, vector<64x192xf32>, vector<18x192xf32> -> vector<18x192xf32>
    %427 = vector.broadcast %421 : vector<1x192xf32> to vector<18x192xf32>
    %428 = arith.addf %426, %427 : vector<18x192xf32>
    %429 = vector.extract_strided_slice %428 {offsets = [0, 0], sizes = [18, 64], strides = [1, 1]} : vector<18x192xf32> to vector<18x64xf32>
    %430 = vector.extract_strided_slice %428 {offsets = [0, 64], sizes = [18, 64], strides = [1, 1]} : vector<18x192xf32> to vector<18x64xf32>
    %431 = vector.extract_strided_slice %428 {offsets = [0, 128], sizes = [18, 64], strides = [1, 1]} : vector<18x192xf32> to vector<18x64xf32>
    %432 = vector.extract_strided_slice %429 {offsets = [0, 0], sizes = [18, 16], strides = [1, 1]} : vector<18x64xf32> to vector<18x16xf32>
    %cst_178 = arith.constant 2.500000e-01 : f32
    %433 = vector.broadcast %cst_178 : f32 to vector<18x16xf32>
    %434 = arith.mulf %432, %433 : vector<18x16xf32>
    %435 = vector.extract_strided_slice %430 {offsets = [0, 0], sizes = [18, 16], strides = [1, 1]} : vector<18x64xf32> to vector<18x16xf32>
    %436 = vector.extract_strided_slice %431 {offsets = [0, 0], sizes = [18, 16], strides = [1, 1]} : vector<18x64xf32> to vector<18x16xf32>
    %cst_179 = arith.constant dense<0.000000e+00> : vector<18x18xf32>
    %437 = tpu.matmul %434, %435, %cst_179 {dimension_numbers = #tpu.dot_dimension_numbers<[1], [1], [0], [0], [0, 0, 1, 0], [], []>} : vector<18x16xf32>, vector<18x16xf32>, vector<18x18xf32> -> vector<18x18xf32>
    %438 = arith.addf %437, %75 : vector<18x18xf32>
    %cst_180 = arith.constant dense<0xFF800000> : vector<18xf32>
    %439 = vector.multi_reduction <maximumf>, %438, %cst_180 [1] : vector<18x18xf32> to vector<18xf32>
    %440 = vector.shape_cast %439 : vector<18xf32> to vector<18x1xf32>
    %441 = vector.broadcast %440 : vector<18x1xf32> to vector<18x18xf32>
    %442 = arith.subf %438, %441 : vector<18x18xf32>
    %443 = math.exp %442 : vector<18x18xf32>
    %cst_181 = arith.constant dense<0.000000e+00> : vector<18xf32>
    %444 = vector.multi_reduction <add>, %443, %cst_181 [1] : vector<18x18xf32> to vector<18xf32>
    %445 = vector.shape_cast %444 : vector<18xf32> to vector<18x1xf32>
    %446 = tpu.reciprocal %445 {approx = true} : vector<18x1xf32> -> vector<18x1xf32>
    %447 = vector.broadcast %446 : vector<18x1xf32> to vector<18x18xf32>
    %448 = arith.mulf %443, %447 : vector<18x18xf32>
    %cst_182 = arith.constant dense<0.000000e+00> : vector<18x16xf32>
    %449 = tpu.matmul %448, %436, %cst_182 {dimension_numbers = #tpu.dot_dimension_numbers<[1], [0], [0], [1], [0, 0, 1, 1], [], []>} : vector<18x18xf32>, vector<18x16xf32>, vector<18x16xf32> -> vector<18x16xf32>
    %450 = vector.extract_strided_slice %422 {offsets = [0, 0], sizes = [16, 64], strides = [1, 1]} : vector<64x64xf32> to vector<16x64xf32>
    %cst_183 = arith.constant dense<0.000000e+00> : vector<18x64xf32>
    %451 = tpu.matmul %449, %450, %cst_183 {dimension_numbers = #tpu.dot_dimension_numbers<[1], [0], [0], [1], [0, 0, 1, 1], [], []>} : vector<18x16xf32>, vector<16x64xf32>, vector<18x64xf32> -> vector<18x64xf32>
    %452 = vector.extract_strided_slice %429 {offsets = [0, 16], sizes = [18, 16], strides = [1, 1]} : vector<18x64xf32> to vector<18x16xf32>
    %cst_184 = arith.constant 2.500000e-01 : f32
    %453 = vector.broadcast %cst_184 : f32 to vector<18x16xf32>
    %454 = arith.mulf %452, %453 : vector<18x16xf32>
    %455 = vector.extract_strided_slice %430 {offsets = [0, 16], sizes = [18, 16], strides = [1, 1]} : vector<18x64xf32> to vector<18x16xf32>
    %456 = vector.extract_strided_slice %431 {offsets = [0, 16], sizes = [18, 16], strides = [1, 1]} : vector<18x64xf32> to vector<18x16xf32>
    %cst_185 = arith.constant dense<0.000000e+00> : vector<18x18xf32>
    %457 = tpu.matmul %454, %455, %cst_185 {dimension_numbers = #tpu.dot_dimension_numbers<[1], [1], [0], [0], [0, 0, 1, 0], [], []>} : vector<18x16xf32>, vector<18x16xf32>, vector<18x18xf32> -> vector<18x18xf32>
    %458 = arith.addf %457, %75 : vector<18x18xf32>
    %cst_186 = arith.constant dense<0xFF800000> : vector<18xf32>
    %459 = vector.multi_reduction <maximumf>, %458, %cst_186 [1] : vector<18x18xf32> to vector<18xf32>
    %460 = vector.shape_cast %459 : vector<18xf32> to vector<18x1xf32>
    %461 = vector.broadcast %460 : vector<18x1xf32> to vector<18x18xf32>
    %462 = arith.subf %458, %461 : vector<18x18xf32>
    %463 = math.exp %462 : vector<18x18xf32>
    %cst_187 = arith.constant dense<0.000000e+00> : vector<18xf32>
    %464 = vector.multi_reduction <add>, %463, %cst_187 [1] : vector<18x18xf32> to vector<18xf32>
    %465 = vector.shape_cast %464 : vector<18xf32> to vector<18x1xf32>
    %466 = tpu.reciprocal %465 {approx = true} : vector<18x1xf32> -> vector<18x1xf32>
    %467 = vector.broadcast %466 : vector<18x1xf32> to vector<18x18xf32>
    %468 = arith.mulf %463, %467 : vector<18x18xf32>
    %cst_188 = arith.constant dense<0.000000e+00> : vector<18x16xf32>
    %469 = tpu.matmul %468, %456, %cst_188 {dimension_numbers = #tpu.dot_dimension_numbers<[1], [0], [0], [1], [0, 0, 1, 1], [], []>} : vector<18x18xf32>, vector<18x16xf32>, vector<18x16xf32> -> vector<18x16xf32>
    %470 = vector.extract_strided_slice %422 {offsets = [16, 0], sizes = [16, 64], strides = [1, 1]} : vector<64x64xf32> to vector<16x64xf32>
    %cst_189 = arith.constant dense<0.000000e+00> : vector<18x64xf32>
    %471 = tpu.matmul %469, %470, %cst_189 {dimension_numbers = #tpu.dot_dimension_numbers<[1], [0], [0], [1], [0, 0, 1, 1], [], []>} : vector<18x16xf32>, vector<16x64xf32>, vector<18x64xf32> -> vector<18x64xf32>
    %472 = arith.addf %451, %471 : vector<18x64xf32>
    %473 = vector.extract_strided_slice %429 {offsets = [0, 32], sizes = [18, 16], strides = [1, 1]} : vector<18x64xf32> to vector<18x16xf32>
    %cst_190 = arith.constant 2.500000e-01 : f32
    %474 = vector.broadcast %cst_190 : f32 to vector<18x16xf32>
    %475 = arith.mulf %473, %474 : vector<18x16xf32>
    %476 = vector.extract_strided_slice %430 {offsets = [0, 32], sizes = [18, 16], strides = [1, 1]} : vector<18x64xf32> to vector<18x16xf32>
    %477 = vector.extract_strided_slice %431 {offsets = [0, 32], sizes = [18, 16], strides = [1, 1]} : vector<18x64xf32> to vector<18x16xf32>
    %cst_191 = arith.constant dense<0.000000e+00> : vector<18x18xf32>
    %478 = tpu.matmul %475, %476, %cst_191 {dimension_numbers = #tpu.dot_dimension_numbers<[1], [1], [0], [0], [0, 0, 1, 0], [], []>} : vector<18x16xf32>, vector<18x16xf32>, vector<18x18xf32> -> vector<18x18xf32>
    %479 = arith.addf %478, %75 : vector<18x18xf32>
    %cst_192 = arith.constant dense<0xFF800000> : vector<18xf32>
    %480 = vector.multi_reduction <maximumf>, %479, %cst_192 [1] : vector<18x18xf32> to vector<18xf32>
    %481 = vector.shape_cast %480 : vector<18xf32> to vector<18x1xf32>
    %482 = vector.broadcast %481 : vector<18x1xf32> to vector<18x18xf32>
    %483 = arith.subf %479, %482 : vector<18x18xf32>
    %484 = math.exp %483 : vector<18x18xf32>
    %cst_193 = arith.constant dense<0.000000e+00> : vector<18xf32>
    %485 = vector.multi_reduction <add>, %484, %cst_193 [1] : vector<18x18xf32> to vector<18xf32>
    %486 = vector.shape_cast %485 : vector<18xf32> to vector<18x1xf32>
    %487 = tpu.reciprocal %486 {approx = true} : vector<18x1xf32> -> vector<18x1xf32>
    %488 = vector.broadcast %487 : vector<18x1xf32> to vector<18x18xf32>
    %489 = arith.mulf %484, %488 : vector<18x18xf32>
    %cst_194 = arith.constant dense<0.000000e+00> : vector<18x16xf32>
    %490 = tpu.matmul %489, %477, %cst_194 {dimension_numbers = #tpu.dot_dimension_numbers<[1], [0], [0], [1], [0, 0, 1, 1], [], []>} : vector<18x18xf32>, vector<18x16xf32>, vector<18x16xf32> -> vector<18x16xf32>
    %491 = vector.extract_strided_slice %422 {offsets = [32, 0], sizes = [16, 64], strides = [1, 1]} : vector<64x64xf32> to vector<16x64xf32>
    %cst_195 = arith.constant dense<0.000000e+00> : vector<18x64xf32>
    %492 = tpu.matmul %490, %491, %cst_195 {dimension_numbers = #tpu.dot_dimension_numbers<[1], [0], [0], [1], [0, 0, 1, 1], [], []>} : vector<18x16xf32>, vector<16x64xf32>, vector<18x64xf32> -> vector<18x64xf32>
    %493 = arith.addf %472, %492 : vector<18x64xf32>
    %494 = vector.extract_strided_slice %429 {offsets = [0, 48], sizes = [18, 16], strides = [1, 1]} : vector<18x64xf32> to vector<18x16xf32>
    %cst_196 = arith.constant 2.500000e-01 : f32
    %495 = vector.broadcast %cst_196 : f32 to vector<18x16xf32>
    %496 = arith.mulf %494, %495 : vector<18x16xf32>
    %497 = vector.extract_strided_slice %430 {offsets = [0, 48], sizes = [18, 16], strides = [1, 1]} : vector<18x64xf32> to vector<18x16xf32>
    %498 = vector.extract_strided_slice %431 {offsets = [0, 48], sizes = [18, 16], strides = [1, 1]} : vector<18x64xf32> to vector<18x16xf32>
    %cst_197 = arith.constant dense<0.000000e+00> : vector<18x18xf32>
    %499 = tpu.matmul %496, %497, %cst_197 {dimension_numbers = #tpu.dot_dimension_numbers<[1], [1], [0], [0], [0, 0, 1, 0], [], []>} : vector<18x16xf32>, vector<18x16xf32>, vector<18x18xf32> -> vector<18x18xf32>
    %500 = arith.addf %499, %75 : vector<18x18xf32>
    %cst_198 = arith.constant dense<0xFF800000> : vector<18xf32>
    %501 = vector.multi_reduction <maximumf>, %500, %cst_198 [1] : vector<18x18xf32> to vector<18xf32>
    %502 = vector.shape_cast %501 : vector<18xf32> to vector<18x1xf32>
    %503 = vector.broadcast %502 : vector<18x1xf32> to vector<18x18xf32>
    %504 = arith.subf %500, %503 : vector<18x18xf32>
    %505 = math.exp %504 : vector<18x18xf32>
    %cst_199 = arith.constant dense<0.000000e+00> : vector<18xf32>
    %506 = vector.multi_reduction <add>, %505, %cst_199 [1] : vector<18x18xf32> to vector<18xf32>
    %507 = vector.shape_cast %506 : vector<18xf32> to vector<18x1xf32>
    %508 = tpu.reciprocal %507 {approx = true} : vector<18x1xf32> -> vector<18x1xf32>
    %509 = vector.broadcast %508 : vector<18x1xf32> to vector<18x18xf32>
    %510 = arith.mulf %505, %509 : vector<18x18xf32>
    %cst_200 = arith.constant dense<0.000000e+00> : vector<18x16xf32>
    %511 = tpu.matmul %510, %498, %cst_200 {dimension_numbers = #tpu.dot_dimension_numbers<[1], [0], [0], [1], [0, 0, 1, 1], [], []>} : vector<18x18xf32>, vector<18x16xf32>, vector<18x16xf32> -> vector<18x16xf32>
    %512 = vector.extract_strided_slice %422 {offsets = [48, 0], sizes = [16, 64], strides = [1, 1]} : vector<64x64xf32> to vector<16x64xf32>
    %cst_201 = arith.constant dense<0.000000e+00> : vector<18x64xf32>
    %513 = tpu.matmul %511, %512, %cst_201 {dimension_numbers = #tpu.dot_dimension_numbers<[1], [0], [0], [1], [0, 0, 1, 1], [], []>} : vector<18x16xf32>, vector<16x64xf32>, vector<18x64xf32> -> vector<18x64xf32>
    %514 = arith.addf %493, %513 : vector<18x64xf32>
    %515 = arith.addf %419, %514 : vector<18x64xf32>
    %516 = vector.broadcast %423 : vector<1x64xf32> to vector<18x64xf32>
    %517 = arith.addf %515, %516 : vector<18x64xf32>
    %cst_202 = arith.constant dense<0.000000e+00> : vector<18xf32>
    %518 = vector.multi_reduction <add>, %517, %cst_202 [1] : vector<18x64xf32> to vector<18xf32>
    %519 = vector.shape_cast %518 : vector<18xf32> to vector<18x1xf32>
    %cst_203 = arith.constant 6.400000e+01 : f32
    %520 = vector.broadcast %cst_203 : f32 to vector<18x1xf32>
    %521 = arith.divf %519, %520 : vector<18x1xf32>
    %522 = vector.broadcast %521 : vector<18x1xf32> to vector<18x64xf32>
    %523 = arith.subf %517, %522 : vector<18x64xf32>
    %524 = arith.mulf %523, %523 : vector<18x64xf32>
    %cst_204 = arith.constant dense<0.000000e+00> : vector<18xf32>
    %525 = vector.multi_reduction <add>, %524, %cst_204 [1] : vector<18x64xf32> to vector<18xf32>
    %526 = vector.shape_cast %525 : vector<18xf32> to vector<18x1xf32>
    %cst_205 = arith.constant 6.400000e+01 : f32
    %527 = vector.broadcast %cst_205 : f32 to vector<18x1xf32>
    %528 = arith.divf %526, %527 : vector<18x1xf32>
    %cst_206 = arith.constant 9.99999974E-6 : f32
    %529 = vector.broadcast %cst_206 : f32 to vector<18x1xf32>
    %530 = arith.addf %528, %529 : vector<18x1xf32>
    %531 = math.rsqrt %530 : vector<18x1xf32>
    %532 = vector.broadcast %531 : vector<18x1xf32> to vector<18x64xf32>
    %533 = arith.mulf %523, %532 : vector<18x64xf32>
    %534 = vector.broadcast %424 : vector<1x64xf32> to vector<18x64xf32>
    %535 = arith.mulf %533, %534 : vector<18x64xf32>
    %536 = vector.broadcast %425 : vector<1x64xf32> to vector<18x64xf32>
    %537 = arith.addf %535, %536 : vector<18x64xf32>
    %c0_207 = arith.constant 0 : index
    %c0_208 = arith.constant 0 : index
    %538 = vector.load %arg32[%c0_207, %c0_208] : memref<64x64xf32, #tpu.memory_space<vmem>>, vector<64x64xf32>
    %c0_209 = arith.constant 0 : index
    %c0_210 = arith.constant 0 : index
    %539 = vector.load %arg33[%c0_209, %c0_210] : memref<1x64xf32, #tpu.memory_space<vmem>>, vector<1x64xf32>
    %c0_211 = arith.constant 0 : index
    %c0_212 = arith.constant 0 : index
    %540 = vector.load %arg34[%c0_211, %c0_212] : memref<64x128xf32, #tpu.memory_space<vmem>>, vector<64x128xf32>
    %c0_213 = arith.constant 0 : index
    %c0_214 = arith.constant 0 : index
    %541 = vector.load %arg35[%c0_213, %c0_214] : memref<1x128xf32, #tpu.memory_space<vmem>>, vector<1x128xf32>
    %c0_215 = arith.constant 0 : index
    %c0_216 = arith.constant 0 : index
    %542 = vector.load %arg36[%c0_215, %c0_216] : memref<64x64xf32, #tpu.memory_space<vmem>>, vector<64x64xf32>
    %c0_217 = arith.constant 0 : index
    %c0_218 = arith.constant 0 : index
    %543 = vector.load %arg37[%c0_217, %c0_218] : memref<1x64xf32, #tpu.memory_space<vmem>>, vector<1x64xf32>
    %c0_219 = arith.constant 0 : index
    %c0_220 = arith.constant 0 : index
    %544 = vector.load %arg38[%c0_219, %c0_220] : memref<1x64xf32, #tpu.memory_space<vmem>>, vector<1x64xf32>
    %c0_221 = arith.constant 0 : index
    %c0_222 = arith.constant 0 : index
    %545 = vector.load %arg39[%c0_221, %c0_222] : memref<1x64xf32, #tpu.memory_space<vmem>>, vector<1x64xf32>
    %cst_223 = arith.constant dense<0.000000e+00> : vector<18x64xf32>
    %546 = tpu.matmul %537, %538, %cst_223 {dimension_numbers = #tpu.dot_dimension_numbers<[1], [0], [0], [1], [0, 0, 1, 1], [], []>} : vector<18x64xf32>, vector<64x64xf32>, vector<18x64xf32> -> vector<18x64xf32>
    %547 = vector.broadcast %539 : vector<1x64xf32> to vector<18x64xf32>
    %548 = arith.addf %546, %547 : vector<18x64xf32>
    %cst_224 = arith.constant dense<0.000000e+00> : vector<18x128xf32>
    %549 = tpu.matmul %418, %540, %cst_224 {dimension_numbers = #tpu.dot_dimension_numbers<[1], [0], [0], [1], [0, 0, 1, 1], [], []>} : vector<18x64xf32>, vector<64x128xf32>, vector<18x128xf32> -> vector<18x128xf32>
    %550 = vector.broadcast %541 : vector<1x128xf32> to vector<18x128xf32>
    %551 = arith.addf %549, %550 : vector<18x128xf32>
    %552 = vector.extract_strided_slice %551 {offsets = [0, 0], sizes = [18, 64], strides = [1, 1]} : vector<18x128xf32> to vector<18x64xf32>
    %553 = vector.extract_strided_slice %551 {offsets = [0, 64], sizes = [18, 64], strides = [1, 1]} : vector<18x128xf32> to vector<18x64xf32>
    %554 = vector.extract_strided_slice %548 {offsets = [0, 0], sizes = [18, 16], strides = [1, 1]} : vector<18x64xf32> to vector<18x16xf32>
    %cst_225 = arith.constant 2.500000e-01 : f32
    %555 = vector.broadcast %cst_225 : f32 to vector<18x16xf32>
    %556 = arith.mulf %554, %555 : vector<18x16xf32>
    %557 = vector.extract_strided_slice %552 {offsets = [0, 0], sizes = [18, 16], strides = [1, 1]} : vector<18x64xf32> to vector<18x16xf32>
    %558 = vector.extract_strided_slice %553 {offsets = [0, 0], sizes = [18, 16], strides = [1, 1]} : vector<18x64xf32> to vector<18x16xf32>
    %cst_226 = arith.constant dense<0.000000e+00> : vector<18x18xf32>
    %559 = tpu.matmul %556, %557, %cst_226 {dimension_numbers = #tpu.dot_dimension_numbers<[1], [1], [0], [0], [0, 0, 1, 0], [], []>} : vector<18x16xf32>, vector<18x16xf32>, vector<18x18xf32> -> vector<18x18xf32>
    %560 = arith.addf %559, %111 : vector<18x18xf32>
    %cst_227 = arith.constant dense<0xFF800000> : vector<18xf32>
    %561 = vector.multi_reduction <maximumf>, %560, %cst_227 [1] : vector<18x18xf32> to vector<18xf32>
    %562 = vector.shape_cast %561 : vector<18xf32> to vector<18x1xf32>
    %563 = vector.broadcast %562 : vector<18x1xf32> to vector<18x18xf32>
    %564 = arith.subf %560, %563 : vector<18x18xf32>
    %565 = math.exp %564 : vector<18x18xf32>
    %cst_228 = arith.constant dense<0.000000e+00> : vector<18xf32>
    %566 = vector.multi_reduction <add>, %565, %cst_228 [1] : vector<18x18xf32> to vector<18xf32>
    %567 = vector.shape_cast %566 : vector<18xf32> to vector<18x1xf32>
    %568 = tpu.reciprocal %567 {approx = true} : vector<18x1xf32> -> vector<18x1xf32>
    %569 = vector.broadcast %568 : vector<18x1xf32> to vector<18x18xf32>
    %570 = arith.mulf %565, %569 : vector<18x18xf32>
    %cst_229 = arith.constant dense<0.000000e+00> : vector<18x16xf32>
    %571 = tpu.matmul %570, %558, %cst_229 {dimension_numbers = #tpu.dot_dimension_numbers<[1], [0], [0], [1], [0, 0, 1, 1], [], []>} : vector<18x18xf32>, vector<18x16xf32>, vector<18x16xf32> -> vector<18x16xf32>
    %572 = vector.extract_strided_slice %542 {offsets = [0, 0], sizes = [16, 64], strides = [1, 1]} : vector<64x64xf32> to vector<16x64xf32>
    %cst_230 = arith.constant dense<0.000000e+00> : vector<18x64xf32>
    %573 = tpu.matmul %571, %572, %cst_230 {dimension_numbers = #tpu.dot_dimension_numbers<[1], [0], [0], [1], [0, 0, 1, 1], [], []>} : vector<18x16xf32>, vector<16x64xf32>, vector<18x64xf32> -> vector<18x64xf32>
    %574 = vector.extract_strided_slice %548 {offsets = [0, 16], sizes = [18, 16], strides = [1, 1]} : vector<18x64xf32> to vector<18x16xf32>
    %cst_231 = arith.constant 2.500000e-01 : f32
    %575 = vector.broadcast %cst_231 : f32 to vector<18x16xf32>
    %576 = arith.mulf %574, %575 : vector<18x16xf32>
    %577 = vector.extract_strided_slice %552 {offsets = [0, 16], sizes = [18, 16], strides = [1, 1]} : vector<18x64xf32> to vector<18x16xf32>
    %578 = vector.extract_strided_slice %553 {offsets = [0, 16], sizes = [18, 16], strides = [1, 1]} : vector<18x64xf32> to vector<18x16xf32>
    %cst_232 = arith.constant dense<0.000000e+00> : vector<18x18xf32>
    %579 = tpu.matmul %576, %577, %cst_232 {dimension_numbers = #tpu.dot_dimension_numbers<[1], [1], [0], [0], [0, 0, 1, 0], [], []>} : vector<18x16xf32>, vector<18x16xf32>, vector<18x18xf32> -> vector<18x18xf32>
    %580 = arith.addf %579, %111 : vector<18x18xf32>
    %cst_233 = arith.constant dense<0xFF800000> : vector<18xf32>
    %581 = vector.multi_reduction <maximumf>, %580, %cst_233 [1] : vector<18x18xf32> to vector<18xf32>
    %582 = vector.shape_cast %581 : vector<18xf32> to vector<18x1xf32>
    %583 = vector.broadcast %582 : vector<18x1xf32> to vector<18x18xf32>
    %584 = arith.subf %580, %583 : vector<18x18xf32>
    %585 = math.exp %584 : vector<18x18xf32>
    %cst_234 = arith.constant dense<0.000000e+00> : vector<18xf32>
    %586 = vector.multi_reduction <add>, %585, %cst_234 [1] : vector<18x18xf32> to vector<18xf32>
    %587 = vector.shape_cast %586 : vector<18xf32> to vector<18x1xf32>
    %588 = tpu.reciprocal %587 {approx = true} : vector<18x1xf32> -> vector<18x1xf32>
    %589 = vector.broadcast %588 : vector<18x1xf32> to vector<18x18xf32>
    %590 = arith.mulf %585, %589 : vector<18x18xf32>
    %cst_235 = arith.constant dense<0.000000e+00> : vector<18x16xf32>
    %591 = tpu.matmul %590, %578, %cst_235 {dimension_numbers = #tpu.dot_dimension_numbers<[1], [0], [0], [1], [0, 0, 1, 1], [], []>} : vector<18x18xf32>, vector<18x16xf32>, vector<18x16xf32> -> vector<18x16xf32>
    %592 = vector.extract_strided_slice %542 {offsets = [16, 0], sizes = [16, 64], strides = [1, 1]} : vector<64x64xf32> to vector<16x64xf32>
    %cst_236 = arith.constant dense<0.000000e+00> : vector<18x64xf32>
    %593 = tpu.matmul %591, %592, %cst_236 {dimension_numbers = #tpu.dot_dimension_numbers<[1], [0], [0], [1], [0, 0, 1, 1], [], []>} : vector<18x16xf32>, vector<16x64xf32>, vector<18x64xf32> -> vector<18x64xf32>
    %594 = arith.addf %573, %593 : vector<18x64xf32>
    %595 = vector.extract_strided_slice %548 {offsets = [0, 32], sizes = [18, 16], strides = [1, 1]} : vector<18x64xf32> to vector<18x16xf32>
    %cst_237 = arith.constant 2.500000e-01 : f32
    %596 = vector.broadcast %cst_237 : f32 to vector<18x16xf32>
    %597 = arith.mulf %595, %596 : vector<18x16xf32>
    %598 = vector.extract_strided_slice %552 {offsets = [0, 32], sizes = [18, 16], strides = [1, 1]} : vector<18x64xf32> to vector<18x16xf32>
    %599 = vector.extract_strided_slice %553 {offsets = [0, 32], sizes = [18, 16], strides = [1, 1]} : vector<18x64xf32> to vector<18x16xf32>
    %cst_238 = arith.constant dense<0.000000e+00> : vector<18x18xf32>
    %600 = tpu.matmul %597, %598, %cst_238 {dimension_numbers = #tpu.dot_dimension_numbers<[1], [1], [0], [0], [0, 0, 1, 0], [], []>} : vector<18x16xf32>, vector<18x16xf32>, vector<18x18xf32> -> vector<18x18xf32>
    %601 = arith.addf %600, %111 : vector<18x18xf32>
    %cst_239 = arith.constant dense<0xFF800000> : vector<18xf32>
    %602 = vector.multi_reduction <maximumf>, %601, %cst_239 [1] : vector<18x18xf32> to vector<18xf32>
    %603 = vector.shape_cast %602 : vector<18xf32> to vector<18x1xf32>
    %604 = vector.broadcast %603 : vector<18x1xf32> to vector<18x18xf32>
    %605 = arith.subf %601, %604 : vector<18x18xf32>
    %606 = math.exp %605 : vector<18x18xf32>
    %cst_240 = arith.constant dense<0.000000e+00> : vector<18xf32>
    %607 = vector.multi_reduction <add>, %606, %cst_240 [1] : vector<18x18xf32> to vector<18xf32>
    %608 = vector.shape_cast %607 : vector<18xf32> to vector<18x1xf32>
    %609 = tpu.reciprocal %608 {approx = true} : vector<18x1xf32> -> vector<18x1xf32>
    %610 = vector.broadcast %609 : vector<18x1xf32> to vector<18x18xf32>
    %611 = arith.mulf %606, %610 : vector<18x18xf32>
    %cst_241 = arith.constant dense<0.000000e+00> : vector<18x16xf32>
    %612 = tpu.matmul %611, %599, %cst_241 {dimension_numbers = #tpu.dot_dimension_numbers<[1], [0], [0], [1], [0, 0, 1, 1], [], []>} : vector<18x18xf32>, vector<18x16xf32>, vector<18x16xf32> -> vector<18x16xf32>
    %613 = vector.extract_strided_slice %542 {offsets = [32, 0], sizes = [16, 64], strides = [1, 1]} : vector<64x64xf32> to vector<16x64xf32>
    %cst_242 = arith.constant dense<0.000000e+00> : vector<18x64xf32>
    %614 = tpu.matmul %612, %613, %cst_242 {dimension_numbers = #tpu.dot_dimension_numbers<[1], [0], [0], [1], [0, 0, 1, 1], [], []>} : vector<18x16xf32>, vector<16x64xf32>, vector<18x64xf32> -> vector<18x64xf32>
    %615 = arith.addf %594, %614 : vector<18x64xf32>
    %616 = vector.extract_strided_slice %548 {offsets = [0, 48], sizes = [18, 16], strides = [1, 1]} : vector<18x64xf32> to vector<18x16xf32>
    %cst_243 = arith.constant 2.500000e-01 : f32
    %617 = vector.broadcast %cst_243 : f32 to vector<18x16xf32>
    %618 = arith.mulf %616, %617 : vector<18x16xf32>
    %619 = vector.extract_strided_slice %552 {offsets = [0, 48], sizes = [18, 16], strides = [1, 1]} : vector<18x64xf32> to vector<18x16xf32>
    %620 = vector.extract_strided_slice %553 {offsets = [0, 48], sizes = [18, 16], strides = [1, 1]} : vector<18x64xf32> to vector<18x16xf32>
    %cst_244 = arith.constant dense<0.000000e+00> : vector<18x18xf32>
    %621 = tpu.matmul %618, %619, %cst_244 {dimension_numbers = #tpu.dot_dimension_numbers<[1], [1], [0], [0], [0, 0, 1, 0], [], []>} : vector<18x16xf32>, vector<18x16xf32>, vector<18x18xf32> -> vector<18x18xf32>
    %622 = arith.addf %621, %111 : vector<18x18xf32>
    %cst_245 = arith.constant dense<0xFF800000> : vector<18xf32>
    %623 = vector.multi_reduction <maximumf>, %622, %cst_245 [1] : vector<18x18xf32> to vector<18xf32>
    %624 = vector.shape_cast %623 : vector<18xf32> to vector<18x1xf32>
    %625 = vector.broadcast %624 : vector<18x1xf32> to vector<18x18xf32>
    %626 = arith.subf %622, %625 : vector<18x18xf32>
    %627 = math.exp %626 : vector<18x18xf32>
    %cst_246 = arith.constant dense<0.000000e+00> : vector<18xf32>
    %628 = vector.multi_reduction <add>, %627, %cst_246 [1] : vector<18x18xf32> to vector<18xf32>
    %629 = vector.shape_cast %628 : vector<18xf32> to vector<18x1xf32>
    %630 = tpu.reciprocal %629 {approx = true} : vector<18x1xf32> -> vector<18x1xf32>
    %631 = vector.broadcast %630 : vector<18x1xf32> to vector<18x18xf32>
    %632 = arith.mulf %627, %631 : vector<18x18xf32>
    %cst_247 = arith.constant dense<0.000000e+00> : vector<18x16xf32>
    %633 = tpu.matmul %632, %620, %cst_247 {dimension_numbers = #tpu.dot_dimension_numbers<[1], [0], [0], [1], [0, 0, 1, 1], [], []>} : vector<18x18xf32>, vector<18x16xf32>, vector<18x16xf32> -> vector<18x16xf32>
    %634 = vector.extract_strided_slice %542 {offsets = [48, 0], sizes = [16, 64], strides = [1, 1]} : vector<64x64xf32> to vector<16x64xf32>
    %cst_248 = arith.constant dense<0.000000e+00> : vector<18x64xf32>
    %635 = tpu.matmul %633, %634, %cst_248 {dimension_numbers = #tpu.dot_dimension_numbers<[1], [0], [0], [1], [0, 0, 1, 1], [], []>} : vector<18x16xf32>, vector<16x64xf32>, vector<18x64xf32> -> vector<18x64xf32>
    %636 = arith.addf %615, %635 : vector<18x64xf32>
    %637 = arith.addf %537, %636 : vector<18x64xf32>
    %638 = vector.broadcast %543 : vector<1x64xf32> to vector<18x64xf32>
    %639 = arith.addf %637, %638 : vector<18x64xf32>
    %cst_249 = arith.constant dense<0.000000e+00> : vector<18xf32>
    %640 = vector.multi_reduction <add>, %639, %cst_249 [1] : vector<18x64xf32> to vector<18xf32>
    %641 = vector.shape_cast %640 : vector<18xf32> to vector<18x1xf32>
    %cst_250 = arith.constant 6.400000e+01 : f32
    %642 = vector.broadcast %cst_250 : f32 to vector<18x1xf32>
    %643 = arith.divf %641, %642 : vector<18x1xf32>
    %644 = vector.broadcast %643 : vector<18x1xf32> to vector<18x64xf32>
    %645 = arith.subf %639, %644 : vector<18x64xf32>
    %646 = arith.mulf %645, %645 : vector<18x64xf32>
    %cst_251 = arith.constant dense<0.000000e+00> : vector<18xf32>
    %647 = vector.multi_reduction <add>, %646, %cst_251 [1] : vector<18x64xf32> to vector<18xf32>
    %648 = vector.shape_cast %647 : vector<18xf32> to vector<18x1xf32>
    %cst_252 = arith.constant 6.400000e+01 : f32
    %649 = vector.broadcast %cst_252 : f32 to vector<18x1xf32>
    %650 = arith.divf %648, %649 : vector<18x1xf32>
    %cst_253 = arith.constant 9.99999974E-6 : f32
    %651 = vector.broadcast %cst_253 : f32 to vector<18x1xf32>
    %652 = arith.addf %650, %651 : vector<18x1xf32>
    %653 = math.rsqrt %652 : vector<18x1xf32>
    %654 = vector.broadcast %653 : vector<18x1xf32> to vector<18x64xf32>
    %655 = arith.mulf %645, %654 : vector<18x64xf32>
    %656 = vector.broadcast %544 : vector<1x64xf32> to vector<18x64xf32>
    %657 = arith.mulf %655, %656 : vector<18x64xf32>
    %658 = vector.broadcast %545 : vector<1x64xf32> to vector<18x64xf32>
    %659 = arith.addf %657, %658 : vector<18x64xf32>
    %c0_254 = arith.constant 0 : index
    %c0_255 = arith.constant 0 : index
    %660 = vector.load %arg40[%c0_254, %c0_255] : memref<64x256xf32, #tpu.memory_space<vmem>>, vector<64x256xf32>
    %c0_256 = arith.constant 0 : index
    %c0_257 = arith.constant 0 : index
    %661 = vector.load %arg41[%c0_256, %c0_257] : memref<1x256xf32, #tpu.memory_space<vmem>>, vector<1x256xf32>
    %c0_258 = arith.constant 0 : index
    %c0_259 = arith.constant 0 : index
    %662 = vector.load %arg42[%c0_258, %c0_259] : memref<256x64xf32, #tpu.memory_space<vmem>>, vector<256x64xf32>
    %c0_260 = arith.constant 0 : index
    %c0_261 = arith.constant 0 : index
    %663 = vector.load %arg43[%c0_260, %c0_261] : memref<1x64xf32, #tpu.memory_space<vmem>>, vector<1x64xf32>
    %c0_262 = arith.constant 0 : index
    %c0_263 = arith.constant 0 : index
    %664 = vector.load %arg44[%c0_262, %c0_263] : memref<1x64xf32, #tpu.memory_space<vmem>>, vector<1x64xf32>
    %c0_264 = arith.constant 0 : index
    %c0_265 = arith.constant 0 : index
    %665 = vector.load %arg45[%c0_264, %c0_265] : memref<1x64xf32, #tpu.memory_space<vmem>>, vector<1x64xf32>
    %cst_266 = arith.constant dense<0.000000e+00> : vector<18x256xf32>
    %666 = tpu.matmul %659, %660, %cst_266 {dimension_numbers = #tpu.dot_dimension_numbers<[1], [0], [0], [1], [0, 0, 1, 1], [], []>} : vector<18x64xf32>, vector<64x256xf32>, vector<18x256xf32> -> vector<18x256xf32>
    %667 = vector.broadcast %661 : vector<1x256xf32> to vector<18x256xf32>
    %668 = arith.addf %666, %667 : vector<18x256xf32>
    %cst_267 = arith.constant 0.000000e+00 : f32
    %669 = vector.broadcast %cst_267 : f32 to vector<18x256xf32>
    %670 = arith.maximumf %668, %669 : vector<18x256xf32>
    %cst_268 = arith.constant dense<0.000000e+00> : vector<18x64xf32>
    %671 = tpu.matmul %670, %662, %cst_268 {dimension_numbers = #tpu.dot_dimension_numbers<[1], [0], [0], [1], [0, 0, 1, 1], [], []>} : vector<18x256xf32>, vector<256x64xf32>, vector<18x64xf32> -> vector<18x64xf32>
    %672 = vector.broadcast %663 : vector<1x64xf32> to vector<18x64xf32>
    %673 = arith.addf %671, %672 : vector<18x64xf32>
    %674 = arith.addf %659, %673 : vector<18x64xf32>
    %cst_269 = arith.constant dense<0.000000e+00> : vector<18xf32>
    %675 = vector.multi_reduction <add>, %674, %cst_269 [1] : vector<18x64xf32> to vector<18xf32>
    %676 = vector.shape_cast %675 : vector<18xf32> to vector<18x1xf32>
    %cst_270 = arith.constant 6.400000e+01 : f32
    %677 = vector.broadcast %cst_270 : f32 to vector<18x1xf32>
    %678 = arith.divf %676, %677 : vector<18x1xf32>
    %679 = vector.broadcast %678 : vector<18x1xf32> to vector<18x64xf32>
    %680 = arith.subf %674, %679 : vector<18x64xf32>
    %681 = arith.mulf %680, %680 : vector<18x64xf32>
    %cst_271 = arith.constant dense<0.000000e+00> : vector<18xf32>
    %682 = vector.multi_reduction <add>, %681, %cst_271 [1] : vector<18x64xf32> to vector<18xf32>
    %683 = vector.shape_cast %682 : vector<18xf32> to vector<18x1xf32>
    %cst_272 = arith.constant 6.400000e+01 : f32
    %684 = vector.broadcast %cst_272 : f32 to vector<18x1xf32>
    %685 = arith.divf %683, %684 : vector<18x1xf32>
    %cst_273 = arith.constant 9.99999974E-6 : f32
    %686 = vector.broadcast %cst_273 : f32 to vector<18x1xf32>
    %687 = arith.addf %685, %686 : vector<18x1xf32>
    %688 = math.rsqrt %687 : vector<18x1xf32>
    %689 = vector.broadcast %688 : vector<18x1xf32> to vector<18x64xf32>
    %690 = arith.mulf %680, %689 : vector<18x64xf32>
    %691 = vector.broadcast %664 : vector<1x64xf32> to vector<18x64xf32>
    %692 = arith.mulf %690, %691 : vector<18x64xf32>
    %693 = vector.broadcast %665 : vector<1x64xf32> to vector<18x64xf32>
    %694 = arith.addf %692, %693 : vector<18x64xf32>
    %c0_274 = arith.constant 0 : index
    %c0_275 = arith.constant 0 : index
    %695 = vector.load %arg46[%c0_274, %c0_275] : memref<64x192xf32, #tpu.memory_space<vmem>>, vector<64x192xf32>
    %c0_276 = arith.constant 0 : index
    %c0_277 = arith.constant 0 : index
    %696 = vector.load %arg47[%c0_276, %c0_277] : memref<1x192xf32, #tpu.memory_space<vmem>>, vector<1x192xf32>
    %c0_278 = arith.constant 0 : index
    %c0_279 = arith.constant 0 : index
    %697 = vector.load %arg48[%c0_278, %c0_279] : memref<64x64xf32, #tpu.memory_space<vmem>>, vector<64x64xf32>
    %c0_280 = arith.constant 0 : index
    %c0_281 = arith.constant 0 : index
    %698 = vector.load %arg49[%c0_280, %c0_281] : memref<1x64xf32, #tpu.memory_space<vmem>>, vector<1x64xf32>
    %c0_282 = arith.constant 0 : index
    %c0_283 = arith.constant 0 : index
    %699 = vector.load %arg50[%c0_282, %c0_283] : memref<1x64xf32, #tpu.memory_space<vmem>>, vector<1x64xf32>
    %c0_284 = arith.constant 0 : index
    %c0_285 = arith.constant 0 : index
    %700 = vector.load %arg51[%c0_284, %c0_285] : memref<1x64xf32, #tpu.memory_space<vmem>>, vector<1x64xf32>
    %cst_286 = arith.constant dense<0.000000e+00> : vector<18x192xf32>
    %701 = tpu.matmul %694, %695, %cst_286 {dimension_numbers = #tpu.dot_dimension_numbers<[1], [0], [0], [1], [0, 0, 1, 1], [], []>} : vector<18x64xf32>, vector<64x192xf32>, vector<18x192xf32> -> vector<18x192xf32>
    %702 = vector.broadcast %696 : vector<1x192xf32> to vector<18x192xf32>
    %703 = arith.addf %701, %702 : vector<18x192xf32>
    %704 = vector.extract_strided_slice %703 {offsets = [0, 0], sizes = [18, 64], strides = [1, 1]} : vector<18x192xf32> to vector<18x64xf32>
    %705 = vector.extract_strided_slice %703 {offsets = [0, 64], sizes = [18, 64], strides = [1, 1]} : vector<18x192xf32> to vector<18x64xf32>
    %706 = vector.extract_strided_slice %703 {offsets = [0, 128], sizes = [18, 64], strides = [1, 1]} : vector<18x192xf32> to vector<18x64xf32>
    %707 = vector.extract_strided_slice %704 {offsets = [0, 0], sizes = [18, 16], strides = [1, 1]} : vector<18x64xf32> to vector<18x16xf32>
    %cst_287 = arith.constant 2.500000e-01 : f32
    %708 = vector.broadcast %cst_287 : f32 to vector<18x16xf32>
    %709 = arith.mulf %707, %708 : vector<18x16xf32>
    %710 = vector.extract_strided_slice %705 {offsets = [0, 0], sizes = [18, 16], strides = [1, 1]} : vector<18x64xf32> to vector<18x16xf32>
    %711 = vector.extract_strided_slice %706 {offsets = [0, 0], sizes = [18, 16], strides = [1, 1]} : vector<18x64xf32> to vector<18x16xf32>
    %cst_288 = arith.constant dense<0.000000e+00> : vector<18x18xf32>
    %712 = tpu.matmul %709, %710, %cst_288 {dimension_numbers = #tpu.dot_dimension_numbers<[1], [1], [0], [0], [0, 0, 1, 0], [], []>} : vector<18x16xf32>, vector<18x16xf32>, vector<18x18xf32> -> vector<18x18xf32>
    %713 = arith.addf %712, %75 : vector<18x18xf32>
    %cst_289 = arith.constant dense<0xFF800000> : vector<18xf32>
    %714 = vector.multi_reduction <maximumf>, %713, %cst_289 [1] : vector<18x18xf32> to vector<18xf32>
    %715 = vector.shape_cast %714 : vector<18xf32> to vector<18x1xf32>
    %716 = vector.broadcast %715 : vector<18x1xf32> to vector<18x18xf32>
    %717 = arith.subf %713, %716 : vector<18x18xf32>
    %718 = math.exp %717 : vector<18x18xf32>
    %cst_290 = arith.constant dense<0.000000e+00> : vector<18xf32>
    %719 = vector.multi_reduction <add>, %718, %cst_290 [1] : vector<18x18xf32> to vector<18xf32>
    %720 = vector.shape_cast %719 : vector<18xf32> to vector<18x1xf32>
    %721 = tpu.reciprocal %720 {approx = true} : vector<18x1xf32> -> vector<18x1xf32>
    %722 = vector.broadcast %721 : vector<18x1xf32> to vector<18x18xf32>
    %723 = arith.mulf %718, %722 : vector<18x18xf32>
    %cst_291 = arith.constant dense<0.000000e+00> : vector<18x16xf32>
    %724 = tpu.matmul %723, %711, %cst_291 {dimension_numbers = #tpu.dot_dimension_numbers<[1], [0], [0], [1], [0, 0, 1, 1], [], []>} : vector<18x18xf32>, vector<18x16xf32>, vector<18x16xf32> -> vector<18x16xf32>
    %725 = vector.extract_strided_slice %697 {offsets = [0, 0], sizes = [16, 64], strides = [1, 1]} : vector<64x64xf32> to vector<16x64xf32>
    %cst_292 = arith.constant dense<0.000000e+00> : vector<18x64xf32>
    %726 = tpu.matmul %724, %725, %cst_292 {dimension_numbers = #tpu.dot_dimension_numbers<[1], [0], [0], [1], [0, 0, 1, 1], [], []>} : vector<18x16xf32>, vector<16x64xf32>, vector<18x64xf32> -> vector<18x64xf32>
    %727 = vector.extract_strided_slice %704 {offsets = [0, 16], sizes = [18, 16], strides = [1, 1]} : vector<18x64xf32> to vector<18x16xf32>
    %cst_293 = arith.constant 2.500000e-01 : f32
    %728 = vector.broadcast %cst_293 : f32 to vector<18x16xf32>
    %729 = arith.mulf %727, %728 : vector<18x16xf32>
    %730 = vector.extract_strided_slice %705 {offsets = [0, 16], sizes = [18, 16], strides = [1, 1]} : vector<18x64xf32> to vector<18x16xf32>
    %731 = vector.extract_strided_slice %706 {offsets = [0, 16], sizes = [18, 16], strides = [1, 1]} : vector<18x64xf32> to vector<18x16xf32>
    %cst_294 = arith.constant dense<0.000000e+00> : vector<18x18xf32>
    %732 = tpu.matmul %729, %730, %cst_294 {dimension_numbers = #tpu.dot_dimension_numbers<[1], [1], [0], [0], [0, 0, 1, 0], [], []>} : vector<18x16xf32>, vector<18x16xf32>, vector<18x18xf32> -> vector<18x18xf32>
    %733 = arith.addf %732, %75 : vector<18x18xf32>
    %cst_295 = arith.constant dense<0xFF800000> : vector<18xf32>
    %734 = vector.multi_reduction <maximumf>, %733, %cst_295 [1] : vector<18x18xf32> to vector<18xf32>
    %735 = vector.shape_cast %734 : vector<18xf32> to vector<18x1xf32>
    %736 = vector.broadcast %735 : vector<18x1xf32> to vector<18x18xf32>
    %737 = arith.subf %733, %736 : vector<18x18xf32>
    %738 = math.exp %737 : vector<18x18xf32>
    %cst_296 = arith.constant dense<0.000000e+00> : vector<18xf32>
    %739 = vector.multi_reduction <add>, %738, %cst_296 [1] : vector<18x18xf32> to vector<18xf32>
    %740 = vector.shape_cast %739 : vector<18xf32> to vector<18x1xf32>
    %741 = tpu.reciprocal %740 {approx = true} : vector<18x1xf32> -> vector<18x1xf32>
    %742 = vector.broadcast %741 : vector<18x1xf32> to vector<18x18xf32>
    %743 = arith.mulf %738, %742 : vector<18x18xf32>
    %cst_297 = arith.constant dense<0.000000e+00> : vector<18x16xf32>
    %744 = tpu.matmul %743, %731, %cst_297 {dimension_numbers = #tpu.dot_dimension_numbers<[1], [0], [0], [1], [0, 0, 1, 1], [], []>} : vector<18x18xf32>, vector<18x16xf32>, vector<18x16xf32> -> vector<18x16xf32>
    %745 = vector.extract_strided_slice %697 {offsets = [16, 0], sizes = [16, 64], strides = [1, 1]} : vector<64x64xf32> to vector<16x64xf32>
    %cst_298 = arith.constant dense<0.000000e+00> : vector<18x64xf32>
    %746 = tpu.matmul %744, %745, %cst_298 {dimension_numbers = #tpu.dot_dimension_numbers<[1], [0], [0], [1], [0, 0, 1, 1], [], []>} : vector<18x16xf32>, vector<16x64xf32>, vector<18x64xf32> -> vector<18x64xf32>
    %747 = arith.addf %726, %746 : vector<18x64xf32>
    %748 = vector.extract_strided_slice %704 {offsets = [0, 32], sizes = [18, 16], strides = [1, 1]} : vector<18x64xf32> to vector<18x16xf32>
    %cst_299 = arith.constant 2.500000e-01 : f32
    %749 = vector.broadcast %cst_299 : f32 to vector<18x16xf32>
    %750 = arith.mulf %748, %749 : vector<18x16xf32>
    %751 = vector.extract_strided_slice %705 {offsets = [0, 32], sizes = [18, 16], strides = [1, 1]} : vector<18x64xf32> to vector<18x16xf32>
    %752 = vector.extract_strided_slice %706 {offsets = [0, 32], sizes = [18, 16], strides = [1, 1]} : vector<18x64xf32> to vector<18x16xf32>
    %cst_300 = arith.constant dense<0.000000e+00> : vector<18x18xf32>
    %753 = tpu.matmul %750, %751, %cst_300 {dimension_numbers = #tpu.dot_dimension_numbers<[1], [1], [0], [0], [0, 0, 1, 0], [], []>} : vector<18x16xf32>, vector<18x16xf32>, vector<18x18xf32> -> vector<18x18xf32>
    %754 = arith.addf %753, %75 : vector<18x18xf32>
    %cst_301 = arith.constant dense<0xFF800000> : vector<18xf32>
    %755 = vector.multi_reduction <maximumf>, %754, %cst_301 [1] : vector<18x18xf32> to vector<18xf32>
    %756 = vector.shape_cast %755 : vector<18xf32> to vector<18x1xf32>
    %757 = vector.broadcast %756 : vector<18x1xf32> to vector<18x18xf32>
    %758 = arith.subf %754, %757 : vector<18x18xf32>
    %759 = math.exp %758 : vector<18x18xf32>
    %cst_302 = arith.constant dense<0.000000e+00> : vector<18xf32>
    %760 = vector.multi_reduction <add>, %759, %cst_302 [1] : vector<18x18xf32> to vector<18xf32>
    %761 = vector.shape_cast %760 : vector<18xf32> to vector<18x1xf32>
    %762 = tpu.reciprocal %761 {approx = true} : vector<18x1xf32> -> vector<18x1xf32>
    %763 = vector.broadcast %762 : vector<18x1xf32> to vector<18x18xf32>
    %764 = arith.mulf %759, %763 : vector<18x18xf32>
    %cst_303 = arith.constant dense<0.000000e+00> : vector<18x16xf32>
    %765 = tpu.matmul %764, %752, %cst_303 {dimension_numbers = #tpu.dot_dimension_numbers<[1], [0], [0], [1], [0, 0, 1, 1], [], []>} : vector<18x18xf32>, vector<18x16xf32>, vector<18x16xf32> -> vector<18x16xf32>
    %766 = vector.extract_strided_slice %697 {offsets = [32, 0], sizes = [16, 64], strides = [1, 1]} : vector<64x64xf32> to vector<16x64xf32>
    %cst_304 = arith.constant dense<0.000000e+00> : vector<18x64xf32>
    %767 = tpu.matmul %765, %766, %cst_304 {dimension_numbers = #tpu.dot_dimension_numbers<[1], [0], [0], [1], [0, 0, 1, 1], [], []>} : vector<18x16xf32>, vector<16x64xf32>, vector<18x64xf32> -> vector<18x64xf32>
    %768 = arith.addf %747, %767 : vector<18x64xf32>
    %769 = vector.extract_strided_slice %704 {offsets = [0, 48], sizes = [18, 16], strides = [1, 1]} : vector<18x64xf32> to vector<18x16xf32>
    %cst_305 = arith.constant 2.500000e-01 : f32
    %770 = vector.broadcast %cst_305 : f32 to vector<18x16xf32>
    %771 = arith.mulf %769, %770 : vector<18x16xf32>
    %772 = vector.extract_strided_slice %705 {offsets = [0, 48], sizes = [18, 16], strides = [1, 1]} : vector<18x64xf32> to vector<18x16xf32>
    %773 = vector.extract_strided_slice %706 {offsets = [0, 48], sizes = [18, 16], strides = [1, 1]} : vector<18x64xf32> to vector<18x16xf32>
    %cst_306 = arith.constant dense<0.000000e+00> : vector<18x18xf32>
    %774 = tpu.matmul %771, %772, %cst_306 {dimension_numbers = #tpu.dot_dimension_numbers<[1], [1], [0], [0], [0, 0, 1, 0], [], []>} : vector<18x16xf32>, vector<18x16xf32>, vector<18x18xf32> -> vector<18x18xf32>
    %775 = arith.addf %774, %75 : vector<18x18xf32>
    %cst_307 = arith.constant dense<0xFF800000> : vector<18xf32>
    %776 = vector.multi_reduction <maximumf>, %775, %cst_307 [1] : vector<18x18xf32> to vector<18xf32>
    %777 = vector.shape_cast %776 : vector<18xf32> to vector<18x1xf32>
    %778 = vector.broadcast %777 : vector<18x1xf32> to vector<18x18xf32>
    %779 = arith.subf %775, %778 : vector<18x18xf32>
    %780 = math.exp %779 : vector<18x18xf32>
    %cst_308 = arith.constant dense<0.000000e+00> : vector<18xf32>
    %781 = vector.multi_reduction <add>, %780, %cst_308 [1] : vector<18x18xf32> to vector<18xf32>
    %782 = vector.shape_cast %781 : vector<18xf32> to vector<18x1xf32>
    %783 = tpu.reciprocal %782 {approx = true} : vector<18x1xf32> -> vector<18x1xf32>
    %784 = vector.broadcast %783 : vector<18x1xf32> to vector<18x18xf32>
    %785 = arith.mulf %780, %784 : vector<18x18xf32>
    %cst_309 = arith.constant dense<0.000000e+00> : vector<18x16xf32>
    %786 = tpu.matmul %785, %773, %cst_309 {dimension_numbers = #tpu.dot_dimension_numbers<[1], [0], [0], [1], [0, 0, 1, 1], [], []>} : vector<18x18xf32>, vector<18x16xf32>, vector<18x16xf32> -> vector<18x16xf32>
    %787 = vector.extract_strided_slice %697 {offsets = [48, 0], sizes = [16, 64], strides = [1, 1]} : vector<64x64xf32> to vector<16x64xf32>
    %cst_310 = arith.constant dense<0.000000e+00> : vector<18x64xf32>
    %788 = tpu.matmul %786, %787, %cst_310 {dimension_numbers = #tpu.dot_dimension_numbers<[1], [0], [0], [1], [0, 0, 1, 1], [], []>} : vector<18x16xf32>, vector<16x64xf32>, vector<18x64xf32> -> vector<18x64xf32>
    %789 = arith.addf %768, %788 : vector<18x64xf32>
    %790 = arith.addf %694, %789 : vector<18x64xf32>
    %791 = vector.broadcast %698 : vector<1x64xf32> to vector<18x64xf32>
    %792 = arith.addf %790, %791 : vector<18x64xf32>
    %cst_311 = arith.constant dense<0.000000e+00> : vector<18xf32>
    %793 = vector.multi_reduction <add>, %792, %cst_311 [1] : vector<18x64xf32> to vector<18xf32>
    %794 = vector.shape_cast %793 : vector<18xf32> to vector<18x1xf32>
    %cst_312 = arith.constant 6.400000e+01 : f32
    %795 = vector.broadcast %cst_312 : f32 to vector<18x1xf32>
    %796 = arith.divf %794, %795 : vector<18x1xf32>
    %797 = vector.broadcast %796 : vector<18x1xf32> to vector<18x64xf32>
    %798 = arith.subf %792, %797 : vector<18x64xf32>
    %799 = arith.mulf %798, %798 : vector<18x64xf32>
    %cst_313 = arith.constant dense<0.000000e+00> : vector<18xf32>
    %800 = vector.multi_reduction <add>, %799, %cst_313 [1] : vector<18x64xf32> to vector<18xf32>
    %801 = vector.shape_cast %800 : vector<18xf32> to vector<18x1xf32>
    %cst_314 = arith.constant 6.400000e+01 : f32
    %802 = vector.broadcast %cst_314 : f32 to vector<18x1xf32>
    %803 = arith.divf %801, %802 : vector<18x1xf32>
    %cst_315 = arith.constant 9.99999974E-6 : f32
    %804 = vector.broadcast %cst_315 : f32 to vector<18x1xf32>
    %805 = arith.addf %803, %804 : vector<18x1xf32>
    %806 = math.rsqrt %805 : vector<18x1xf32>
    %807 = vector.broadcast %806 : vector<18x1xf32> to vector<18x64xf32>
    %808 = arith.mulf %798, %807 : vector<18x64xf32>
    %809 = vector.broadcast %699 : vector<1x64xf32> to vector<18x64xf32>
    %810 = arith.mulf %808, %809 : vector<18x64xf32>
    %811 = vector.broadcast %700 : vector<1x64xf32> to vector<18x64xf32>
    %812 = arith.addf %810, %811 : vector<18x64xf32>
    %c0_316 = arith.constant 0 : index
    %c0_317 = arith.constant 0 : index
    %813 = vector.load %arg52[%c0_316, %c0_317] : memref<64x64xf32, #tpu.memory_space<vmem>>, vector<64x64xf32>
    %c0_318 = arith.constant 0 : index
    %c0_319 = arith.constant 0 : index
    %814 = vector.load %arg53[%c0_318, %c0_319] : memref<1x64xf32, #tpu.memory_space<vmem>>, vector<1x64xf32>
    %c0_320 = arith.constant 0 : index
    %c0_321 = arith.constant 0 : index
    %815 = vector.load %arg54[%c0_320, %c0_321] : memref<64x128xf32, #tpu.memory_space<vmem>>, vector<64x128xf32>
    %c0_322 = arith.constant 0 : index
    %c0_323 = arith.constant 0 : index
    %816 = vector.load %arg55[%c0_322, %c0_323] : memref<1x128xf32, #tpu.memory_space<vmem>>, vector<1x128xf32>
    %c0_324 = arith.constant 0 : index
    %c0_325 = arith.constant 0 : index
    %817 = vector.load %arg56[%c0_324, %c0_325] : memref<64x64xf32, #tpu.memory_space<vmem>>, vector<64x64xf32>
    %c0_326 = arith.constant 0 : index
    %c0_327 = arith.constant 0 : index
    %818 = vector.load %arg57[%c0_326, %c0_327] : memref<1x64xf32, #tpu.memory_space<vmem>>, vector<1x64xf32>
    %c0_328 = arith.constant 0 : index
    %c0_329 = arith.constant 0 : index
    %819 = vector.load %arg58[%c0_328, %c0_329] : memref<1x64xf32, #tpu.memory_space<vmem>>, vector<1x64xf32>
    %c0_330 = arith.constant 0 : index
    %c0_331 = arith.constant 0 : index
    %820 = vector.load %arg59[%c0_330, %c0_331] : memref<1x64xf32, #tpu.memory_space<vmem>>, vector<1x64xf32>
    %cst_332 = arith.constant dense<0.000000e+00> : vector<18x64xf32>
    %821 = tpu.matmul %812, %813, %cst_332 {dimension_numbers = #tpu.dot_dimension_numbers<[1], [0], [0], [1], [0, 0, 1, 1], [], []>} : vector<18x64xf32>, vector<64x64xf32>, vector<18x64xf32> -> vector<18x64xf32>
    %822 = vector.broadcast %814 : vector<1x64xf32> to vector<18x64xf32>
    %823 = arith.addf %821, %822 : vector<18x64xf32>
    %cst_333 = arith.constant dense<0.000000e+00> : vector<18x128xf32>
    %824 = tpu.matmul %418, %815, %cst_333 {dimension_numbers = #tpu.dot_dimension_numbers<[1], [0], [0], [1], [0, 0, 1, 1], [], []>} : vector<18x64xf32>, vector<64x128xf32>, vector<18x128xf32> -> vector<18x128xf32>
    %825 = vector.broadcast %816 : vector<1x128xf32> to vector<18x128xf32>
    %826 = arith.addf %824, %825 : vector<18x128xf32>
    %827 = vector.extract_strided_slice %826 {offsets = [0, 0], sizes = [18, 64], strides = [1, 1]} : vector<18x128xf32> to vector<18x64xf32>
    %828 = vector.extract_strided_slice %826 {offsets = [0, 64], sizes = [18, 64], strides = [1, 1]} : vector<18x128xf32> to vector<18x64xf32>
    %829 = vector.extract_strided_slice %823 {offsets = [0, 0], sizes = [18, 16], strides = [1, 1]} : vector<18x64xf32> to vector<18x16xf32>
    %cst_334 = arith.constant 2.500000e-01 : f32
    %830 = vector.broadcast %cst_334 : f32 to vector<18x16xf32>
    %831 = arith.mulf %829, %830 : vector<18x16xf32>
    %832 = vector.extract_strided_slice %827 {offsets = [0, 0], sizes = [18, 16], strides = [1, 1]} : vector<18x64xf32> to vector<18x16xf32>
    %833 = vector.extract_strided_slice %828 {offsets = [0, 0], sizes = [18, 16], strides = [1, 1]} : vector<18x64xf32> to vector<18x16xf32>
    %cst_335 = arith.constant dense<0.000000e+00> : vector<18x18xf32>
    %834 = tpu.matmul %831, %832, %cst_335 {dimension_numbers = #tpu.dot_dimension_numbers<[1], [1], [0], [0], [0, 0, 1, 0], [], []>} : vector<18x16xf32>, vector<18x16xf32>, vector<18x18xf32> -> vector<18x18xf32>
    %835 = arith.addf %834, %111 : vector<18x18xf32>
    %cst_336 = arith.constant dense<0xFF800000> : vector<18xf32>
    %836 = vector.multi_reduction <maximumf>, %835, %cst_336 [1] : vector<18x18xf32> to vector<18xf32>
    %837 = vector.shape_cast %836 : vector<18xf32> to vector<18x1xf32>
    %838 = vector.broadcast %837 : vector<18x1xf32> to vector<18x18xf32>
    %839 = arith.subf %835, %838 : vector<18x18xf32>
    %840 = math.exp %839 : vector<18x18xf32>
    %cst_337 = arith.constant dense<0.000000e+00> : vector<18xf32>
    %841 = vector.multi_reduction <add>, %840, %cst_337 [1] : vector<18x18xf32> to vector<18xf32>
    %842 = vector.shape_cast %841 : vector<18xf32> to vector<18x1xf32>
    %843 = tpu.reciprocal %842 {approx = true} : vector<18x1xf32> -> vector<18x1xf32>
    %844 = vector.broadcast %843 : vector<18x1xf32> to vector<18x18xf32>
    %845 = arith.mulf %840, %844 : vector<18x18xf32>
    %cst_338 = arith.constant dense<0.000000e+00> : vector<18x16xf32>
    %846 = tpu.matmul %845, %833, %cst_338 {dimension_numbers = #tpu.dot_dimension_numbers<[1], [0], [0], [1], [0, 0, 1, 1], [], []>} : vector<18x18xf32>, vector<18x16xf32>, vector<18x16xf32> -> vector<18x16xf32>
    %847 = vector.extract_strided_slice %817 {offsets = [0, 0], sizes = [16, 64], strides = [1, 1]} : vector<64x64xf32> to vector<16x64xf32>
    %cst_339 = arith.constant dense<0.000000e+00> : vector<18x64xf32>
    %848 = tpu.matmul %846, %847, %cst_339 {dimension_numbers = #tpu.dot_dimension_numbers<[1], [0], [0], [1], [0, 0, 1, 1], [], []>} : vector<18x16xf32>, vector<16x64xf32>, vector<18x64xf32> -> vector<18x64xf32>
    %849 = vector.extract_strided_slice %823 {offsets = [0, 16], sizes = [18, 16], strides = [1, 1]} : vector<18x64xf32> to vector<18x16xf32>
    %cst_340 = arith.constant 2.500000e-01 : f32
    %850 = vector.broadcast %cst_340 : f32 to vector<18x16xf32>
    %851 = arith.mulf %849, %850 : vector<18x16xf32>
    %852 = vector.extract_strided_slice %827 {offsets = [0, 16], sizes = [18, 16], strides = [1, 1]} : vector<18x64xf32> to vector<18x16xf32>
    %853 = vector.extract_strided_slice %828 {offsets = [0, 16], sizes = [18, 16], strides = [1, 1]} : vector<18x64xf32> to vector<18x16xf32>
    %cst_341 = arith.constant dense<0.000000e+00> : vector<18x18xf32>
    %854 = tpu.matmul %851, %852, %cst_341 {dimension_numbers = #tpu.dot_dimension_numbers<[1], [1], [0], [0], [0, 0, 1, 0], [], []>} : vector<18x16xf32>, vector<18x16xf32>, vector<18x18xf32> -> vector<18x18xf32>
    %855 = arith.addf %854, %111 : vector<18x18xf32>
    %cst_342 = arith.constant dense<0xFF800000> : vector<18xf32>
    %856 = vector.multi_reduction <maximumf>, %855, %cst_342 [1] : vector<18x18xf32> to vector<18xf32>
    %857 = vector.shape_cast %856 : vector<18xf32> to vector<18x1xf32>
    %858 = vector.broadcast %857 : vector<18x1xf32> to vector<18x18xf32>
    %859 = arith.subf %855, %858 : vector<18x18xf32>
    %860 = math.exp %859 : vector<18x18xf32>
    %cst_343 = arith.constant dense<0.000000e+00> : vector<18xf32>
    %861 = vector.multi_reduction <add>, %860, %cst_343 [1] : vector<18x18xf32> to vector<18xf32>
    %862 = vector.shape_cast %861 : vector<18xf32> to vector<18x1xf32>
    %863 = tpu.reciprocal %862 {approx = true} : vector<18x1xf32> -> vector<18x1xf32>
    %864 = vector.broadcast %863 : vector<18x1xf32> to vector<18x18xf32>
    %865 = arith.mulf %860, %864 : vector<18x18xf32>
    %cst_344 = arith.constant dense<0.000000e+00> : vector<18x16xf32>
    %866 = tpu.matmul %865, %853, %cst_344 {dimension_numbers = #tpu.dot_dimension_numbers<[1], [0], [0], [1], [0, 0, 1, 1], [], []>} : vector<18x18xf32>, vector<18x16xf32>, vector<18x16xf32> -> vector<18x16xf32>
    %867 = vector.extract_strided_slice %817 {offsets = [16, 0], sizes = [16, 64], strides = [1, 1]} : vector<64x64xf32> to vector<16x64xf32>
    %cst_345 = arith.constant dense<0.000000e+00> : vector<18x64xf32>
    %868 = tpu.matmul %866, %867, %cst_345 {dimension_numbers = #tpu.dot_dimension_numbers<[1], [0], [0], [1], [0, 0, 1, 1], [], []>} : vector<18x16xf32>, vector<16x64xf32>, vector<18x64xf32> -> vector<18x64xf32>
    %869 = arith.addf %848, %868 : vector<18x64xf32>
    %870 = vector.extract_strided_slice %823 {offsets = [0, 32], sizes = [18, 16], strides = [1, 1]} : vector<18x64xf32> to vector<18x16xf32>
    %cst_346 = arith.constant 2.500000e-01 : f32
    %871 = vector.broadcast %cst_346 : f32 to vector<18x16xf32>
    %872 = arith.mulf %870, %871 : vector<18x16xf32>
    %873 = vector.extract_strided_slice %827 {offsets = [0, 32], sizes = [18, 16], strides = [1, 1]} : vector<18x64xf32> to vector<18x16xf32>
    %874 = vector.extract_strided_slice %828 {offsets = [0, 32], sizes = [18, 16], strides = [1, 1]} : vector<18x64xf32> to vector<18x16xf32>
    %cst_347 = arith.constant dense<0.000000e+00> : vector<18x18xf32>
    %875 = tpu.matmul %872, %873, %cst_347 {dimension_numbers = #tpu.dot_dimension_numbers<[1], [1], [0], [0], [0, 0, 1, 0], [], []>} : vector<18x16xf32>, vector<18x16xf32>, vector<18x18xf32> -> vector<18x18xf32>
    %876 = arith.addf %875, %111 : vector<18x18xf32>
    %cst_348 = arith.constant dense<0xFF800000> : vector<18xf32>
    %877 = vector.multi_reduction <maximumf>, %876, %cst_348 [1] : vector<18x18xf32> to vector<18xf32>
    %878 = vector.shape_cast %877 : vector<18xf32> to vector<18x1xf32>
    %879 = vector.broadcast %878 : vector<18x1xf32> to vector<18x18xf32>
    %880 = arith.subf %876, %879 : vector<18x18xf32>
    %881 = math.exp %880 : vector<18x18xf32>
    %cst_349 = arith.constant dense<0.000000e+00> : vector<18xf32>
    %882 = vector.multi_reduction <add>, %881, %cst_349 [1] : vector<18x18xf32> to vector<18xf32>
    %883 = vector.shape_cast %882 : vector<18xf32> to vector<18x1xf32>
    %884 = tpu.reciprocal %883 {approx = true} : vector<18x1xf32> -> vector<18x1xf32>
    %885 = vector.broadcast %884 : vector<18x1xf32> to vector<18x18xf32>
    %886 = arith.mulf %881, %885 : vector<18x18xf32>
    %cst_350 = arith.constant dense<0.000000e+00> : vector<18x16xf32>
    %887 = tpu.matmul %886, %874, %cst_350 {dimension_numbers = #tpu.dot_dimension_numbers<[1], [0], [0], [1], [0, 0, 1, 1], [], []>} : vector<18x18xf32>, vector<18x16xf32>, vector<18x16xf32> -> vector<18x16xf32>
    %888 = vector.extract_strided_slice %817 {offsets = [32, 0], sizes = [16, 64], strides = [1, 1]} : vector<64x64xf32> to vector<16x64xf32>
    %cst_351 = arith.constant dense<0.000000e+00> : vector<18x64xf32>
    %889 = tpu.matmul %887, %888, %cst_351 {dimension_numbers = #tpu.dot_dimension_numbers<[1], [0], [0], [1], [0, 0, 1, 1], [], []>} : vector<18x16xf32>, vector<16x64xf32>, vector<18x64xf32> -> vector<18x64xf32>
    %890 = arith.addf %869, %889 : vector<18x64xf32>
    %891 = vector.extract_strided_slice %823 {offsets = [0, 48], sizes = [18, 16], strides = [1, 1]} : vector<18x64xf32> to vector<18x16xf32>
    %cst_352 = arith.constant 2.500000e-01 : f32
    %892 = vector.broadcast %cst_352 : f32 to vector<18x16xf32>
    %893 = arith.mulf %891, %892 : vector<18x16xf32>
    %894 = vector.extract_strided_slice %827 {offsets = [0, 48], sizes = [18, 16], strides = [1, 1]} : vector<18x64xf32> to vector<18x16xf32>
    %895 = vector.extract_strided_slice %828 {offsets = [0, 48], sizes = [18, 16], strides = [1, 1]} : vector<18x64xf32> to vector<18x16xf32>
    %cst_353 = arith.constant dense<0.000000e+00> : vector<18x18xf32>
    %896 = tpu.matmul %893, %894, %cst_353 {dimension_numbers = #tpu.dot_dimension_numbers<[1], [1], [0], [0], [0, 0, 1, 0], [], []>} : vector<18x16xf32>, vector<18x16xf32>, vector<18x18xf32> -> vector<18x18xf32>
    %897 = arith.addf %896, %111 : vector<18x18xf32>
    %cst_354 = arith.constant dense<0xFF800000> : vector<18xf32>
    %898 = vector.multi_reduction <maximumf>, %897, %cst_354 [1] : vector<18x18xf32> to vector<18xf32>
    %899 = vector.shape_cast %898 : vector<18xf32> to vector<18x1xf32>
    %900 = vector.broadcast %899 : vector<18x1xf32> to vector<18x18xf32>
    %901 = arith.subf %897, %900 : vector<18x18xf32>
    %902 = math.exp %901 : vector<18x18xf32>
    %cst_355 = arith.constant dense<0.000000e+00> : vector<18xf32>
    %903 = vector.multi_reduction <add>, %902, %cst_355 [1] : vector<18x18xf32> to vector<18xf32>
    %904 = vector.shape_cast %903 : vector<18xf32> to vector<18x1xf32>
    %905 = tpu.reciprocal %904 {approx = true} : vector<18x1xf32> -> vector<18x1xf32>
    %906 = vector.broadcast %905 : vector<18x1xf32> to vector<18x18xf32>
    %907 = arith.mulf %902, %906 : vector<18x18xf32>
    %cst_356 = arith.constant dense<0.000000e+00> : vector<18x16xf32>
    %908 = tpu.matmul %907, %895, %cst_356 {dimension_numbers = #tpu.dot_dimension_numbers<[1], [0], [0], [1], [0, 0, 1, 1], [], []>} : vector<18x18xf32>, vector<18x16xf32>, vector<18x16xf32> -> vector<18x16xf32>
    %909 = vector.extract_strided_slice %817 {offsets = [48, 0], sizes = [16, 64], strides = [1, 1]} : vector<64x64xf32> to vector<16x64xf32>
    %cst_357 = arith.constant dense<0.000000e+00> : vector<18x64xf32>
    %910 = tpu.matmul %908, %909, %cst_357 {dimension_numbers = #tpu.dot_dimension_numbers<[1], [0], [0], [1], [0, 0, 1, 1], [], []>} : vector<18x16xf32>, vector<16x64xf32>, vector<18x64xf32> -> vector<18x64xf32>
    %911 = arith.addf %890, %910 : vector<18x64xf32>
    %912 = arith.addf %812, %911 : vector<18x64xf32>
    %913 = vector.broadcast %818 : vector<1x64xf32> to vector<18x64xf32>
    %914 = arith.addf %912, %913 : vector<18x64xf32>
    %cst_358 = arith.constant dense<0.000000e+00> : vector<18xf32>
    %915 = vector.multi_reduction <add>, %914, %cst_358 [1] : vector<18x64xf32> to vector<18xf32>
    %916 = vector.shape_cast %915 : vector<18xf32> to vector<18x1xf32>
    %cst_359 = arith.constant 6.400000e+01 : f32
    %917 = vector.broadcast %cst_359 : f32 to vector<18x1xf32>
    %918 = arith.divf %916, %917 : vector<18x1xf32>
    %919 = vector.broadcast %918 : vector<18x1xf32> to vector<18x64xf32>
    %920 = arith.subf %914, %919 : vector<18x64xf32>
    %921 = arith.mulf %920, %920 : vector<18x64xf32>
    %cst_360 = arith.constant dense<0.000000e+00> : vector<18xf32>
    %922 = vector.multi_reduction <add>, %921, %cst_360 [1] : vector<18x64xf32> to vector<18xf32>
    %923 = vector.shape_cast %922 : vector<18xf32> to vector<18x1xf32>
    %cst_361 = arith.constant 6.400000e+01 : f32
    %924 = vector.broadcast %cst_361 : f32 to vector<18x1xf32>
    %925 = arith.divf %923, %924 : vector<18x1xf32>
    %cst_362 = arith.constant 9.99999974E-6 : f32
    %926 = vector.broadcast %cst_362 : f32 to vector<18x1xf32>
    %927 = arith.addf %925, %926 : vector<18x1xf32>
    %928 = math.rsqrt %927 : vector<18x1xf32>
    %929 = vector.broadcast %928 : vector<18x1xf32> to vector<18x64xf32>
    %930 = arith.mulf %920, %929 : vector<18x64xf32>
    %931 = vector.broadcast %819 : vector<1x64xf32> to vector<18x64xf32>
    %932 = arith.mulf %930, %931 : vector<18x64xf32>
    %933 = vector.broadcast %820 : vector<1x64xf32> to vector<18x64xf32>
    %934 = arith.addf %932, %933 : vector<18x64xf32>
    %c0_363 = arith.constant 0 : index
    %c0_364 = arith.constant 0 : index
    %935 = vector.load %arg60[%c0_363, %c0_364] : memref<64x256xf32, #tpu.memory_space<vmem>>, vector<64x256xf32>
    %c0_365 = arith.constant 0 : index
    %c0_366 = arith.constant 0 : index
    %936 = vector.load %arg61[%c0_365, %c0_366] : memref<1x256xf32, #tpu.memory_space<vmem>>, vector<1x256xf32>
    %c0_367 = arith.constant 0 : index
    %c0_368 = arith.constant 0 : index
    %937 = vector.load %arg62[%c0_367, %c0_368] : memref<256x64xf32, #tpu.memory_space<vmem>>, vector<256x64xf32>
    %c0_369 = arith.constant 0 : index
    %c0_370 = arith.constant 0 : index
    %938 = vector.load %arg63[%c0_369, %c0_370] : memref<1x64xf32, #tpu.memory_space<vmem>>, vector<1x64xf32>
    %c0_371 = arith.constant 0 : index
    %c0_372 = arith.constant 0 : index
    %939 = vector.load %arg64[%c0_371, %c0_372] : memref<1x64xf32, #tpu.memory_space<vmem>>, vector<1x64xf32>
    %c0_373 = arith.constant 0 : index
    %c0_374 = arith.constant 0 : index
    %940 = vector.load %arg65[%c0_373, %c0_374] : memref<1x64xf32, #tpu.memory_space<vmem>>, vector<1x64xf32>
    %cst_375 = arith.constant dense<0.000000e+00> : vector<18x256xf32>
    %941 = tpu.matmul %934, %935, %cst_375 {dimension_numbers = #tpu.dot_dimension_numbers<[1], [0], [0], [1], [0, 0, 1, 1], [], []>} : vector<18x64xf32>, vector<64x256xf32>, vector<18x256xf32> -> vector<18x256xf32>
    %942 = vector.broadcast %936 : vector<1x256xf32> to vector<18x256xf32>
    %943 = arith.addf %941, %942 : vector<18x256xf32>
    %cst_376 = arith.constant 0.000000e+00 : f32
    %944 = vector.broadcast %cst_376 : f32 to vector<18x256xf32>
    %945 = arith.maximumf %943, %944 : vector<18x256xf32>
    %cst_377 = arith.constant dense<0.000000e+00> : vector<18x64xf32>
    %946 = tpu.matmul %945, %937, %cst_377 {dimension_numbers = #tpu.dot_dimension_numbers<[1], [0], [0], [1], [0, 0, 1, 1], [], []>} : vector<18x256xf32>, vector<256x64xf32>, vector<18x64xf32> -> vector<18x64xf32>
    %947 = vector.broadcast %938 : vector<1x64xf32> to vector<18x64xf32>
    %948 = arith.addf %946, %947 : vector<18x64xf32>
    %949 = arith.addf %934, %948 : vector<18x64xf32>
    %cst_378 = arith.constant dense<0.000000e+00> : vector<18xf32>
    %950 = vector.multi_reduction <add>, %949, %cst_378 [1] : vector<18x64xf32> to vector<18xf32>
    %951 = vector.shape_cast %950 : vector<18xf32> to vector<18x1xf32>
    %cst_379 = arith.constant 6.400000e+01 : f32
    %952 = vector.broadcast %cst_379 : f32 to vector<18x1xf32>
    %953 = arith.divf %951, %952 : vector<18x1xf32>
    %954 = vector.broadcast %953 : vector<18x1xf32> to vector<18x64xf32>
    %955 = arith.subf %949, %954 : vector<18x64xf32>
    %956 = arith.mulf %955, %955 : vector<18x64xf32>
    %cst_380 = arith.constant dense<0.000000e+00> : vector<18xf32>
    %957 = vector.multi_reduction <add>, %956, %cst_380 [1] : vector<18x64xf32> to vector<18xf32>
    %958 = vector.shape_cast %957 : vector<18xf32> to vector<18x1xf32>
    %cst_381 = arith.constant 6.400000e+01 : f32
    %959 = vector.broadcast %cst_381 : f32 to vector<18x1xf32>
    %960 = arith.divf %958, %959 : vector<18x1xf32>
    %cst_382 = arith.constant 9.99999974E-6 : f32
    %961 = vector.broadcast %cst_382 : f32 to vector<18x1xf32>
    %962 = arith.addf %960, %961 : vector<18x1xf32>
    %963 = math.rsqrt %962 : vector<18x1xf32>
    %964 = vector.broadcast %963 : vector<18x1xf32> to vector<18x64xf32>
    %965 = arith.mulf %955, %964 : vector<18x64xf32>
    %966 = vector.broadcast %939 : vector<1x64xf32> to vector<18x64xf32>
    %967 = arith.mulf %965, %966 : vector<18x64xf32>
    %968 = vector.broadcast %940 : vector<1x64xf32> to vector<18x64xf32>
    %969 = arith.addf %967, %968 : vector<18x64xf32>
    %c0_383 = arith.constant 0 : index
    %c0_384 = arith.constant 0 : index
    %970 = vector.load %arg66[%c0_383, %c0_384] : memref<18x64xf32, #tpu.memory_space<vmem>>, vector<18x64xf32>
    tpu.vector_store %arg66[%c0_383, %c0_384], %969 {strides = array<i32>} : memref<18x64xf32, #tpu.memory_space<vmem>>, vector<18x64xf32>,
    return
  }
}

</mosaic_0001>

<bundles_post_ra>
// kernel: transformer_forward.1
= control target key start
LH: loop header
LB: loop body
LE: loop exit
PB: predicated region body
PF: predicated region fallthrough
CT: control target
= control target key end

     0   :  { %s15119_s6 = smov 1   ;;  %s15120_s10 = smov 2   ;;  %s18130_s0 = inlined_call_operand.smem [shape: u32[67], index: -1, kind: input, shape index: {}] }
   0x1   :  { %s15230_s5 = sld [smem:[%s18130_s0]]   ;;  %s15121_s14 = smov 3  }
   0x2   :  { %s15235_s9 = sld [smem:[%s18130_s0 + %s15119_s6]]   ;;  %s15122_s18 = smov 4  }
   0x3   :  { %s15240_s13 = sld [smem:[%s18130_s0 + %s15120_s10]]   ;;  %s15123_s22 = smov 5  }
   0x4   :  { %s15245_s17 = sld [smem:[%s18130_s0 + %s15121_s14]]   ;;  %s15124_s26 = smov 6  }
   0x5   :  { %s15250_s21 = sld [smem:[%s18130_s0 + %s15122_s18]]   ;;  %s15125_s30 = smov 7  }
   0x6   :  { %s15255_s25 = sld [smem:[%s18130_s0 + %s15123_s22]]   ;;  %s15126_s4 = smov 8  }
   0x7   :  { %18174 = sst [smem:[#allocation56_spill]] %s15230_s5  ;;  %s15127_s10 = smov 9  }
   0x8   :  { %18175 = sst [smem:[#allocation57_spill]] %s15235_s9  ;;  %s15128_s15 = smov 10  }
   0x9   :  { %18176 = sst [smem:[#allocation58_spill]] %s15240_s13  ;;  %s15129_s20 = smov 11  }
   0xa   :  { %18177 = sst [smem:[#allocation59_spill]] %s15245_s17  ;;  %s15131_s1 = smov 13  }
   0xb   :  { %18178 = sst [smem:[#allocation60_spill]] %s15250_s21  ;;  %s15132_s7 = smov 14  }
   0xc   :  { %18179 = sst [smem:[#allocation61_spill]] %s15255_s25  ;;  %s15134_s22 = smov 16  }
   0xd   :  { %s15260_s29 = sld [smem:[%s18130_s0 + %s15124_s26]]   ;;  %s15130_s26 = smov 12  }
   0xe   :  { %s15265_s3 = sld [smem:[%s18130_s0 + %s15125_s30]]   ;;  %s15135_s28 = smov 17  }
   0xf   :  { %s15270_s8 = sld [smem:[%s18130_s0 + %s15126_s4]]  }
  0x10   :  { %s15275_s14 = sld [smem:[%s18130_s0 + %s15127_s10]]  }
  0x11   :  { %s15280_s19 = sld [smem:[%s18130_s0 + %s15128_s15]]   ;;  %s15133_s15 = smov 15  }
  0x12   :  { %s15285_s24 = sld [smem:[%s18130_s0 + %s15129_s20]]  }
  0x13   :  { %18180 = sst [smem:[#allocation62_spill]] %s15260_s29 }
  0x14   :  { %18181 = sst [smem:[#allocation63_spill]] %s15265_s3 }
  0x15   :  { %18182 = sst [smem:[#allocation64_spill]] %s15270_s8 }
  0x16   :  { %18183 = sst [smem:[#allocation65_spill]] %s15275_s14 }
  0x17   :  { %18184 = sst [smem:[#allocation66_spill]] %s15280_s19 }
  0x18   :  { %18185 = sst [smem:[#allocation67_spill]] %s15285_s24 }
  0x19   :  { %s15290_s30 = sld [smem:[%s18130_s0 + %s15130_s26]]  }
  0x1a   :  { %s15295_s6 = sld [smem:[%s18130_s0 + %s15131_s1]]  }
  0x1b   :  { %s15300_s12 = sld [smem:[%s18130_s0 + %s15132_s7]]   ;;  %s15136_s7 = smov 18  }
  0x1c   :  { %s15305_s20 = sld [smem:[%s18130_s0 + %s15133_s15]]   ;;  %s15137_s15 = smov 19  }
  0x1d   :  { %s15310_s27 = sld [smem:[%s18130_s0 + %s15134_s22]]   ;;  %s15138_s22 = smov 20  }
  0x1e   :  { %s15315_s4 = sld [smem:[%s18130_s0 + %s15135_s28]]   ;;  %s15139_s28 = smov 21  }
  0x1f   :  { %18186 = sst [smem:[#allocation68_spill]] %s15290_s30 }
  0x20   :  { %18187 = sst [smem:[#allocation69_spill]] %s15295_s6 }
  0x21   :  { %18188 = sst [smem:[#allocation70_spill]] %s15300_s12 }
  0x22   :  { %18189 = sst [smem:[#allocation71_spill]] %s15305_s20 }
  0x23   :  { %18190 = sst [smem:[#allocation72_spill]] %s15310_s27 }
  0x24   :  { %18191 = sst [smem:[#allocation73_spill]] %s15315_s4 }
  0x25   :  { %s15320_s9 = sld [smem:[%s18130_s0 + %s15136_s7]]   ;;  %s15140_s7 = smov 22  }
  0x26   :  { %s15325_s20 = sld [smem:[%s18130_s0 + %s15137_s15]]   ;;  %s15141_s15 = smov 23  }
  0x27   :  { %s15330_s27 = sld [smem:[%s18130_s0 + %s15138_s22]]   ;;  %s15142_s22 = smov 24  }
  0x28   :  { %s15335_s4 = sld [smem:[%s18130_s0 + %s15139_s28]]   ;;  %s15143_s28 = smov 25  }
  0x29   :  { %s15345_s6 = sld [smem:[%s18130_s0 + %s15141_s15]]   ;;  %s15145_s15 = smov 27  }
  0x2a   :  { %s15365_s30 = sld [smem:[%s18130_s0 + %s15145_s15]]   ;;  %s15149_s15 = smov 31  }
  0x2b   :  { %18192 = sst [smem:[#allocation74_spill]] %s15320_s9 }
  0x2c   :  { %s15340_s9 = sld [smem:[%s18130_s0 + %s15140_s7]]   ;;  %s15144_s7 = smov 26  }
  0x2d   :  { %18193 = sst [smem:[#allocation75_spill]] %s15330_s27 }
  0x2e   :  { %18194 = sst [smem:[#allocation76_spill]] %s15335_s4 }
  0x2f   :  { %s15350_s27 = sld [smem:[%s18130_s0 + %s15142_s22]]   ;;  %s15146_s22 = smov 28  }
  0x30   :  { %s15355_s4 = sld [smem:[%s18130_s0 + %s15143_s28]]   ;;  %s15147_s28 = smov 29  }
  0x31   :  { %18197 = sst [smem:[#allocation79_spill]] %s15365_s30 }
  0x32   :  { %18195 = sst [smem:[#allocation77_spill]] %s15340_s9 }
  0x33   :  { %s15360_s9 = sld [smem:[%s18130_s0 + %s15144_s7]]   ;;  %s15148_s7 = smov 30  }
  0x34   :  { %s15370_s12 = sld [smem:[%s18130_s0 + %s15146_s22]]   ;;  %s15150_s22 = smov 32  }
  0x35   :  { %s15375_s24 = sld [smem:[%s18130_s0 + %s15147_s28]]   ;;  %s15151_s28 = smov 33  }
  0x36   :  { %s15385_s30 = sld [smem:[%s18130_s0 + %s15149_s15]]   ;;  %s15153_s15 = smov 35  }
  0x37   :  { %s15395_s14 = sld [smem:[%s18130_s0 + %s15151_s28]]   ;;  %s15155_s28 = smov 37  }
  0x38   :  { %s15405_s29 = sld [smem:[%s18130_s0 + %s15153_s15]]   ;;  %s15157_s15 = smov 39  }
  0x39   :  { %18196 = sst [smem:[#allocation78_spill]] %s15360_s9 }
  0x3a   :  { %18198 = sst [smem:[#allocation80_spill]] %s15370_s12 }
  0x3b   :  { %s15380_s9 = sld [smem:[%s18130_s0 + %s15148_s7]]   ;;  %s15152_s7 = smov 34  }
  0x3c   :  { %18199 = sst [smem:[#allocation81_spill]] %s15385_s30 }
  0x3d   :  { %s15390_s12 = sld [smem:[%s18130_s0 + %s15150_s22]]   ;;  %s15154_s22 = smov 36  }
  0x3e   :  { %s15400_s3 = sld [smem:[%s18130_s0 + %s15152_s7]]   ;;  %s15156_s7 = smov 38  }
  0x3f   :  { %18202 = sst [smem:[#allocation84_spill]] %s15405_s29 }
  0x40   :  { %s15415_s19 = sld [smem:[%s18130_s0 + %s15155_s28]]   ;;  %s15159_s28 = smov 41  }
  0x41   :  { %s15425_s8 = sld [smem:[%s18130_s0 + %s15157_s15]]   ;;  %s15161_s15 = smov 43  }
  0x42   :  { %s15435_s25 = sld [smem:[%s18130_s0 + %s15159_s28]]   ;;  %s15163_s28 = smov 45  }
  0x43   :  { %18200 = sst [smem:[#allocation82_spill]] %s15390_s12 }
  0x44   :  { %18201 = sst [smem:[#allocation83_spill]] %s15400_s3 }
  0x45   :  { %s15410_s12 = sld [smem:[%s18130_s0 + %s15154_s22]]   ;;  %s15158_s22 = smov 40  }
  0x46   :  { %s15420_s3 = sld [smem:[%s18130_s0 + %s15156_s7]]   ;;  %s15160_s7 = smov 42  }
  0x47   :  { %s15440_s21 = sld [smem:[%s18130_s0 + %s15160_s7]]   ;;  %s15164_s7 = smov 46  }
  0x48   :  { %18206 = sst [smem:[#allocation88_spill]] %s15435_s25 }
  0x49   :  { %s15445_s17 = sld [smem:[%s18130_s0 + %s15161_s15]]   ;;  %s15165_s15 = smov 47  }
  0x4a   :  { %s15455_s25 = sld [smem:[%s18130_s0 + %s15163_s28]]   ;;  %s15167_s28 = smov 49  }
  0x4b   :  { %18203 = sst [smem:[#allocation85_spill]] %s15410_s12 }
  0x4c   :  { %18204 = sst [smem:[#allocation86_spill]] %s15420_s3 }
  0x4d   :  { %s15430_s12 = sld [smem:[%s18130_s0 + %s15158_s22]]   ;;  %s15162_s22 = smov 44  }
  0x4e   :  { %18207 = sst [smem:[#allocation89_spill]] %s15440_s21 }
  0x4f   :  { %18208 = sst [smem:[#allocation90_spill]] %s15445_s17 }
  0x50   :  { %18209 = sst [smem:[#allocation91_spill]] %s15455_s25 }
  0x51   :  { %s15460_s21 = sld [smem:[%s18130_s0 + %s15164_s7]]   ;;  %s15168_s7 = smov 50  }
  0x52   :  { %s15465_s5 = sld [smem:[%s18130_s0 + %s15165_s15]]   ;;  %s15169_s15 = smov 51  }
  0x53   :  { %18205 = sst [smem:[#allocation87_spill]] %s15430_s12 }
  0x54   :  { %s15450_s12 = sld [smem:[%s18130_s0 + %s15162_s22]]   ;;  %s15166_s22 = smov 48  }
  0x55   :  { %s15470_s13 = sld [smem:[%s18130_s0 + %s15166_s22]]   ;;  %s15170_s22 = smov 52  }
  0x56   :  { %s15475_s25 = sld [smem:[%s18130_s0 + %s15167_s28]]   ;;  %s15171_s28 = smov 53  }
  0x57   :  { %18210 = sst [smem:[#allocation92_spill]] %s15460_s21 }
  0x58   :  { %18211 = sst [smem:[#allocation93_spill]] %s15465_s5 }
  0x59   :  { %s15480_s21 = sld [smem:[%s18130_s0 + %s15168_s7]]   ;;  %s15172_s7 = smov 54  }
  0x5a   :  { %s15485_s5 = sld [smem:[%s18130_s0 + %s15169_s15]]   ;;  %s15173_s15 = smov 55  }
  0x5b   :  { %18212 = sst [smem:[#allocation94_spill]] %s15470_s13 }
  0x5c   :  { %s15490_s13 = sld [smem:[%s18130_s0 + %s15170_s22]]   ;;  %s15174_s22 = smov 56  }
  0x5d   :  { %s15495_s17 = sld [smem:[%s18130_s0 + %s15171_s28]]   ;;  %s15175_s28 = smov 57  }
  0x5e   :  { %s15505_s3 = sld [smem:[%s18130_s0 + %s15173_s15]]   ;;  %s15177_s15 = smov 59  }
  0x5f   :  { %18213 = sst [smem:[#allocation95_spill]] %s15480_s21 }
  0x60   :  { %s15500_s21 = sld [smem:[%s18130_s0 + %s15172_s7]]   ;;  %s15176_s7 = smov 58  }
  0x61   :  { %s15525_s29 = sld [smem:[%s18130_s0 + %s15177_s15]]   ;;  %s15181_s15 = smov 63  }
  0x62   :  { %18214 = sst [smem:[#allocation96_spill]] %s15490_s13 }
  0x63   :  { %18215 = sst [smem:[#allocation97_spill]] %s15495_s17 }
  0x64   :  { %s15510_s13 = sld [smem:[%s18130_s0 + %s15174_s22]]   ;;  %s15178_s22 = smov 60  }
  0x65   :  { %s15515_s17 = sld [smem:[%s18130_s0 + %s15175_s28]]   ;;  %s15179_s28 = smov 61  }
  0x66   :  { %18216 = sst [smem:[#allocation98_spill]] %s15500_s21 }
  0x67   :  { %s15520_s21 = sld [smem:[%s18130_s0 + %s15176_s7]]   ;;  %s15180_s7 = smov 62  }
  0x68   :  { %18219 = sst [smem:[#allocation101_spill]] %s15525_s29 }
  0x69   :  { %s15540_s30 = sld [smem:[%s18130_s0 + %s15180_s7]]   ;;  %s15184_s7 = smov 66  }
  0x6a   :  { %18217 = sst [smem:[#allocation99_spill]] %s15510_s13 }
  0x6b   :  { %18218 = sst [smem:[#allocation100_spill]] %s15515_s17 }
  0x6c   :  { %s15530_s13 = sld [smem:[%s18130_s0 + %s15178_s22]]   ;;  %s15182_s22 = smov 64  }
  0x6d   :  { %s15535_s17 = sld [smem:[%s18130_s0 + %s15179_s28]]   ;;  %s15183_s28 = smov 65  }
  0x6e   :  { %s15545_s29 = sld [smem:[%s18130_s0 + %s15181_s15]]  }
  0x6f   :  { %18222 = sst [smem:[#allocation104_spill]] %s15540_s30 }
  0x70   :  { %s15560_s30 = sld [smem:[%s18130_s0 + %s15184_s7]]  }
  0x72   :  { %18220 = sst [smem:[#allocation102_spill]] %s15530_s13 }
  0x73   :  { %18221 = sst [smem:[#allocation103_spill]] %s15535_s17 }
  0x74   :  { %s15550_s13 = sld [smem:[%s18130_s0 + %s15182_s22]]  }
  0x75   :  { %s15555_s17 = sld [smem:[%s18130_s0 + %s15183_s28]]  }
  0x76   :  { %138 = vsyncpa [#allocation3], 0 }
  0x77   :  { %139 = vsyncpa [#allocation5], 0 }
  0x78   :  { %140 = vsyncpa [#allocation8], 0 }
  0x79   :  { %141 = vsyncpa [#allocation11], 0 }
  0x7a   :  { %142 = vsyncpa [#allocation14], 0 }
  0x7b   :  { %143 = vsyncpa [#allocation17], 0 }
  0x7c   :  { %144 = vsyncpa [#allocation20], 0 }
  0x7d   :  { %145 = vsyncpa [#allocation23], 0 }
  0x7e   :  { %146 = vsyncpa [#allocation26], 0 }
  0x7f   :  { %147 = vsyncpa [#allocation29], 0 }
  0x80   :  { %148 = vsyncpa [#allocation32], 0 }
  0x81   :  { %149 = vsyncpa [#allocation35], 0 }
  0x82   :  { %150 = vsyncpa [#allocation38], 0 }
  0x83   :  { %151 = vsyncpa [#allocation41], 0  ;;  %s15185_s15 = smov [#allocation4]   ;;  %s15186_s16 = smov [#allocation7]  }
  0x84   :  { %s212_s0 = sshll.u32 %s15185_s15, 4  ;;  %s232_s18 = sshll.u32 %s15186_s16, 4  ;;  %s213_s0 = int_to_ptr.vmem [resolvable:$true] %s212_s0  ;;  %s233_s18 = int_to_ptr.vmem [resolvable:$true] %s232_s18 }
  0x85   :  { %s14519_s22 = scalar_lea.hbm %s15345_s6, 16 }
  0x86   :  { %p14520_p0 = scmp.ne.s32.totalorder %s15345_s6, %s14519_s22  ;;  %p14523_p1 = scmp.lt.u32.totalorder %s14519_s22, %s15345_s6 }
  0x88   :  { %p14525_p2 = pnand %p14523_p1, %p14520_p0 }
  0x8a   :  { %14528 = shalt.err (!%p14525_p2)
}
  0x8b   :  { %s14529_s23 = scalar_lea.vmem %s213_s0, 16  ;;  %s14533_s26 = scalar_lea.vmem %s213_s0, 32 }
  0x8c   :  { %p14530_p3 = scmp.ne.s32.totalorder %s213_s0, %s14529_s23  ;;  %p14534_p4 = scmp.lt.s32.totalorder %s213_s0, %s213_s0 }
  0x8d   :  { %p14535_p5 = scmp.lt.s32.totalorder %s14533_s26, %s14529_s23 }
  0x8f   :  { %p14536_p6 = por %p14535_p5, %p14534_p4 }
  0x91   :  { %p14537_p7 = pnand %p14536_p6, %p14530_p3 }
  0x93   :  { %14540 = shalt.err (!%p14537_p7)
}
  0x94   :  { %215 = dma.hbm_to_vmem [thread:$0]  %s15345_s6, 16, %s213_s0, [#allocation5]  }
  0x95   :  { %s14541_s28 = scalar_lea.hbm %s15355_s4, 16 }
  0x96   :  { %p14542_p8 = scmp.ne.s32.totalorder %s15355_s4, %s14541_s28  ;;  %p14545_p9 = scmp.lt.u32.totalorder %s14541_s28, %s15355_s4 }
  0x98   :  { %p14547_p10 = pnand %p14545_p9, %p14542_p8 }
  0x9a   :  { %14550 = shalt.err (!%p14547_p10)
}
  0x9b   :  { %s14551_s1 = scalar_lea.vmem %s233_s18, 16  ;;  %s14555_s2 = scalar_lea.vmem %s233_s18, 32 }
  0x9c   :  { %p14552_p11 = scmp.ne.s32.totalorder %s233_s18, %s14551_s1  ;;  %p14556_p12 = scmp.lt.s32.totalorder %s233_s18, %s233_s18 }
  0x9d   :  { %p14557_p13 = scmp.lt.s32.totalorder %s14555_s2, %s14551_s1 }
  0x9f   :  { %p14558_p0 = por %p14557_p13, %p14556_p12 }
  0xa1   :  { %p14559_p1 = pnand %p14558_p0, %p14552_p11 }
  0xa3   :  { %14562 = shalt.err (!%p14559_p1)
}
  0xa4   :  { %235 = dma.hbm_to_vmem [thread:$0]  %s15355_s4, 16, %s233_s18, [#allocation8]  }
  0xa5   :  { %s15187_s7 = smov [#allocation10]   ;;  %s15188_s10 = smov [#allocation13]  }
  0xa6   :  { %s258_s6 = sshll.u32 %s15187_s7, 4  ;;  %s280_s11 = sshll.u32 %s15188_s10, 4  ;;  %s259_s6 = int_to_ptr.vmem [resolvable:$true] %s258_s6  ;;  %s281_s11 = int_to_ptr.vmem [resolvable:$true] %s280_s11 }
  0xa7   :  { %s14563_s15 = scalar_lea.hbm %s15380_s9, 16 }
  0xa8   :  { %p14564_p2 = scmp.ne.s32.totalorder %s15380_s9, %s14563_s15  ;;  %p14567_p3 = scmp.lt.u32.totalorder %s14563_s15, %s15380_s9 }
  0xaa   :  { %p14569_p4 = pnand %p14567_p3, %p14564_p2 }
  0xac   :  { %14572 = shalt.err (!%p14569_p4)
}
  0xad   :  { %s14573_s0 = scalar_lea.vmem %s259_s6, 16  ;;  %s14577_s16 = scalar_lea.vmem %s259_s6, 32 }
  0xae   :  { %p14574_p5 = scmp.ne.s32.totalorder %s259_s6, %s14573_s0  ;;  %p14578_p6 = scmp.lt.s32.totalorder %s259_s6, %s259_s6 }
  0xaf   :  { %p14579_p7 = scmp.lt.s32.totalorder %s14577_s16, %s14573_s0 }
  0xb1   :  { %p14580_p8 = por %p14579_p7, %p14578_p6 }
  0xb3   :  { %p14581_p9 = pnand %p14580_p8, %p14574_p5 }
  0xb5   :  { %14584 = shalt.err (!%p14581_p9)
}
  0xb6   :  { %261 = dma.hbm_to_vmem [thread:$0]  %s15380_s9, 16, %s259_s6, [#allocation11]  }
  0xb7   :  { %s14585_s4 = scalar_lea.hbm %s15395_s14, 16 }
  0xb8   :  { %p14586_p10 = scmp.ne.s32.totalorder %s15395_s14, %s14585_s4  ;;  %p14589_p11 = scmp.lt.u32.totalorder %s14585_s4, %s15395_s14 }
  0xba   :  { %p14591_p12 = pnand %p14589_p11, %p14586_p10 }
  0xbc   :  { %14594 = shalt.err (!%p14591_p12)
}
  0xbd   :  { %s14595_s18 = scalar_lea.vmem %s281_s11, 16  ;;  %s14599_s22 = scalar_lea.vmem %s281_s11, 32 }
  0xbe   :  { %p14596_p13 = scmp.ne.s32.totalorder %s281_s11, %s14595_s18  ;;  %p14600_p0 = scmp.lt.s32.totalorder %s281_s11, %s281_s11 }
  0xbf   :  { %p14601_p1 = scmp.lt.s32.totalorder %s14599_s22, %s14595_s18 }
  0xc1   :  { %p14602_p2 = por %p14601_p1, %p14600_p0 }
  0xc3   :  { %p14603_p3 = pnand %p14602_p2, %p14596_p13 }
  0xc5   :  { %14606 = shalt.err (!%p14603_p3)
}
  0xc6   :  { %283 = dma.hbm_to_vmem [thread:$0]  %s15395_s14, 16, %s281_s11, [#allocation14]  }
  0xc7   :  { %s15189_s23 = smov [#allocation16]   ;;  %s15190_s26 = smov [#allocation19]  }
  0xc8   :  { %s304_s9 = sshll.u32 %s15189_s23, 4  ;;  %s324_s28 = sshll.u32 %s15190_s26, 4  ;;  %s305_s9 = int_to_ptr.vmem [resolvable:$true] %s304_s9  ;;  %s325_s28 = int_to_ptr.vmem [resolvable:$true] %s324_s28 }
  0xc9   :  { %s14607_s1 = scalar_lea.hbm %s15415_s19, 16 }
  0xca   :  { %p14608_p4 = scmp.ne.s32.totalorder %s15415_s19, %s14607_s1  ;;  %p14611_p5 = scmp.lt.u32.totalorder %s14607_s1, %s15415_s19 }
  0xcc   :  { %p14613_p6 = pnand %p14611_p5, %p14608_p4 }
  0xce   :  { %14616 = shalt.err (!%p14613_p6)
}
  0xcf   :  { %s14617_s2 = scalar_lea.vmem %s305_s9, 16  ;;  %s14621_s7 = scalar_lea.vmem %s305_s9, 32 }
  0xd0   :  { %p14618_p7 = scmp.ne.s32.totalorder %s305_s9, %s14617_s2  ;;  %p14622_p8 = scmp.lt.s32.totalorder %s305_s9, %s305_s9 }
  0xd1   :  { %p14623_p9 = scmp.lt.s32.totalorder %s14621_s7, %s14617_s2 }
  0xd3   :  { %p14624_p10 = por %p14623_p9, %p14622_p8 }
  0xd5   :  { %p14625_p11 = pnand %p14624_p10, %p14618_p7 }
  0xd7   :  { %14628 = shalt.err (!%p14625_p11)
}
  0xd8   :  { %307 = dma.hbm_to_vmem [thread:$0]  %s15415_s19, 16, %s305_s9, [#allocation17]  }
  0xd9   :  { %s14629_s14 = scalar_lea.hbm %s15425_s8, 16 }
  0xda   :  { %p14630_p12 = scmp.ne.s32.totalorder %s15425_s8, %s14629_s14  ;;  %p14633_p13 = scmp.lt.u32.totalorder %s14629_s14, %s15425_s8 }
  0xdc   :  { %p14635_p0 = pnand %p14633_p13, %p14630_p12 }
  0xde   :  { %14638 = shalt.err (!%p14635_p0)
}
  0xdf   :  { %s14639_s6 = scalar_lea.vmem %s325_s28, 16  ;;  %s14643_s10 = scalar_lea.vmem %s325_s28, 32 }
  0xe0   :  { %p14640_p1 = scmp.ne.s32.totalorder %s325_s28, %s14639_s6  ;;  %p14644_p2 = scmp.lt.s32.totalorder %s325_s28, %s325_s28 }
  0xe1   :  { %p14645_p3 = scmp.lt.s32.totalorder %s14643_s10, %s14639_s6 }
  0xe3   :  { %p14646_p4 = por %p14645_p3, %p14644_p2 }
  0xe5   :  { %p14647_p5 = pnand %p14646_p4, %p14640_p1 }
  0xe7   :  { %14650 = shalt.err (!%p14647_p5)
}
  0xe8   :  { %327 = dma.hbm_to_vmem [thread:$0]  %s15425_s8, 16, %s325_s28, [#allocation20]  }
  0xe9   :  { %s15191_s11 = smov [#allocation22]   ;;  %s15192_s15 = smov [#allocation25]  }
  0xea   :  { %s350_s19 = sshll.u32 %s15191_s11, 4  ;;  %s376_s0 = sshll.u32 %s15192_s15, 4  ;;  %s351_s19 = int_to_ptr.vmem [resolvable:$true] %s350_s19  ;;  %s377_s0 = int_to_ptr.vmem [resolvable:$true] %s376_s0 }
  0xeb   :  { %s14651_s16 = scalar_lea.hbm %s15450_s12, 16 }
  0xec   :  { %p14652_p6 = scmp.ne.s32.totalorder %s15450_s12, %s14651_s16  ;;  %p14655_p7 = scmp.lt.u32.totalorder %s14651_s16, %s15450_s12 }
  0xee   :  { %p14657_p8 = pnand %p14655_p7, %p14652_p6 }
  0xf0   :  { %14660 = shalt.err (!%p14657_p8)
}
  0xf1   :  { %s14661_s4 = scalar_lea.vmem %s351_s19, 16  ;;  %s14665_s18 = scalar_lea.vmem %s351_s19, 32 }
  0xf2   :  { %p14662_p9 = scmp.ne.s32.totalorder %s351_s19, %s14661_s4  ;;  %p14666_p10 = scmp.lt.s32.totalorder %s351_s19, %s351_s19 }
  0xf3   :  { %p14667_p11 = scmp.lt.s32.totalorder %s14665_s18, %s14661_s4 }
  0xf5   :  { %p14668_p12 = por %p14667_p11, %p14666_p10 }
  0xf7   :  { %p14669_p13 = pnand %p14668_p12, %p14662_p9 }
  0xf9   :  { %14672 = shalt.err (!%p14669_p13)
}
  0xfa   :  { %353 = dma.hbm_to_vmem [thread:$0]  %s15450_s12, 16, %s351_s19, [#allocation23]  }
  0xfb   :  { %s14673_s8 = scalar_lea.hbm %s15475_s25, 16 }
  0xfc   :  { %p14674_p0 = scmp.ne.s32.totalorder %s15475_s25, %s14673_s8  ;;  %p14677_p1 = scmp.lt.u32.totalorder %s14673_s8, %s15475_s25 }
  0xfe   :  { %p14679_p2 = pnand %p14677_p1, %p14674_p0 }
 0x100   :  { %14682 = shalt.err (!%p14679_p2)
}
 0x101   :  { %s14683_s22 = scalar_lea.vmem %s377_s0, 16  ;;  %s14687_s23 = scalar_lea.vmem %s377_s0, 32 }
 0x102   :  { %p14684_p3 = scmp.ne.s32.totalorder %s377_s0, %s14683_s22  ;;  %p14688_p4 = scmp.lt.s32.totalorder %s377_s0, %s377_s0 }
 0x103   :  { %p14689_p5 = scmp.lt.s32.totalorder %s14687_s23, %s14683_s22 }
 0x105   :  { %p14690_p6 = por %p14689_p5, %p14688_p4 }
 0x107   :  { %p14691_p7 = pnand %p14690_p6, %p14684_p3 }
 0x109   :  { %14694 = shalt.err (!%p14691_p7)
}
 0x10a   :  { %379 = dma.hbm_to_vmem [thread:$0]  %s15475_s25, 16, %s377_s0, [#allocation26]  }
 0x10b   :  { %s15193_s9 = smov [#allocation28]   ;;  %s15194_s26 = smov [#allocation31]  }
 0x10c   :  { %s396_s12 = sshll.u32 %s15193_s9, 4  ;;  %s420_s28 = sshll.u32 %s15194_s26, 4  ;;  %s397_s12 = int_to_ptr.vmem [resolvable:$true] %s396_s12  ;;  %s421_s28 = int_to_ptr.vmem [resolvable:$true] %s420_s28 }
 0x10d   :  { %s14695_s1 = scalar_lea.hbm %s15485_s5, 16 }
 0x10e   :  { %p14696_p8 = scmp.ne.s32.totalorder %s15485_s5, %s14695_s1  ;;  %p14699_p9 = scmp.lt.u32.totalorder %s14695_s1, %s15485_s5 }
 0x110   :  { %p14701_p10 = pnand %p14699_p9, %p14696_p8 }
 0x112   :  { %14704 = shalt.err (!%p14701_p10)
}
 0x113   :  { %s14705_s2 = scalar_lea.vmem %s397_s12, 16  ;;  %s14709_s7 = scalar_lea.vmem %s397_s12, 32 }
 0x114   :  { %p14706_p11 = scmp.ne.s32.totalorder %s397_s12, %s14705_s2  ;;  %p14710_p12 = scmp.lt.s32.totalorder %s397_s12, %s397_s12 }
 0x115   :  { %p14711_p13 = scmp.lt.s32.totalorder %s14709_s7, %s14705_s2 }
 0x117   :  { %p14712_p0 = por %p14711_p13, %p14710_p12 }
 0x119   :  { %p14713_p1 = pnand %p14712_p0, %p14706_p11 }
 0x11b   :  { %14716 = shalt.err (!%p14713_p1)
}
 0x11c   :  { %399 = dma.hbm_to_vmem [thread:$0]  %s15485_s5, 16, %s397_s12, [#allocation29]  }
 0x11d   :  { %s14717_s25 = scalar_lea.hbm %s15505_s3, 16 }
 0x11e   :  { %p14718_p2 = scmp.ne.s32.totalorder %s15505_s3, %s14717_s25  ;;  %p14721_p3 = scmp.lt.u32.totalorder %s14717_s25, %s15505_s3 }
 0x120   :  { %p14723_p4 = pnand %p14721_p3, %p14718_p2 }
 0x122   :  { %14726 = shalt.err (!%p14723_p4)
}
 0x123   :  { %s14727_s14 = scalar_lea.vmem %s421_s28, 16  ;;  %s14731_s6 = scalar_lea.vmem %s421_s28, 32 }
 0x124   :  { %p14728_p5 = scmp.ne.s32.totalorder %s421_s28, %s14727_s14  ;;  %p14732_p6 = scmp.lt.s32.totalorder %s421_s28, %s421_s28 }
 0x125   :  { %p14733_p7 = scmp.lt.s32.totalorder %s14731_s6, %s14727_s14 }
 0x127   :  { %p14734_p8 = por %p14733_p7, %p14732_p6 }
 0x129   :  { %p14735_p9 = pnand %p14734_p8, %p14728_p5 }
 0x12b   :  { %14738 = shalt.err (!%p14735_p9)
}
 0x12c   :  { %423 = dma.hbm_to_vmem [thread:$0]  %s15505_s3, 16, %s421_s28, [#allocation32]  }
 0x12d   :  { %s15195_s10 = smov [#allocation34]   ;;  %s15196_s11 = smov [#allocation37]  }
 0x12e   :  { %s442_s5 = sshll.u32 %s15195_s10, 4  ;;  %s468_s19 = sshll.u32 %s15196_s11, 4  ;;  %s443_s5 = int_to_ptr.vmem [resolvable:$true] %s442_s5  ;;  %s469_s19 = int_to_ptr.vmem [resolvable:$true] %s468_s19 }
 0x12f   :  { %s14739_s15 = scalar_lea.hbm %s15520_s21, 16 }
 0x130   :  { %p14740_p10 = scmp.ne.s32.totalorder %s15520_s21, %s14739_s15  ;;  %p14743_p11 = scmp.lt.u32.totalorder %s14739_s15, %s15520_s21 }
 0x132   :  { %p14745_p12 = pnand %p14743_p11, %p14740_p10 }
 0x134   :  { %14748 = shalt.err (!%p14745_p12)
}
 0x135   :  { %s14749_s0 = scalar_lea.vmem %s443_s5, 16  ;;  %s14753_s16 = scalar_lea.vmem %s443_s5, 32 }
 0x136   :  { %p14750_p13 = scmp.ne.s32.totalorder %s443_s5, %s14749_s0  ;;  %p14754_p0 = scmp.lt.s32.totalorder %s443_s5, %s443_s5 }
 0x137   :  { %p14755_p1 = scmp.lt.s32.totalorder %s14753_s16, %s14749_s0 }
 0x139   :  { %p14756_p2 = por %p14755_p1, %p14754_p0 }
 0x13b   :  { %p14757_p3 = pnand %p14756_p2, %p14750_p13 }
 0x13d   :  { %14760 = shalt.err (!%p14757_p3)
}
 0x13e   :  { %445 = dma.hbm_to_vmem [thread:$0]  %s15520_s21, 16, %s443_s5, [#allocation35]  }
 0x13f   :  { %s14761_s3 = scalar_lea.hbm %s15545_s29, 16 }
 0x140   :  { %p14762_p4 = scmp.ne.s32.totalorder %s15545_s29, %s14761_s3  ;;  %p14765_p5 = scmp.lt.u32.totalorder %s14761_s3, %s15545_s29 }
 0x142   :  { %p14767_p6 = pnand %p14765_p5, %p14762_p4 }
 0x144   :  { %14770 = shalt.err (!%p14767_p6)
}
 0x145   :  { %s14771_s4 = scalar_lea.vmem %s469_s19, 16  ;;  %s14775_s18 = scalar_lea.vmem %s469_s19, 32 }
 0x146   :  { %p14772_p7 = scmp.ne.s32.totalorder %s469_s19, %s14771_s4  ;;  %p14776_p8 = scmp.lt.s32.totalorder %s469_s19, %s469_s19 }
 0x147   :  { %p14777_p9 = scmp.lt.s32.totalorder %s14775_s18, %s14771_s4 }
 0x149   :  { %p14778_p10 = por %p14777_p9, %p14776_p8 }
 0x14b   :  { %p14779_p11 = pnand %p14778_p10, %p14772_p7 }
 0x14d   :  { %14782 = shalt.err (!%p14779_p11)
}
 0x14e   :  { %471 = dma.hbm_to_vmem [thread:$0]  %s15545_s29, 16, %s469_s19, [#allocation38]  }
 0x14f   :  { %s15197_s8 = smov [#allocation2]   ;;  %s15198_s22 = smov [#allocation6]  }
 0x150   :  { %s196_s21 = sshll.u32 %s15197_s8, 4  ;;  %s222_s23 = sshll.u32 %s15198_s22, 4  ;;  %s197_s21 = int_to_ptr.vmem [resolvable:$true] %s196_s21  ;;  %s223_s23 = int_to_ptr.vmem [resolvable:$true] %s222_s23 }
 0x151   :  { %s14783_s9 = scalar_lea.hbm %s15325_s20, 16 }
 0x152   :  { %p14784_p12 = scmp.ne.s32.totalorder %s15325_s20, %s14783_s9  ;;  %p14787_p13 = scmp.lt.u32.totalorder %s14783_s9, %s15325_s20 }
 0x154   :  { %p14789_p0 = pnand %p14787_p13, %p14784_p12 }
 0x156   :  { %14792 = shalt.err (!%p14789_p0)
}
 0x157   :  { %s14793_s12 = scalar_lea.vmem %s197_s21, 16  ;;  %s14797_s26 = scalar_lea.vmem %s197_s21, 32 }
 0x158   :  { %p14794_p1 = scmp.ne.s32.totalorder %s197_s21, %s14793_s12  ;;  %p14798_p2 = scmp.lt.s32.totalorder %s197_s21, %s197_s21 }
 0x159   :  { %p14799_p3 = scmp.lt.s32.totalorder %s14797_s26, %s14793_s12 }
 0x15b   :  { %p14800_p4 = por %p14799_p3, %p14798_p2 }
 0x15d   :  { %p14801_p5 = pnand %p14800_p4, %p14794_p1 }
 0x15f   :  { %14804 = shalt.err (!%p14801_p5)
}
 0x160   :  { %199 = dma.hbm_to_vmem [thread:$0]  %s15325_s20, 16, %s197_s21, [#allocation3]  }
 0x161   :  { %s14805_s29 = scalar_lea.hbm %s15350_s27, 16 }
 0x162   :  { %p14806_p6 = scmp.ne.s32.totalorder %s15350_s27, %s14805_s29  ;;  %p14809_p7 = scmp.lt.u32.totalorder %s14805_s29, %s15350_s27 }
 0x164   :  { %p14811_p8 = pnand %p14809_p7, %p14806_p6 }
 0x166   :  { %14814 = shalt.err (!%p14811_p8)
}
 0x167   :  { %s14815_s28 = scalar_lea.vmem %s223_s23, 16  ;;  %s14819_s1 = scalar_lea.vmem %s223_s23, 32 }
 0x168   :  { %p14816_p9 = scmp.ne.s32.totalorder %s223_s23, %s14815_s28  ;;  %p14820_p10 = scmp.lt.s32.totalorder %s223_s23, %s223_s23 }
 0x169   :  { %p14821_p11 = scmp.lt.s32.totalorder %s14819_s1, %s14815_s28 }
 0x16b   :  { %p14822_p12 = por %p14821_p11, %p14820_p10 }
 0x16d   :  { %p14823_p13 = pnand %p14822_p12, %p14816_p9 }
 0x16f   :  { %14826 = shalt.err (!%p14823_p13)
}
 0x170   :  { %225 = dma.hbm_to_vmem [thread:$0]  %s15350_s27, 16, %s223_s23, [#allocation5]  }
 0x171   :  { %s15199_s2 = smov [#allocation9]   ;;  %s15200_s7 = smov [#allocation12]  }
 0x172   :  { %s248_s20 = sshll.u32 %s15199_s2, 4  ;;  %s268_s25 = sshll.u32 %s15200_s7, 4  ;;  %s249_s20 = int_to_ptr.vmem [resolvable:$true] %s248_s20  ;;  %s269_s25 = int_to_ptr.vmem [resolvable:$true] %s268_s25 }
 0x173   :  { %s14827_s14 = scalar_lea.hbm %s15375_s24, 16 }
 0x174   :  { %p14828_p0 = scmp.ne.s32.totalorder %s15375_s24, %s14827_s14  ;;  %p14831_p1 = scmp.lt.u32.totalorder %s14827_s14, %s15375_s24 }
 0x176   :  { %p14833_p2 = pnand %p14831_p1, %p14828_p0 }
 0x178   :  { %14836 = shalt.err (!%p14833_p2)
}
 0x179   :  { %s14837_s6 = scalar_lea.vmem %s249_s20, 16  ;;  %s14841_s10 = scalar_lea.vmem %s249_s20, 32 }
 0x17a   :  { %p14838_p3 = scmp.ne.s32.totalorder %s249_s20, %s14837_s6  ;;  %p14842_p4 = scmp.lt.s32.totalorder %s249_s20, %s249_s20 }
 0x17b   :  { %p14843_p5 = scmp.lt.s32.totalorder %s14841_s10, %s14837_s6 }
 0x17d   :  { %p14844_p6 = por %p14843_p5, %p14842_p4 }
 0x17f   :  { %p14845_p7 = pnand %p14844_p6, %p14838_p3 }
 0x181   :  { %14848 = shalt.err (!%p14845_p7)
}
 0x182   :  { %s18223_s27 = sld [smem:[#allocation81_spill]] }
 0x183   :  { %251 = dma.hbm_to_vmem [thread:$0]  %s15375_s24, 16, %s249_s20, [#allocation8]  }
 0x188   :  { %s14849_s5 = scalar_lea.hbm %s18223_s27, 16 }
 0x189   :  { %p14850_p8 = scmp.ne.s32.totalorder %s18223_s27, %s14849_s5  ;;  %p14853_p9 = scmp.lt.u32.totalorder %s14849_s5, %s18223_s27 }
 0x18b   :  { %p14855_p10 = pnand %p14853_p9, %p14850_p8 }
 0x18d   :  { %14858 = shalt.err (!%p14855_p10)
}
 0x18e   :  { %s14859_s11 = scalar_lea.vmem %s269_s25, 16  ;;  %s14863_s19 = scalar_lea.vmem %s269_s25, 32 }
 0x18f   :  { %p14860_p11 = scmp.ne.s32.totalorder %s269_s25, %s14859_s11  ;;  %p14864_p12 = scmp.lt.s32.totalorder %s269_s25, %s269_s25 }
 0x190   :  { %p14865_p13 = scmp.lt.s32.totalorder %s14863_s19, %s14859_s11 }
 0x192   :  { %p14866_p0 = por %p14865_p13, %p14864_p12 }
 0x194   :  { %p14867_p1 = pnand %p14866_p0, %p14860_p11 }
 0x196   :  { %14870 = shalt.err (!%p14867_p1)
}
 0x197   :  { %s18224_s15 = sld [smem:[#allocation84_spill]]  ;;  %s15201_s0 = smov [#allocation15]  }
 0x198   :  { %271 = dma.hbm_to_vmem [thread:$0]  %s18223_s27, 16, %s269_s25, [#allocation11]  }
 0x199   :  { %s292_s24 = sshll.u32 %s15201_s0, 4  ;;  %s15202_s16 = smov [#allocation18]   ;;  %s293_s24 = int_to_ptr.vmem [resolvable:$true] %s292_s24 }
 0x19a   :  { %s314_s3 = sshll.u32 %s15202_s16, 4  ;;  %s315_s3 = int_to_ptr.vmem [resolvable:$true] %s314_s3 }
 0x19d   :  { %s14871_s4 = scalar_lea.hbm %s18224_s15, 16 }
 0x19e   :  { %p14872_p2 = scmp.ne.s32.totalorder %s18224_s15, %s14871_s4  ;;  %p14875_p3 = scmp.lt.u32.totalorder %s14871_s4, %s18224_s15 }
 0x1a0   :  { %p14877_p4 = pnand %p14875_p3, %p14872_p2 }
 0x1a2   :  { %14880 = shalt.err (!%p14877_p4)
}
 0x1a3   :  { %s14881_s18 = scalar_lea.vmem %s293_s24, 16  ;;  %s14885_s8 = scalar_lea.vmem %s293_s24, 32 }
 0x1a4   :  { %p14882_p5 = scmp.ne.s32.totalorder %s293_s24, %s14881_s18  ;;  %p14886_p6 = scmp.lt.s32.totalorder %s293_s24, %s293_s24 }
 0x1a5   :  { %p14887_p7 = scmp.lt.s32.totalorder %s14885_s8, %s14881_s18 }
 0x1a7   :  { %p14888_p8 = por %p14887_p7, %p14886_p6 }
 0x1a9   :  { %p14889_p9 = pnand %p14888_p8, %p14882_p5 }
 0x1ab   :  { %14892 = shalt.err (!%p14889_p9)
}
 0x1ac   :  { %s18225_s21 = sld [smem:[#allocation86_spill]] }
 0x1ad   :  { %295 = dma.hbm_to_vmem [thread:$0]  %s18224_s15, 16, %s293_s24, [#allocation14]  }
 0x1b2   :  { %s14893_s22 = scalar_lea.hbm %s18225_s21, 16 }
 0x1b3   :  { %p14894_p10 = scmp.ne.s32.totalorder %s18225_s21, %s14893_s22  ;;  %p14897_p11 = scmp.lt.u32.totalorder %s14893_s22, %s18225_s21 }
 0x1b5   :  { %p14899_p12 = pnand %p14897_p11, %p14894_p10 }
 0x1b7   :  { %14902 = shalt.err (!%p14899_p12)
}
 0x1b8   :  { %s14903_s23 = scalar_lea.vmem %s315_s3, 16  ;;  %s14907_s9 = scalar_lea.vmem %s315_s3, 32 }
 0x1b9   :  { %p14904_p13 = scmp.ne.s32.totalorder %s315_s3, %s14903_s23  ;;  %p14908_p0 = scmp.lt.s32.totalorder %s315_s3, %s315_s3 }
 0x1ba   :  { %p14909_p1 = scmp.lt.s32.totalorder %s14907_s9, %s14903_s23 }
 0x1bc   :  { %p14910_p2 = por %p14909_p1, %p14908_p0 }
 0x1be   :  { %p14911_p3 = pnand %p14910_p2, %p14904_p13 }
 0x1c0   :  { %14914 = shalt.err (!%p14911_p3)
}
 0x1c1   :  { %s18226_s12 = sld [smem:[#allocation90_spill]]  ;;  %s15203_s26 = smov [#allocation21]  }
 0x1c2   :  { %317 = dma.hbm_to_vmem [thread:$0]  %s18225_s21, 16, %s315_s3, [#allocation17]  }
 0x1c3   :  { %s340_s29 = sshll.u32 %s15203_s26, 4  ;;  %s15204_s28 = smov [#allocation24]   ;;  %s341_s29 = int_to_ptr.vmem [resolvable:$true] %s340_s29 }
 0x1c4   :  { %s360_s1 = sshll.u32 %s15204_s28, 4  ;;  %s361_s1 = int_to_ptr.vmem [resolvable:$true] %s360_s1 }
 0x1c7   :  { %s14915_s2 = scalar_lea.hbm %s18226_s12, 16 }
 0x1c8   :  { %p14916_p4 = scmp.ne.s32.totalorder %s18226_s12, %s14915_s2  ;;  %p14919_p5 = scmp.lt.u32.totalorder %s14915_s2, %s18226_s12 }
 0x1ca   :  { %p14921_p6 = pnand %p14919_p5, %p14916_p4 }
 0x1cc   :  { %14924 = shalt.err (!%p14921_p6)
}
 0x1cd   :  { %s14925_s20 = scalar_lea.vmem %s341_s29, 16  ;;  %s14929_s7 = scalar_lea.vmem %s341_s29, 32 }
 0x1ce   :  { %p14926_p7 = scmp.ne.s32.totalorder %s341_s29, %s14925_s20  ;;  %p14930_p8 = scmp.lt.s32.totalorder %s341_s29, %s341_s29 }
 0x1cf   :  { %p14931_p9 = scmp.lt.s32.totalorder %s14929_s7, %s14925_s20 }
 0x1d1   :  { %p14932_p10 = por %p14931_p9, %p14930_p8 }
 0x1d3   :  { %p14933_p11 = pnand %p14932_p10, %p14926_p7 }
 0x1d5   :  { %14936 = shalt.err (!%p14933_p11)
}
 0x1d6   :  { %s18227_s25 = sld [smem:[#allocation91_spill]] }
 0x1d7   :  { %343 = dma.hbm_to_vmem [thread:$0]  %s18226_s12, 16, %s341_s29, [#allocation20]  }
 0x1dc   :  { %s14937_s14 = scalar_lea.hbm %s18227_s25, 16 }
 0x1dd   :  { %p14938_p12 = scmp.ne.s32.totalorder %s18227_s25, %s14937_s14  ;;  %p14941_p13 = scmp.lt.u32.totalorder %s14937_s14, %s18227_s25 }
 0x1df   :  { %p14943_p0 = pnand %p14941_p13, %p14938_p12 }
 0x1e1   :  { %14946 = shalt.err (!%p14943_p0)
}
 0x1e2   :  { %s14947_s6 = scalar_lea.vmem %s361_s1, 16  ;;  %s14951_s10 = scalar_lea.vmem %s361_s1, 32 }
 0x1e3   :  { %p14948_p1 = scmp.ne.s32.totalorder %s361_s1, %s14947_s6  ;;  %p14952_p2 = scmp.lt.s32.totalorder %s361_s1, %s361_s1 }
 0x1e4   :  { %p14953_p3 = scmp.lt.s32.totalorder %s14951_s10, %s14947_s6 }
 0x1e6   :  { %p14954_p4 = por %p14953_p3, %p14952_p2 }
 0x1e8   :  { %p14955_p5 = pnand %p14954_p4, %p14948_p1 }
 0x1ea   :  { %14958 = shalt.err (!%p14955_p5)
}
 0x1eb   :  { %s18228_s27 = sld [smem:[#allocation95_spill]]  ;;  %s15205_s5 = smov [#allocation27]  }
 0x1ec   :  { %363 = dma.hbm_to_vmem [thread:$0]  %s18227_s25, 16, %s361_s1, [#allocation23]  }
 0x1ed   :  { %s386_s11 = sshll.u32 %s15205_s5, 4  ;;  %s15206_s19 = smov [#allocation30]   ;;  %s387_s11 = int_to_ptr.vmem [resolvable:$true] %s386_s11 }
 0x1ee   :  { %s408_s15 = sshll.u32 %s15206_s19, 4  ;;  %s409_s15 = int_to_ptr.vmem [resolvable:$true] %s408_s15 }
 0x1f1   :  { %s14959_s0 = scalar_lea.hbm %s18228_s27, 16 }
 0x1f2   :  { %p14960_p6 = scmp.ne.s32.totalorder %s18228_s27, %s14959_s0  ;;  %p14963_p7 = scmp.lt.u32.totalorder %s14959_s0, %s18228_s27 }
 0x1f4   :  { %p14965_p8 = pnand %p14963_p7, %p14960_p6 }
 0x1f6   :  { %14968 = shalt.err (!%p14965_p8)
}
 0x1f7   :  { %s14969_s24 = scalar_lea.vmem %s387_s11, 16  ;;  %s14973_s16 = scalar_lea.vmem %s387_s11, 32 }
 0x1f8   :  { %p14970_p9 = scmp.ne.s32.totalorder %s387_s11, %s14969_s24  ;;  %p14974_p10 = scmp.lt.s32.totalorder %s387_s11, %s387_s11 }
 0x1f9   :  { %p14975_p11 = scmp.lt.s32.totalorder %s14973_s16, %s14969_s24 }
 0x1fb   :  { %p14976_p12 = por %p14975_p11, %p14974_p10 }
 0x1fd   :  { %p14977_p13 = pnand %p14976_p12, %p14970_p9 }
 0x1ff   :  { %14980 = shalt.err (!%p14977_p13)
}
 0x200   :  { %s18229_s3 = sld [smem:[#allocation97_spill]] }
 0x201   :  { %389 = dma.hbm_to_vmem [thread:$0]  %s18228_s27, 16, %s387_s11, [#allocation26]  }
 0x206   :  { %s14981_s4 = scalar_lea.hbm %s18229_s3, 16 }
 0x207   :  { %p14982_p0 = scmp.ne.s32.totalorder %s18229_s3, %s14981_s4  ;;  %p14985_p1 = scmp.lt.u32.totalorder %s14981_s4, %s18229_s3 }
 0x209   :  { %p14987_p2 = pnand %p14985_p1, %p14982_p0 }
 0x20b   :  { %14990 = shalt.err (!%p14987_p2)
}
 0x20c   :  { %s14991_s18 = scalar_lea.vmem %s409_s15, 16  ;;  %s14995_s8 = scalar_lea.vmem %s409_s15, 32 }
 0x20d   :  { %p14992_p3 = scmp.ne.s32.totalorder %s409_s15, %s14991_s18  ;;  %p14996_p4 = scmp.lt.s32.totalorder %s409_s15, %s409_s15 }
 0x20e   :  { %p14997_p5 = scmp.lt.s32.totalorder %s14995_s8, %s14991_s18 }
 0x210   :  { %p14998_p6 = por %p14997_p5, %p14996_p4 }
 0x212   :  { %p14999_p7 = pnand %p14998_p6, %p14992_p3 }
 0x214   :  { %15002 = shalt.err (!%p14999_p7)
}
 0x215   :  { %s18230_s21 = sld [smem:[#allocation100_spill]]  ;;  %s15207_s22 = smov [#allocation33]  }
 0x216   :  { %411 = dma.hbm_to_vmem [thread:$0]  %s18229_s3, 16, %s409_s15, [#allocation29]  }
 0x217   :  { %s432_s23 = sshll.u32 %s15207_s22, 4  ;;  %s15208_s9 = smov [#allocation36]   ;;  %s433_s23 = int_to_ptr.vmem [resolvable:$true] %s432_s23 }
 0x218   :  { %s452_s12 = sshll.u32 %s15208_s9, 4  ;;  %s453_s12 = int_to_ptr.vmem [resolvable:$true] %s452_s12 }
 0x21b   :  { %s15003_s26 = scalar_lea.hbm %s18230_s21, 16 }
 0x21c   :  { %p15004_p8 = scmp.ne.s32.totalorder %s18230_s21, %s15003_s26  ;;  %p15007_p9 = scmp.lt.u32.totalorder %s15003_s26, %s18230_s21 }
 0x21e   :  { %p15009_p10 = pnand %p15007_p9, %p15004_p8 }
 0x220   :  { %15012 = shalt.err (!%p15009_p10)
}
 0x221   :  { %s15013_s29 = scalar_lea.vmem %s433_s23, 16  ;;  %s15017_s28 = scalar_lea.vmem %s433_s23, 32 }
 0x222   :  { %p15014_p11 = scmp.ne.s32.totalorder %s433_s23, %s15013_s29  ;;  %p15018_p12 = scmp.lt.s32.totalorder %s433_s23, %s433_s23 }
 0x223   :  { %p15019_p13 = scmp.lt.s32.totalorder %s15017_s28, %s15013_s29 }
 0x225   :  { %p15020_p0 = por %p15019_p13, %p15018_p12 }
 0x227   :  { %p15021_p1 = pnand %p15020_p0, %p15014_p11 }
 0x229   :  { %15024 = shalt.err (!%p15021_p1)
}
 0x22a   :  { %s18231_s1 = sld [smem:[#allocation101_spill]] }
 0x22b   :  { %435 = dma.hbm_to_vmem [thread:$0]  %s18230_s21, 16, %s433_s23, [#allocation32]  }
 0x230   :  { %s15025_s2 = scalar_lea.hbm %s18231_s1, 16 }
 0x231   :  { %p15026_p2 = scmp.ne.s32.totalorder %s18231_s1, %s15025_s2  ;;  %p15029_p3 = scmp.lt.u32.totalorder %s15025_s2, %s18231_s1 }
 0x233   :  { %p15031_p4 = pnand %p15029_p3, %p15026_p2 }
 0x235   :  { %15034 = shalt.err (!%p15031_p4)
}
 0x236   :  { %s15035_s20 = scalar_lea.vmem %s453_s12, 16  ;;  %s15039_s7 = scalar_lea.vmem %s453_s12, 32 }
 0x237   :  { %p15036_p5 = scmp.ne.s32.totalorder %s453_s12, %s15035_s20  ;;  %p15040_p6 = scmp.lt.s32.totalorder %s453_s12, %s453_s12 }
 0x238   :  { %p15041_p7 = scmp.lt.s32.totalorder %s15039_s7, %s15035_s20 }
 0x23a   :  { %p15042_p8 = por %p15041_p7, %p15040_p6 }
 0x23c   :  { %p15043_p9 = pnand %p15042_p8, %p15036_p5 }
 0x23e   :  { %15046 = shalt.err (!%p15043_p9)
}
 0x23f   :  { %455 = dma.hbm_to_vmem [thread:$0]  %s18231_s1, 16, %s453_s12, [#allocation35]  }
 0x240   :  { %s15209_s25 = smov [#allocation39]   ;;  %s15210_s6 = smov [#allocation40]  }
 0x241   :  { %s478_s14 = sshll.u32 %s15209_s25, 4  ;;  %s488_s10 = sshll.u32 %s15210_s6, 4  ;;  %s479_s14 = int_to_ptr.vmem [resolvable:$true] %s478_s14  ;;  %s489_s10 = int_to_ptr.vmem [resolvable:$true] %s488_s10 }
 0x242   :  { %s15047_s27 = scalar_lea.hbm %s15550_s13, 16 }
 0x243   :  { %p15048_p10 = scmp.ne.s32.totalorder %s15550_s13, %s15047_s27  ;;  %p15051_p11 = scmp.lt.u32.totalorder %s15047_s27, %s15550_s13 }
 0x245   :  { %p15053_p12 = pnand %p15051_p11, %p15048_p10 }
 0x247   :  { %15056 = shalt.err (!%p15053_p12)
}
 0x248   :  { %s15057_s5 = scalar_lea.vmem %s479_s14, 16  ;;  %s15061_s11 = scalar_lea.vmem %s479_s14, 32 }
 0x249   :  { %p15058_p13 = scmp.ne.s32.totalorder %s479_s14, %s15057_s5  ;;  %p15062_p0 = scmp.lt.s32.totalorder %s479_s14, %s479_s14 }
 0x24a   :  { %p15063_p1 = scmp.lt.s32.totalorder %s15061_s11, %s15057_s5 }
 0x24c   :  { %p15064_p2 = por %p15063_p1, %p15062_p0 }
 0x24e   :  { %p15065_p3 = pnand %p15064_p2, %p15058_p13 }
 0x250   :  { %15068 = shalt.err (!%p15065_p3)
}
 0x251   :  { %481 = dma.hbm_to_vmem [thread:$0]  %s15550_s13, 16, %s479_s14, [#allocation38]  }
 0x252   :  { %s15069_s19 = scalar_lea.hbm %s15555_s17, 16 }
 0x253   :  { %p15070_p4 = scmp.ne.s32.totalorder %s15555_s17, %s15069_s19  ;;  %p15073_p5 = scmp.lt.u32.totalorder %s15069_s19, %s15555_s17 }
 0x255   :  { %p15075_p6 = pnand %p15073_p5, %p15070_p4 }
 0x257   :  { %15078 = shalt.err (!%p15075_p6)
}
 0x258   :  { %s15079_s15 = scalar_lea.vmem %s489_s10, 16  ;;  %s15083_s0 = scalar_lea.vmem %s489_s10, 32 }
 0x259   :  { %p15080_p7 = scmp.ne.s32.totalorder %s489_s10, %s15079_s15  ;;  %p15084_p8 = scmp.lt.s32.totalorder %s489_s10, %s489_s10 }
 0x25a   :  { %p15085_p9 = scmp.lt.s32.totalorder %s15083_s0, %s15079_s15 }
 0x25c   :  { %p15086_p10 = por %p15085_p9, %p15084_p8 }
 0x25e   :  { %p15087_p11 = pnand %p15086_p10, %p15080_p7 }
 0x260   :  { %15090 = shalt.err (!%p15087_p11)
}
 0x261   :  { %491 = dma.hbm_to_vmem [thread:$0]  %s15555_s17, 16, %s489_s10, [#allocation41]  }
 0x262   :  { %15091 = dma.done.wait [#allocation3], 16  }
 0x263   :  { %15092 = vsyncadd [#allocation3], 4294967280 }
 0x264   :  { %15093 = dma.done.wait [#allocation5], 32  }
 0x265   :  { %15094 = vsyncadd [#allocation5], 4294967264 }
 0x266   :  { %15095 = dma.done.wait [#allocation8], 32  }
 0x267   :  { %15096 = vsyncadd [#allocation8], 4294967264 }
 0x268   :  { %15097 = dma.done.wait [#allocation11], 32  }
 0x269   :  { %15098 = vsyncadd [#allocation11], 4294967264 }
 0x26a   :  { %15099 = dma.done.wait [#allocation14], 32  }
 0x26b   :  { %15100 = vsyncadd [#allocation14], 4294967264 }
 0x26c   :  { %15101 = dma.done.wait [#allocation17], 32  }
 0x26d   :  { %15102 = vsyncadd [#allocation17], 4294967264 }
 0x26e   :  { %15103 = dma.done.wait [#allocation20], 32  }
 0x26f   :  { %15104 = vsyncadd [#allocation20], 4294967264 }
 0x270   :  { %15105 = dma.done.wait [#allocation23], 32  }
 0x271   :  { %15106 = vsyncadd [#allocation23], 4294967264 }
 0x272   :  { %15107 = dma.done.wait [#allocation26], 32  }
 0x273   :  { %15108 = vsyncadd [#allocation26], 4294967264 }
 0x274   :  { %15109 = dma.done.wait [#allocation29], 32  }
 0x275   :  { %15110 = vsyncadd [#allocation29], 4294967264 }
 0x276   :  { %15111 = dma.done.wait [#allocation32], 32  }
 0x277   :  { %15112 = vsyncadd [#allocation32], 4294967264 }
 0x278   :  { %15113 = dma.done.wait [#allocation35], 32  }
 0x279   :  { %15114 = vsyncadd [#allocation35], 4294967264 }
 0x27a   :  { %15115 = dma.done.wait [#allocation38], 32  }
 0x27b   :  { %15116 = vsyncadd [#allocation38], 4294967264 }
 0x27c   :  { %15117 = dma.done.wait [#allocation41], 16  }
 0x27d   :  { %15118 = vsyncadd [#allocation41], 4294967280  ;;  %s18232_s13 = sld [smem:[#allocation58_spill]]  ;;  %v15211_v0 = vmov 0.0   ;;  %s18233_s17 = sld [smem:[#allocation56_spill]]  ;;  %vm18169_vm0 = vcmask 523264   ;;  %v570_v29 = vlaneseq }
 0x27e   :  { %774 = vmatprep.mubr.f32.mxu0 %v15211_v0  ;;  %s18234_s24 = sld [smem:[#allocation59_spill]]  ;;  %v15212_v28 = vmov 0.0|0.0   ;;  %s15213_s16 = smov 48   ;;  %vm18172_vm1 = vmmov 0   ;;  %vm18171_vm2 = vcmask 1041408   ;;  %vm18170_vm3 = vcmask 130048  }
 0x27f   :  { %13329 = vmatprep.subr.bf16.mxu1 %v15212_v28  ;;  %v15697_v30 = vshrl.u32 %v570_v29, 7  ;;  %s15214_s3 = smov 64   ;;  %12198 = vmatprep.mubr.msk.f32.mxu1 %vm18172_vm1, %v15211_v0  ;;  %s15216_s4 = smov 112   ;;  %vm15747_vm4 = vmpackc.low %vm18170_vm3, %vm18170_vm3  ;;  %vm901_vm15 = vcmask 146432  }
 0x280   :  { %s15218_s18 = smov 32   ;;  %s15219_s8 = smov 96  }
 0x281   :  { %v15700_v31 = vsub.s32 0, %v15697_v30  ;;  %v15704_v33 = vsub.s32 1, %v15697_v30  ;;  %s18243_s21 = sld [smem:[#allocation60_spill]]  ;;  %s15220_s22 = smov 16  }
 0x282   :  { %s15221_s23 = smov 80   ;;  %s18244_s9 = sld [smem:[#allocation61_spill]] }
 0x283   :  { %v662_v1 = vld [vmem:[%s18232_s13 + $0x8] sm:$0xff]  ;;  %v664_v2 = vld [vmem:[%s18232_s13 + $0x18] sm:$0xff]  ;;  %v661_v3 = vld [vmem:[%s18232_s13] sm:$0xff]  ;;  %s18245_s12 = sld [smem:[#allocation64_spill]]  ;;  %s18246_s26 = sld [smem:[#allocation66_spill]] }
 0x284   :  { %v13309_v4 = vpack.c.bf16 %v664_v2, %v662_v1  ;;  %v663_v5 = vld [vmem:[%s18232_s13 + $0x10] sm:$0xff]  ;;  %v666_v6 = vld [vmem:[%s18232_s13 + $0x28] sm:$0xff]  ;;  %v668_v7 = vld [vmem:[%s18232_s13 + $0x38] sm:$0xff]  ;;  %s18247_s29 = sld [smem:[#allocation62_spill]]  ;;  %s18248_s28 = sld [smem:[#allocation63_spill]] }
 0x285   :  { %v13311_v8 = vpack.c.bf16 %v663_v5, %v661_v3  ;;  %v13313_v9 = vpack.c.bf16 %v668_v7, %v666_v6  ;;  %v665_v10 = vld [vmem:[%s18232_s13 + $0x20] sm:$0xff]  ;;  %v667_v11 = vld [vmem:[%s18232_s13 + $0x30] sm:$0xff]  ;;  %v670_v12 = vld [vmem:[%s18232_s13 + $0x48] sm:$0xff]  ;;  %v15783_v5 = vand.u32 127, %v570_v29  ;;  %v15786_v6 = vadd.s32 8, %v15697_v30  ;;  %s18249_s1 = sld [smem:[#allocation65_spill]] }
 0x286   :  { %13310 = vmatprep.subr.bf16.mxu0 %v13309_v4  ;;  %v672_v13 = vld [vmem:[%s18232_s13 + $0x58] sm:$0xff]  ;;  %v13315_v14 = vpack.c.bf16 %v667_v11, %v665_v10  ;;  %v669_v16 = vld [vmem:[%s18232_s13 + $0x40] sm:$0xff]  ;;  %v671_v17 = vld [vmem:[%s18232_s13 + $0x50] sm:$0xff]  ;;  %s18250_s2 = sld [smem:[#allocation67_spill]]  ;;  %s18251_s20 = sld [smem:[#allocation70_spill]] }
 0x287   :  { %13312 = vmatpush1.bf16.msra.mxu0 %v13311_v8  ;;  %v13317_v15 = vpack.c.bf16 %v672_v13, %v670_v12  ;;  %v674_v18 = vld [vmem:[%s18232_s13 + $0x68] sm:$0xff]  ;;  %v676_v19 = vld [vmem:[%s18232_s13 + $0x78] sm:$0xff]  ;;  %v13319_v20 = vpack.c.bf16 %v671_v17, %v669_v16  ;;  %v673_v22 = vld [vmem:[%s18232_s13 + $0x60] sm:$0xff]  ;;  %v15789_v7 = vadd.s32 4294967287, %v15786_v6  ;;  %v15792_v8 = vadd.s32 4294967287, %v15783_v5  ;;  %s18252_s7 = sld [smem:[#allocation68_spill]] }
 0x288   :  { %13314 = vmatprep.subr.bf16.mxu0 %v13313_v9  ;;  %v13321_v21 = vpack.c.bf16 %v676_v19, %v674_v18  ;;  %v675_v23 = vld [vmem:[%s18232_s13 + $0x70] sm:$0xff]  ;;  %v15684_v25 = vld [vmem:[%s18233_s17] sm:$0xff]  ;;  %v659_v26 = vld [vmem:[%s18233_s17 + $0x8] sm:$0xff]  ;;  %v573_v9 = vadd.s32 16, %v15697_v30  ;;  %vm18167_vm7 = vcmp.lt.s32.totalorder %v15786_v6, 9  ;;  %vm589_vm10 = vcmp.lt.s32.totalorder %v15783_v5, 9 }
 0x289   :  { %v13323_v24 = vpack.c.bf16 %v675_v23, %v673_v22  ;;  %v660_v27 = vld [vmem:[%s18233_s17 + $0x10] sm:$0x3]  ;;  %v677_v32 = vld [vmem:[%s18234_s24] sm:$0x3]  ;;  %vm18164_vm5 = vcmp.ge.s32.totalorder %v15789_v7, 0  ;;  %vm606_vm6 = vcmp.ge.s32.totalorder %v15792_v8, 0  ;;  %vm15808_vm11 = vmand %vm18167_vm7, %vm589_vm10 }
 0x28a   :  { %v693_v35 = vrot.slane %v677_v32, %v15700_v31  ;;  %v697_v37 = vrot.slane %v677_v32, %v15704_v33  ;;  %vm608_vm8 = vmand %vm18164_vm5, %vm606_vm6  ;;  %vm18166_vm9 = vcmp.lt.s32.totalorder %v15792_v8, 9  ;;  %v15801_v10 = vadd.s32 4294967287, %v573_v9  ;;  %s18253_s25 = sld [smem:[#allocation69_spill]]  ;;  %s18254_s14 = sld [smem:[#allocation71_spill]] }
 0x28b   :  { %13316 = vmatpush1.bf16.msra.mxu0 %v13315_v14  ;;  %vm15814_vm12 = vmand %vm608_vm8, %vm18166_vm9  ;;  %v15217_v13 = vmov -1e+30   ;;  %s18255_s6 = sld [smem:[#allocation72_spill]]  ;;  %s18256_s10 = sld [smem:[#allocation73_spill]] }
 0x28c   :  { %13318 = vmatprep.subr.bf16.mxu0 %v13317_v15  ;;  %vm18165_vm13 = vcmp.lt.s32.totalorder %v15801_v10, 9  ;;  %v15822_v14 = vsel %vm589_vm10, 0.0, %v15217_v13  ;;  %vm615_vm14 = vmor %vm15808_vm11, %vm15814_vm12  ;;  %s18257_s27 = sld [smem:[#allocation75_spill]]  ;;  %s18258_s5 = sld [smem:[#allocation78_spill]] }
 0x28d   :  { %vm609_vm8 = vmand %vm18165_vm13, %vm606_vm6  ;;  %v15832_v18 = vsel %vm615_vm14, 0.0, %v15217_v13  ;;  %vm908_vm6 = vcmask 140288   ;;  %vm18168_vm14 = vcmask 517120   ;;  %s18259_s11 = sld [smem:[#allocation77_spill]]  ;;  %s18260_s19 = sld [smem:[#allocation74_spill]]  ;;  %vm621_vm13 = vcmp.le.s32.totalorder %v15783_v5, %v15786_v6 }
 0x28e   :  { %vm15837_vm5 = vmand %vm609_vm8, %vm18166_vm9  ;;  %s18261_s15 = sld [smem:[#allocation57_spill]]  ;;  %s18262_s0 = sld [smem:[#allocation76_spill]]  ;;  %vm620_vm8 = vcmp.le.s32.totalorder %v15783_v5, %v15697_v30  ;;  %vm627_vm9 = vcmp.le.s32.totalorder %v15792_v8, %v15789_v7 }
 0x28f   :  { %13320 = vmatpush1.bf16.msra.mxu0 %v13319_v20  ;;  %s18263_s13 = sld [smem:[#allocation79_spill]]  ;;  %vm623_vm7 = vmand %vm589_vm10, %vm620_vm8  ;;  %s18288_s24 = sld [smem:[#allocation83_spill]] }
 0x290   :  { %13322 = vmatprep.subr.bf16.mxu0 %v13321_v21 }
 0x293   :  { %13324 = vmatpush1.bf16.msra.mxu0 %v13323_v24  ;;  %v15845_v24 = vsel %vm15837_vm5, 0.0, %v15217_v13 }
 0x294   :  { %13325 = vmatprep.subr.bf16.mxu0 %v15212_v28 }
 0x296   :  { %11179 = vmatmul.mubr.msk.f32.vlgmr.msra.gmra.mrb[0].mxu0 %vm18169_vm0, %v15684_v25 }
 0x297   :  { %780 = vmatprep.mubr.f32.mxu0 %v15211_v0 }
 0x29a   :  { %11180 = vmatmul.mubr.msk.f32.gmra.mrb[2].mxu0 %vm18169_vm0, %v659_v26 }
 0x29b   :  { %786 = vmatprep.mubr.f32.mxu0 %v15211_v0 }
 0x29e   :  { %11181 = vmatmul.mubr.msk.f32.gmra.mrb[4].mxu0 %vm18169_vm0, %v660_v27 }
 0x29f   :  { %12183 = vmatprep.mubr.msk.f32.mxu0 %vm18172_vm1, %v15211_v0 }
 0x369   :  { %v776_v34 = vpop.f32.mrb[0].mxu0 }
 0x36a   :  { %v778_v36 = vpop.f32.mrb[1].mxu0  ;;  %v777_v39 = vadd.f32 %v776_v34, %v693_v35 }
 0x36b   :  { %v779_v42 = vadd.f32 %v778_v36, %v697_v37 }
 0x36c   :  { %v15733_v52 = vmul.f32 0.25, %v777_v39 }
 0x36d   :  { %v782_v38 = vpop.f32.mrb[2].mxu0 }
 0x36e   :  { %v783_v40 = vadd.f32 %v782_v38, %v693_v35  ;;  %v784_v41 = vpop.f32.mrb[3].mxu0 }
 0x36f   :  { %v785_v43 = vadd.f32 %v784_v41, %v697_v37 }
 0x370   :  { %v15708_v44 = vpack.i.bf16 %v783_v40, %v777_v39  ;;  %v15731_v51 = vmul.f32 0.25, %v783_v40 }
 0x371   :  { %v788_v45 = vpop.f32.mrb[4].mxu0  ;;  %v13330_v46 = vpack.c.bf16 %v785_v43, %v779_v42  ;;  %v15710_v47 = vpack.i.bf16 %v785_v43, %v779_v42 }
 0x372   :  { %13962 = vrot.lane.b32.xlu1 %v15708_v44, %s15213_s16  ;;  %13957 = vrot.lane.b32.xlu0 %v15708_v44, %s15214_s3  ;;  %v15716_v48 = vadd.f32 %v788_v45, %v693_v35  ;;  %v790_v49 = vpop.f32.mrb[5].mxu0 }
 0x373   :  { %13331 = vmatpush3.bf16.msra.mxu1 %v13330_v46  ;;  %v15718_v50 = vadd.f32 %v790_v49, %v697_v37 }
 0x374   :  { %12196 = vmatprep.subr.mxu1 %v15211_v0  ;;  %v15741_v53 = vmul.f32 0.25, %v15716_v48 }
 0x376   :  { %1039 = vrot.lane.b32.xlu1 %v15716_v48, %s15213_s16  ;;  %803 = vrot.lane.b32.xlu0 %v15716_v48, %s15214_s3 }
 0x377   :  { %12197 = vmatpush3.msk.msra.mxu1 %vm18171_vm2, %v15718_v50 }
 0x378   :  { %13336 = vmatprep.subr.bf16.mxu1 %v15212_v28 }
 0x37a   :  { %1031 = vrot.lane.b32.xlu1 %v15731_v51, %s15216_s4  ;;  %1029 = vrot.lane.b32.xlu0 %v15733_v52, %s15216_s4 }
 0x37e   :  { %1033 = vrot.lane.b32.xlu0 %v15741_v53, %s15216_s4 }
 0x3e4   :  { %v13958_v54 = vpop.permute.xlu0 %13957  ;;  %v13963_v59 = vpop.permute.xlu1 %13962 }
 0x3e5   :  { %v13960_v55 = vunpack.i.h.bf16 %v13958_v54  ;;  %v13959_v56 = vunpack.i.l.bf16 %v13958_v54  ;;  %v13965_v60 = vunpack.i.h.bf16 %v13963_v59  ;;  %v13964_v61 = vunpack.i.l.bf16 %v13963_v59 }
 0x3e7   :  { %v13326_v58 = vpack.c.bf16 %v13960_v55, %v13959_v56  ;;  %v13333_v63 = vpack.c.bf16 %v13965_v60, %v13964_v61 }
 0x3e8   :  { %v804_v62 = vpop.permute.xlu0 %803  ;;  %v1040_v1 = vpop.permute.xlu1 %1039 }
 0x3e9   :  { %13328 = vmatpush3.bf16.xpose.msk.msra.mxu0 %vm15747_vm4, %v13326_v58 }
 0x3ea   :  { %12181 = vmatprep.subr.mxu0 %v15211_v0 }
 0x3ec   :  { %v1030_v2 = vpop.permute.xlu0 %1029  ;;  %v1032_v3 = vpop.permute.xlu1 %1031 }
 0x3f0   :  { %v1034_v4 = vpop.permute.xlu0 %1033 }
 0x3f1   :  { %12182 = vmatpush3.xpose.msk.msra.mxu0 %vm18170_vm3, %v804_v62 }
 0x3f2   :  { %13332 = vmatprep.subr.bf16.mxu0 %v15212_v28 }
 0x3f4   :  { %12184 = vmatmul.mubr.msk.f32.vlgmr.msra.gmra.mrb[6].mxu0 %vm18170_vm3, %v15733_v52 }
 0x3f5   :  { %13335 = vmatpush3.bf16.xpose.msk.msra.mxu0 %vm15747_vm4, %v13333_v63  ;;  %12186 = vmatprep.mubr.msk.f32.mxu0 %vm18172_vm1, %v15211_v0 }
 0x3f6   :  { %12211 = vmatprep.subr.mxu0 %v15211_v0 }
 0x3f8   :  { %12187 = vmatmul.mubr.msk.f32.gmra.mrb[8].mxu0 %vm18170_vm3, %v15731_v51 }
 0x3f9   :  { %12189 = vmatprep.mubr.msk.f32.mxu0 %vm18172_vm1, %v15211_v0 }
 0x3fc   :  { %12190 = vmatmul.mubr.msk.f32.gmra.mrb[10].mxu0 %vm18170_vm3, %v15741_v53 }
 0x3fd   :  { %12212 = vmatpush3.xpose.msk.msra.mxu0 %vm18170_vm3, %v1040_v1  ;;  %12213 = vmatprep.mubr.msk.f32.mxu0 %vm18172_vm1, %v15211_v0 }
 0x3fe   :  { %13339 = vmatprep.subr.bf16.mxu0 %v15212_v28 }
 0x400   :  { %12214 = vmatmul.mubr.msk.f32.vlgmr.msra.gmra.mrb[12].mxu0 %vm18170_vm3, %v1030_v2 }
 0x401   :  { %12216 = vmatprep.mubr.msk.f32.mxu0 %vm18172_vm1, %v15211_v0 }
 0x404   :  { %12217 = vmatmul.mubr.msk.f32.gmra.mrb[14].mxu0 %vm18170_vm3, %v1032_v3 }
 0x405   :  { %12219 = vmatprep.mubr.msk.f32.mxu0 %vm18172_vm1, %v15211_v0 }
 0x408   :  { %12220 = vmatmul.mubr.msk.f32.gmra.mrb[16].mxu0 %vm18170_vm3, %v1034_v4 }
 0x409   :  { %12241 = vmatprep.mubr.msk.f32.mxu0 %vm18172_vm1, %v15211_v0 }
 0x4c7   :  { %v887_v15 = vpop.f32.mrb[6].mxu0 }
 0x4c8   :  { %v12185_v16 = vpop.f32.mrb[7].mxu0  ;;  %v888_v17 = vadd.f32 %v887_v15, %v15822_v14 }
 0x4ca   :  { %v902_v19 = vsel %vm901_vm15, %v888_v17, -inf }
 0x4cb   :  { %903 = vmax.xlane.f32.xlu1 %v902_v19  ;;  %v892_v21 = vpop.f32.mrb[8].mxu0 }
 0x4cc   :  { %v12188_v22 = vpop.f32.mrb[9].mxu0  ;;  %v893_v23 = vadd.f32 %v892_v21, %v15832_v18 }
 0x4ce   :  { %v905_v26 = vsel %vm901_vm15, %v893_v23, -inf }
 0x4cf   :  { %906 = vmax.xlane.f32.xlu0 %v905_v26  ;;  %v897_v27 = vpop.f32.mrb[10].mxu0 }
 0x4d0   :  { %v12191_v29 = vpop.f32.mrb[11].mxu0  ;;  %v898_v32 = vadd.f32 %v897_v27, %v15845_v24 }
 0x4d2   :  { %v909_v34 = vsel %vm908_vm6, %v898_v32, -inf }
 0x4d3   :  { %910 = vmax.xlane.f32.xlu0 %v909_v34  ;;  %v1119_v35 = vpop.f32.mrb[12].mxu0 }
 0x4d4   :  { %v12215_v36 = vpop.f32.mrb[13].mxu0  ;;  %v1120_v37 = vadd.f32 %v1119_v35, %v15822_v14 }
 0x4d6   :  { %v1133_v38 = vsel %vm901_vm15, %v1120_v37, -inf }
 0x4d7   :  { %1134 = vmax.xlane.f32.xlu1 %v1133_v38  ;;  %v1124_v39 = vpop.f32.mrb[14].mxu0 }
 0x4d8   :  { %v12218_v40 = vpop.f32.mrb[15].mxu0  ;;  %v1125_v41 = vadd.f32 %v1124_v39, %v15832_v18 }
 0x4da   :  { %v1136_v42 = vsel %vm901_vm15, %v1125_v41, -inf }
 0x4db   :  { %1137 = vmax.xlane.f32.xlu0 %v1136_v42  ;;  %v1129_v43 = vpop.f32.mrb[16].mxu0 }
 0x4dc   :  { %v12221_v45 = vpop.f32.mrb[17].mxu0  ;;  %v1130_v46 = vadd.f32 %v1129_v43, %v15845_v24 }
 0x4de   :  { %v1139_v49 = vsel %vm908_vm6, %v1130_v46, -inf }
 0x4df   :  { %1140 = vmax.xlane.f32.xlu1 %v1139_v49 }
 0x558   :  { %v904_v54 = vpop.xlane.xlu1 %903 }
 0x559   :  { %v912_v55 = vsub.f32 %v888_v17, %v904_v54 }
 0x55b   :  { %v915_v56 = vmul.f32 1.442695, %v912_v55 }
 0x55c   :  { %v907_v58 = vpop.xlane.xlu0 %906 }
 0x55d   :  { %14166 = vpow2.f32 %v915_v56  ;;  %v913_v59 = vsub.f32 %v893_v23, %v907_v58 }
 0x55f   :  { %v917_v60 = vmul.f32 1.442695, %v913_v59 }
 0x560   :  { %v911_v61 = vpop.xlane.xlu0 %910 }
 0x561   :  { %14168 = vpow2.f32 %v917_v60  ;;  %v914_v62 = vsub.f32 %v898_v32, %v911_v61 }
 0x563   :  { %v919_v63 = vmul.f32 1.442695, %v914_v62 }
 0x564   :  { %v1135_v1 = vpop.xlane.xlu1 %1134 }
 0x565   :  { %14170 = vpow2.f32 %v919_v63  ;;  %v1142_v2 = vsub.f32 %v1120_v37, %v1135_v1  ;;  %v678_v63 = vld [vmem:[%s18243_s21] sm:$0xff]  ;;  %v679_v1 = vld [vmem:[%s18243_s21 + $0x8] sm:$0xff] }
 0x567   :  { %v14167_v3 = vpop.eup %14166  ;;  %v1145_v4 = vmul.f32 1.442695, %v1142_v2 }
 0x568   :  { %v1138_v9 = vpop.xlane.xlu0 %1137  ;;  %v921_v15 = vsel %vm901_vm15, %v14167_v3, 0.0 }
 0x569   :  { %14172 = vpow2.f32 %v1145_v4  ;;  %v1143_v16 = vsub.f32 %v1125_v41, %v1138_v9  ;;  %922 = vadd.xlane.f32.xlu0 %v921_v15 }
 0x56b   :  { %v14169_v17 = vpop.eup %14168  ;;  %v1147_v19 = vmul.f32 1.442695, %v1143_v16 }
 0x56c   :  { %v1141_v21 = vpop.xlane.xlu1 %1140  ;;  %v924_v22 = vsel %vm901_vm15, %v14169_v17, 0.0 }
 0x56d   :  { %14174 = vpow2.f32 %v1147_v19  ;;  %v1144_v23 = vsub.f32 %v1130_v46, %v1141_v21  ;;  %925 = vadd.xlane.f32.xlu1 %v924_v22  ;;  %v680_v21 = vld [vmem:[%s18243_s21 + $0x10] sm:$0xff]  ;;  %v681_v22 = vld [vmem:[%s18243_s21 + $0x18] sm:$0xff] }
 0x56f   :  { %v14171_v26 = vpop.eup %14170  ;;  %v1149_v27 = vmul.f32 1.442695, %v1144_v23  ;;  %v13340_v23 = vpack.c.bf16 %v681_v22, %v680_v21 }
 0x570   :  { %v927_v29 = vsel %vm908_vm6, %v14171_v26, 0.0 }
 0x571   :  { %14176 = vpow2.f32 %v1149_v27  ;;  %928 = vadd.xlane.f32.xlu0 %v927_v29  ;;  %13341 = vmatpush3.bf16.msra.mxu0 %v13340_v23 }
 0x572   :  { %13345 = vmatprep.subr.bf16.mxu0 %v15212_v28 }
 0x573   :  { %v14173_v32 = vpop.eup %14172 }
 0x574   :  { %v1151_v34 = vsel %vm901_vm15, %v14173_v32, 0.0 }
 0x575   :  { %1152 = vadd.xlane.f32.xlu1 %v1151_v34 }
 0x577   :  { %v14175_v35 = vpop.eup %14174 }
 0x578   :  { %v1154_v36 = vsel %vm901_vm15, %v14175_v35, 0.0 }
 0x579   :  { %1155 = vadd.xlane.f32.xlu0 %v1154_v36 }
 0x57b   :  { %v14177_v37 = vpop.eup %14176 }
 0x57c   :  { %v1157_v38 = vsel %vm908_vm6, %v14177_v37, 0.0 }
 0x57d   :  { %1158 = vadd.xlane.f32.xlu1 %v1157_v38 }
 0x58e   :  { %1172 = vrot.lane.b32.xlu1 %v15718_v50, %s15216_s4 }
 0x58f   :  { %13967 = vrot.lane.b32.xlu0 %v15710_v47, %s15216_s4 }
 0x592   :  { %13972 = vrot.lane.b32.xlu1 %v15708_v44, %s15218_s18 }
 0x593   :  { %1455 = vrot.lane.b32.xlu0 %v15716_v48, %s15218_s18 }
 0x596   :  { %1445 = vrot.lane.b32.xlu1 %v15733_v52, %s15219_s8 }
 0x597   :  { %1447 = vrot.lane.b32.xlu0 %v15731_v51, %s15219_s8 }
 0x59a   :  { %1449 = vrot.lane.b32.xlu1 %v15741_v53, %s15219_s8 }
 0x5f6   :  { %v923_v39 = vpop.xlane.xlu0 %922 }
 0x5f7   :  { %14178 = vrcp.f32 %v923_v39 }
 0x5fa   :  { %v926_v40 = vpop.xlane.xlu1 %925 }
 0x5fb   :  { %14180 = vrcp.f32 %v926_v40 }
 0x5fe   :  { %v929_v41 = vpop.xlane.xlu0 %928 }
 0x5ff   :  { %14182 = vrcp.f32 %v929_v41 }
 0x601   :  { %v14179_v42 = vpop.eup %14178 }
 0x602   :  { %v1153_v43 = vpop.xlane.xlu1 %1152  ;;  %v933_v45 = vmul.f32 %v14179_v42, %v14167_v3  ;;  %v13343_v3 = vpack.c.bf16 %v679_v1, %v678_v63 }
 0x603   :  { %14184 = vrcp.f32 %v1153_v43 }
 0x604   :  { %12199 = vmatmul.mubr.msk.f32.vlgmr.msra.gmra.mrb[0].mxu1 %vm901_vm15, %v933_v45 }
 0x605   :  { %v14181_v46 = vpop.eup %14180  ;;  %12201 = vmatprep.mubr.msk.f32.mxu1 %vm18172_vm1, %v15211_v0 }
 0x606   :  { %v1156_v49 = vpop.xlane.xlu0 %1155  ;;  %v934_v54 = vmul.f32 %v14181_v46, %v14169_v17 }
 0x607   :  { %14186 = vrcp.f32 %v1156_v49 }
 0x608   :  { %12202 = vmatmul.mubr.msk.f32.gmra.mrb[2].mxu1 %vm901_vm15, %v934_v54 }
 0x609   :  { %v14183_v55 = vpop.eup %14182  ;;  %12204 = vmatprep.mubr.msk.f32.mxu1 %vm18172_vm1, %v15211_v0 }
 0x60a   :  { %v13968_v56 = vpop.permute.xlu0 %13967  ;;  %v1159_v58 = vpop.xlane.xlu1 %1158  ;;  %v935_v59 = vmul.f32 %v14183_v55, %v14171_v26 }
 0x60b   :  { %v13970_v60 = vunpack.i.h.bf16 %v13968_v56  ;;  %v13969_v61 = vunpack.i.l.bf16 %v13968_v56  ;;  %14188 = vrcp.f32 %v1159_v58 }
 0x60c   :  { %12205 = vmatmul.mubr.msk.f32.gmra.mrb[4].mxu1 %vm901_vm15, %v935_v59 }
 0x60d   :  { %v13337_v62 = vpack.c.bf16 %v13970_v60, %v13969_v61  ;;  %12228 = vmatprep.mubr.msk.f32.mxu1 %vm18172_vm1, %v15211_v0  ;;  %v14185_v2 = vpop.eup %14184 }
 0x60e   :  { %v1163_v4 = vmul.f32 %v14185_v2, %v14173_v32  ;;  %v1173_v9 = vpop.permute.xlu1 %1172  ;;  %v1456_v46 = vpop.permute.xlu0 %1455 }
 0x60f   :  { %13338 = vmatpush3.bf16.msra.mxu1 %v13337_v62 }
 0x610   :  { %12226 = vmatprep.subr.mxu1 %v15211_v0 }
 0x611   :  { %v14187_v15 = vpop.eup %14186 }
 0x612   :  { %v1164_v16 = vmul.f32 %v14187_v15, %v14175_v35  ;;  %v13973_v35 = vpop.permute.xlu1 %13972  ;;  %v1448_v55 = vpop.permute.xlu0 %1447 }
 0x613   :  { %12227 = vmatpush3.msk.msra.mxu1 %vm18171_vm2, %v1173_v9  ;;  %v13974_v38 = vunpack.i.l.bf16 %v13973_v35 }
 0x614   :  { %12229 = vmatmul.mubr.msk.f32.vlgmr.msra.gmra.mrb[6].mxu1 %vm901_vm15, %v1163_v4  ;;  %13342 = vmatprep.subr.bf16.mxu1 %v15212_v28 }
 0x615   :  { %12231 = vmatprep.mubr.msk.f32.mxu1 %vm18172_vm1, %v15211_v0  ;;  %13344 = vmatpush3.bf16.msra.mxu1 %v13343_v3  ;;  %v14189_v17 = vpop.eup %14188 }
 0x616   :  { %13349 = vmatprep.subr.bf16.mxu1 %v15212_v28  ;;  %v1165_v19 = vmul.f32 %v14189_v17, %v14177_v37  ;;  %v13975_v37 = vunpack.i.h.bf16 %v13973_v35  ;;  %v1446_v54 = vpop.permute.xlu1 %1445 }
 0x618   :  { %12232 = vmatmul.mubr.msk.f32.gmra.mrb[8].mxu1 %vm901_vm15, %v1164_v16  ;;  %v13346_v39 = vpack.c.bf16 %v13975_v37, %v13974_v38 }
 0x619   :  { %12234 = vmatprep.mubr.msk.f32.mxu1 %vm18172_vm1, %v15211_v0 }
 0x61a   :  { %v1450_v56 = vpop.permute.xlu1 %1449 }
 0x61c   :  { %12235 = vmatmul.mubr.msk.f32.gmra.mrb[10].mxu1 %vm901_vm15, %v1165_v19 }
 0x61d   :  { %12254 = vmatprep.mubr.msk.f32.mxu1 %vm18172_vm1, %v15211_v0 }
 0x6d7   :  { %v1015_v26 = vpop.f32.mrb[0].mxu1 }
 0x6d8   :  { %v12200_v27 = vpop.f32.mrb[1].mxu1  ;;  %12255 = vmatmul.mubr.msk.f32.vlgmr.msra.gmra.mrb[12].mxu1 %vm18170_vm3, %v1015_v26 }
 0x6d9   :  { %12257 = vmatprep.mubr.msk.f32.mxu1 %vm18172_vm1, %v15211_v0 }
 0x6db   :  { %v1020_v29 = vpop.f32.mrb[2].mxu1 }
 0x6dc   :  { %v12203_v32 = vpop.f32.mrb[3].mxu1  ;;  %12258 = vmatmul.mubr.msk.f32.gmra.mrb[14].mxu1 %vm18170_vm3, %v1020_v29 }
 0x6dd   :  { %12260 = vmatprep.mubr.msk.f32.mxu1 %vm18172_vm1, %v15211_v0 }
 0x6df   :  { %v1025_v34 = vpop.f32.mrb[4].mxu1 }
 0x6e0   :  { %v12206_v36 = vpop.f32.mrb[5].mxu1  ;;  %12261 = vmatmul.mubr.msk.f32.gmra.mrb[16].mxu1 %vm18170_vm3, %v1025_v34 }
 0x6e1   :  { %12284 = vmatprep.mubr.msk.f32.mxu1 %vm18172_vm1, %v15211_v0 }
 0x6e7   :  { %v1253_v40 = vpop.f32.mrb[6].mxu1 }
 0x6e8   :  { %v12230_v41 = vpop.f32.mrb[7].mxu1  ;;  %12242 = vmatmul.mubr.msk.f32.vlgmr.msra.gmra.mrb[18].mxu0 %vm18170_vm3, %v1253_v40 }
 0x6e9   :  { %13348 = vmatpush3.bf16.xpose.msk.msra.mxu0 %vm15747_vm4, %v13346_v39  ;;  %12244 = vmatprep.mubr.msk.f32.mxu0 %vm18172_vm1, %v15211_v0 }
 0x6ea   :  { %12267 = vmatprep.subr.mxu0 %v15211_v0 }
 0x6eb   :  { %v1258_v42 = vpop.f32.mrb[8].mxu1 }
 0x6ec   :  { %v12233_v43 = vpop.f32.mrb[9].mxu1  ;;  %12245 = vmatmul.mubr.msk.f32.gmra.mrb[20].mxu0 %vm18170_vm3, %v1258_v42 }
 0x6ed   :  { %12247 = vmatprep.mubr.msk.f32.mxu0 %vm18172_vm1, %v15211_v0 }
 0x6ef   :  { %v1263_v45 = vpop.f32.mrb[10].mxu1 }
 0x6f0   :  { %v12236_v49 = vpop.f32.mrb[11].mxu1  ;;  %12248 = vmatmul.mubr.msk.f32.gmra.mrb[22].mxu0 %vm18170_vm3, %v1263_v45 }
 0x6f1   :  { %12268 = vmatpush3.xpose.msk.msra.mxu0 %vm18170_vm3, %v1456_v46  ;;  %12269 = vmatprep.mubr.msk.f32.mxu0 %vm18172_vm1, %v15211_v0 }
 0x6f2   :  { %13352 = vmatprep.subr.bf16.mxu0 %v15212_v28 }
 0x6f4   :  { %12270 = vmatmul.mubr.msk.f32.vlgmr.msra.gmra.mrb[24].mxu0 %vm18170_vm3, %v1446_v54 }
 0x6f5   :  { %12272 = vmatprep.mubr.msk.f32.mxu0 %vm18172_vm1, %v15211_v0 }
 0x6f8   :  { %12273 = vmatmul.mubr.msk.f32.gmra.mrb[26].mxu0 %vm18170_vm3, %v1448_v55 }
 0x6f9   :  { %12275 = vmatprep.mubr.msk.f32.mxu0 %vm18172_vm1, %v15211_v0 }
 0x6fc   :  { %12276 = vmatmul.mubr.msk.f32.gmra.mrb[28].mxu0 %vm18170_vm3, %v1450_v56 }
 0x6fd   :  { %12297 = vmatprep.mubr.msk.f32.mxu0 %vm18172_vm1, %v15211_v0 }
 0x7ab   :  { %v1431_v58 = vpop.f32.mrb[12].mxu1 }
 0x7ac   :  { %v12256_v59 = vpop.f32.mrb[13].mxu1 }
 0x7af   :  { %v1436_v60 = vpop.f32.mrb[14].mxu1 }
 0x7b0   :  { %v12259_v61 = vpop.f32.mrb[15].mxu1 }
 0x7b3   :  { %v1441_v62 = vpop.f32.mrb[16].mxu1 }
 0x7b4   :  { %v12262_v63 = vpop.f32.mrb[17].mxu1 }
 0x7bb   :  { %v1342_v1 = vpop.f32.mrb[18].mxu0 }
 0x7bc   :  { %v12243_v2 = vpop.f32.mrb[19].mxu0  ;;  %v15935_v3 = vadd.f32 %v1431_v58, %v1342_v1 }
 0x7bd   :  { %v683_v2 = vld [vmem:[%s18243_s21 + $0x28] sm:$0xff] }
 0x7bf   :  { %v1347_v4 = vpop.f32.mrb[20].mxu0 }
 0x7c0   :  { %v15937_v9 = vadd.f32 %v1436_v60, %v1347_v4  ;;  %v12246_v15 = vpop.f32.mrb[21].mxu0 }
 0x7c3   :  { %v1352_v16 = vpop.f32.mrb[22].mxu0 }
 0x7c4   :  { %v15939_v17 = vadd.f32 %v1441_v62, %v1352_v16  ;;  %v12249_v19 = vpop.f32.mrb[23].mxu0 }
 0x7c7   :  { %v1535_v21 = vpop.f32.mrb[24].mxu0 }
 0x7c8   :  { %v1536_v22 = vadd.f32 %v1535_v21, %v15822_v14  ;;  %v12271_v23 = vpop.f32.mrb[25].mxu0 }
 0x7ca   :  { %v1549_v26 = vsel %vm901_vm15, %v1536_v22, -inf }
 0x7cb   :  { %1550 = vmax.xlane.f32.xlu0 %v1549_v26  ;;  %v1540_v27 = vpop.f32.mrb[26].mxu0 }
 0x7cc   :  { %v1541_v29 = vadd.f32 %v1540_v27, %v15832_v18  ;;  %v12274_v32 = vpop.f32.mrb[27].mxu0 }
 0x7ce   :  { %v1552_v34 = vsel %vm901_vm15, %v1541_v29, -inf }
 0x7cf   :  { %1553 = vmax.xlane.f32.xlu1 %v1552_v34  ;;  %v1545_v35 = vpop.f32.mrb[28].mxu0 }
 0x7d0   :  { %v1546_v36 = vadd.f32 %v1545_v35, %v15845_v24  ;;  %v12277_v37 = vpop.f32.mrb[29].mxu0 }
 0x7d2   :  { %v1555_v38 = vsel %vm908_vm6, %v1546_v36, -inf }
 0x7d3   :  { %1556 = vmax.xlane.f32.xlu0 %v1555_v38 }
 0x7e0   :  { %13977 = vrot.lane.b32.xlu1 %v15710_v47, %s15219_s8 }
 0x7e4   :  { %13982 = vrot.lane.b32.xlu1 %v15708_v44, %s15220_s22 }
 0x858   :  { %v1551_v39 = vpop.xlane.xlu0 %1550 }
 0x859   :  { %v1558_v40 = vsub.f32 %v1536_v22, %v1551_v39 }
 0x85b   :  { %v1561_v41 = vmul.f32 1.442695, %v1558_v40 }
 0x85c   :  { %v1554_v42 = vpop.xlane.xlu1 %1553 }
 0x85d   :  { %14190 = vpow2.f32 %v1561_v41  ;;  %v1559_v43 = vsub.f32 %v1541_v29, %v1554_v42 }
 0x85f   :  { %v1563_v45 = vmul.f32 1.442695, %v1559_v43 }
 0x860   :  { %v13978_v46 = vpop.permute.xlu1 %13977  ;;  %v1557_v60 = vpop.xlane.xlu0 %1556 }
 0x861   :  { %14192 = vpow2.f32 %v1563_v45  ;;  %v13980_v49 = vunpack.i.h.bf16 %v13978_v46  ;;  %v13979_v54 = vunpack.i.l.bf16 %v13978_v46  ;;  %v1560_v61 = vsub.f32 %v1546_v36, %v1557_v60 }
 0x863   :  { %v13350_v55 = vpack.c.bf16 %v13980_v49, %v13979_v54  ;;  %v1565_v62 = vmul.f32 1.442695, %v1560_v61 }
 0x865   :  { %13351 = vmatpush3.bf16.msra.mxu1 %v13350_v55  ;;  %14194 = vpow2.f32 %v1565_v62 }
 0x866   :  { %12282 = vmatprep.subr.mxu1 %v15211_v0 }
 0x867   :  { %v14191_v56 = vpop.eup %14190 }
 0x868   :  { %v1567_v58 = vsel %vm901_vm15, %v14191_v56, 0.0 }
 0x869   :  { %1568 = vadd.xlane.f32.xlu0 %v1567_v58 }
 0x86b   :  { %v14193_v44 = vpop.eup %14192 }
 0x86c   :  { %v1570_v59 = vsel %vm901_vm15, %v14193_v44, 0.0 }
 0x86d   :  { %1571 = vadd.xlane.f32.xlu1 %v1570_v59 }
 0x86f   :  { %v14195_v63 = vpop.eup %14194 }
 0x870   :  { %v1573_v1 = vsel %vm908_vm6, %v14195_v63, 0.0 }
 0x87e   :  { %1783 = vrot.lane.b32.xlu1 %v15716_v48, %s15220_s22  ;;  %v682_v48 = vld [vmem:[%s18243_s21 + $0x20] sm:$0xff] }
 0x87f   :  { %1586 = vrot.lane.b32.xlu0 %v15718_v50, %s15219_s8  ;;  %v13353_v4 = vpack.c.bf16 %v683_v2, %v682_v48 }
 0x881   :  { %13354 = vmatpush3.bf16.msra.mxu0 %v13353_v4 }
 0x882   :  { %1775 = vrot.lane.b32.xlu1 %v15731_v51, %s15221_s23  ;;  %13359 = vmatprep.subr.bf16.mxu0 %v15212_v28  ;;  %v13983_v51 = vpop.permute.xlu1 %13982 }
 0x883   :  { %v13984_v21 = vunpack.i.l.bf16 %v13983_v51 }
 0x89e   :  { %1574 = vadd.xlane.f32.xlu0 %v1573_v1 }
 0x8b4   :  { %1773 = vrot.lane.b32.xlu0 %v15733_v52, %s15221_s23  ;;  %v13985_v52 = vunpack.i.h.bf16 %v13983_v51 }
 0x8b6   :  { %v13356_v23 = vpack.c.bf16 %v13985_v52, %v13984_v21 }
 0x8b8   :  { %1777 = vrot.lane.b32.xlu0 %v15741_v53, %s15221_s23 }
 0x8f6   :  { %v1569_v15 = vpop.xlane.xlu0 %1568 }
 0x8f7   :  { %14196 = vrcp.f32 %v1569_v15 }
 0x8fa   :  { %v1572_v16 = vpop.xlane.xlu1 %1571  ;;  %v1587_v19 = vpop.permute.xlu0 %1586 }
 0x8fb   :  { %14198 = vrcp.f32 %v1572_v16  ;;  %12283 = vmatpush3.msk.msra.mxu1 %vm18171_vm2, %v1587_v19 }
 0x8fc   :  { %13355 = vmatprep.subr.bf16.mxu1 %v15212_v28 }
 0x8fe   :  { %v1784_v29 = vpop.permute.xlu1 %1783 }
 0x901   :  { %v14197_v22 = vpop.eup %14196 }
 0x902   :  { %v1579_v53 = vmul.f32 %v14197_v22, %v14191_v56  ;;  %v1776_v37 = vpop.permute.xlu1 %1775 }
 0x904   :  { %12285 = vmatmul.mubr.msk.f32.vlgmr.msra.gmra.mrb[18].mxu1 %vm901_vm15, %v1579_v53 }
 0x905   :  { %v14199_v26 = vpop.eup %14198  ;;  %13358 = vmatpush3.bf16.xpose.msk.msra.mxu1 %vm15747_vm4, %v13356_v23  ;;  %12287 = vmatprep.mubr.msk.f32.mxu1 %vm18172_vm1, %v15211_v0 }
 0x906   :  { %v1580_v27 = vmul.f32 %v14199_v26, %v14193_v44  ;;  %12310 = vmatprep.subr.mxu1 %v15211_v0 }
 0x908   :  { %12288 = vmatmul.mubr.msk.f32.gmra.mrb[20].mxu1 %vm901_vm15, %v1580_v27 }
 0x909   :  { %12290 = vmatprep.mubr.msk.f32.mxu1 %vm18172_vm1, %v15211_v0 }
 0x90d   :  { %12311 = vmatpush3.xpose.msk.msra.mxu1 %vm18170_vm3, %v1784_v29 }
 0x90e   :  { %13362 = vmatprep.subr.bf16.mxu1 %v15212_v28 }
 0x92b   :  { %v1575_v32 = vpop.xlane.xlu0 %1574 }
 0x92c   :  { %14200 = vrcp.f32 %v1575_v32 }
 0x92f   :  { %v1774_v36 = vpop.permute.xlu0 %1773 }
 0x933   :  { %v1778_v38 = vpop.permute.xlu0 %1777 }
 0x936   :  { %v14201_v34 = vpop.eup %14200 }
 0x937   :  { %v1581_v35 = vmul.f32 %v14201_v34, %v14195_v63 }
 0x939   :  { %12291 = vmatmul.mubr.msk.f32.gmra.mrb[22].mxu1 %vm901_vm15, %v1581_v35 }
 0x93a   :  { %12312 = vmatprep.mubr.msk.f32.mxu1 %vm18172_vm1, %v15211_v0 }
 0x93d   :  { %12313 = vmatmul.mubr.msk.f32.vlgmr.msra.gmra.mrb[24].mxu1 %vm18170_vm3, %v1774_v36 }
 0x93e   :  { %12315 = vmatprep.mubr.msk.f32.mxu1 %vm18172_vm1, %v15211_v0 }
 0x941   :  { %12316 = vmatmul.mubr.msk.f32.gmra.mrb[26].mxu1 %vm18170_vm3, %v1776_v37 }
 0x942   :  { %12318 = vmatprep.mubr.msk.f32.mxu1 %vm18172_vm1, %v15211_v0 }
 0x945   :  { %12319 = vmatmul.mubr.msk.f32.gmra.mrb[28].mxu1 %vm18170_vm3, %v1778_v38 }
 0x946   :  { %12340 = vmatprep.mubr.msk.f32.mxu1 %vm18172_vm1, %v15211_v0 }
 0x9d7   :  { %v1667_v39 = vpop.f32.mrb[18].mxu1 }
 0x9d8   :  { %v12286_v40 = vpop.f32.mrb[19].mxu1  ;;  %12298 = vmatmul.mubr.msk.f32.vlgmr.msra.gmra.mrb[30].mxu0 %vm18170_vm3, %v1667_v39 }
 0x9d9   :  { %12300 = vmatprep.mubr.msk.f32.mxu0 %vm18172_vm1, %v15211_v0 }
 0x9db   :  { %v1672_v41 = vpop.f32.mrb[20].mxu1 }
 0x9dc   :  { %v12289_v42 = vpop.f32.mrb[21].mxu1  ;;  %12301 = vmatmul.mubr.msk.f32.gmra.mrb[32].mxu0 %vm18170_vm3, %v1672_v41 }
 0x9dd   :  { %12303 = vmatprep.mubr.msk.f32.mxu0 %vm18172_vm1, %v15211_v0 }
 0xa0c   :  { %v1677_v43 = vpop.f32.mrb[22].mxu1 }
 0xa0d   :  { %v12292_v45 = vpop.f32.mrb[23].mxu1  ;;  %12304 = vmatmul.mubr.msk.f32.gmra.mrb[34].mxu0 %vm18170_vm3, %v1677_v43 }
 0xa0e   :  { %12327 = vmatprep.mubr.msk.f32.mxu0 %vm18172_vm1, %v15211_v0 }
 0xa10   :  { %v1863_v46 = vpop.f32.mrb[24].mxu1 }
 0xa11   :  { %v1864_v49 = vadd.f32 %v1863_v46, %v15822_v14  ;;  %v12314_v54 = vpop.f32.mrb[25].mxu1 }
 0xa13   :  { %v1877_v55 = vsel %vm901_vm15, %v1864_v49, -inf }
 0xa14   :  { %1878 = vmax.xlane.f32.xlu1 %v1877_v55  ;;  %v1868_v56 = vpop.f32.mrb[26].mxu1 }
 0xa15   :  { %v1869_v58 = vadd.f32 %v1868_v56, %v15832_v18  ;;  %v12317_v44 = vpop.f32.mrb[27].mxu1 }
 0xa17   :  { %v1880_v59 = vsel %vm901_vm15, %v1869_v58, -inf }
 0xa18   :  { %1881 = vmax.xlane.f32.xlu0 %v1880_v59  ;;  %v1873_v60 = vpop.f32.mrb[28].mxu1 }
 0xa19   :  { %v1874_v61 = vadd.f32 %v1873_v60, %v15845_v24  ;;  %v12320_v62 = vpop.f32.mrb[29].mxu1 }
 0xa1b   :  { %v1883_v63 = vsel %vm908_vm6, %v1874_v61, -inf }
 0xa1c   :  { %1884 = vmax.xlane.f32.xlu0 %v1883_v63 }
 0xaa1   :  { %v1879_v1 = vpop.xlane.xlu1 %1878 }
 0xaa2   :  { %v1886_v48 = vsub.f32 %v1864_v49, %v1879_v1 }
 0xaa4   :  { %v1889_v2 = vmul.f32 1.442695, %v1886_v48 }
 0xaa5   :  { %v1882_v4 = vpop.xlane.xlu0 %1881 }
 0xaa6   :  { %14202 = vpow2.f32 %v1889_v2  ;;  %v1887_v51 = vsub.f32 %v1869_v58, %v1882_v4 }
 0xaa8   :  { %v1891_v15 = vmul.f32 1.442695, %v1887_v51 }
 0xaa9   :  { %v1885_v16 = vpop.xlane.xlu0 %1884 }
 0xaaa   :  { %14204 = vpow2.f32 %v1891_v15  ;;  %v1888_v19 = vsub.f32 %v1874_v61, %v1885_v16  ;;  %v11234_v15 = vld [vmem:[%s18244_s9] ss:$0 sm:$0xff]  ;;  %s18318_s9 = sld [smem:[#allocation85_spill]] }
 0xaab   :  { %v1756_v52 = vpop.f32.mrb[30].mxu0 }
 0xaac   :  { %v1893_v21 = vmul.f32 1.442695, %v1888_v19  ;;  %v1770_v22 = vadd.f32 %v1756_v52, %v15935_v3  ;;  %v12299_v53 = vpop.f32.mrb[31].mxu0  ;;  %v684_v3 = vld [vmem:[%s18243_s21 + $0x30] sm:$0xff] }
 0xaae   :  { %14206 = vpow2.f32 %v1893_v21 }
 0xaaf   :  { %v1761_v23 = vpop.f32.mrb[32].mxu0 }
 0xab0   :  { %v14203_v26 = vpop.eup %14202  ;;  %v1771_v27 = vadd.f32 %v1761_v23, %v15937_v9  ;;  %v12302_v29 = vpop.f32.mrb[33].mxu0  ;;  %v685_v9 = vld [vmem:[%s18243_s21 + $0x38] sm:$0xff]  ;;  %v14514_v23 = vld [vmem:[%s18233_s17 + $0x8] sm:$0xff]  ;;  %s18295_s21 = sld [smem:[#allocation82_spill]] }
 0xab1   :  { %v1895_v32 = vsel %vm901_vm15, %v14203_v26, 0.0  ;;  %v13363_v38 = vpack.c.bf16 %v685_v9, %v684_v3 }
 0xab2   :  { %1896 = vadd.xlane.f32.xlu1 %v1895_v32 }
 0xab3   :  { %13364 = vmatpush3.bf16.msra.mxu1 %v13363_v38 }
 0xab4   :  { %v14205_v34 = vpop.eup %14204 }
 0xab5   :  { %v1898_v35 = vsel %vm901_vm15, %v14205_v34, 0.0 }
 0xab6   :  { %1899 = vadd.xlane.f32.xlu0 %v1898_v35 }
 0xab8   :  { %v14207_v36 = vpop.eup %14206 }
 0xab9   :  { %v1901_v37 = vsel %vm908_vm6, %v14207_v36, 0.0 }
 0xaba   :  { %1902 = vadd.xlane.f32.xlu1 %v1901_v37  ;;  %v14515_v37 = vld [vmem:[%s18233_s17 + $0x10] sm:$0x3]  ;;  %s18264_s17 = sld [smem:[#allocation80_spill]] }
 0xacb   :  { %1914 = vrot.lane.b32.xlu1 %v15718_v50, %s15221_s23 }
 0xacc   :  { %13987 = vrot.lane.b32.xlu0 %v15710_v47, %s15221_s23 }
 0xae0   :  { %v1766_v39 = vpop.f32.mrb[34].mxu0 }
 0xae1   :  { %v1772_v40 = vadd.f32 %v1766_v39, %v15939_v17  ;;  %v12305_v41 = vpop.f32.mrb[35].mxu0 }
 0xb3f   :  { %v1897_v42 = vpop.xlane.xlu1 %1896 }
 0xb40   :  { %14208 = vrcp.f32 %v1897_v42 }
 0xb43   :  { %v1900_v43 = vpop.xlane.xlu0 %1899 }
 0xb44   :  { %14210 = vrcp.f32 %v1900_v43 }
 0xb47   :  { %v1903_v45 = vpop.xlane.xlu1 %1902  ;;  %v13988_v46 = vpop.permute.xlu0 %13987 }
 0xb48   :  { %v13990_v49 = vunpack.i.h.bf16 %v13988_v46  ;;  %v13989_v54 = vunpack.i.l.bf16 %v13988_v46  ;;  %14212 = vrcp.f32 %v1903_v45 }
 0xb4a   :  { %v13360_v50 = vpack.c.bf16 %v13990_v49, %v13989_v54  ;;  %v14209_v55 = vpop.eup %14208 }
 0xb4b   :  { %v1907_v47 = vmul.f32 %v14209_v55, %v14203_v26  ;;  %v1915_v56 = vpop.permute.xlu1 %1914 }
 0xb4c   :  { %13361 = vmatpush3.bf16.msra.mxu0 %v13360_v50 }
 0xb4d   :  { %12325 = vmatprep.subr.mxu0 %v15211_v0 }
 0xb4e   :  { %v14211_v58 = vpop.eup %14210 }
 0xb4f   :  { %v1908_v17 = vmul.f32 %v14211_v58, %v14205_v34  ;;  %v2173_v58 = vld [vmem:[%s18245_s12 + $0x8] sm:$0xff] }
 0xb50   :  { %12326 = vmatpush3.msk.msra.mxu0 %vm18171_vm2, %v1915_v56 }
 0xb51   :  { %12328 = vmatmul.mubr.msk.f32.vlgmr.msra.gmra.mrb[36].mxu0 %vm901_vm15, %v1907_v47 }
 0xb52   :  { %12330 = vmatprep.mubr.msk.f32.mxu0 %vm18172_vm1, %v15211_v0  ;;  %v14213_v44 = vpop.eup %14212 }
 0xb53   :  { %v1909_v59 = vmul.f32 %v14213_v44, %v14207_v36 }
 0xb55   :  { %12331 = vmatmul.mubr.msk.f32.gmra.mrb[38].mxu0 %vm901_vm15, %v1908_v17  ;;  %v2175_v17 = vld [vmem:[%s18245_s12 + $0x18] sm:$0xff] }
 0xb56   :  { %12333 = vmatprep.mubr.msk.f32.mxu0 %vm18172_vm1, %v15211_v0  ;;  %v13365_v44 = vpack.c.bf16 %v2175_v17, %v2173_v58 }
 0xb58   :  { %13366 = vmatprep.subr.bf16.mxu0 %v13365_v44  ;;  %v2195_v44 = vld [vmem:[%s18246_s26 + $0x30] sm:$0xff] }
 0xb59   :  { %12334 = vmatmul.mubr.msk.f32.gmra.mrb[40].mxu0 %vm901_vm15, %v1909_v59  ;;  %v2172_v59 = vld [vmem:[%s18245_s12] sm:$0xff] }
 0xb5a   :  { %2308 = vmatprep.mubr.f32.mxu0 %v15211_v0 }
 0xc24   :  { %v1995_v60 = vpop.f32.mrb[36].mxu0 }
 0xc25   :  { %v12329_v61 = vpop.f32.mrb[37].mxu0  ;;  %12341 = vmatmul.mubr.msk.f32.vlgmr.msra.gmra.mrb[30].mxu1 %vm18170_vm3, %v1995_v60  ;;  %v2174_v60 = vld [vmem:[%s18245_s12 + $0x10] sm:$0xff] }
 0xc26   :  { %12343 = vmatprep.mubr.msk.f32.mxu1 %vm18172_vm1, %v15211_v0  ;;  %v13367_v61 = vpack.c.bf16 %v2174_v60, %v2172_v59  ;;  %v2196_v59 = vld [vmem:[%s18246_s26 + $0x38] sm:$0xff]  ;;  %v2213_v60 = vld [vmem:[%s18246_s26 + $0xc0] sm:$0xff] }
 0xc28   :  { %v2000_v62 = vpop.f32.mrb[38].mxu0  ;;  %13368 = vmatpush1.bf16.msra.mxu0 %v13367_v61  ;;  %v2214_v61 = vld [vmem:[%s18246_s26 + $0xc8] sm:$0xff] }
 0xc29   :  { %v12332_v63 = vpop.f32.mrb[39].mxu0  ;;  %12344 = vmatmul.mubr.msk.f32.gmra.mrb[32].mxu1 %vm18170_vm3, %v2000_v62  ;;  %v2177_v62 = vld [vmem:[%s18245_s12 + $0x28] sm:$0xff] }
 0xc2a   :  { %12346 = vmatprep.mubr.msk.f32.mxu1 %vm18172_vm1, %v15211_v0  ;;  %v2179_v63 = vld [vmem:[%s18245_s12 + $0x38] sm:$0xff] }
 0xc2c   :  { %v2005_v1 = vpop.f32.mrb[40].mxu0 }
 0xc2d   :  { %v12335_v48 = vpop.f32.mrb[41].mxu0  ;;  %12347 = vmatmul.mubr.msk.f32.gmra.mrb[34].mxu1 %vm18170_vm3, %v2005_v1  ;;  %v13369_v1 = vpack.c.bf16 %v2179_v63, %v2177_v62  ;;  %v13395_v62 = vpack.c.bf16 %v2196_v59, %v2195_v44  ;;  %v13397_v63 = vpack.c.bf16 %v2214_v61, %v2213_v60  ;;  %v2203_v59 = vld [vmem:[%s18246_s26 + $0x70] sm:$0xff]  ;;  %v2204_v60 = vld [vmem:[%s18246_s26 + $0x78] sm:$0xff] }
 0xc2e   :  { %v2176_v48 = vld [vmem:[%s18245_s12 + $0x20] sm:$0xff]  ;;  %v13411_v61 = vpack.c.bf16 %v2204_v60, %v2203_v59 }
 0xc2f   :  { %13370 = vmatprep.subr.bf16.mxu0 %v13369_v1  ;;  %v2197_v1 = vld [vmem:[%s18246_s26 + $0x40] sm:$0xff] }
 0xcf8   :  { %v2084_v2 = vpop.f32.mrb[30].mxu1 }
 0xcf9   :  { %v2098_v4 = vadd.f32 %v2084_v2, %v1770_v22  ;;  %v12342_v51 = vpop.f32.mrb[31].mxu1  ;;  %v2178_v2 = vld [vmem:[%s18245_s12 + $0x30] sm:$0xff] }
 0xcfa   :  { %v2181_v51 = vld [vmem:[%s18245_s12 + $0x48] sm:$0xff] }
 0xcfb   :  { %v2101_v16 = vadd.f32 %v2098_v4, %v15684_v25  ;;  %v13371_v4 = vpack.c.bf16 %v2178_v2, %v2176_v48  ;;  %v2198_v48 = vld [vmem:[%s18246_s26 + $0x48] sm:$0xff]  ;;  %v2215_v2 = vld [vmem:[%s18246_s26 + $0xd0] sm:$0xff] }
 0xcfc   :  { %v2089_v19 = vpop.f32.mrb[32].mxu1 }
 0xcfd   :  { %v2099_v52 = vadd.f32 %v2089_v19, %v1771_v27  ;;  %v12345_v21 = vpop.f32.mrb[33].mxu1  ;;  %v2110_v53 = vadd.f32 %v11234_v15, %v2101_v16  ;;  %13372 = vmatpush1.bf16.msra.mxu0 %v13371_v4  ;;  %v2180_v19 = vld [vmem:[%s18245_s12 + $0x40] sm:$0xff]  ;;  %v2216_v4 = vld [vmem:[%s18246_s26 + $0xd8] sm:$0xff] }
 0xcff   :  { %v2102_v26 = vadd.f32 %v14514_v23, %v2099_v52  ;;  %v2113_v29 = vsel %vm18169_vm0, %v2110_v53, 0.0  ;;  %v2182_v52 = vld [vmem:[%s18245_s12 + $0x50] sm:$0xff]  ;;  %v2187_v23 = vld [vmem:[%s18245_s12 + $0x78] sm:$0xff] }
 0xd00   :  { %2114 = vadd.xlane.f32.xlu1 %v2113_v29  ;;  %v2094_v32 = vpop.f32.mrb[34].mxu1  ;;  %v13375_v21 = vpack.c.bf16 %v2182_v52, %v2180_v19  ;;  %v2184_v29 = vld [vmem:[%s18245_s12 + $0x60] sm:$0xff]  ;;  %v2200_v19 = vld [vmem:[%s18246_s26 + $0x58] sm:$0xff] }
 0xd01   :  { %v2100_v34 = vadd.f32 %v2094_v32, %v1772_v40  ;;  %v12348_v35 = vpop.f32.mrb[35].mxu1  ;;  %v2111_v36 = vadd.f32 %v11234_v15, %v2102_v26  ;;  %v2186_v32 = vld [vmem:[%s18245_s12 + $0x70] sm:$0xff]  ;;  %v2217_v52 = vld [vmem:[%s18246_s26 + $0xe0] sm:$0xff] }
 0xd02   :  { %v2205_v35 = vld [vmem:[%s18246_s26 + $0x80] sm:$0xff] }
 0xd03   :  { %v2103_v22 = vadd.f32 %v14515_v37, %v2100_v34  ;;  %v2116_v3 = vsel %vm18169_vm0, %v2111_v36, 0.0  ;;  %v13379_v34 = vpack.c.bf16 %v2186_v32, %v2184_v29  ;;  %v2189_v37 = vld [vmem:[%s18246_s26] sm:$0xff] }
 0xd04   :  { %2117 = vadd.xlane.f32.xlu0 %v2116_v3  ;;  %v2190_v3 = vld [vmem:[%s18246_s26 + $0x8] sm:$0xff] }
 0xd05   :  { %v2112_v25 = vadd.f32 %v11234_v15, %v2103_v22  ;;  %v2183_v15 = vld [vmem:[%s18245_s12 + $0x58] sm:$0xff] }
 0xd06   :  { %v13373_v16 = vpack.c.bf16 %v2183_v15, %v2181_v51  ;;  %v13399_v51 = vpack.c.bf16 %v2198_v48, %v2197_v1  ;;  %v13401_v15 = vpack.c.bf16 %v2216_v4, %v2215_v2 }
 0xd07   :  { %v2120_v27 = vsel %vm18168_vm14, %v2112_v25, 0.0 }
 0xd08   :  { %2121 = vadd.xlane.f32.xlu0 %v2120_v27  ;;  %13374 = vmatprep.subr.bf16.mxu0 %v13373_v16  ;;  %v2208_v27 = vld [vmem:[%s18246_s26 + $0x98] sm:$0xff]  ;;  %v2199_v16 = vld [vmem:[%s18246_s26 + $0x50] sm:$0xff] }
 0xd09   :  { %13376 = vmatpush1.bf16.msra.mxu0 %v13375_v21  ;;  %v2218_v21 = vld [vmem:[%s18246_s26 + $0xe8] sm:$0xff] }
 0xd8d   :  { %v2115_v9 = vpop.xlane.xlu1 %2114 }
 0xd8e   :  { %v2124_v38 = vmul.f32 0.015625, %v2115_v9  ;;  %v13383_v9 = vpack.c.bf16 %v2190_v3, %v2189_v37 }
 0xd90   :  { %v16044_v39 = vsub.f32 %v2110_v53, %v2124_v38  ;;  %v2185_v53 = vld [vmem:[%s18245_s12 + $0x68] sm:$0xff]  ;;  %s18343_s12 = sld [smem:[#allocation87_spill]] }
 0xd91   :  { %v2118_v41 = vpop.xlane.xlu0 %2117  ;;  %v13377_v26 = vpack.c.bf16 %v2187_v23, %v2185_v53  ;;  %v13403_v53 = vpack.c.bf16 %v2200_v19, %v2199_v16  ;;  %v13405_v23 = vpack.c.bf16 %v2218_v21, %v2217_v52 }
 0xd92   :  { %v2125_v40 = vmul.f32 0.015625, %v2118_v41  ;;  %v2130_v42 = vmul.f32 %v16044_v39, %v16044_v39  ;;  %v2191_v41 = vld [vmem:[%s18246_s26 + $0x10] sm:$0xff] }
 0xd93   :  { %13378 = vmatprep.subr.bf16.mxu0 %v13377_v26 }
 0xd94   :  { %v16048_v43 = vsub.f32 %v2111_v36, %v2125_v40  ;;  %v2133_v45 = vsel %vm18169_vm0, %v2130_v42, 0.0  ;;  %13380 = vmatpush1.bf16.msra.mxu0 %v13379_v34  ;;  %v2206_v36 = vld [vmem:[%s18246_s26 + $0x88] sm:$0xff]  ;;  %v2192_v40 = vld [vmem:[%s18246_s26 + $0x18] sm:$0xff]  ;;  %v2209_v42 = vld [vmem:[%s18246_s26 + $0xa0] sm:$0xff] }
 0xd95   :  { %2134 = vadd.xlane.f32.xlu1 %v2133_v45  ;;  %v2122_v46 = vpop.xlane.xlu0 %2121  ;;  %v13381_v22 = vpack.c.bf16 %v2206_v36, %v2205_v35  ;;  %v2210_v45 = vld [vmem:[%s18246_s26 + $0xa8] sm:$0xff] }
 0xd96   :  { %v2126_v49 = vmul.f32 0.015625, %v2122_v46  ;;  %v2131_v54 = vmul.f32 %v16048_v43, %v16048_v43  ;;  %v13387_v46 = vpack.c.bf16 %v2192_v40, %v2191_v41 }
 0xd97   :  { %13382 = vmatprep.subr.bf16.mxu1 %v13381_v22 }
 0xd98   :  { %v16053_v50 = vsub.f32 %v2112_v25, %v2126_v49  ;;  %v2136_v55 = vsel %vm18169_vm0, %v2131_v54, 0.0  ;;  %v2207_v25 = vld [vmem:[%s18246_s26 + $0x90] sm:$0xff]  ;;  %13384 = vmatpush3.bf16.msra.mxu1 %v13383_v9  ;;  %v13389_v49 = vpack.c.bf16 %v2210_v45, %v2209_v42  ;;  %v2193_v54 = vld [vmem:[%s18246_s26 + $0x20] sm:$0xff] }
 0xd99   :  { %2137 = vadd.xlane.f32.xlu0 %v2136_v55  ;;  %v13385_v38 = vpack.c.bf16 %v2208_v27, %v2207_v25  ;;  %v2194_v55 = vld [vmem:[%s18246_s26 + $0x28] sm:$0xff]  ;;  %v11235_v27 = vld [vmem:[%s18247_s29] ss:$0 sm:$0xff]  ;;  %s18351_s29 = sld [smem:[#allocation88_spill]] }
 0xd9a   :  { %v2132_v47 = vmul.f32 %v16053_v50, %v16053_v50  ;;  %v13391_v58 = vpack.c.bf16 %v2194_v55, %v2193_v54 }
 0xd9b   :  { %13386 = vmatprep.subr.bf16.mxu1 %v13385_v38  ;;  %v11236_v38 = vld [vmem:[%s18248_s28] ss:$0 sm:$0xff]  ;;  %s18355_s28 = sld [smem:[#allocation92_spill]] }
 0xd9c   :  { %v2139_v56 = vsel %vm18168_vm14, %v2132_v47, 0.0  ;;  %v2211_v47 = vld [vmem:[%s18246_s26 + $0xb0] sm:$0xff]  ;;  %13388 = vmatpush3.bf16.msra.mxu1 %v13387_v46 }
 0xd9d   :  { %2140 = vadd.xlane.f32.xlu1 %v2139_v56  ;;  %v2212_v56 = vld [vmem:[%s18246_s26 + $0xb8] sm:$0xff]  ;;  %13390 = vmatprep.subr.bf16.mxu1 %v13389_v49 }
 0xd9e   :  { %v13393_v17 = vpack.c.bf16 %v2212_v56, %v2211_v47  ;;  %v2201_v47 = vld [vmem:[%s18246_s26 + $0x60] sm:$0xff]  ;;  %v2202_v56 = vld [vmem:[%s18246_s26 + $0x68] sm:$0xff] }
 0xda0   :  { %13392 = vmatpush3.bf16.msra.mxu1 %v13391_v58  ;;  %v13407_v58 = vpack.c.bf16 %v2202_v56, %v2201_v47 }
 0xda1   :  { %13394 = vmatprep.subr.bf16.mxu1 %v13393_v17  ;;  %v2219_v17 = vld [vmem:[%s18246_s26 + $0xf0] sm:$0xff] }
 0xda4   :  { %13396 = vmatpush3.bf16.msra.mxu1 %v13395_v62  ;;  %v2188_v62 = vld [vmem:[%s18249_s1] sm:$0x3]  ;;  %s18359_s1 = sld [smem:[#allocation93_spill]] }
 0xda5   :  { %13398 = vmatprep.subr.bf16.mxu1 %v13397_v63  ;;  %v2228_v63 = vrot.slane %v2188_v62, %v15700_v31  ;;  %v2232_v1 = vrot.slane %v2188_v62, %v15704_v33 }
 0xda8   :  { %13400 = vmatpush3.bf16.msra.mxu1 %v13399_v51 }
 0xda9   :  { %13402 = vmatprep.subr.bf16.mxu1 %v13401_v15 }
 0xdac   :  { %13404 = vmatpush3.bf16.msra.mxu1 %v13403_v53 }
 0xdad   :  { %13406 = vmatprep.subr.bf16.mxu1 %v13405_v23 }
 0xdb0   :  { %13408 = vmatpush3.bf16.msra.mxu1 %v13407_v58 }
 0xe22   :  { %v2135_v26 = vpop.xlane.xlu1 %2134 }
 0xe23   :  { %v2142_v29 = vmul.f32 0.015625, %v2135_v26 }
 0xe25   :  { %v2145_v32 = vadd.f32 1e-05, %v2142_v29 }
 0xe26   :  { %v2138_v34 = vpop.xlane.xlu0 %2137 }
 0xe27   :  { %14214 = vrsqrt.f32 %v2145_v32  ;;  %v2143_v35 = vmul.f32 0.015625, %v2138_v34 }
 0xe29   :  { %v2146_v36 = vadd.f32 1e-05, %v2143_v35 }
 0xe2a   :  { %v2141_v37 = vpop.xlane.xlu1 %2140 }
 0xe2b   :  { %14216 = vrsqrt.f32 %v2146_v36  ;;  %v2144_v22 = vmul.f32 0.015625, %v2141_v37 }
 0xe2d   :  { %v2147_v3 = vadd.f32 1e-05, %v2144_v22 }
 0xe2f   :  { %14218 = vrsqrt.f32 %v2147_v3  ;;  %v11240_v3 = vld [vmem:[%s18250_s2] ss:$0 sm:$0xff]  ;;  %s18371_s2 = sld [smem:[#allocation94_spill]] }
 0xe31   :  { %v14215_v25 = vpop.eup %14214 }
 0xe32   :  { %v2151_v9 = vmul.f32 %v14215_v25, %v16044_v39 }
 0xe34   :  { %v2160_v41 = vmul.f32 %v11235_v27, %v2151_v9 }
 0xe35   :  { %v14217_v40 = vpop.eup %14216 }
 0xe36   :  { %v16104_v42 = vadd.f32 %v11236_v38, %v2160_v41  ;;  %v2152_v45 = vmul.f32 %v14217_v40, %v16048_v43 }
 0xe38   :  { %11237 = vmatmul.mubr.msk.f32.vlgmr.msra.gmra.mrb[42].mxu0 %vm18169_vm0, %v16104_v42  ;;  %v2161_v46 = vmul.f32 %v11235_v27, %v2152_v45 }
 0xe39   :  { %v14219_v49 = vpop.eup %14218  ;;  %2314 = vmatprep.mubr.f32.mxu0 %v15211_v0 }
 0xe3a   :  { %v16110_v39 = vadd.f32 %v11236_v38, %v2161_v46  ;;  %v2153_v54 = vmul.f32 %v14219_v49, %v16053_v50  ;;  %v2220_v50 = vld [vmem:[%s18246_s26 + $0xf8] sm:$0xff]  ;;  %s18347_s26 = sld [smem:[#allocation89_spill]] }
 0xe3b   :  { %v13409_v44 = vpack.c.bf16 %v2220_v50, %v2219_v17 }
 0xe3c   :  { %11238 = vmatmul.mubr.msk.f32.gmra.mrb[44].mxu0 %vm18169_vm0, %v16110_v39  ;;  %v2162_v55 = vmul.f32 %v11235_v27, %v2153_v54 }
 0xe3d   :  { %2320 = vmatprep.mubr.f32.mxu0 %v15211_v0  ;;  %13410 = vmatprep.subr.bf16.mxu1 %v13409_v44 }
 0xe3e   :  { %v16116_v43 = vadd.f32 %v11236_v38, %v2162_v55  ;;  %13412 = vmatpush3.bf16.msra.mxu1 %v13411_v61 }
 0xe3f   :  { %13433 = vmatprep.subr.bf16.mxu1 %v15212_v28 }
 0xe40   :  { %11239 = vmatmul.mubr.msk.f32.gmra.mrb[46].mxu0 %vm18169_vm0, %v16116_v43 }
 0xe41   :  { %2591 = vmatprep.mubr.f32.mxu0 %v15211_v0 }
 0xf0b   :  { %v2310_v48 = vpop.f32.mrb[42].mxu0 }
 0xf0c   :  { %v2311_v2 = vadd.f32 %v2310_v48, %v2228_v63  ;;  %v2312_v4 = vpop.f32.mrb[43].mxu0 }
 0xf0d   :  { %v2313_v51 = vadd.f32 %v2312_v4, %v2232_v1 }
 0xf0e   :  { %v2327_v19 = vmax.f32 %v2311_v2, 0.0 }
 0xf0f   :  { %v2328_v15 = vmax.f32 %v2313_v51, 0.0  ;;  %v2316_v16 = vpop.f32.mrb[44].mxu0 }
 0xf10   :  { %v2317_v52 = vadd.f32 %v2316_v16, %v2228_v63  ;;  %v2318_v21 = vpop.f32.mrb[45].mxu0 }
 0xf11   :  { %v2319_v53 = vadd.f32 %v2318_v21, %v2232_v1  ;;  %2403 = vmatprep.mubr.f32.mxu1 %v2328_v15 }
 0xf12   :  { %2404 = vmatmul.mubr.f32.vlgmr.msra.gmra.mrb[36].mxu1 %v2327_v19  ;;  %v2329_v29 = vmax.f32 %v2317_v52, 0.0  ;;  %v2480_v19 = vld [vmem:[%s18251_s20 + $0x8] sm:$0xff]  ;;  %v2482_v52 = vld [vmem:[%s18251_s20 + $0x18] sm:$0xff] }
 0xf13   :  { %v2330_v23 = vmax.f32 %v2319_v53, 0.0  ;;  %v2322_v26 = vpop.f32.mrb[46].mxu0  ;;  %v13413_v21 = vpack.c.bf16 %v2482_v52, %v2480_v19  ;;  %v2479_v53 = vld [vmem:[%s18251_s20] sm:$0xff] }
 0xf14   :  { %v2323_v32 = vadd.f32 %v2322_v26, %v2228_v63  ;;  %v2324_v34 = vpop.f32.mrb[47].mxu0 }
 0xf15   :  { %v2325_v35 = vadd.f32 %v2324_v34, %v2232_v1  ;;  %2408 = vmatprep.mubr.f32.mxu1 %v2330_v23  ;;  %v2481_v23 = vld [vmem:[%s18251_s20 + $0x10] sm:$0xff]  ;;  %13414 = vmatprep.subr.bf16.mxu0 %v13413_v21 }
 0xf16   :  { %2409 = vmatmul.mubr.f32.gmra.mrb[38].mxu1 %v2329_v29  ;;  %v2331_v37 = vmax.f32 %v2323_v32, 0.0  ;;  %v13415_v26 = vpack.c.bf16 %v2481_v23, %v2479_v53  ;;  %v2484_v29 = vld [vmem:[%s18251_s20 + $0x28] sm:$0xff]  ;;  %v2486_v32 = vld [vmem:[%s18251_s20 + $0x38] sm:$0xff] }
 0xf17   :  { %v2332_v36 = vmax.f32 %v2325_v35, 0.0  ;;  %v13417_v34 = vpack.c.bf16 %v2486_v32, %v2484_v29  ;;  %v2483_v35 = vld [vmem:[%s18251_s20 + $0x20] sm:$0xff] }
 0xf18   :  { %13416 = vmatpush1.bf16.msra.mxu0 %v13415_v26 }
 0xf19   :  { %2413 = vmatprep.mubr.f32.mxu1 %v2332_v36  ;;  %v2485_v36 = vld [vmem:[%s18251_s20 + $0x30] sm:$0xff]  ;;  %13418 = vmatprep.subr.bf16.mxu0 %v13417_v34 }
 0xf1a   :  { %2414 = vmatmul.mubr.f32.gmra.mrb[40].mxu1 %v2331_v37  ;;  %v13419_v37 = vpack.c.bf16 %v2485_v36, %v2483_v35 }
 0xf1b   :  { %12370 = vmatprep.mubr.msk.f32.mxu1 %vm18172_vm1, %v15211_v0 }
 0xf1c   :  { %13420 = vmatpush1.bf16.msra.mxu0 %v13419_v37 }
 0xfe5   :  { %v11661_v22 = vpop.f32.mrb[36].mxu1 }
 0xfe6   :  { %v11662_v25 = vpop.f32.mrb[37].mxu1 }
 0xfe7   :  { %v11663_v27 = vadd.f32 %v11662_v25, %v11661_v22  ;;  %v2488_v22 = vld [vmem:[%s18251_s20 + $0x48] sm:$0xff] }
 0xfe9   :  { %v2406_v9 = vadd.f32 %v11663_v27, %v11240_v3  ;;  %v11664_v38 = vpop.f32.mrb[38].mxu1  ;;  %v2487_v27 = vld [vmem:[%s18251_s20 + $0x40] sm:$0xff] }
 0xfea   :  { %v11665_v41 = vpop.f32.mrb[39].mxu1 }
 0xfeb   :  { %v11666_v40 = vadd.f32 %v11665_v41, %v11664_v38  ;;  %v2419_v45 = vadd.f32 %v2406_v9, %v16104_v42  ;;  %v2489_v9 = vld [vmem:[%s18251_s20 + $0x50] sm:$0xff]  ;;  %v2492_v41 = vld [vmem:[%s18251_s20 + $0x68] sm:$0xff] }
 0xfec   :  { %v13423_v38 = vpack.c.bf16 %v2489_v9, %v2487_v27 }
 0xfed   :  { %v2411_v46 = vadd.f32 %v11666_v40, %v11240_v3  ;;  %v11667_v49 = vpop.f32.mrb[40].mxu1  ;;  %v2422_v54 = vsel %vm18169_vm0, %v2419_v45, 0.0  ;;  %v2494_v40 = vld [vmem:[%s18251_s20 + $0x78] sm:$0xff] }
 0xfee   :  { %v11668_v55 = vpop.f32.mrb[41].mxu1  ;;  %2423 = vadd.xlane.f32.xlu0 %v2422_v54 }
 0xfef   :  { %v11669_v47 = vadd.f32 %v11668_v55, %v11667_v49  ;;  %v2420_v56 = vadd.f32 %v2411_v46, %v16110_v39  ;;  %v2491_v46 = vld [vmem:[%s18251_s20 + $0x60] sm:$0xff]  ;;  %v2493_v49 = vld [vmem:[%s18251_s20 + $0x70] sm:$0xff] }
 0xff0   :  { %v13427_v54 = vpack.c.bf16 %v2493_v49, %v2491_v46 }
 0xff1   :  { %v2416_v58 = vadd.f32 %v11669_v47, %v11240_v3  ;;  %v2425_v17 = vsel %vm18169_vm0, %v2420_v56, 0.0  ;;  %v2490_v3 = vld [vmem:[%s18251_s20 + $0x58] sm:$0xff]  ;;  %s18390_s20 = sld [smem:[#allocation98_spill]] }
 0xff2   :  { %2426 = vadd.xlane.f32.xlu1 %v2425_v17  ;;  %v13421_v25 = vpack.c.bf16 %v2490_v3, %v2488_v22 }
 0xff3   :  { %v2421_v50 = vadd.f32 %v2416_v58, %v16116_v43 }
 0xff4   :  { %13422 = vmatprep.subr.bf16.mxu0 %v13421_v25 }
 0xff5   :  { %v2428_v44 = vsel %vm18168_vm14, %v2421_v50, 0.0  ;;  %13424 = vmatpush1.bf16.msra.mxu0 %v13423_v38 }
 0xff6   :  { %2429 = vadd.xlane.f32.xlu0 %v2428_v44 }
0x107b   :  { %v2424_v59 = vpop.xlane.xlu0 %2423 }
0x107c   :  { %v2431_v42 = vmul.f32 0.015625, %v2424_v59 }
0x107e   :  { %v16140_v60 = vsub.f32 %v2419_v45, %v2431_v42  ;;  %v13425_v45 = vpack.c.bf16 %v2494_v40, %v2492_v41 }
0x107f   :  { %v2427_v61 = vpop.xlane.xlu1 %2426 }
0x1080   :  { %v2432_v62 = vmul.f32 0.015625, %v2427_v61  ;;  %v2437_v39 = vmul.f32 %v16140_v60, %v16140_v60  ;;  %13426 = vmatprep.subr.bf16.mxu0 %v13425_v45 }
0x1081   :  { %13428 = vmatpush1.bf16.msra.mxu0 %v13427_v54 }
0x1082   :  { %v16144_v63 = vsub.f32 %v2420_v56, %v2432_v62  ;;  %v2440_v43 = vsel %vm18169_vm0, %v2437_v39, 0.0  ;;  %13429 = vmatprep.subr.bf16.mxu0 %v15212_v28  ;;  %v11241_v62 = vld [vmem:[%s18252_s7] ss:$0 sm:$0xff]  ;;  %s18401_s7 = sld [smem:[#allocation96_spill]] }
0x1083   :  { %2441 = vadd.xlane.f32.xlu1 %v2440_v43  ;;  %v2430_v1 = vpop.xlane.xlu0 %2429  ;;  %v11242_v43 = vld [vmem:[%s18253_s25] ss:$0 sm:$0xff] }
0x1084   :  { %v2433_v48 = vmul.f32 0.015625, %v2430_v1  ;;  %v2438_v2 = vmul.f32 %v16144_v63, %v16144_v63 }
0x1086   :  { %v16149_v4 = vsub.f32 %v2421_v50, %v2433_v48  ;;  %v2443_v51 = vsel %vm18169_vm0, %v2438_v2, 0.0 }
0x1087   :  { %2444 = vadd.xlane.f32.xlu0 %v2443_v51 }
0x1088   :  { %v2439_v15 = vmul.f32 %v16149_v4, %v16149_v4 }
0x108a   :  { %v2446_v16 = vsel %vm18168_vm14, %v2439_v15, 0.0 }
0x108b   :  { %2447 = vadd.xlane.f32.xlu1 %v2446_v16 }
0x1110   :  { %v2442_v55 = vpop.xlane.xlu1 %2441 }
0x1111   :  { %v2449_v47 = vmul.f32 0.015625, %v2442_v55 }
0x1113   :  { %v2452_v56 = vadd.f32 1e-05, %v2449_v47 }
0x1114   :  { %v2445_v58 = vpop.xlane.xlu0 %2444 }
0x1115   :  { %14220 = vrsqrt.f32 %v2452_v56  ;;  %v2450_v17 = vmul.f32 0.015625, %v2445_v58 }
0x1117   :  { %v2453_v50 = vadd.f32 1e-05, %v2450_v17 }
0x1118   :  { %v2448_v44 = vpop.xlane.xlu1 %2447 }
0x1119   :  { %14222 = vrsqrt.f32 %v2453_v50  ;;  %v2451_v59 = vmul.f32 0.015625, %v2448_v44 }
0x111b   :  { %v2454_v42 = vadd.f32 1e-05, %v2451_v59 }
0x111d   :  { %14224 = vrsqrt.f32 %v2454_v42 }
0x111f   :  { %v14221_v61 = vpop.eup %14220 }
0x1120   :  { %v2458_v39 = vmul.f32 %v14221_v61, %v16140_v60 }
0x1122   :  { %v2467_v1 = vmul.f32 %v11241_v62, %v2458_v39 }
0x1123   :  { %v14223_v48 = vpop.eup %14222 }
0x1124   :  { %v16175_v2 = vadd.f32 %v11242_v43, %v2467_v1  ;;  %v2459_v51 = vmul.f32 %v14223_v48, %v16144_v63  ;;  %v2495_v63 = vld [vmem:[%s18254_s14] sm:$0x3] }
0x1125   :  { %v2511_v23 = vrot.slane %v2495_v63, %v15700_v31 }
0x1126   :  { %11243 = vmatmul.mubr.msk.f32.vlgmr.msra.gmra.mrb[48].mxu0 %vm18169_vm0, %v16175_v2  ;;  %v2468_v15 = vmul.f32 %v11241_v62, %v2459_v51 }
0x1127   :  { %v14225_v16 = vpop.eup %14224  ;;  %2597 = vmatprep.mubr.f32.mxu0 %v15211_v0 }
0x1128   :  { %v16181_v19 = vadd.f32 %v11242_v43, %v2468_v15  ;;  %v2460_v52 = vmul.f32 %v14225_v16, %v16149_v4  ;;  %v2515_v4 = vrot.slane %v2495_v63, %v15704_v33 }
0x112a   :  { %11244 = vmatmul.mubr.msk.f32.gmra.mrb[50].mxu0 %vm18169_vm0, %v16181_v19  ;;  %v2469_v60 = vmul.f32 %v11241_v62, %v2460_v52 }
0x112b   :  { %2603 = vmatprep.mubr.f32.mxu0 %v15211_v0 }
0x112c   :  { %v16187_v21 = vadd.f32 %v11242_v43, %v2469_v60 }
0x112e   :  { %11245 = vmatmul.mubr.msk.f32.gmra.mrb[52].mxu0 %vm18169_vm0, %v16187_v21 }
0x112f   :  { %12355 = vmatprep.mubr.msk.f32.mxu0 %vm18172_vm1, %v15211_v0 }
0x11f9   :  { %v2593_v53 = vpop.f32.mrb[48].mxu0 }
0x11fa   :  { %v2595_v26 = vpop.f32.mrb[49].mxu0  ;;  %v2594_v32 = vadd.f32 %v2593_v53, %v2511_v23 }
0x11fb   :  { %v2596_v36 = vadd.f32 %v2595_v26, %v2515_v4 }
0x11fc   :  { %v16220_v45 = vmul.f32 0.25, %v2594_v32 }
0x11fd   :  { %v2599_v29 = vpop.f32.mrb[50].mxu0 }
0x11fe   :  { %v2600_v34 = vadd.f32 %v2599_v29, %v2511_v23  ;;  %v2601_v35 = vpop.f32.mrb[51].mxu0 }
0x11ff   :  { %v2602_v37 = vadd.f32 %v2601_v35, %v2515_v4 }
0x1200   :  { %v16196_v22 = vpack.i.bf16 %v2600_v34, %v2594_v32  ;;  %v16215_v40 = vmul.f32 0.25, %v2600_v34 }
0x1201   :  { %v2605_v3 = vpop.f32.mrb[52].mxu0  ;;  %v13434_v25 = vpack.c.bf16 %v2602_v37, %v2596_v36  ;;  %v16198_v27 = vpack.i.bf16 %v2602_v37, %v2596_v36 }
0x1202   :  { %v16200_v9 = vadd.f32 %v2605_v3, %v2511_v23  ;;  %v2607_v38 = vpop.f32.mrb[53].mxu0  ;;  %13992 = vrot.lane.b32.xlu0 %v16196_v22, %s15214_s3 }
0x1203   :  { %13435 = vmatpush3.bf16.msra.mxu1 %v13434_v25  ;;  %v16207_v41 = vadd.f32 %v2607_v38, %v2515_v4 }
0x1204   :  { %2620 = vrot.lane.b32.xlu1 %v16200_v9, %s15214_s3  ;;  %12368 = vmatprep.subr.mxu1 %v15211_v0  ;;  %v16225_v46 = vmul.f32 0.25, %v16200_v9 }
0x1206   :  { %2852 = vrot.lane.b32.xlu0 %v16200_v9, %s15213_s16 }
0x1207   :  { %12369 = vmatpush3.msk.msra.mxu1 %vm18171_vm2, %v16207_v41 }
0x1208   :  { %13997 = vrot.lane.b32.xlu1 %v16196_v22, %s15213_s16  ;;  %13440 = vmatprep.subr.bf16.mxu1 %v15212_v28 }
0x120a   :  { %2844 = vrot.lane.b32.xlu0 %v16215_v40, %s15216_s4 }
0x120c   :  { %2842 = vrot.lane.b32.xlu1 %v16220_v45, %s15216_s4 }
0x1210   :  { %2846 = vrot.lane.b32.xlu1 %v16225_v46, %s15216_s4 }
0x1274   :  { %v13993_v49 = vpop.permute.xlu0 %13992 }
0x1275   :  { %v13995_v54 = vunpack.i.h.bf16 %v13993_v49  ;;  %v13994_v55 = vunpack.i.l.bf16 %v13993_v49 }
0x1276   :  { %v2621_v47 = vpop.permute.xlu1 %2620 }
0x1277   :  { %v13430_v56 = vpack.c.bf16 %v13995_v54, %v13994_v55 }
0x1278   :  { %v2853_v59 = vpop.permute.xlu0 %2852 }
0x1279   :  { %13432 = vmatpush3.bf16.xpose.msk.msra.mxu0 %vm15747_vm4, %v13430_v56 }
0x127a   :  { %12353 = vmatprep.subr.mxu0 %v15211_v0  ;;  %v13998_v58 = vpop.permute.xlu1 %13997 }
0x127b   :  { %v14000_v17 = vunpack.i.h.bf16 %v13998_v58  ;;  %v13999_v50 = vunpack.i.l.bf16 %v13998_v58 }
0x127c   :  { %v2845_v61 = vpop.permute.xlu0 %2844 }
0x127d   :  { %v13437_v44 = vpack.c.bf16 %v14000_v17, %v13999_v50 }
0x127e   :  { %v2843_v42 = vpop.permute.xlu1 %2842 }
0x1281   :  { %12354 = vmatpush3.xpose.msk.msra.mxu0 %vm18170_vm3, %v2621_v47 }
0x1282   :  { %13436 = vmatprep.subr.bf16.mxu0 %v15212_v28  ;;  %v2847_v62 = vpop.permute.xlu1 %2846 }
0x1284   :  { %12356 = vmatmul.mubr.msk.f32.vlgmr.msra.gmra.mrb[54].mxu0 %vm18170_vm3, %v16220_v45 }
0x1285   :  { %13439 = vmatpush3.bf16.xpose.msk.msra.mxu0 %vm15747_vm4, %v13437_v44  ;;  %12358 = vmatprep.mubr.msk.f32.mxu0 %vm18172_vm1, %v15211_v0 }
0x1286   :  { %12383 = vmatprep.subr.mxu0 %v15211_v0 }
0x1288   :  { %12359 = vmatmul.mubr.msk.f32.gmra.mrb[56].mxu0 %vm18170_vm3, %v16215_v40 }
0x1289   :  { %12361 = vmatprep.mubr.msk.f32.mxu0 %vm18172_vm1, %v15211_v0 }
0x128c   :  { %12362 = vmatmul.mubr.msk.f32.gmra.mrb[58].mxu0 %vm18170_vm3, %v16225_v46 }
0x128d   :  { %12384 = vmatpush3.xpose.msk.msra.mxu0 %vm18170_vm3, %v2853_v59  ;;  %12385 = vmatprep.mubr.msk.f32.mxu0 %vm18172_vm1, %v15211_v0 }
0x128e   :  { %13443 = vmatprep.subr.bf16.mxu0 %v15212_v28 }
0x1290   :  { %12386 = vmatmul.mubr.msk.f32.vlgmr.msra.gmra.mrb[60].mxu0 %vm18170_vm3, %v2843_v42 }
0x1291   :  { %12388 = vmatprep.mubr.msk.f32.mxu0 %vm18172_vm1, %v15211_v0 }
0x1294   :  { %12389 = vmatmul.mubr.msk.f32.gmra.mrb[62].mxu0 %vm18170_vm3, %v2845_v61 }
0x1295   :  { %12391 = vmatprep.mubr.msk.f32.mxu0 %vm18172_vm1, %v15211_v0 }
0x1298   :  { %12392 = vmatmul.mubr.msk.f32.gmra.mrb[64].mxu0 %vm18170_vm3, %v2847_v62 }
0x1299   :  { %12413 = vmatprep.mubr.msk.f32.mxu0 %vm18172_vm1, %v15211_v0 }
0x1357   :  { %v2703_v39 = vpop.f32.mrb[54].mxu0 }
0x1358   :  { %v2704_v43 = vadd.f32 %v2703_v39, %v15822_v14  ;;  %v12357_v1 = vpop.f32.mrb[55].mxu0 }
0x135a   :  { %v2717_v48 = vsel %vm901_vm15, %v2704_v43, -inf }
0x135b   :  { %2718 = vmax.xlane.f32.xlu0 %v2717_v48  ;;  %v2708_v51 = vpop.f32.mrb[56].mxu0 }
0x135c   :  { %v2709_v15 = vadd.f32 %v2708_v51, %v15832_v18  ;;  %v12360_v16 = vpop.f32.mrb[57].mxu0 }
0x135e   :  { %v2720_v52 = vsel %vm901_vm15, %v2709_v15, -inf }
0x135f   :  { %2721 = vmax.xlane.f32.xlu1 %v2720_v52  ;;  %v2713_v60 = vpop.f32.mrb[58].mxu0 }
0x1360   :  { %v2714_v63 = vadd.f32 %v2713_v60, %v15845_v24  ;;  %v12363_v53 = vpop.f32.mrb[59].mxu0 }
0x1362   :  { %v2723_v23 = vsel %vm908_vm6, %v2714_v63, -inf }
0x1363   :  { %2724 = vmax.xlane.f32.xlu0 %v2723_v23  ;;  %v2932_v26 = vpop.f32.mrb[60].mxu0 }
0x1364   :  { %v2933_v4 = vadd.f32 %v2932_v26, %v15822_v14  ;;  %v12387_v29 = vpop.f32.mrb[61].mxu0 }
0x1366   :  { %v2946_v32 = vsel %vm901_vm15, %v2933_v4, -inf }
0x1367   :  { %2947 = vmax.xlane.f32.xlu0 %v2946_v32  ;;  %v2937_v34 = vpop.f32.mrb[62].mxu0 }
0x1368   :  { %v2938_v35 = vadd.f32 %v2937_v34, %v15832_v18  ;;  %v12390_v36 = vpop.f32.mrb[63].mxu0 }
0x136a   :  { %v2949_v37 = vsel %vm901_vm15, %v2938_v35, -inf }
0x136b   :  { %2950 = vmax.xlane.f32.xlu1 %v2949_v37  ;;  %v2942_v3 = vpop.f32.mrb[64].mxu0 }
0x136c   :  { %v2943_v25 = vadd.f32 %v2942_v3, %v15845_v24  ;;  %v12393_v38 = vpop.f32.mrb[65].mxu0 }
0x136e   :  { %v2952_v49 = vsel %vm908_vm6, %v2943_v25, -inf }
0x136f   :  { %2953 = vmax.xlane.f32.xlu0 %v2952_v49 }
0x13e8   :  { %v2719_v54 = vpop.xlane.xlu0 %2718 }
0x13e9   :  { %v2726_v55 = vsub.f32 %v2704_v43, %v2719_v54 }
0x13eb   :  { %v2729_v47 = vmul.f32 1.442695, %v2726_v55 }
0x13ec   :  { %v2722_v56 = vpop.xlane.xlu1 %2721 }
0x13ed   :  { %14226 = vpow2.f32 %v2729_v47  ;;  %v2727_v58 = vsub.f32 %v2709_v15, %v2722_v56 }
0x13ef   :  { %v2731_v17 = vmul.f32 1.442695, %v2727_v58 }
0x13f0   :  { %v2725_v50 = vpop.xlane.xlu0 %2724 }
0x13f1   :  { %14228 = vpow2.f32 %v2731_v17  ;;  %v2728_v44 = vsub.f32 %v2714_v63, %v2725_v50 }
0x13f3   :  { %v2733_v59 = vmul.f32 1.442695, %v2728_v44 }
0x13f4   :  { %v2948_v42 = vpop.xlane.xlu0 %2947 }
0x13f5   :  { %14230 = vpow2.f32 %v2733_v59  ;;  %v2955_v61 = vsub.f32 %v2933_v4, %v2948_v42 }
0x13f7   :  { %v14227_v62 = vpop.eup %14226  ;;  %v2958_v39 = vmul.f32 1.442695, %v2955_v61  ;;  %v2496_v61 = vld [vmem:[%s18255_s6] sm:$0xff] }
0x13f8   :  { %v2951_v1 = vpop.xlane.xlu1 %2950  ;;  %v2735_v48 = vsel %vm901_vm15, %v14227_v62, 0.0 }
0x13f9   :  { %14232 = vpow2.f32 %v2958_v39  ;;  %v2956_v51 = vsub.f32 %v2938_v35, %v2951_v1  ;;  %2736 = vadd.xlane.f32.xlu1 %v2735_v48 }
0x13fb   :  { %v14229_v43 = vpop.eup %14228  ;;  %v2960_v16 = vmul.f32 1.442695, %v2956_v51 }
0x13fc   :  { %v2954_v52 = vpop.xlane.xlu0 %2953  ;;  %v2738_v15 = vsel %vm901_vm15, %v14229_v43, 0.0 }
0x13fd   :  { %14234 = vpow2.f32 %v2960_v16  ;;  %v2957_v60 = vsub.f32 %v2943_v25, %v2954_v52  ;;  %2739 = vadd.xlane.f32.xlu0 %v2738_v15 }
0x13ff   :  { %v14231_v63 = vpop.eup %14230  ;;  %v2962_v53 = vmul.f32 1.442695, %v2957_v60  ;;  %v2498_v60 = vld [vmem:[%s18255_s6 + $0x10] sm:$0xff] }
0x1400   :  { %v2741_v23 = vsel %vm908_vm6, %v14231_v63, 0.0 }
0x1401   :  { %14236 = vpow2.f32 %v2962_v53  ;;  %2742 = vadd.xlane.f32.xlu1 %v2741_v23 }
0x1403   :  { %v14233_v26 = vpop.eup %14232 }
0x1404   :  { %v2964_v4 = vsel %vm901_vm15, %v14233_v26, 0.0 }
0x1405   :  { %2965 = vadd.xlane.f32.xlu0 %v2964_v4 }
0x1407   :  { %v14235_v29 = vpop.eup %14234 }
0x1408   :  { %v2967_v32 = vsel %vm901_vm15, %v14235_v29, 0.0 }
0x1409   :  { %2968 = vadd.xlane.f32.xlu1 %v2967_v32 }
0x140b   :  { %v14237_v34 = vpop.eup %14236 }
0x140c   :  { %v2970_v35 = vsel %vm908_vm6, %v14237_v34, 0.0 }
0x140d   :  { %2971 = vadd.xlane.f32.xlu0 %v2970_v35 }
0x141a   :  { %14002 = vrot.lane.b32.xlu1 %v16198_v27, %s15216_s4 }
0x141e   :  { %14007 = vrot.lane.b32.xlu1 %v16196_v22, %s15218_s18 }
0x1422   :  { %3268 = vrot.lane.b32.xlu1 %v16200_v9, %s15218_s18 }
0x1423   :  { %2985 = vrot.lane.b32.xlu0 %v16207_v41, %s15216_s4 }
0x1426   :  { %3260 = vrot.lane.b32.xlu1 %v16215_v40, %s15219_s8 }
0x1427   :  { %3258 = vrot.lane.b32.xlu0 %v16220_v45, %s15219_s8 }
0x142b   :  { %3262 = vrot.lane.b32.xlu0 %v16225_v46, %s15219_s8 }
0x1486   :  { %v2737_v36 = vpop.xlane.xlu1 %2736 }
0x1487   :  { %14238 = vrcp.f32 %v2737_v36 }
0x148a   :  { %v2740_v37 = vpop.xlane.xlu0 %2739 }
0x148b   :  { %14240 = vrcp.f32 %v2740_v37 }
0x148e   :  { %v2743_v3 = vpop.xlane.xlu1 %2742 }
0x148f   :  { %14242 = vrcp.f32 %v2743_v3 }
0x1491   :  { %v14239_v25 = vpop.eup %14238 }
0x1492   :  { %v2747_v38 = vmul.f32 %v14239_v25, %v14227_v62  ;;  %v2966_v49 = vpop.xlane.xlu0 %2965  ;;  %v2497_v62 = vld [vmem:[%s18255_s6 + $0x8] sm:$0xff] }
0x1493   :  { %14244 = vrcp.f32 %v2966_v49  ;;  %v13447_v1 = vpack.c.bf16 %v2497_v62, %v2496_v61 }
0x1494   :  { %12371 = vmatmul.mubr.msk.f32.vlgmr.msra.gmra.mrb[42].mxu1 %vm901_vm15, %v2747_v38 }
0x1495   :  { %v14241_v54 = vpop.eup %14240  ;;  %12373 = vmatprep.mubr.msk.f32.mxu1 %vm18172_vm1, %v15211_v0 }
0x1496   :  { %v2969_v55 = vpop.xlane.xlu1 %2968  ;;  %v2748_v47 = vmul.f32 %v14241_v54, %v14229_v43 }
0x1497   :  { %14246 = vrcp.f32 %v2969_v55 }
0x1498   :  { %12374 = vmatmul.mubr.msk.f32.gmra.mrb[44].mxu1 %vm901_vm15, %v2748_v47 }
0x1499   :  { %v14243_v56 = vpop.eup %14242  ;;  %12376 = vmatprep.mubr.msk.f32.mxu1 %vm18172_vm1, %v15211_v0 }
0x149a   :  { %v14003_v58 = vpop.permute.xlu1 %14002  ;;  %v2972_v17 = vpop.xlane.xlu0 %2971  ;;  %v2749_v50 = vmul.f32 %v14243_v56, %v14231_v63  ;;  %v2499_v63 = vld [vmem:[%s18255_s6 + $0x18] sm:$0xff] }
0x149b   :  { %v14005_v44 = vunpack.i.h.bf16 %v14003_v58  ;;  %v14004_v59 = vunpack.i.l.bf16 %v14003_v58  ;;  %14248 = vrcp.f32 %v2972_v17  ;;  %v13444_v53 = vpack.c.bf16 %v2499_v63, %v2498_v60 }
0x149c   :  { %12377 = vmatmul.mubr.msk.f32.gmra.mrb[46].mxu1 %vm901_vm15, %v2749_v50 }
0x149d   :  { %v13441_v42 = vpack.c.bf16 %v14005_v44, %v14004_v59  ;;  %12400 = vmatprep.mubr.msk.f32.mxu1 %vm18172_vm1, %v15211_v0  ;;  %v14245_v39 = vpop.eup %14244  ;;  %13445 = vmatpush3.bf16.msra.mxu0 %v13444_v53 }
0x149e   :  { %v2976_v48 = vmul.f32 %v14245_v39, %v14233_v26  ;;  %v2986_v51 = vpop.permute.xlu0 %2985  ;;  %13449 = vmatprep.subr.bf16.mxu0 %v15212_v28 }
0x149f   :  { %13442 = vmatpush3.bf16.msra.mxu1 %v13441_v42 }
0x14a0   :  { %12398 = vmatprep.subr.mxu1 %v15211_v0 }
0x14a1   :  { %v14247_v43 = vpop.eup %14246 }
0x14a2   :  { %v2977_v16 = vmul.f32 %v14247_v43, %v14235_v29  ;;  %v3259_v58 = vpop.permute.xlu0 %3258 }
0x14a3   :  { %12399 = vmatpush3.msk.msra.mxu1 %vm18171_vm2, %v2986_v51 }
0x14a4   :  { %12401 = vmatmul.mubr.msk.f32.vlgmr.msra.gmra.mrb[48].mxu1 %vm901_vm15, %v2976_v48  ;;  %13446 = vmatprep.subr.bf16.mxu1 %v15212_v28 }
0x14a5   :  { %12403 = vmatprep.mubr.msk.f32.mxu1 %vm18172_vm1, %v15211_v0  ;;  %13448 = vmatpush3.bf16.msra.mxu1 %v13447_v1  ;;  %v14249_v52 = vpop.eup %14248 }
0x14a6   :  { %13453 = vmatprep.subr.bf16.mxu1 %v15212_v28  ;;  %v2978_v15 = vmul.f32 %v14249_v52, %v14237_v34  ;;  %v14008_v34 = vpop.permute.xlu1 %14007  ;;  %v3263_v50 = vpop.permute.xlu0 %3262 }
0x14a7   :  { %v14010_v36 = vunpack.i.h.bf16 %v14008_v34  ;;  %v14009_v37 = vunpack.i.l.bf16 %v14008_v34 }
0x14a8   :  { %12404 = vmatmul.mubr.msk.f32.gmra.mrb[50].mxu1 %vm901_vm15, %v2977_v16 }
0x14a9   :  { %12406 = vmatprep.mubr.msk.f32.mxu1 %vm18172_vm1, %v15211_v0  ;;  %v13450_v3 = vpack.c.bf16 %v14010_v36, %v14009_v37 }
0x14aa   :  { %v3269_v47 = vpop.permute.xlu1 %3268 }
0x14ac   :  { %12407 = vmatmul.mubr.msk.f32.gmra.mrb[52].mxu1 %vm901_vm15, %v2978_v15 }
0x14ad   :  { %12426 = vmatprep.mubr.msk.f32.mxu1 %vm18172_vm1, %v15211_v0 }
0x14ae   :  { %v3261_v17 = vpop.permute.xlu1 %3260 }
0x1567   :  { %v2828_v23 = vpop.f32.mrb[42].mxu1 }
0x1568   :  { %v12372_v26 = vpop.f32.mrb[43].mxu1  ;;  %12427 = vmatmul.mubr.msk.f32.vlgmr.msra.gmra.mrb[54].mxu1 %vm18170_vm3, %v2828_v23 }
0x1569   :  { %12429 = vmatprep.mubr.msk.f32.mxu1 %vm18172_vm1, %v15211_v0 }
0x156b   :  { %v2833_v4 = vpop.f32.mrb[44].mxu1 }
0x156c   :  { %v12375_v29 = vpop.f32.mrb[45].mxu1  ;;  %12430 = vmatmul.mubr.msk.f32.gmra.mrb[56].mxu1 %vm18170_vm3, %v2833_v4 }
0x156d   :  { %12432 = vmatprep.mubr.msk.f32.mxu1 %vm18172_vm1, %v15211_v0 }
0x156f   :  { %v2838_v32 = vpop.f32.mrb[46].mxu1 }
0x1570   :  { %v12378_v35 = vpop.f32.mrb[47].mxu1  ;;  %12433 = vmatmul.mubr.msk.f32.gmra.mrb[58].mxu1 %vm18170_vm3, %v2838_v32 }
0x1571   :  { %12456 = vmatprep.mubr.msk.f32.mxu1 %vm18172_vm1, %v15211_v0 }
0x1577   :  { %v3066_v25 = vpop.f32.mrb[48].mxu1 }
0x1578   :  { %v12402_v38 = vpop.f32.mrb[49].mxu1  ;;  %12414 = vmatmul.mubr.msk.f32.vlgmr.msra.gmra.mrb[66].mxu0 %vm18170_vm3, %v3066_v25 }
0x1579   :  { %13452 = vmatpush3.bf16.xpose.msk.msra.mxu0 %vm15747_vm4, %v13450_v3  ;;  %12416 = vmatprep.mubr.msk.f32.mxu0 %vm18172_vm1, %v15211_v0 }
0x157a   :  { %12439 = vmatprep.subr.mxu0 %v15211_v0 }
0x157b   :  { %v3071_v49 = vpop.f32.mrb[50].mxu1 }
0x157c   :  { %v12405_v54 = vpop.f32.mrb[51].mxu1  ;;  %12417 = vmatmul.mubr.msk.f32.gmra.mrb[68].mxu0 %vm18170_vm3, %v3071_v49 }
0x157d   :  { %12419 = vmatprep.mubr.msk.f32.mxu0 %vm18172_vm1, %v15211_v0 }
0x157f   :  { %v3076_v55 = vpop.f32.mrb[52].mxu1 }
0x1580   :  { %v12408_v56 = vpop.f32.mrb[53].mxu1  ;;  %12420 = vmatmul.mubr.msk.f32.gmra.mrb[70].mxu0 %vm18170_vm3, %v3076_v55 }
0x1581   :  { %12440 = vmatpush3.xpose.msk.msra.mxu0 %vm18170_vm3, %v3269_v47  ;;  %12441 = vmatprep.mubr.msk.f32.mxu0 %vm18172_vm1, %v15211_v0 }
0x1582   :  { %13456 = vmatprep.subr.bf16.mxu0 %v15212_v28 }
0x1584   :  { %12442 = vmatmul.mubr.msk.f32.vlgmr.msra.gmra.mrb[72].mxu0 %vm18170_vm3, %v3259_v58 }
0x1585   :  { %12444 = vmatprep.mubr.msk.f32.mxu0 %vm18172_vm1, %v15211_v0 }
0x1588   :  { %12445 = vmatmul.mubr.msk.f32.gmra.mrb[74].mxu0 %vm18170_vm3, %v3261_v17 }
0x1589   :  { %12447 = vmatprep.mubr.msk.f32.mxu0 %vm18172_vm1, %v15211_v0 }
0x158c   :  { %12448 = vmatmul.mubr.msk.f32.gmra.mrb[76].mxu0 %vm18170_vm3, %v3263_v50 }
0x158d   :  { %12469 = vmatprep.mubr.msk.f32.mxu0 %vm18172_vm1, %v15211_v0 }
0x163b   :  { %v3244_v44 = vpop.f32.mrb[54].mxu1 }
0x163c   :  { %v12428_v59 = vpop.f32.mrb[55].mxu1 }
0x163f   :  { %v3249_v42 = vpop.f32.mrb[56].mxu1 }
0x1640   :  { %v12431_v61 = vpop.f32.mrb[57].mxu1 }
0x1643   :  { %v3254_v62 = vpop.f32.mrb[58].mxu1 }
0x1644   :  { %v12434_v39 = vpop.f32.mrb[59].mxu1 }
0x164b   :  { %v3155_v1 = vpop.f32.mrb[66].mxu0 }
0x164c   :  { %v16351_v48 = vadd.f32 %v3244_v44, %v3155_v1  ;;  %v12415_v51 = vpop.f32.mrb[67].mxu0  ;;  %v2501_v1 = vld [vmem:[%s18255_s6 + $0x28] sm:$0xff] }
0x164f   :  { %v3160_v43 = vpop.f32.mrb[68].mxu0 }
0x1650   :  { %v16353_v16 = vadd.f32 %v3249_v42, %v3160_v43  ;;  %v12418_v52 = vpop.f32.mrb[69].mxu0 }
0x1653   :  { %v3165_v15 = vpop.f32.mrb[70].mxu0 }
0x1654   :  { %v16355_v60 = vadd.f32 %v3254_v62, %v3165_v15  ;;  %v12421_v63 = vpop.f32.mrb[71].mxu0 }
0x1657   :  { %v3348_v53 = vpop.f32.mrb[72].mxu0 }
0x1658   :  { %v3349_v23 = vadd.f32 %v3348_v53, %v15822_v14  ;;  %v12443_v26 = vpop.f32.mrb[73].mxu0 }
0x165a   :  { %v3362_v4 = vsel %vm901_vm15, %v3349_v23, -inf }
0x165b   :  { %3363 = vmax.xlane.f32.xlu1 %v3362_v4  ;;  %v3353_v29 = vpop.f32.mrb[74].mxu0 }
0x165c   :  { %v3354_v32 = vadd.f32 %v3353_v29, %v15832_v18  ;;  %v12446_v34 = vpop.f32.mrb[75].mxu0 }
0x165e   :  { %v3365_v35 = vsel %vm901_vm15, %v3354_v32, -inf }
0x165f   :  { %3366 = vmax.xlane.f32.xlu0 %v3365_v35  ;;  %v3358_v36 = vpop.f32.mrb[76].mxu0 }
0x1660   :  { %v3359_v37 = vadd.f32 %v3358_v36, %v15845_v24  ;;  %v12449_v3 = vpop.f32.mrb[77].mxu0 }
0x1662   :  { %v3368_v25 = vsel %vm908_vm6, %v3359_v37, -inf }
0x1663   :  { %3369 = vmax.xlane.f32.xlu0 %v3368_v25 }
0x16e8   :  { %v3364_v38 = vpop.xlane.xlu1 %3363 }
0x16e9   :  { %v3371_v49 = vsub.f32 %v3349_v23, %v3364_v38 }
0x16eb   :  { %v3374_v54 = vmul.f32 1.442695, %v3371_v49 }
0x16ec   :  { %v3367_v55 = vpop.xlane.xlu0 %3366 }
0x16ed   :  { %14250 = vpow2.f32 %v3374_v54  ;;  %v3372_v47 = vsub.f32 %v3354_v32, %v3367_v55 }
0x16ef   :  { %v3376_v56 = vmul.f32 1.442695, %v3372_v47 }
0x16f0   :  { %v3370_v59 = vpop.xlane.xlu0 %3369 }
0x16f1   :  { %14252 = vpow2.f32 %v3376_v56  ;;  %v3373_v42 = vsub.f32 %v3359_v37, %v3370_v59 }
0x16f3   :  { %v3378_v61 = vmul.f32 1.442695, %v3373_v42 }
0x16f5   :  { %14254 = vpow2.f32 %v3378_v61 }
0x16f7   :  { %v14251_v58 = vpop.eup %14250 }
0x16f8   :  { %v3380_v17 = vsel %vm901_vm15, %v14251_v58, 0.0 }
0x16f9   :  { %3381 = vadd.xlane.f32.xlu1 %v3380_v17 }
0x16fb   :  { %v14253_v50 = vpop.eup %14252 }
0x16fc   :  { %v3383_v44 = vsel %vm901_vm15, %v14253_v50, 0.0 }
0x16fd   :  { %3384 = vadd.xlane.f32.xlu0 %v3383_v44 }
0x16ff   :  { %v14255_v62 = vpop.eup %14254 }
0x1700   :  { %v3386_v39 = vsel %vm908_vm6, %v14255_v62, 0.0 }
0x170a   :  { %3399 = vrot.lane.b32.xlu1 %v16207_v41, %s15219_s8 }
0x170e   :  { %14017 = vrot.lane.b32.xlu1 %v16196_v22, %s15220_s22  ;;  %v2500_v22 = vld [vmem:[%s18255_s6 + $0x20] sm:$0xff] }
0x1713   :  { %14012 = vrot.lane.b32.xlu0 %v16198_v27, %s15219_s8 }
0x1717   :  { %3596 = vrot.lane.b32.xlu0 %v16200_v9, %s15220_s22  ;;  %v13457_v9 = vpack.c.bf16 %v2501_v1, %v2500_v22 }
0x1719   :  { %13458 = vmatpush3.bf16.msra.mxu0 %v13457_v9 }
0x171a   :  { %13463 = vmatprep.subr.bf16.mxu0 %v15212_v28 }
0x171b   :  { %3588 = vrot.lane.b32.xlu0 %v16215_v40, %s15221_s23 }
0x1732   :  { %3387 = vadd.xlane.f32.xlu1 %v3386_v39 }
0x1743   :  { %3586 = vrot.lane.b32.xlu1 %v16220_v45, %s15221_s23 }
0x1747   :  { %3590 = vrot.lane.b32.xlu1 %v16225_v46, %s15221_s23 }
0x1786   :  { %v3382_v40 = vpop.xlane.xlu1 %3381 }
0x1787   :  { %14256 = vrcp.f32 %v3382_v40 }
0x178a   :  { %v3385_v51 = vpop.xlane.xlu0 %3384  ;;  %v3400_v52 = vpop.permute.xlu1 %3399 }
0x178b   :  { %14258 = vrcp.f32 %v3385_v51 }
0x178e   :  { %v14013_v43 = vpop.permute.xlu0 %14012  ;;  %v14018_v45 = vpop.permute.xlu1 %14017 }
0x178f   :  { %v14015_v15 = vunpack.i.h.bf16 %v14013_v43  ;;  %v14014_v63 = vunpack.i.l.bf16 %v14013_v43  ;;  %v14020_v4 = vunpack.i.h.bf16 %v14018_v45  ;;  %v14019_v29 = vunpack.i.l.bf16 %v14018_v45 }
0x1791   :  { %v13454_v53 = vpack.c.bf16 %v14015_v15, %v14014_v63  ;;  %v14257_v23 = vpop.eup %14256  ;;  %v13460_v34 = vpack.c.bf16 %v14020_v4, %v14019_v29 }
0x1792   :  { %v3392_v46 = vmul.f32 %v14257_v23, %v14251_v58  ;;  %v3597_v35 = vpop.permute.xlu0 %3596 }
0x1793   :  { %13455 = vmatpush3.bf16.msra.mxu1 %v13454_v53 }
0x1794   :  { %12454 = vmatprep.subr.mxu1 %v15211_v0 }
0x1795   :  { %v14259_v26 = vpop.eup %14258 }
0x1796   :  { %v3393_v32 = vmul.f32 %v14259_v26, %v14253_v50  ;;  %v3589_v38 = vpop.permute.xlu0 %3588 }
0x1797   :  { %12455 = vmatpush3.msk.msra.mxu1 %vm18171_vm2, %v3400_v52 }
0x1798   :  { %12457 = vmatmul.mubr.msk.f32.vlgmr.msra.gmra.mrb[60].mxu1 %vm901_vm15, %v3392_v46  ;;  %13459 = vmatprep.subr.bf16.mxu1 %v15212_v28 }
0x1799   :  { %12459 = vmatprep.mubr.msk.f32.mxu1 %vm18172_vm1, %v15211_v0 }
0x179c   :  { %12460 = vmatmul.mubr.msk.f32.gmra.mrb[62].mxu1 %vm901_vm15, %v3393_v32 }
0x179d   :  { %12462 = vmatprep.mubr.msk.f32.mxu1 %vm18172_vm1, %v15211_v0 }
0x179e   :  { %13462 = vmatpush3.bf16.xpose.msk.msra.mxu1 %vm15747_vm4, %v13460_v34 }
0x179f   :  { %12482 = vmatprep.subr.mxu1 %v15211_v0 }
0x17a6   :  { %12483 = vmatpush3.xpose.msk.msra.mxu1 %vm18170_vm3, %v3597_v35 }
0x17a7   :  { %13466 = vmatprep.subr.bf16.mxu1 %v15212_v28 }
0x17bf   :  { %v3388_v36 = vpop.xlane.xlu1 %3387 }
0x17c0   :  { %14260 = vrcp.f32 %v3388_v36 }
0x17c3   :  { %v3587_v25 = vpop.permute.xlu1 %3586 }
0x17c7   :  { %v3591_v49 = vpop.permute.xlu1 %3590 }
0x17ca   :  { %v14261_v37 = vpop.eup %14260 }
0x17cb   :  { %v3394_v3 = vmul.f32 %v14261_v37, %v14255_v62 }
0x17cd   :  { %12463 = vmatmul.mubr.msk.f32.gmra.mrb[64].mxu1 %vm901_vm15, %v3394_v3 }
0x17ce   :  { %12484 = vmatprep.mubr.msk.f32.mxu1 %vm18172_vm1, %v15211_v0 }
0x17d1   :  { %12485 = vmatmul.mubr.msk.f32.vlgmr.msra.gmra.mrb[66].mxu1 %vm18170_vm3, %v3587_v25 }
0x17d2   :  { %12487 = vmatprep.mubr.msk.f32.mxu1 %vm18172_vm1, %v15211_v0 }
0x17d5   :  { %12488 = vmatmul.mubr.msk.f32.gmra.mrb[68].mxu1 %vm18170_vm3, %v3589_v38 }
0x17d6   :  { %12490 = vmatprep.mubr.msk.f32.mxu1 %vm18172_vm1, %v15211_v0 }
0x17d9   :  { %12491 = vmatmul.mubr.msk.f32.gmra.mrb[70].mxu1 %vm18170_vm3, %v3591_v49 }
0x17da   :  { %12512 = vmatprep.mubr.msk.f32.mxu1 %vm18172_vm1, %v15211_v0 }
0x186b   :  { %v3480_v54 = vpop.f32.mrb[60].mxu1 }
0x186c   :  { %v12458_v55 = vpop.f32.mrb[61].mxu1  ;;  %12470 = vmatmul.mubr.msk.f32.vlgmr.msra.gmra.mrb[78].mxu0 %vm18170_vm3, %v3480_v54 }
0x186d   :  { %12472 = vmatprep.mubr.msk.f32.mxu0 %vm18172_vm1, %v15211_v0 }
0x186f   :  { %v3485_v47 = vpop.f32.mrb[62].mxu1 }
0x1870   :  { %v12461_v56 = vpop.f32.mrb[63].mxu1  ;;  %12473 = vmatmul.mubr.msk.f32.gmra.mrb[80].mxu0 %vm18170_vm3, %v3485_v47 }
0x1871   :  { %12475 = vmatprep.mubr.msk.f32.mxu0 %vm18172_vm1, %v15211_v0 }
0x18a0   :  { %v3490_v58 = vpop.f32.mrb[64].mxu1 }
0x18a1   :  { %v12464_v17 = vpop.f32.mrb[65].mxu1  ;;  %12476 = vmatmul.mubr.msk.f32.gmra.mrb[82].mxu0 %vm18170_vm3, %v3490_v58 }
0x18a2   :  { %12499 = vmatprep.mubr.msk.f32.mxu0 %vm18172_vm1, %v15211_v0 }
0x18a4   :  { %v3676_v50 = vpop.f32.mrb[66].mxu1 }
0x18a5   :  { %v3677_v44 = vadd.f32 %v3676_v50, %v15822_v14  ;;  %v12486_v59 = vpop.f32.mrb[67].mxu1 }
0x18a7   :  { %v3690_v42 = vsel %vm901_vm15, %v3677_v44, -inf }
0x18a8   :  { %3691 = vmax.xlane.f32.xlu0 %v3690_v42  ;;  %v3681_v61 = vpop.f32.mrb[68].mxu1 }
0x18a9   :  { %v3682_v62 = vadd.f32 %v3681_v61, %v15832_v18  ;;  %v12489_v39 = vpop.f32.mrb[69].mxu1 }
0x18ab   :  { %v3693_v22 = vsel %vm901_vm15, %v3682_v62, -inf }
0x18ac   :  { %3694 = vmax.xlane.f32.xlu1 %v3693_v22  ;;  %v3686_v1 = vpop.f32.mrb[70].mxu1 }
0x18ad   :  { %v3687_v9 = vadd.f32 %v3686_v1, %v15845_v24  ;;  %v12492_v40 = vpop.f32.mrb[71].mxu1 }
0x18af   :  { %v3696_v51 = vsel %vm908_vm6, %v3687_v9, -inf }
0x18b0   :  { %3697 = vmax.xlane.f32.xlu0 %v3696_v51 }
0x1935   :  { %v3692_v43 = vpop.xlane.xlu0 %3691 }
0x1936   :  { %v3699_v14 = vsub.f32 %v3677_v44, %v3692_v43 }
0x1938   :  { %v3702_v52 = vmul.f32 1.442695, %v3699_v14 }
0x1939   :  { %v3695_v15 = vpop.xlane.xlu1 %3694 }
0x193a   :  { %14262 = vpow2.f32 %v3702_v52  ;;  %v3700_v63 = vsub.f32 %v3682_v62, %v3695_v15 }
0x193c   :  { %v3704_v53 = vmul.f32 1.442695, %v3700_v63  ;;  %v11298_v63 = vld [vmem:[%s18256_s10] ss:$0 sm:$0xff] }
0x193d   :  { %v3698_v23 = vpop.xlane.xlu0 %3697 }
0x193e   :  { %14264 = vpow2.f32 %v3704_v53  ;;  %v3701_v18 = vsub.f32 %v3687_v9, %v3698_v23 }
0x193f   :  { %v3569_v45 = vpop.f32.mrb[78].mxu0 }
0x1940   :  { %v3706_v46 = vmul.f32 1.442695, %v3701_v18  ;;  %v3583_v26 = vadd.f32 %v3569_v45, %v16351_v48  ;;  %v12471_v4 = vpop.f32.mrb[79].mxu0  ;;  %v2502_v48 = vld [vmem:[%s18255_s6 + $0x30] sm:$0xff] }
0x1942   :  { %14266 = vpow2.f32 %v3706_v46 }
0x1943   :  { %v3574_v24 = vpop.f32.mrb[80].mxu0 }
0x1944   :  { %v14263_v29 = vpop.eup %14262  ;;  %v3584_v32 = vadd.f32 %v3574_v24, %v16353_v16  ;;  %v12474_v34 = vpop.f32.mrb[81].mxu0  ;;  %v2503_v16 = vld [vmem:[%s18255_s6 + $0x38] sm:$0xff] }
0x1945   :  { %v3708_v35 = vsel %vm901_vm15, %v14263_v29, 0.0  ;;  %v13467_v38 = vpack.c.bf16 %v2503_v16, %v2502_v48 }
0x1946   :  { %3709 = vadd.xlane.f32.xlu0 %v3708_v35 }
0x1947   :  { %13468 = vmatpush3.bf16.msra.mxu1 %v13467_v38 }
0x1948   :  { %v14265_v36 = vpop.eup %14264 }
0x1949   :  { %v3711_v37 = vsel %vm901_vm15, %v14265_v36, 0.0 }
0x194a   :  { %3712 = vadd.xlane.f32.xlu1 %v3711_v37 }
0x194c   :  { %v14267_v3 = vpop.eup %14266 }
0x194d   :  { %v3714_v25 = vsel %vm908_vm6, %v14267_v3, 0.0 }
0x194e   :  { %3715 = vadd.xlane.f32.xlu0 %v3714_v25 }
0x195b   :  { %14022 = vrot.lane.b32.xlu1 %v16198_v27, %s15221_s23 }
0x1964   :  { %3727 = vrot.lane.b32.xlu0 %v16207_v41, %s15221_s23 }
0x1974   :  { %v3579_v49 = vpop.f32.mrb[82].mxu0 }
0x1975   :  { %v3585_v54 = vadd.f32 %v3579_v49, %v16355_v60  ;;  %v12477_v55 = vpop.f32.mrb[83].mxu0 }
0x19d3   :  { %v3710_v47 = vpop.xlane.xlu0 %3709 }
0x19d4   :  { %14268 = vrcp.f32 %v3710_v47 }
0x19d7   :  { %v3713_v56 = vpop.xlane.xlu1 %3712 }
0x19d8   :  { %14270 = vrcp.f32 %v3713_v56 }
0x19db   :  { %v14023_v58 = vpop.permute.xlu1 %14022  ;;  %v3716_v17 = vpop.xlane.xlu0 %3715 }
0x19dc   :  { %v14025_v50 = vunpack.i.h.bf16 %v14023_v58  ;;  %v14024_v44 = vunpack.i.l.bf16 %v14023_v58  ;;  %14272 = vrcp.f32 %v3716_v17 }
0x19de   :  { %v13464_v27 = vpack.c.bf16 %v14025_v50, %v14024_v44  ;;  %v14269_v59 = vpop.eup %14268  ;;  %v3984_v44 = vld [vmem:[%s18257_s27 + $0x8] sm:$0xff] }
0x19df   :  { %v3720_v41 = vmul.f32 %v14269_v59, %v14263_v29  ;;  %v3728_v42 = vpop.permute.xlu0 %3727 }
0x19e0   :  { %13465 = vmatpush3.bf16.msra.mxu0 %v13464_v27  ;;  %v3986_v27 = vld [vmem:[%s18257_s27 + $0x18] sm:$0xff] }
0x19e1   :  { %12497 = vmatprep.subr.mxu0 %v15211_v0  ;;  %v13469_v59 = vpack.c.bf16 %v3986_v27, %v3984_v44 }
0x19e2   :  { %v14271_v61 = vpop.eup %14270 }
0x19e3   :  { %v3721_v60 = vmul.f32 %v14271_v61, %v14265_v36 }
0x19e4   :  { %12498 = vmatpush3.msk.msra.mxu0 %vm18171_vm2, %v3728_v42  ;;  %v3985_v42 = vld [vmem:[%s18257_s27 + $0x10] sm:$0xff] }
0x19e5   :  { %12500 = vmatmul.mubr.msk.f32.vlgmr.msra.gmra.mrb[84].mxu0 %vm901_vm15, %v3720_v41  ;;  %v3983_v41 = vld [vmem:[%s18257_s27] sm:$0xff]  ;;  %13470 = vmatprep.subr.bf16.mxu0 %v13469_v59  ;;  %v4006_v59 = vld [vmem:[%s18259_s11 + $0x30] sm:$0xff] }
0x19e6   :  { %12502 = vmatprep.mubr.msk.f32.mxu0 %vm18172_vm1, %v15211_v0  ;;  %v14273_v62 = vpop.eup %14272  ;;  %v13471_v61 = vpack.c.bf16 %v3985_v42, %v3983_v41  ;;  %v4007_v41 = vld [vmem:[%s18259_s11 + $0x38] sm:$0xff]  ;;  %v4024_v42 = vld [vmem:[%s18259_s11 + $0xc0] sm:$0xff] }
0x19e7   :  { %v3722_v39 = vmul.f32 %v14273_v62, %v14267_v3  ;;  %v3990_v62 = vld [vmem:[%s18257_s27 + $0x38] sm:$0xff] }
0x19e8   :  { %13472 = vmatpush1.bf16.msra.mxu0 %v13471_v61  ;;  %v4025_v61 = vld [vmem:[%s18259_s11 + $0xc8] sm:$0xff] }
0x19e9   :  { %12503 = vmatmul.mubr.msk.f32.gmra.mrb[86].mxu0 %vm901_vm15, %v3721_v60  ;;  %v3988_v60 = vld [vmem:[%s18257_s27 + $0x28] sm:$0xff] }
0x19ea   :  { %12505 = vmatprep.mubr.msk.f32.mxu0 %vm18172_vm1, %v15211_v0 }
0x19ed   :  { %12506 = vmatmul.mubr.msk.f32.gmra.mrb[88].mxu0 %vm901_vm15, %v3722_v39  ;;  %v13473_v39 = vpack.c.bf16 %v3990_v62, %v3988_v60  ;;  %v13499_v60 = vpack.c.bf16 %v4007_v41, %v4006_v59  ;;  %v13501_v62 = vpack.c.bf16 %v4025_v61, %v4024_v42  ;;  %v4301_v61 = vld [vmem:[%s18258_s5 + $0x40] sm:$0xff] }
0x19ee   :  { %4119 = vmatprep.mubr.f32.mxu0 %v15211_v0 }
0x19ef   :  { %13474 = vmatprep.subr.bf16.mxu0 %v13473_v39  ;;  %v4008_v39 = vld [vmem:[%s18259_s11 + $0x40] sm:$0xff] }
0x1ab8   :  { %v3808_v22 = vpop.f32.mrb[84].mxu0 }
0x1ab9   :  { %v12501_v1 = vpop.f32.mrb[85].mxu0  ;;  %12513 = vmatmul.mubr.msk.f32.vlgmr.msra.gmra.mrb[72].mxu1 %vm18170_vm3, %v3808_v22  ;;  %v3987_v22 = vld [vmem:[%s18257_s27 + $0x20] sm:$0xff] }
0x1aba   :  { %12515 = vmatprep.mubr.msk.f32.mxu1 %vm18172_vm1, %v15211_v0  ;;  %v3989_v1 = vld [vmem:[%s18257_s27 + $0x30] sm:$0xff] }
0x1abc   :  { %v3813_v9 = vpop.f32.mrb[86].mxu0 }
0x1abd   :  { %v12504_v40 = vpop.f32.mrb[87].mxu0  ;;  %12516 = vmatmul.mubr.msk.f32.gmra.mrb[74].mxu1 %vm18170_vm3, %v3813_v9  ;;  %v13475_v9 = vpack.c.bf16 %v3989_v1, %v3987_v22  ;;  %v4009_v22 = vld [vmem:[%s18259_s11 + $0x48] sm:$0xff]  ;;  %v4026_v1 = vld [vmem:[%s18259_s11 + $0xd0] sm:$0xff] }
0x1abe   :  { %12518 = vmatprep.mubr.msk.f32.mxu1 %vm18172_vm1, %v15211_v0  ;;  %v3992_v40 = vld [vmem:[%s18257_s27 + $0x48] sm:$0xff] }
0x1abf   :  { %13476 = vmatpush1.bf16.msra.mxu0 %v13475_v9  ;;  %v4027_v9 = vld [vmem:[%s18259_s11 + $0xd8] sm:$0xff] }
0x1ac0   :  { %v3818_v51 = vpop.f32.mrb[88].mxu0 }
0x1ac1   :  { %v12507_v43 = vpop.f32.mrb[89].mxu0  ;;  %12519 = vmatmul.mubr.msk.f32.gmra.mrb[76].mxu1 %vm18170_vm3, %v3818_v51  ;;  %v3994_v51 = vld [vmem:[%s18257_s27 + $0x58] sm:$0xff] }
0x1ac2   :  { %v13477_v43 = vpack.c.bf16 %v3994_v51, %v3992_v40  ;;  %v13503_v40 = vpack.c.bf16 %v4009_v22, %v4008_v39  ;;  %v13505_v51 = vpack.c.bf16 %v4027_v9, %v4026_v1  ;;  %v4308_v39 = vld [vmem:[%s18258_s5 + $0x78] sm:$0xff] }
0x1ac4   :  { %13478 = vmatprep.subr.bf16.mxu0 %v13477_v43  ;;  %v4010_v43 = vld [vmem:[%s18259_s11 + $0x50] sm:$0xff] }
0x1b8c   :  { %v3897_v14 = vpop.f32.mrb[72].mxu1 }
0x1b8d   :  { %v3911_v52 = vadd.f32 %v3897_v14, %v3583_v26  ;;  %v12514_v15 = vpop.f32.mrb[73].mxu1  ;;  %v3991_v14 = vld [vmem:[%s18257_s27 + $0x40] sm:$0xff] }
0x1b8f   :  { %v3914_v53 = vadd.f32 %v3911_v52, %v16175_v2  ;;  %v3993_v52 = vld [vmem:[%s18257_s27 + $0x50] sm:$0xff] }
0x1b90   :  { %v3902_v23 = vpop.f32.mrb[74].mxu1  ;;  %v13479_v15 = vpack.c.bf16 %v3993_v52, %v3991_v14  ;;  %v4011_v14 = vld [vmem:[%s18259_s11 + $0x58] sm:$0xff]  ;;  %v4028_v52 = vld [vmem:[%s18259_s11 + $0xe0] sm:$0xff] }
0x1b91   :  { %v3912_v18 = vadd.f32 %v3902_v23, %v3584_v32  ;;  %v12517_v45 = vpop.f32.mrb[75].mxu1  ;;  %v3923_v46 = vadd.f32 %v11298_v63, %v3914_v53  ;;  %v3998_v53 = vld [vmem:[%s18257_s27 + $0x78] sm:$0xff] }
0x1b92   :  { %13480 = vmatpush1.bf16.msra.mxu0 %v13479_v15  ;;  %v3997_v45 = vld [vmem:[%s18257_s27 + $0x70] sm:$0xff]  ;;  %v4029_v15 = vld [vmem:[%s18259_s11 + $0xe8] sm:$0xff] }
0x1b93   :  { %v3915_v4 = vadd.f32 %v3912_v18, %v16181_v19  ;;  %v3926_v24 = vsel %vm18169_vm0, %v3923_v46, 0.0  ;;  %v3995_v18 = vld [vmem:[%s18257_s27 + $0x60] sm:$0xff] }
0x1b94   :  { %3927 = vadd.xlane.f32.xlu1 %v3926_v24  ;;  %v3907_v29 = vpop.f32.mrb[76].mxu1  ;;  %v4296_v24 = vld [vmem:[%s18258_s5 + $0x18] sm:$0xff] }
0x1b95   :  { %v3913_v34 = vadd.f32 %v3907_v29, %v3585_v54  ;;  %v12520_v35 = vpop.f32.mrb[77].mxu1  ;;  %v3924_v36 = vadd.f32 %v11298_v63, %v3915_v4  ;;  %v4294_v4 = vld [vmem:[%s18258_s5 + $0x8] sm:$0xff] }
0x1b96   :  { %v13517_v29 = vpack.c.bf16 %v4296_v24, %v4294_v4  ;;  %v4017_v35 = vld [vmem:[%s18259_s11 + $0x88] sm:$0xff] }
0x1b97   :  { %v3916_v37 = vadd.f32 %v3913_v34, %v16187_v21  ;;  %v3929_v26 = vsel %vm18169_vm0, %v3924_v36, 0.0  ;;  %v4016_v34 = vld [vmem:[%s18259_s11 + $0x80] sm:$0xff] }
0x1b98   :  { %3930 = vadd.xlane.f32.xlu0 %v3929_v26  ;;  %v4001_v26 = vld [vmem:[%s18259_s11 + $0x8] sm:$0xff] }
0x1b99   :  { %v3925_v3 = vadd.f32 %v11298_v63, %v3916_v37  ;;  %v3996_v63 = vld [vmem:[%s18257_s27 + $0x68] sm:$0xff]  ;;  %v13485_v37 = vpack.c.bf16 %v4017_v35, %v4016_v34 }
0x1b9a   :  { %v13481_v23 = vpack.c.bf16 %v3998_v53, %v3996_v63  ;;  %v13507_v63 = vpack.c.bf16 %v4011_v14, %v4010_v43  ;;  %v13509_v53 = vpack.c.bf16 %v4029_v15, %v4028_v52  ;;  %v4290_v14 = vld [vmem:[%s18261_s15] sm:$0xff]  ;;  %v4291_v52 = vld [vmem:[%s18261_s15 + $0x8] sm:$0xff]  ;;  %v4292_v15 = vld [vmem:[%s18261_s15 + $0x10] sm:$0x3] }
0x1b9b   :  { %v3932_v2 = vsel %vm18168_vm14, %v3925_v3, 0.0  ;;  %13486 = vmatprep.subr.bf16.mxu1 %v13485_v37  ;;  %v11299_v37 = vld [vmem:[%s18260_s19] ss:$0 sm:$0xff] }
0x1b9c   :  { %3933 = vadd.xlane.f32.xlu1 %v3932_v2  ;;  %13482 = vmatprep.subr.bf16.mxu0 %v13481_v23  ;;  %v4019_v2 = vld [vmem:[%s18259_s11 + $0x98] sm:$0xff] }
0x1c21   :  { %v3928_v32 = vpop.xlane.xlu1 %3927 }
0x1c22   :  { %v3935_v25 = vmul.f32 0.015625, %v3928_v32 }
0x1c24   :  { %v16460_v48 = vsub.f32 %v3923_v46, %v3935_v25  ;;  %v13483_v46 = vpack.c.bf16 %v3997_v45, %v3995_v18 }
0x1c25   :  { %v3931_v19 = vpop.xlane.xlu0 %3930 }
0x1c26   :  { %v3936_v16 = vmul.f32 0.015625, %v3931_v19  ;;  %v3941_v38 = vmul.f32 %v16460_v48, %v16460_v48  ;;  %13484 = vmatpush1.bf16.msra.mxu0 %v13483_v46  ;;  %v4002_v19 = vld [vmem:[%s18259_s11 + $0x10] sm:$0xff] }
0x1c27   :  { %13518 = vmatprep.subr.bf16.mxu0 %v13517_v29 }
0x1c28   :  { %v16464_v21 = vsub.f32 %v3924_v36, %v3936_v16  ;;  %v3944_v49 = vsel %vm18169_vm0, %v3941_v38, 0.0  ;;  %v4000_v36 = vld [vmem:[%s18259_s11] sm:$0xff]  ;;  %v4003_v16 = vld [vmem:[%s18259_s11 + $0x18] sm:$0xff] }
0x1c29   :  { %3945 = vadd.xlane.f32.xlu0 %v3944_v49  ;;  %v3934_v54 = vpop.xlane.xlu1 %3933  ;;  %v13487_v32 = vpack.c.bf16 %v4001_v26, %v4000_v36  ;;  %v4020_v38 = vld [vmem:[%s18259_s11 + $0xa0] sm:$0xff]  ;;  %v4021_v49 = vld [vmem:[%s18259_s11 + $0xa8] sm:$0xff] }
0x1c2a   :  { %v3937_v55 = vmul.f32 0.015625, %v3934_v54  ;;  %v3942_v47 = vmul.f32 %v16464_v21, %v16464_v21  ;;  %v13491_v54 = vpack.c.bf16 %v4003_v16, %v4002_v19  ;;  %v4300_v19 = vld [vmem:[%s18258_s5 + $0x38] sm:$0xff] }
0x1c2b   :  { %13488 = vmatpush3.bf16.msra.mxu1 %v13487_v32  ;;  %v11300_v32 = vld [vmem:[#allocation2] ss:$0 sm:$0xff] }
0x1c2c   :  { %v16469_v56 = vsub.f32 %v3925_v3, %v3937_v55  ;;  %v3947_v58 = vsel %vm18169_vm0, %v3942_v47, 0.0  ;;  %v4018_v3 = vld [vmem:[%s18259_s11 + $0x90] sm:$0xff]  ;;  %v13493_v55 = vpack.c.bf16 %v4021_v49, %v4020_v38  ;;  %v4004_v47 = vld [vmem:[%s18259_s11 + $0x20] sm:$0xff] }
0x1c2d   :  { %3948 = vadd.xlane.f32.xlu1 %v3947_v58  ;;  %v13489_v25 = vpack.c.bf16 %v4019_v2, %v4018_v3  ;;  %v4005_v58 = vld [vmem:[%s18259_s11 + $0x28] sm:$0xff]  ;;  %v4293_v3 = vld [vmem:[%s18258_s5] sm:$0xff]  ;;  %v4295_v2 = vld [vmem:[%s18258_s5 + $0x10] sm:$0xff] }
0x1c2e   :  { %v3943_v17 = vmul.f32 %v16469_v56, %v16469_v56  ;;  %v13495_v44 = vpack.c.bf16 %v4005_v58, %v4004_v47  ;;  %v13519_v49 = vpack.c.bf16 %v4295_v2, %v4293_v3  ;;  %v4297_v58 = vld [vmem:[%s18258_s5 + $0x20] sm:$0xff] }
0x1c2f   :  { %13490 = vmatprep.subr.bf16.mxu1 %v13489_v25  ;;  %v4298_v25 = vld [vmem:[%s18258_s5 + $0x28] sm:$0xff] }
0x1c30   :  { %v3950_v50 = vsel %vm18168_vm14, %v3943_v17, 0.0  ;;  %v4022_v17 = vld [vmem:[%s18259_s11 + $0xb0] sm:$0xff]  ;;  %13492 = vmatpush3.bf16.msra.mxu1 %v13491_v54  ;;  %vm624_vm14 = vmand %vm15808_vm11, %vm621_vm13 }
0x1c31   :  { %3951 = vadd.xlane.f32.xlu0 %v3950_v50  ;;  %v4023_v50 = vld [vmem:[%s18259_s11 + $0xb8] sm:$0xff]  ;;  %13494 = vmatprep.subr.bf16.mxu1 %v13493_v55  ;;  %v13521_v55 = vpack.c.bf16 %v4300_v19, %v4298_v25 }
0x1c32   :  { %v13497_v27 = vpack.c.bf16 %v4023_v50, %v4022_v17  ;;  %v4299_v17 = vld [vmem:[%s18258_s5 + $0x30] sm:$0xff]  ;;  %v4304_v50 = vld [vmem:[%s18258_s5 + $0x58] sm:$0xff] }
0x1c33   :  { %v13523_v59 = vpack.c.bf16 %v4299_v17, %v4297_v58 }
0x1c34   :  { %13496 = vmatpush3.bf16.msra.mxu1 %v13495_v44 }
0x1c35   :  { %13498 = vmatprep.subr.bf16.mxu1 %v13497_v27 }
0x1c38   :  { %13500 = vmatpush3.bf16.msra.mxu1 %v13499_v60  ;;  %v4303_v60 = vld [vmem:[%s18258_s5 + $0x50] sm:$0xff] }
0x1c39   :  { %13502 = vmatprep.subr.bf16.mxu1 %v13501_v62  ;;  %v4306_v62 = vld [vmem:[%s18258_s5 + $0x68] sm:$0xff]  ;;  %v13527_v1 = vpack.c.bf16 %v4303_v60, %v4301_v61 }
0x1c3c   :  { %13504 = vmatpush3.bf16.msra.mxu1 %v13503_v40  ;;  %v13529_v40 = vpack.c.bf16 %v4308_v39, %v4306_v62 }
0x1c3d   :  { %13506 = vmatprep.subr.bf16.mxu1 %v13505_v51  ;;  %v4307_v51 = vld [vmem:[%s18258_s5 + $0x70] sm:$0xff] }
0x1c40   :  { %13508 = vmatpush3.bf16.msra.mxu1 %v13507_v63  ;;  %v4012_v63 = vld [vmem:[%s18259_s11 + $0x60] sm:$0xff] }
0x1c41   :  { %13510 = vmatprep.subr.bf16.mxu1 %v13509_v53  ;;  %v4013_v53 = vld [vmem:[%s18259_s11 + $0x68] sm:$0xff] }
0x1cb6   :  { %v3946_v23 = vpop.xlane.xlu0 %3945 }
0x1cb7   :  { %v3953_v18 = vmul.f32 0.015625, %v3946_v23  ;;  %v13511_v23 = vpack.c.bf16 %v4013_v53, %v4012_v63 }
0x1cb9   :  { %v3956_v45 = vadd.f32 1e-05, %v3953_v18  ;;  %13512 = vmatpush3.bf16.msra.mxu1 %v13511_v23  ;;  %v4030_v18 = vld [vmem:[%s18259_s11 + $0xf0] sm:$0xff] }
0x1cba   :  { %v3949_v46 = vpop.xlane.xlu1 %3948 }
0x1cbb   :  { %14274 = vrsqrt.f32 %v3956_v45  ;;  %v3954_v4 = vmul.f32 0.015625, %v3949_v46  ;;  %v4031_v45 = vld [vmem:[%s18259_s11 + $0xf8] sm:$0xff] }
0x1cbc   :  { %v13513_v46 = vpack.c.bf16 %v4031_v45, %v4030_v18 }
0x1cbd   :  { %v3957_v24 = vadd.f32 1e-05, %v3954_v4  ;;  %v4014_v4 = vld [vmem:[%s18259_s11 + $0x70] sm:$0xff] }
0x1cbe   :  { %v3952_v29 = vpop.xlane.xlu0 %3951  ;;  %13514 = vmatprep.subr.bf16.mxu1 %v13513_v46 }
0x1cbf   :  { %14276 = vrsqrt.f32 %v3957_v24  ;;  %v3955_v34 = vmul.f32 0.015625, %v3952_v29  ;;  %v4015_v24 = vld [vmem:[%s18259_s11 + $0x78] sm:$0xff] }
0x1cc0   :  { %v13515_v29 = vpack.c.bf16 %v4015_v24, %v4014_v4 }
0x1cc1   :  { %v3958_v35 = vadd.f32 1e-05, %v3955_v34  ;;  %v3999_v34 = vld [vmem:[%s18262_s0] sm:$0x3] }
0x1cc2   :  { %13516 = vmatpush3.bf16.msra.mxu1 %v13515_v29 }
0x1cc3   :  { %14278 = vrsqrt.f32 %v3958_v35  ;;  %13537 = vmatprep.subr.bf16.mxu1 %v15212_v28  ;;  %v4039_v35 = vrot.slane %v3999_v34, %v15700_v31 }
0x1cc5   :  { %v14275_v36 = vpop.eup %14274 }
0x1cc6   :  { %v3962_v26 = vmul.f32 %v14275_v36, %v16460_v48  ;;  %v4302_v48 = vld [vmem:[%s18258_s5 + $0x48] sm:$0xff]  ;;  %v4043_v36 = vrot.slane %v3999_v34, %v15704_v33 }
0x1cc8   :  { %v3971_v16 = vmul.f32 %v11299_v37, %v3962_v26 }
0x1cc9   :  { %v14277_v38 = vpop.eup %14276 }
0x1cca   :  { %v16525_v54 = vadd.f32 %v11300_v32, %v3971_v16  ;;  %v3963_v47 = vmul.f32 %v14277_v38, %v16464_v21  ;;  %v13525_v21 = vpack.c.bf16 %v4304_v50, %v4302_v48 }
0x1ccc   :  { %11301 = vmatmul.mubr.msk.f32.vlgmr.msra.gmra.mrb[90].mxu0 %vm18169_vm0, %v16525_v54  ;;  %v3972_v44 = vmul.f32 %v11299_v37, %v3963_v47 }
0x1ccd   :  { %v14279_v27 = vpop.eup %14278  ;;  %13520 = vmatpush1.bf16.msra.mxu0 %v13519_v49  ;;  %4125 = vmatprep.mubr.f32.mxu0 %v15211_v0 }
0x1cce   :  { %13522 = vmatprep.subr.bf16.mxu0 %v13521_v55  ;;  %v16535_v41 = vadd.f32 %v11300_v32, %v3972_v44  ;;  %v3964_v42 = vmul.f32 %v14279_v27, %v16469_v56  ;;  %v4305_v56 = vld [vmem:[%s18258_s5 + $0x60] sm:$0xff] }
0x1ccf   :  { %v13531_v43 = vpack.c.bf16 %v4307_v51, %v4305_v56 }
0x1cd0   :  { %11302 = vmatmul.mubr.msk.f32.gmra.mrb[92].mxu0 %vm18169_vm0, %v16535_v41  ;;  %v3973_v22 = vmul.f32 %v11299_v37, %v3964_v42 }
0x1cd1   :  { %13524 = vmatpush1.bf16.msra.mxu0 %v13523_v59  ;;  %4131 = vmatprep.mubr.f32.mxu0 %v15211_v0  ;;  %v4309_v59 = vld [vmem:[%s18263_s13] sm:$0x3] }
0x1cd2   :  { %13526 = vmatprep.subr.bf16.mxu0 %v13525_v21  ;;  %v16545_v9 = vadd.f32 %v11300_v32, %v3973_v22  ;;  %v4325_v42 = vrot.slane %v4309_v59, %v15700_v31  ;;  %v4329_v60 = vrot.slane %v4309_v59, %v15704_v33 }
0x1cd4   :  { %11303 = vmatmul.mubr.msk.f32.gmra.mrb[94].mxu0 %vm18169_vm0, %v16545_v9 }
0x1cd5   :  { %13528 = vmatpush1.bf16.msra.mxu0 %v13527_v1  ;;  %4405 = vmatprep.mubr.f32.mxu0 %v15211_v0 }
0x1cd6   :  { %13530 = vmatprep.subr.bf16.mxu0 %v13529_v40 }
0x1cd9   :  { %13532 = vmatpush1.bf16.msra.mxu0 %v13531_v43 }
0x1cda   :  { %13533 = vmatprep.subr.bf16.mxu0 %v15212_v28 }
0x1cdc   :  { %11307 = vmatmul.mubr.msk.f32.vlgmr.msra.gmra.mrb[96].mxu0 %vm18169_vm0, %v4290_v14 }
0x1cdd   :  { %4411 = vmatprep.mubr.f32.mxu0 %v15211_v0 }
0x1ce0   :  { %11308 = vmatmul.mubr.msk.f32.gmra.mrb[98].mxu0 %vm18169_vm0, %v4291_v52 }
0x1ce1   :  { %4417 = vmatprep.mubr.f32.mxu0 %v15211_v0 }
0x1ce4   :  { %11309 = vmatmul.mubr.msk.f32.gmra.mrb[100].mxu0 %vm18169_vm0, %v4292_v15  ;;  %vm630_vm0 = vmand %vm15814_vm12, %vm627_vm9 }
0x1ce5   :  { %12527 = vmatprep.mubr.msk.f32.mxu0 %vm18172_vm1, %v15211_v0 }
0x1d9f   :  { %v4121_v37 = vpop.f32.mrb[90].mxu0 }
0x1da0   :  { %v4122_v26 = vadd.f32 %v4121_v37, %v4039_v35  ;;  %v4123_v3 = vpop.f32.mrb[91].mxu0 }
0x1da1   :  { %v4124_v2 = vadd.f32 %v4123_v3, %v4043_v36 }
0x1da2   :  { %v4138_v19 = vmax.f32 %v4122_v26, 0.0 }
0x1da3   :  { %v4139_v32 = vmax.f32 %v4124_v2, 0.0  ;;  %v4127_v25 = vpop.f32.mrb[92].mxu0 }
0x1da4   :  { %v4128_v16 = vadd.f32 %v4127_v25, %v4039_v35  ;;  %v4129_v38 = vpop.f32.mrb[93].mxu0 }
0x1da5   :  { %v4130_v49 = vadd.f32 %v4129_v38, %v4043_v36  ;;  %4214 = vmatprep.mubr.f32.mxu1 %v4139_v32 }
0x1da6   :  { %4215 = vmatmul.mubr.f32.vlgmr.msra.gmra.mrb[78].mxu1 %v4138_v19  ;;  %v4140_v58 = vmax.f32 %v4128_v16, 0.0 }
0x1da7   :  { %v4141_v55 = vmax.f32 %v4130_v49, 0.0  ;;  %v4133_v47 = vpop.f32.mrb[94].mxu0 }
0x1da8   :  { %v4134_v17 = vadd.f32 %v4133_v47, %v4039_v35  ;;  %v4135_v48 = vpop.f32.mrb[95].mxu0 }
0x1da9   :  { %v4136_v50 = vadd.f32 %v4135_v48, %v4043_v36  ;;  %4219 = vmatprep.mubr.f32.mxu1 %v4141_v55 }
0x1daa   :  { %4220 = vmatmul.mubr.f32.gmra.mrb[80].mxu1 %v4140_v58  ;;  %v4142_v27 = vmax.f32 %v4134_v17, 0.0 }
0x1dab   :  { %v4143_v44 = vmax.f32 %v4136_v50, 0.0  ;;  %v16661_v50 = vsel %vm623_vm7, 0.0, %v15217_v13 }
0x1dad   :  { %4224 = vmatprep.mubr.f32.mxu1 %v4143_v44 }
0x1dae   :  { %4225 = vmatmul.mubr.f32.gmra.mrb[82].mxu1 %v4142_v27 }
0x1daf   :  { %v4407_v21 = vpop.f32.mrb[96].mxu0  ;;  %12542 = vmatprep.mubr.msk.f32.mxu1 %vm18172_vm1, %v15211_v0 }
0x1db0   :  { %v4409_v61 = vpop.f32.mrb[97].mxu0  ;;  %v4408_v39 = vadd.f32 %v4407_v21, %v4325_v42 }
0x1db1   :  { %v4410_v40 = vadd.f32 %v4409_v61, %v4329_v60 }
0x1db2   :  { %v16593_v23 = vmul.f32 0.25, %v4408_v39 }
0x1db3   :  { %v4413_v62 = vpop.f32.mrb[98].mxu0 }
0x1db4   :  { %v4414_v22 = vadd.f32 %v4413_v62, %v4325_v42  ;;  %v4415_v1 = vpop.f32.mrb[99].mxu0 }
0x1db5   :  { %v4416_v56 = vadd.f32 %v4415_v1, %v4329_v60 }
0x1db6   :  { %v16578_v51 = vpack.i.bf16 %v4414_v22, %v4408_v39  ;;  %v16605_v45 = vmul.f32 0.25, %v4414_v22 }
0x1db7   :  { %v4419_v43 = vpop.f32.mrb[100].mxu0  ;;  %v13538_v14 = vpack.c.bf16 %v4416_v56, %v4410_v40  ;;  %v16580_v52 = vpack.i.bf16 %v4416_v56, %v4410_v40 }
0x1db8   :  { %v16582_v15 = vadd.f32 %v4419_v43, %v4325_v42  ;;  %14027 = vrot.lane.b32.xlu1 %v16578_v51, %s15214_s3  ;;  %v4421_v63 = vpop.f32.mrb[101].mxu0 }
0x1db9   :  { %13539 = vmatpush3.bf16.msra.mxu1 %v13538_v14  ;;  %v16586_v53 = vadd.f32 %v4421_v63, %v4329_v60 }
0x1dba   :  { %4434 = vrot.lane.b32.xlu0 %v16582_v15, %s15214_s3  ;;  %12540 = vmatprep.subr.mxu1 %v15211_v0  ;;  %v16600_v18 = vmul.f32 0.25, %v16582_v15 }
0x1dbc   :  { %14032 = vrot.lane.b32.xlu1 %v16578_v51, %s15213_s16 }
0x1dbd   :  { %12541 = vmatpush3.msk.msra.mxu1 %vm18171_vm2, %v16586_v53  ;;  %vm628_vm2 = vcmp.le.s32.totalorder %v15792_v8, %v15801_v10 }
0x1dbe   :  { %4656 = vrot.lane.b32.xlu0 %v16593_v23, %s15216_s4  ;;  %13544 = vmatprep.subr.bf16.mxu1 %v15212_v28  ;;  %vm631_vm11 = vmand %vm15837_vm5, %vm628_vm2  ;;  %vm18266_vm2 = vcmask 130048  }
0x1dbf   :  { %v16674_v61 = vsel %vm631_vm11, 0.0, %v15217_v13  ;;  %vm18268_vm5 = vmmov %vm18266_vm2 }
0x1dc0   :  { %4666 = vrot.lane.b32.xlu1 %v16582_v15, %s15213_s16  ;;  %vm18269_vm7 = vmmov %vm18266_vm2 }
0x1dc1   :  { %vm18270_vm9 = vmmov %vm18266_vm2 }
0x1dc2   :  { %4660 = vrot.lane.b32.xlu0 %v16600_v18, %s15216_s4  ;;  %vm18271_vm12 = vmmov %vm18266_vm2 }
0x1dc3   :  { %vm18272_vm13 = vmmov %vm18266_vm2 }
0x1dc4   :  { %4658 = vrot.lane.b32.xlu1 %v16605_v45, %s15216_s4  ;;  %vm18274_vm8 = vmmov %vm18266_vm2 }
0x1dc5   :  { %vm18275_vm11 = vmmov %vm18266_vm2 }
0x1e2a   :  { %v14028_v46 = vpop.permute.xlu1 %14027 }
0x1e2b   :  { %v14030_v4 = vunpack.i.h.bf16 %v14028_v46  ;;  %v14029_v24 = vunpack.i.l.bf16 %v14028_v46 }
0x1e2c   :  { %v4435_v37 = vpop.permute.xlu0 %4434 }
0x1e2d   :  { %v13534_v29 = vpack.c.bf16 %v14030_v4, %v14029_v24 }
0x1e2e   :  { %v14033_v34 = vpop.permute.xlu1 %14032 }
0x1e2f   :  { %13536 = vmatpush3.bf16.xpose.msk.msra.mxu0 %vm15747_vm4, %v13534_v29  ;;  %v14035_v35 = vunpack.i.h.bf16 %v14033_v34  ;;  %v14034_v36 = vunpack.i.l.bf16 %v14033_v34 }
0x1e30   :  { %12525 = vmatprep.subr.mxu0 %v15211_v0  ;;  %v4657_v2 = vpop.permute.xlu0 %4656 }
0x1e31   :  { %v13541_v26 = vpack.c.bf16 %v14035_v35, %v14034_v36 }
0x1e32   :  { %v4667_v3 = vpop.permute.xlu1 %4666 }
0x1e34   :  { %v4661_v25 = vpop.permute.xlu0 %4660 }
0x1e36   :  { %v4659_v32 = vpop.permute.xlu1 %4658 }
0x1e37   :  { %12526 = vmatpush3.xpose.msk.msra.mxu0 %vm18170_vm3, %v4435_v37 }
0x1e38   :  { %13540 = vmatprep.subr.bf16.mxu0 %v15212_v28 }
0x1e3a   :  { %12528 = vmatmul.mubr.msk.f32.vlgmr.msra.gmra.mrb[102].mxu0 %vm18170_vm3, %v16593_v23 }
0x1e3b   :  { %13543 = vmatpush3.bf16.xpose.msk.msra.mxu0 %vm15747_vm4, %v13541_v26  ;;  %12530 = vmatprep.mubr.msk.f32.mxu0 %vm18172_vm1, %v15211_v0 }
0x1e3c   :  { %12555 = vmatprep.subr.mxu0 %v15211_v0 }
0x1e3e   :  { %12531 = vmatmul.mubr.msk.f32.gmra.mrb[104].mxu0 %vm18170_vm3, %v16605_v45 }
0x1e3f   :  { %12533 = vmatprep.mubr.msk.f32.mxu0 %vm18172_vm1, %v15211_v0 }
0x1e42   :  { %12534 = vmatmul.mubr.msk.f32.gmra.mrb[106].mxu0 %vm18170_vm3, %v16600_v18 }
0x1e43   :  { %12556 = vmatpush3.xpose.msk.msra.mxu0 %vm18170_vm3, %v4667_v3  ;;  %12557 = vmatprep.mubr.msk.f32.mxu0 %vm18172_vm1, %v15211_v0 }
0x1e44   :  { %13547 = vmatprep.subr.bf16.mxu0 %v15212_v28 }
0x1e46   :  { %12558 = vmatmul.mubr.msk.f32.vlgmr.msra.gmra.mrb[108].mxu0 %vm18170_vm3, %v4657_v2 }
0x1e47   :  { %12560 = vmatprep.mubr.msk.f32.mxu0 %vm18172_vm1, %v15211_v0 }
0x1e4a   :  { %12561 = vmatmul.mubr.msk.f32.gmra.mrb[110].mxu0 %vm18170_vm3, %v4659_v32 }
0x1e4b   :  { %12563 = vmatprep.mubr.msk.f32.mxu0 %vm18172_vm1, %v15211_v0 }
0x1e4e   :  { %12564 = vmatmul.mubr.msk.f32.gmra.mrb[112].mxu0 %vm18170_vm3, %v4661_v25  ;;  %vm633_vm3 = vmor %vm624_vm14, %vm630_vm0  ;;  %vm18265_vm0 = vcmask 1041408  }
0x1e4f   :  { %12585 = vmatprep.mubr.msk.f32.mxu0 %vm18172_vm1, %v15211_v0  ;;  %v16667_v59 = vsel %vm633_vm3, 0.0, %v15217_v13  ;;  %vm18267_vm3 = vmmov %vm18266_vm2 }
0x1e50   :  { %vm18273_vm14 = vmmov %vm18266_vm2 }
0x1e79   :  { %v11770_v19 = vpop.f32.mrb[78].mxu1 }
0x1e7a   :  { %v11771_v16 = vpop.f32.mrb[79].mxu1 }
0x1e7b   :  { %v16642_v38 = vadd.f32 %v11771_v16, %v11770_v19 }
0x1e7d   :  { %v11773_v49 = vpop.f32.mrb[80].mxu1 }
0x1e7e   :  { %v11774_v55 = vpop.f32.mrb[81].mxu1 }
0x1e7f   :  { %v16644_v47 = vadd.f32 %v11774_v55, %v11773_v49 }
0x1e81   :  { %v11776_v58 = vpop.f32.mrb[82].mxu1 }
0x1e82   :  { %v11777_v17 = vpop.f32.mrb[83].mxu1 }
0x1e83   :  { %v16646_v48 = vadd.f32 %v11777_v17, %v11776_v58 }
0x1f0d   :  { %v4517_v30 = vpop.f32.mrb[102].mxu0 }
0x1f0e   :  { %v4518_v44 = vadd.f32 %v4517_v30, %v16661_v50  ;;  %v12529_v27 = vpop.f32.mrb[103].mxu0 }
0x1f10   :  { %v4531_v11 = vsel %vm901_vm15, %v4518_v44, -inf }
0x1f11   :  { %4532 = vmax.xlane.f32.xlu1 %v4531_v11  ;;  %v4522_v12 = vpop.f32.mrb[104].mxu0 }
0x1f12   :  { %v4523_v21 = vadd.f32 %v4522_v12, %v16667_v59  ;;  %v12532_v42 = vpop.f32.mrb[105].mxu0 }
0x1f14   :  { %v4534_v60 = vsel %vm901_vm15, %v4523_v21, -inf }
0x1f15   :  { %4535 = vmax.xlane.f32.xlu0 %v4534_v60  ;;  %v4527_v62 = vpop.f32.mrb[106].mxu0 }
0x1f16   :  { %v4528_v39 = vadd.f32 %v4527_v62, %v16674_v61  ;;  %v12535_v22 = vpop.f32.mrb[107].mxu0 }
0x1f18   :  { %v4537_v1 = vsel %vm908_vm6, %v4528_v39, -inf }
0x1f19   :  { %4538 = vmax.xlane.f32.xlu0 %v4537_v1  ;;  %v4746_v20 = vpop.f32.mrb[108].mxu0 }
0x1f1a   :  { %v4747_v40 = vadd.f32 %v4746_v20, %v16661_v50  ;;  %v12559_v56 = vpop.f32.mrb[109].mxu0 }
0x1f1c   :  { %v4760_v43 = vsel %vm901_vm15, %v4747_v40, -inf }
0x1f1d   :  { %4761 = vmax.xlane.f32.xlu1 %v4760_v43  ;;  %v4751_v14 = vpop.f32.mrb[110].mxu0 }
0x1f1e   :  { %v4752_v63 = vadd.f32 %v4751_v14, %v16667_v59  ;;  %v12562_v46 = vpop.f32.mrb[111].mxu0 }
0x1f20   :  { %v4763_v4 = vsel %vm901_vm15, %v4752_v63, -inf }
0x1f21   :  { %4764 = vmax.xlane.f32.xlu0 %v4763_v4  ;;  %v4756_v24 = vpop.f32.mrb[112].mxu0 }
0x1f22   :  { %v4757_v29 = vadd.f32 %v4756_v24, %v16674_v61  ;;  %v12565_v34 = vpop.f32.mrb[113].mxu0 }
0x1f24   :  { %v4766_v35 = vsel %vm908_vm6, %v4757_v29, -inf }
0x1f25   :  { %4767 = vmax.xlane.f32.xlu1 %v4766_v35 }
0x1f9e   :  { %v4533_v36 = vpop.xlane.xlu1 %4532 }
0x1f9f   :  { %v4540_v37 = vsub.f32 %v4518_v44, %v4533_v36 }
0x1fa1   :  { %v4543_v26 = vmul.f32 1.442695, %v4540_v37 }
0x1fa2   :  { %v4536_v3 = vpop.xlane.xlu0 %4535 }
0x1fa3   :  { %14280 = vpow2.f32 %v4543_v26  ;;  %v4541_v2 = vsub.f32 %v4523_v21, %v4536_v3 }
0x1fa5   :  { %v4545_v32 = vmul.f32 1.442695, %v4541_v2 }
0x1fa6   :  { %v4539_v25 = vpop.xlane.xlu0 %4538 }
0x1fa7   :  { %14282 = vpow2.f32 %v4545_v32  ;;  %v4542_v19 = vsub.f32 %v4528_v39, %v4539_v25 }
0x1fa9   :  { %v4547_v16 = vmul.f32 1.442695, %v4542_v19 }
0x1faa   :  { %v4762_v49 = vpop.xlane.xlu1 %4761 }
0x1fab   :  { %14284 = vpow2.f32 %v4547_v16  ;;  %v4769_v55 = vsub.f32 %v4747_v40, %v4762_v49  ;;  %v4310_v49 = vld [vmem:[%s18264_s17] sm:$0xff] }
0x1fad   :  { %v14281_v58 = vpop.eup %14280  ;;  %v4772_v17 = vmul.f32 1.442695, %v4769_v55  ;;  %v4311_v55 = vld [vmem:[%s18264_s17 + $0x8] sm:$0xff] }
0x1fae   :  { %v4765_v30 = vpop.xlane.xlu0 %4764  ;;  %v4549_v27 = vsel %vm901_vm15, %v14281_v58, 0.0 }
0x1faf   :  { %14286 = vpow2.f32 %v4772_v17  ;;  %v4770_v11 = vsub.f32 %v4752_v63, %v4765_v30  ;;  %4550 = vadd.xlane.f32.xlu0 %v4549_v27  ;;  %v13551_v17 = vpack.c.bf16 %v4311_v55, %v4310_v49 }
0x1fb1   :  { %v14283_v44 = vpop.eup %14282  ;;  %v4774_v12 = vmul.f32 1.442695, %v4770_v11 }
0x1fb2   :  { %v4768_v42 = vpop.xlane.xlu1 %4767  ;;  %v4552_v21 = vsel %vm901_vm15, %v14283_v44, 0.0 }
0x1fb3   :  { %14288 = vpow2.f32 %v4774_v12  ;;  %v4771_v60 = vsub.f32 %v4757_v29, %v4768_v42  ;;  %4553 = vadd.xlane.f32.xlu1 %v4552_v21  ;;  %v4312_v21 = vld [vmem:[%s18264_s17 + $0x10] sm:$0xff] }
0x1fb5   :  { %v14285_v62 = vpop.eup %14284  ;;  %v4776_v39 = vmul.f32 1.442695, %v4771_v60  ;;  %v4313_v60 = vld [vmem:[%s18264_s17 + $0x18] sm:$0xff] }
0x1fb6   :  { %v4555_v22 = vsel %vm908_vm6, %v14285_v62, 0.0 }
0x1fb7   :  { %14290 = vpow2.f32 %v4776_v39  ;;  %4556 = vadd.xlane.f32.xlu0 %v4555_v22 }
0x1fb9   :  { %v14287_v1 = vpop.eup %14286 }
0x1fba   :  { %v4778_v20 = vsel %vm901_vm15, %v14287_v1, 0.0 }
0x1fbb   :  { %4779 = vadd.xlane.f32.xlu1 %v4778_v20 }
0x1fbd   :  { %v14289_v40 = vpop.eup %14288 }
0x1fbe   :  { %v4781_v56 = vsel %vm901_vm15, %v14289_v40, 0.0 }
0x1fbf   :  { %4782 = vadd.xlane.f32.xlu0 %v4781_v56 }
0x1fc1   :  { %v14291_v43 = vpop.eup %14290 }
0x1fc2   :  { %v4784_v14 = vsel %vm908_vm6, %v14291_v43, 0.0 }
0x1fc3   :  { %4785 = vadd.xlane.f32.xlu1 %v4784_v14 }
0x1fd4   :  { %4799 = vrot.lane.b32.xlu1 %v16586_v53, %s15216_s4 }
0x1fd5   :  { %14037 = vrot.lane.b32.xlu0 %v16580_v52, %s15216_s4 }
0x1fd8   :  { %14042 = vrot.lane.b32.xlu1 %v16578_v51, %s15218_s18 }
0x1fd9   :  { %5082 = vrot.lane.b32.xlu0 %v16582_v15, %s15218_s18 }
0x1fdc   :  { %5072 = vrot.lane.b32.xlu1 %v16593_v23, %s15219_s8 }
0x1fdd   :  { %5074 = vrot.lane.b32.xlu0 %v16605_v45, %s15219_s8 }
0x1fe0   :  { %5076 = vrot.lane.b32.xlu1 %v16600_v18, %s15219_s8 }
0x203c   :  { %v4551_v63 = vpop.xlane.xlu0 %4550 }
0x203d   :  { %14292 = vrcp.f32 %v4551_v63 }
0x2040   :  { %v4554_v46 = vpop.xlane.xlu1 %4553 }
0x2041   :  { %14294 = vrcp.f32 %v4554_v46 }
0x2044   :  { %v4557_v4 = vpop.xlane.xlu0 %4556 }
0x2045   :  { %14296 = vrcp.f32 %v4557_v4 }
0x2047   :  { %v14293_v24 = vpop.eup %14292 }
0x2048   :  { %v4561_v29 = vmul.f32 %v14293_v24, %v14281_v58  ;;  %v4780_v34 = vpop.xlane.xlu1 %4779 }
0x2049   :  { %14298 = vrcp.f32 %v4780_v34 }
0x204a   :  { %12543 = vmatmul.mubr.msk.f32.vlgmr.msra.gmra.mrb[84].mxu1 %vm901_vm15, %v4561_v29 }
0x204b   :  { %v14295_v35 = vpop.eup %14294  ;;  %12545 = vmatprep.mubr.msk.f32.mxu1 %vm18172_vm1, %v15211_v0 }
0x204c   :  { %v4783_v36 = vpop.xlane.xlu0 %4782  ;;  %v4562_v37 = vmul.f32 %v14295_v35, %v14283_v44 }
0x204d   :  { %14300 = vrcp.f32 %v4783_v36 }
0x204e   :  { %12546 = vmatmul.mubr.msk.f32.gmra.mrb[86].mxu1 %vm901_vm15, %v4562_v37 }
0x204f   :  { %v14297_v26 = vpop.eup %14296  ;;  %12548 = vmatprep.mubr.msk.f32.mxu1 %vm18172_vm1, %v15211_v0 }
0x2050   :  { %v14038_v3 = vpop.permute.xlu0 %14037  ;;  %v4786_v2 = vpop.xlane.xlu1 %4785  ;;  %v4563_v32 = vmul.f32 %v14297_v26, %v14285_v62  ;;  %v13548_v62 = vpack.c.bf16 %v4313_v60, %v4312_v21 }
0x2051   :  { %v14040_v25 = vunpack.i.h.bf16 %v14038_v3  ;;  %v14039_v19 = vunpack.i.l.bf16 %v14038_v3  ;;  %14302 = vrcp.f32 %v4786_v2 }
0x2052   :  { %12549 = vmatmul.mubr.msk.f32.gmra.mrb[88].mxu1 %vm901_vm15, %v4563_v32  ;;  %13549 = vmatpush3.bf16.msra.mxu0 %v13548_v62 }
0x2053   :  { %v13545_v16 = vpack.c.bf16 %v14040_v25, %v14039_v19  ;;  %12572 = vmatprep.mubr.msk.f32.mxu1 %vm18172_vm1, %v15211_v0  ;;  %v14299_v58 = vpop.eup %14298  ;;  %13553 = vmatprep.subr.bf16.mxu0 %v15212_v28 }
0x2054   :  { %v4790_v30 = vmul.f32 %v14299_v58, %v14287_v1  ;;  %v4800_v27 = vpop.permute.xlu1 %4799  ;;  %v5083_v36 = vpop.permute.xlu0 %5082 }
0x2055   :  { %13546 = vmatpush3.bf16.msra.mxu1 %v13545_v16 }
0x2056   :  { %12570 = vmatprep.subr.mxu1 %v15211_v0 }
0x2057   :  { %v14301_v11 = vpop.eup %14300 }
0x2058   :  { %v4791_v44 = vmul.f32 %v14301_v11, %v14289_v40  ;;  %v14043_v56 = vpop.permute.xlu1 %14042  ;;  %v5075_v3 = vpop.permute.xlu0 %5074 }
0x2059   :  { %12571 = vmatpush3.msk.msra.mxu1 %vm18265_vm0, %v4800_v27  ;;  %v14045_v14 = vunpack.i.h.bf16 %v14043_v56  ;;  %v14044_v63 = vunpack.i.l.bf16 %v14043_v56 }
0x205a   :  { %12573 = vmatmul.mubr.msk.f32.vlgmr.msra.gmra.mrb[90].mxu1 %vm901_vm15, %v4790_v30  ;;  %13550 = vmatprep.subr.bf16.mxu1 %v15212_v28 }
0x205b   :  { %12575 = vmatprep.mubr.msk.f32.mxu1 %vm18172_vm1, %v15211_v0  ;;  %13552 = vmatpush3.bf16.msra.mxu1 %v13551_v17  ;;  %v14303_v12 = vpop.eup %14302  ;;  %v13554_v46 = vpack.c.bf16 %v14045_v14, %v14044_v63 }
0x205c   :  { %13557 = vmatprep.subr.bf16.mxu1 %v15212_v28  ;;  %v4792_v42 = vmul.f32 %v14303_v12, %v14291_v43  ;;  %v5073_v26 = vpop.permute.xlu1 %5072 }
0x205e   :  { %12576 = vmatmul.mubr.msk.f32.gmra.mrb[92].mxu1 %vm901_vm15, %v4791_v44 }
0x205f   :  { %12578 = vmatprep.mubr.msk.f32.mxu1 %vm18172_vm1, %v15211_v0 }
0x2060   :  { %v5077_v2 = vpop.permute.xlu1 %5076 }
0x2062   :  { %12579 = vmatmul.mubr.msk.f32.gmra.mrb[94].mxu1 %vm901_vm15, %v4792_v42 }
0x2063   :  { %12598 = vmatprep.mubr.msk.f32.mxu1 %vm18172_vm1, %v15211_v0 }
0x211d   :  { %v4642_v39 = vpop.f32.mrb[84].mxu1 }
0x211e   :  { %v12544_v22 = vpop.f32.mrb[85].mxu1  ;;  %12599 = vmatmul.mubr.msk.f32.vlgmr.msra.gmra.mrb[96].mxu1 %vm18266_vm2, %v4642_v39 }
0x211f   :  { %12601 = vmatprep.mubr.msk.f32.mxu1 %vm18172_vm1, %v15211_v0 }
0x2121   :  { %v4647_v1 = vpop.f32.mrb[86].mxu1 }
0x2122   :  { %v12547_v20 = vpop.f32.mrb[87].mxu1  ;;  %12602 = vmatmul.mubr.msk.f32.gmra.mrb[98].mxu1 %vm18267_vm3, %v4647_v1  ;;  %vm18276_vm3 = vmmov %vm18266_vm2 }
0x2123   :  { %12604 = vmatprep.mubr.msk.f32.mxu1 %vm18172_vm1, %v15211_v0 }
0x2125   :  { %v4652_v40 = vpop.f32.mrb[88].mxu1 }
0x2126   :  { %v12550_v43 = vpop.f32.mrb[89].mxu1  ;;  %12605 = vmatmul.mubr.msk.f32.gmra.mrb[100].mxu1 %vm18268_vm5, %v4652_v40  ;;  %vm18277_vm5 = vmmov %vm18266_vm2 }
0x2127   :  { %12628 = vmatprep.mubr.msk.f32.mxu1 %vm18172_vm1, %v15211_v0 }
0x212d   :  { %v4880_v4 = vpop.f32.mrb[90].mxu1 }
0x212e   :  { %v12574_v24 = vpop.f32.mrb[91].mxu1  ;;  %12586 = vmatmul.mubr.msk.f32.vlgmr.msra.gmra.mrb[114].mxu0 %vm18269_vm7, %v4880_v4  ;;  %vm18278_vm7 = vmmov %vm18266_vm2 }
0x212f   :  { %13556 = vmatpush3.bf16.xpose.msk.msra.mxu0 %vm15747_vm4, %v13554_v46  ;;  %12588 = vmatprep.mubr.msk.f32.mxu0 %vm18172_vm1, %v15211_v0 }
0x2130   :  { %12611 = vmatprep.subr.mxu0 %v15211_v0 }
0x2131   :  { %v4885_v29 = vpop.f32.mrb[92].mxu1 }
0x2132   :  { %v12577_v34 = vpop.f32.mrb[93].mxu1  ;;  %12589 = vmatmul.mubr.msk.f32.gmra.mrb[116].mxu0 %vm18270_vm9, %v4885_v29  ;;  %vm18279_vm9 = vmmov %vm18266_vm2 }
0x2133   :  { %12591 = vmatprep.mubr.msk.f32.mxu0 %vm18172_vm1, %v15211_v0 }
0x2135   :  { %v4890_v35 = vpop.f32.mrb[94].mxu1 }
0x2136   :  { %v12580_v37 = vpop.f32.mrb[95].mxu1  ;;  %12592 = vmatmul.mubr.msk.f32.gmra.mrb[118].mxu0 %vm18271_vm12, %v4890_v35  ;;  %vm18280_vm12 = vmmov %vm18266_vm2 }
0x2137   :  { %12612 = vmatpush3.xpose.msk.msra.mxu0 %vm18272_vm13, %v5083_v36  ;;  %12613 = vmatprep.mubr.msk.f32.mxu0 %vm18172_vm1, %v15211_v0  ;;  %vm18281_vm13 = vmmov %vm18266_vm2 }
0x2138   :  { %13560 = vmatprep.subr.bf16.mxu0 %v15212_v28 }
0x213a   :  { %12614 = vmatmul.mubr.msk.f32.vlgmr.msra.gmra.mrb[120].mxu0 %vm18273_vm14, %v5073_v26  ;;  %vm18282_vm14 = vcmask 523264  }
0x213b   :  { %12616 = vmatprep.mubr.msk.f32.mxu0 %vm18172_vm1, %v15211_v0 }
0x213e   :  { %12617 = vmatmul.mubr.msk.f32.gmra.mrb[122].mxu0 %vm18274_vm8, %v5075_v3  ;;  %vm18283_vm8 = vcmask 517120  }
0x213f   :  { %12619 = vmatprep.mubr.msk.f32.mxu0 %vm18172_vm1, %v15211_v0 }
0x2142   :  { %12620 = vmatmul.mubr.msk.f32.gmra.mrb[124].mxu0 %vm18275_vm11, %v5077_v2  ;;  %vm18284_vm11 = vmmov %vm18282_vm14 }
0x2143   :  { %12641 = vmatprep.mubr.msk.f32.mxu0 %vm18172_vm1, %v15211_v0 }
0x21f1   :  { %v5058_v32 = vpop.f32.mrb[96].mxu1 }
0x21f2   :  { %v12600_v25 = vpop.f32.mrb[97].mxu1 }
0x21f5   :  { %v5063_v19 = vpop.f32.mrb[98].mxu1 }
0x21f6   :  { %v12603_v16 = vpop.f32.mrb[99].mxu1 }
0x21f9   :  { %v5068_v49 = vpop.f32.mrb[100].mxu1 }
0x21fa   :  { %v12606_v55 = vpop.f32.mrb[101].mxu1 }
0x2201   :  { %v4969_v58 = vpop.f32.mrb[114].mxu0 }
0x2202   :  { %v16764_v17 = vadd.f32 %v5058_v32, %v4969_v58  ;;  %v12587_v30 = vpop.f32.mrb[115].mxu0 }
0x2205   :  { %v4974_v27 = vpop.f32.mrb[116].mxu0 }
0x2206   :  { %v16766_v11 = vadd.f32 %v5063_v19, %v4974_v27  ;;  %v12590_v44 = vpop.f32.mrb[117].mxu0  ;;  %v4315_v27 = vld [vmem:[%s18264_s17 + $0x28] sm:$0xff] }
0x2209   :  { %v4979_v12 = vpop.f32.mrb[118].mxu0 }
0x220a   :  { %v16768_v42 = vadd.f32 %v5068_v49, %v4979_v12  ;;  %v12593_v21 = vpop.f32.mrb[119].mxu0 }
0x220d   :  { %v5162_v60 = vpop.f32.mrb[120].mxu0 }
0x220e   :  { %v5163_v62 = vadd.f32 %v5162_v60, %v16661_v50  ;;  %v12615_v39 = vpop.f32.mrb[121].mxu0 }
0x2210   :  { %v5176_v22 = vsel %vm901_vm15, %v5163_v62, -inf }
0x2211   :  { %5177 = vmax.xlane.f32.xlu0 %v5176_v22  ;;  %v5167_v1 = vpop.f32.mrb[122].mxu0 }
0x2212   :  { %v5168_v20 = vadd.f32 %v5167_v1, %v16667_v59  ;;  %v12618_v40 = vpop.f32.mrb[123].mxu0 }
0x2214   :  { %v5179_v56 = vsel %vm901_vm15, %v5168_v20, -inf }
0x2215   :  { %5180 = vmax.xlane.f32.xlu1 %v5179_v56  ;;  %v5172_v43 = vpop.f32.mrb[124].mxu0 }
0x2216   :  { %v5173_v14 = vadd.f32 %v5172_v43, %v16674_v61  ;;  %v12621_v63 = vpop.f32.mrb[125].mxu0 }
0x2218   :  { %v5182_v46 = vsel %vm908_vm6, %v5173_v14, -inf }
0x2219   :  { %5183 = vmax.xlane.f32.xlu0 %v5182_v46 }
0x2226   :  { %14047 = vrot.lane.b32.xlu1 %v16580_v52, %s15219_s8 }
0x222a   :  { %14052 = vrot.lane.b32.xlu1 %v16578_v51, %s15220_s22 }
0x229e   :  { %v5178_v4 = vpop.xlane.xlu0 %5177 }
0x229f   :  { %v5185_v24 = vsub.f32 %v5163_v62, %v5178_v4 }
0x22a1   :  { %v5188_v29 = vmul.f32 1.442695, %v5185_v24 }
0x22a2   :  { %v5181_v34 = vpop.xlane.xlu1 %5180 }
0x22a3   :  { %14304 = vpow2.f32 %v5188_v29  ;;  %v5186_v35 = vsub.f32 %v5168_v20, %v5181_v34 }
0x22a5   :  { %v5190_v36 = vmul.f32 1.442695, %v5186_v35 }
0x22a6   :  { %v14048_v37 = vpop.permute.xlu1 %14047  ;;  %v5184_v16 = vpop.xlane.xlu0 %5183 }
0x22a7   :  { %14306 = vpow2.f32 %v5190_v36  ;;  %v14050_v26 = vunpack.i.h.bf16 %v14048_v37  ;;  %v14049_v3 = vunpack.i.l.bf16 %v14048_v37  ;;  %v5187_v49 = vsub.f32 %v5173_v14, %v5184_v16 }
0x22a9   :  { %v13558_v2 = vpack.c.bf16 %v14050_v26, %v14049_v3  ;;  %v5192_v55 = vmul.f32 1.442695, %v5187_v49 }
0x22ab   :  { %13559 = vmatpush3.bf16.msra.mxu1 %v13558_v2  ;;  %14308 = vpow2.f32 %v5192_v55 }
0x22ac   :  { %12626 = vmatprep.subr.mxu1 %v15211_v0 }
0x22ad   :  { %v14305_v32 = vpop.eup %14304 }
0x22ae   :  { %v5194_v25 = vsel %vm901_vm15, %v14305_v32, 0.0 }
0x22af   :  { %5195 = vadd.xlane.f32.xlu0 %v5194_v25 }
0x22b1   :  { %v14307_v51 = vpop.eup %14306 }
0x22b2   :  { %v5197_v19 = vsel %vm901_vm15, %v14307_v51, 0.0 }
0x22b3   :  { %5198 = vadd.xlane.f32.xlu1 %v5197_v19 }
0x22b5   :  { %v14309_v58 = vpop.eup %14308 }
0x22b6   :  { %v5200_v30 = vsel %vm908_vm6, %v14309_v58, 0.0 }
0x22c4   :  { %5410 = vrot.lane.b32.xlu1 %v16582_v15, %s15220_s22  ;;  %v4314_v15 = vld [vmem:[%s18264_s17 + $0x20] sm:$0xff] }
0x22c5   :  { %5213 = vrot.lane.b32.xlu0 %v16586_v53, %s15219_s8  ;;  %v13561_v44 = vpack.c.bf16 %v4315_v27, %v4314_v15 }
0x22c7   :  { %13562 = vmatpush3.bf16.msra.mxu0 %v13561_v44 }
0x22c8   :  { %5402 = vrot.lane.b32.xlu1 %v16605_v45, %s15221_s23  ;;  %13567 = vmatprep.subr.bf16.mxu0 %v15212_v28  ;;  %v14053_v45 = vpop.permute.xlu1 %14052 }
0x22c9   :  { %v14054_v62 = vunpack.i.l.bf16 %v14053_v45 }
0x22e4   :  { %5201 = vadd.xlane.f32.xlu0 %v5200_v30 }
0x22fa   :  { %5400 = vrot.lane.b32.xlu0 %v16593_v23, %s15221_s23  ;;  %v14055_v23 = vunpack.i.h.bf16 %v14053_v45 }
0x22fc   :  { %v13564_v22 = vpack.c.bf16 %v14055_v23, %v14054_v62 }
0x22fe   :  { %5404 = vrot.lane.b32.xlu0 %v16600_v18, %s15221_s23 }
0x233c   :  { %v5196_v12 = vpop.xlane.xlu0 %5195 }
0x233d   :  { %14310 = vrcp.f32 %v5196_v12 }
0x2340   :  { %v5199_v21 = vpop.xlane.xlu1 %5198  ;;  %v5214_v60 = vpop.permute.xlu0 %5213 }
0x2341   :  { %14312 = vrcp.f32 %v5199_v21  ;;  %12627 = vmatpush3.msk.msra.mxu1 %vm18265_vm0, %v5214_v60 }
0x2342   :  { %13563 = vmatprep.subr.bf16.mxu1 %v15212_v28 }
0x2344   :  { %v5411_v40 = vpop.permute.xlu1 %5410 }
0x2347   :  { %v14311_v39 = vpop.eup %14310 }
0x2348   :  { %v5206_v18 = vmul.f32 %v14311_v39, %v14305_v32  ;;  %v5403_v46 = vpop.permute.xlu1 %5402 }
0x234a   :  { %12629 = vmatmul.mubr.msk.f32.vlgmr.msra.gmra.mrb[102].mxu1 %vm901_vm15, %v5206_v18 }
0x234b   :  { %v14313_v1 = vpop.eup %14312  ;;  %13566 = vmatpush3.bf16.xpose.msk.msra.mxu1 %vm15747_vm4, %v13564_v22  ;;  %12631 = vmatprep.mubr.msk.f32.mxu1 %vm18172_vm1, %v15211_v0 }
0x234c   :  { %v5207_v20 = vmul.f32 %v14313_v1, %v14307_v51  ;;  %12654 = vmatprep.subr.mxu1 %v15211_v0 }
0x234e   :  { %12632 = vmatmul.mubr.msk.f32.gmra.mrb[104].mxu1 %vm901_vm15, %v5207_v20 }
0x234f   :  { %12634 = vmatprep.mubr.msk.f32.mxu1 %vm18172_vm1, %v15211_v0 }
0x2353   :  { %12655 = vmatpush3.xpose.msk.msra.mxu1 %vm18266_vm2, %v5411_v40 }
0x2354   :  { %13570 = vmatprep.subr.bf16.mxu1 %v15212_v28 }
0x2371   :  { %v5202_v56 = vpop.xlane.xlu0 %5201 }
0x2372   :  { %14314 = vrcp.f32 %v5202_v56 }
0x2375   :  { %v5401_v63 = vpop.permute.xlu0 %5400 }
0x2379   :  { %v5405_v4 = vpop.permute.xlu0 %5404 }
0x237c   :  { %v14315_v43 = vpop.eup %14314 }
0x237d   :  { %v5208_v14 = vmul.f32 %v14315_v43, %v14309_v58 }
0x237f   :  { %12635 = vmatmul.mubr.msk.f32.gmra.mrb[106].mxu1 %vm901_vm15, %v5208_v14 }
0x2380   :  { %12656 = vmatprep.mubr.msk.f32.mxu1 %vm18172_vm1, %v15211_v0 }
0x2383   :  { %12657 = vmatmul.mubr.msk.f32.vlgmr.msra.gmra.mrb[108].mxu1 %vm18276_vm3, %v5401_v63  ;;  %vm18285_vm3 = vmmov %vm18266_vm2 }
0x2384   :  { %12659 = vmatprep.mubr.msk.f32.mxu1 %vm18172_vm1, %v15211_v0 }
0x2387   :  { %12660 = vmatmul.mubr.msk.f32.gmra.mrb[110].mxu1 %vm18277_vm5, %v5403_v46  ;;  %vm18286_vm5 = vmmov %vm18266_vm2 }
0x2388   :  { %12662 = vmatprep.mubr.msk.f32.mxu1 %vm18172_vm1, %v15211_v0 }
0x238b   :  { %12663 = vmatmul.mubr.msk.f32.gmra.mrb[112].mxu1 %vm18278_vm7, %v5405_v4  ;;  %vm18287_vm7 = vmmov %vm18284_vm11 }
0x238c   :  { %12684 = vmatprep.mubr.msk.f32.mxu1 %vm18172_vm1, %v15211_v0 }
0x241d   :  { %v5294_v24 = vpop.f32.mrb[102].mxu1 }
0x241e   :  { %v12630_v29 = vpop.f32.mrb[103].mxu1  ;;  %12642 = vmatmul.mubr.msk.f32.vlgmr.msra.gmra.mrb[126].mxu0 %vm18279_vm9, %v5294_v24  ;;  %vm18289_vm9 = vmmov %vm18287_vm7 }
0x241f   :  { %12644 = vmatprep.mubr.msk.f32.mxu0 %vm18172_vm1, %v15211_v0 }
0x2421   :  { %v5299_v34 = vpop.f32.mrb[104].mxu1 }
0x2422   :  { %v12633_v35 = vpop.f32.mrb[105].mxu1  ;;  %12645 = vmatmul.mubr.msk.f32.gmra.mrb[128].mxu0 %vm18280_vm12, %v5299_v34  ;;  %vm18290_vm12 = vmmov %vm18283_vm8 }
0x2423   :  { %12647 = vmatprep.mubr.msk.f32.mxu0 %vm18172_vm1, %v15211_v0 }
0x2452   :  { %v5304_v36 = vpop.f32.mrb[106].mxu1 }
0x2453   :  { %v12636_v37 = vpop.f32.mrb[107].mxu1  ;;  %12648 = vmatmul.mubr.msk.f32.gmra.mrb[130].mxu0 %vm18281_vm13, %v5304_v36  ;;  %vm18291_vm13 = vmmov %vm18287_vm7 }
0x2454   :  { %12671 = vmatprep.mubr.msk.f32.mxu0 %vm18172_vm1, %v15211_v0 }
0x2456   :  { %v5490_v26 = vpop.f32.mrb[108].mxu1 }
0x2457   :  { %v5491_v3 = vadd.f32 %v5490_v26, %v16661_v50  ;;  %v12658_v2 = vpop.f32.mrb[109].mxu1 }
0x2459   :  { %v5504_v32 = vsel %vm901_vm15, %v5491_v3, -inf }
0x245a   :  { %5505 = vmax.xlane.f32.xlu1 %v5504_v32  ;;  %v5495_v25 = vpop.f32.mrb[110].mxu1 }
0x245b   :  { %v5496_v51 = vadd.f32 %v5495_v25, %v16667_v59  ;;  %v12661_v19 = vpop.f32.mrb[111].mxu1 }
0x245d   :  { %v5507_v16 = vsel %vm901_vm15, %v5496_v51, -inf }
0x245e   :  { %5508 = vmax.xlane.f32.xlu0 %v5507_v16  ;;  %v5500_v49 = vpop.f32.mrb[112].mxu1 }
0x245f   :  { %v5501_v55 = vadd.f32 %v5500_v49, %v16674_v61  ;;  %v12664_v58 = vpop.f32.mrb[113].mxu1 }
0x2461   :  { %v5510_v30 = vsel %vm908_vm6, %v5501_v55, -inf }
0x2462   :  { %5511 = vmax.xlane.f32.xlu0 %v5510_v30 }
0x24e7   :  { %v5506_v15 = vpop.xlane.xlu1 %5505 }
0x24e8   :  { %v5513_v27 = vsub.f32 %v5491_v3, %v5506_v15 }
0x24ea   :  { %v5516_v44 = vmul.f32 1.442695, %v5513_v27 }
0x24eb   :  { %v5509_v45 = vpop.xlane.xlu0 %5508 }
0x24ec   :  { %14316 = vpow2.f32 %v5516_v44  ;;  %v5514_v12 = vsub.f32 %v5496_v51, %v5509_v45 }
0x24ee   :  { %v5518_v21 = vmul.f32 1.442695, %v5514_v12 }
0x24ef   :  { %v5512_v60 = vpop.xlane.xlu0 %5511 }
0x24f0   :  { %14318 = vpow2.f32 %v5518_v21  ;;  %v5515_v23 = vsub.f32 %v5501_v55, %v5512_v60 }
0x24f1   :  { %v5383_v62 = vpop.f32.mrb[126].mxu0 }
0x24f2   :  { %v5520_v39 = vmul.f32 1.442695, %v5515_v23  ;;  %v16838_v18 = vadd.f32 %v5383_v62, %v16764_v17  ;;  %v12643_v22 = vpop.f32.mrb[127].mxu0 }
0x24f4   :  { %14320 = vpow2.f32 %v5520_v39 }
0x24f5   :  { %v5388_v1 = vpop.f32.mrb[128].mxu0 }
0x24f6   :  { %v14317_v20 = vpop.eup %14316  ;;  %v16841_v40 = vadd.f32 %v5388_v1, %v16766_v11  ;;  %v12646_v56 = vpop.f32.mrb[129].mxu0  ;;  %v11304_v11 = vld [vmem:[#allocation4] ss:$0 sm:$0xff] }
0x24f7   :  { %v5522_v43 = vsel %vm901_vm15, %v14317_v20, 0.0  ;;  %v4222_v34 = vadd.f32 %v16644_v47, %v11304_v11  ;;  %v4217_v35 = vadd.f32 %v16642_v38, %v11304_v11  ;;  %v4227_v36 = vadd.f32 %v16646_v48, %v11304_v11  ;;  %v4317_v48 = vld [vmem:[%s18264_s17 + $0x38] sm:$0xff] }
0x24f8   :  { %5523 = vadd.xlane.f32.xlu1 %v5522_v43  ;;  %v14516_v43 = vld [vmem:[%s18261_s15] sm:$0xff] }
0x24f9   :  { %v16857_v37 = vadd.f32 %v4222_v34, %v16535_v41  ;;  %v16865_v26 = vadd.f32 %v4217_v35, %v16525_v54  ;;  %v4316_v41 = vld [vmem:[%s18264_s17 + $0x30] sm:$0xff] }
0x24fa   :  { %v14319_v14 = vpop.eup %14318 }
0x24fb   :  { %v5525_v63 = vsel %vm901_vm15, %v14319_v14, 0.0  ;;  %v4233_v38 = vsel %vm18284_vm11, %v16865_v26, 0.0  ;;  %vm18293_vm11 = vmmov %vm18287_vm7 }
0x24fc   :  { %5526 = vadd.xlane.f32.xlu0 %v5525_v63 }
0x24fe   :  { %v14321_v46 = vpop.eup %14320 }
0x24ff   :  { %v5528_v4 = vsel %vm908_vm6, %v14321_v46, 0.0 }
0x2500   :  { %5529 = vadd.xlane.f32.xlu1 %v5528_v4 }
0x2511   :  { %5541 = vrot.lane.b32.xlu1 %v16586_v53, %s15221_s23  ;;  %v16862_v53 = vadd.f32 %v4227_v36, %v16545_v9  ;;  %v14517_v36 = vld [vmem:[%s18261_s15 + $0x8] sm:$0xff] }
0x2512   :  { %14057 = vrot.lane.b32.xlu0 %v16580_v52, %s15221_s23  ;;  %v4236_v52 = vsel %vm18282_vm14, %v16857_v37, 0.0  ;;  %vm18292_vm14 = vmmov %vm18287_vm7 }
0x2513   :  { %v4239_v47 = vsel %vm18283_vm8, %v16862_v53, 0.0 }
0x2526   :  { %v5393_v17 = vpop.f32.mrb[130].mxu0 }
0x2527   :  { %v16851_v24 = vadd.f32 %v5393_v17, %v16768_v42  ;;  %v12649_v29 = vpop.f32.mrb[131].mxu0  ;;  %v13571_v42 = vpack.c.bf16 %v4317_v48, %v4316_v41 }
0x2529   :  { %13572 = vmatpush3.bf16.msra.mxu1 %v13571_v42 }
0x252a   :  { %13585 = vmatprep.subr.bf16.mxu1 %v15212_v28 }
0x2531   :  { %4237 = vadd.xlane.f32.xlu0 %v4236_v52 }
0x2535   :  { %4240 = vadd.xlane.f32.xlu0 %v4239_v47  ;;  %4234 = vadd.xlane.f32.xlu1 %v4233_v38 }
0x2585   :  { %v5524_v9 = vpop.xlane.xlu1 %5523 }
0x2586   :  { %14322 = vrcp.f32 %v5524_v9  ;;  %v14518_v9 = vld [vmem:[%s18261_s15 + $0x10] sm:$0x3] }
0x2589   :  { %v5527_v3 = vpop.xlane.xlu0 %5526 }
0x258a   :  { %14324 = vrcp.f32 %v5527_v3 }
0x258d   :  { %v5530_v54 = vpop.xlane.xlu1 %5529  ;;  %v14058_v2 = vpop.permute.xlu0 %14057 }
0x258e   :  { %v14060_v32 = vunpack.i.h.bf16 %v14058_v2  ;;  %v14059_v25 = vunpack.i.l.bf16 %v14058_v2  ;;  %14326 = vrcp.f32 %v5530_v54 }
0x2590   :  { %v13568_v51 = vpack.c.bf16 %v14060_v32, %v14059_v25  ;;  %v14323_v19 = vpop.eup %14322 }
0x2591   :  { %v5534_v16 = vmul.f32 %v14323_v19, %v14317_v20  ;;  %v5542_v49 = vpop.permute.xlu1 %5541  ;;  %v11362_v20 = vld [vmem:[#allocation9] ss:$0 sm:$0xff]  ;;  %v5806_v19 = vld [vmem:[%s18288_s24] sm:$0xff] }
0x2592   :  { %13569 = vmatpush3.bf16.msra.mxu0 %v13568_v51 }
0x2593   :  { %12669 = vmatprep.subr.mxu0 %v15211_v0 }
0x2594   :  { %v14325_v55 = vpop.eup %14324 }
0x2595   :  { %v5535_v58 = vmul.f32 %v14325_v55, %v14319_v14  ;;  %v5808_v55 = vld [vmem:[%s18288_s24 + $0x10] sm:$0xff] }
0x2596   :  { %12670 = vmatpush3.msk.msra.mxu0 %vm18265_vm0, %v5542_v49  ;;  %vm18294_vm0 = vmmov %vm18287_vm7 }
0x2597   :  { %12672 = vmatmul.mubr.msk.f32.vlgmr.msra.gmra.mrb[132].mxu0 %vm901_vm15, %v5534_v16  ;;  %13573 = vmatprep.subr.bf16.mxu0 %v15212_v28  ;;  %v5807_v16 = vld [vmem:[%s18288_s24 + $0x8] sm:$0xff] }
0x2598   :  { %12674 = vmatprep.mubr.msk.f32.mxu0 %vm18172_vm1, %v15211_v0  ;;  %v14327_v30 = vpop.eup %14326  ;;  %v13586_v49 = vpack.c.bf16 %v5807_v16, %v5806_v19 }
0x2599   :  { %v5536_v15 = vmul.f32 %v14327_v30, %v14321_v46 }
0x259b   :  { %12675 = vmatmul.mubr.msk.f32.gmra.mrb[134].mxu0 %vm901_vm15, %v5535_v58  ;;  %v5809_v58 = vld [vmem:[%s18288_s24 + $0x18] sm:$0xff] }
0x259c   :  { %12677 = vmatprep.mubr.msk.f32.mxu0 %vm18172_vm1, %v15211_v0  ;;  %v13589_v30 = vpack.c.bf16 %v5809_v58, %v5808_v55 }
0x259f   :  { %12678 = vmatmul.mubr.msk.f32.gmra.mrb[136].mxu0 %vm901_vm15, %v5536_v15  ;;  %v5810_v15 = vld [vmem:[%s18288_s24 + $0x20] sm:$0xff] }
0x25a0   :  { %12709 = vmatprep.mubr.msk.f32.mxu0 %vm18172_vm1, %v15211_v0 }
0x25be   :  { %v4238_v23 = vpop.xlane.xlu0 %4237 }
0x25bf   :  { %v4243_v29 = vmul.f32 0.015625, %v4238_v23 }
0x25c2   :  { %v4235_v62 = vpop.xlane.xlu1 %4234  ;;  %v4241_v63 = vpop.xlane.xlu0 %4240 }
0x25c3   :  { %v4242_v56 = vmul.f32 0.015625, %v4235_v62  ;;  %v4244_v34 = vmul.f32 0.015625, %v4241_v63 }
0x25c5   :  { %v16899_v35 = vsub.f32 %v16865_v26, %v4242_v56  ;;  %v16908_v42 = vsub.f32 %v16862_v53, %v4244_v34 }
0x25c7   :  { %v4248_v54 = vmul.f32 %v16899_v35, %v16899_v35  ;;  %v4250_v32 = vmul.f32 %v16908_v42, %v16908_v42 }
0x25c9   :  { %v4257_v51 = vsel %vm18283_vm8, %v4250_v32, 0.0 }
0x266a   :  { %v5622_v27 = vpop.f32.mrb[132].mxu0 }
0x266b   :  { %v12673_v44 = vpop.f32.mrb[133].mxu0  ;;  %12685 = vmatmul.mubr.msk.f32.vlgmr.msra.gmra.mrb[114].mxu1 %vm18266_vm2, %v5622_v27  ;;  %v5811_v27 = vld [vmem:[%s18288_s24 + $0x28] sm:$0xff]  ;;  %vm18296_vm2 = vmmov %vm18283_vm8 }
0x266c   :  { %12687 = vmatprep.mubr.msk.f32.mxu1 %vm18172_vm1, %v15211_v0  ;;  %13587 = vmatpush3.bf16.msra.mxu1 %v13586_v49  ;;  %v13592_v44 = vpack.c.bf16 %v5811_v27, %v5810_v15  ;;  %v5800_v49 = vld [vmem:[%s18295_s21 + $0x18] sm:$0xff]  ;;  %v5802_v15 = vld [vmem:[%s18295_s21 + $0x28] sm:$0xff] }
0x266d   :  { %13588 = vmatprep.subr.bf16.mxu1 %v15212_v28 }
0x266e   :  { %v5627_v45 = vpop.f32.mrb[134].mxu0 }
0x266f   :  { %v12676_v12 = vpop.f32.mrb[135].mxu0  ;;  %12688 = vmatmul.mubr.msk.f32.gmra.mrb[116].mxu1 %vm18285_vm3, %v5627_v45  ;;  %v5812_v45 = vld [vmem:[%s18288_s24 + $0x30] sm:$0xff]  ;;  %vm18297_vm3 = vmmov %vm18294_vm0 }
0x2670   :  { %12690 = vmatprep.mubr.msk.f32.mxu1 %vm18172_vm1, %v15211_v0  ;;  %13590 = vmatpush3.bf16.msra.mxu1 %v13589_v30  ;;  %v5813_v12 = vld [vmem:[%s18288_s24 + $0x38] sm:$0xff] }
0x2671   :  { %13591 = vmatprep.subr.bf16.mxu1 %v15212_v28 }
0x2672   :  { %v5632_v21 = vpop.f32.mrb[136].mxu0 }
0x2673   :  { %v12679_v60 = vpop.f32.mrb[137].mxu0  ;;  %12691 = vmatmul.mubr.msk.f32.gmra.mrb[118].mxu1 %vm18286_vm5, %v5632_v21  ;;  %v13595_v21 = vpack.c.bf16 %v5813_v12, %v5812_v45  ;;  %vm18298_vm5 = vmmov %vm18294_vm0  ;;  %v5803_v45 = vld [vmem:[%s18295_s21 + $0x30] sm:$0xff]  ;;  %v5804_v12 = vld [vmem:[%s18295_s21 + $0x38] sm:$0xff] }
0x2674   :  { %12734 = vmatprep.mubr.msk.f32.mxu1 %vm18172_vm1, %v15211_v0  ;;  %13593 = vmatpush3.bf16.msra.mxu1 %v13592_v44 }
0x2675   :  { %13594 = vmatprep.subr.bf16.mxu1 %v15212_v28 }
0x2678   :  { %13596 = vmatpush3.bf16.msra.mxu1 %v13595_v21  ;;  %v13583_v21 = vpack.c.bf16 %v5804_v12, %v5803_v45 }
0x2679   :  { %13601 = vmatprep.subr.bf16.mxu1 %v15212_v28 }
0x273e   :  { %v5711_v39 = vpop.f32.mrb[114].mxu1 }
0x273f   :  { %v5725_v22 = vadd.f32 %v5711_v39, %v16838_v18  ;;  %v12686_v1 = vpop.f32.mrb[115].mxu1 }
0x2741   :  { %v5728_v14 = vadd.f32 %v14516_v43, %v5725_v22 }
0x2742   :  { %v5716_v46 = vpop.f32.mrb[116].mxu1 }
0x2743   :  { %v5726_v4 = vadd.f32 %v5716_v46, %v16841_v40  ;;  %v12689_v17 = vpop.f32.mrb[117].mxu1  ;;  %v5737_v11 = vadd.f32 %v11362_v20, %v5728_v14  ;;  %v16905_v40 = vsub.f32 %v16857_v37, %v4243_v29  ;;  %v4251_v37 = vsel %vm18291_vm13, %v4248_v54, 0.0  ;;  %v11306_v54 = vld [vmem:[#allocation7] ss:$0 sm:$0xff]  ;;  %vm18302_vm13 = vmmov %vm18294_vm0 }
0x2745   :  { %v5729_v52 = vadd.f32 %v14517_v36, %v5726_v4  ;;  %v5740_v18 = vsel %vm18287_vm7, %v5737_v11, 0.0  ;;  %v4249_v53 = vmul.f32 %v16905_v40, %v16905_v40  ;;  %vm18299_vm7 = vmmov %vm18294_vm0 }
0x2746   :  { %v5721_v47 = vpop.f32.mrb[118].mxu1  ;;  %5741 = vadd.xlane.f32.xlu1 %v5740_v18 }
0x2747   :  { %v5727_v38 = vadd.f32 %v5721_v47, %v16851_v24  ;;  %v12692_v41 = vpop.f32.mrb[119].mxu1  ;;  %v5738_v48 = vadd.f32 %v11362_v20, %v5729_v52  ;;  %v4254_v25 = vsel %vm18292_vm14, %v4249_v53, 0.0  ;;  %vm18303_vm14 = vcmask 130048  }
0x2748   :  { %vm18304_vm8 = vmmov %vm18303_vm14 }
0x2749   :  { %v5730_v26 = vadd.f32 %v14518_v9, %v5727_v38  ;;  %v5743_v3 = vsel %vm18289_vm9, %v5738_v48, 0.0  ;;  %vm18300_vm9 = vmmov %vm18294_vm0 }
0x274a   :  { %5744 = vadd.xlane.f32.xlu0 %v5743_v3 }
0x274b   :  { %v5739_v2 = vadd.f32 %v11362_v20, %v5730_v26  ;;  %v11305_v26 = vld [vmem:[#allocation6] ss:$0 sm:$0xff] }
0x274d   :  { %v5746_v24 = vsel %vm18290_vm12, %v5739_v2, 0.0  ;;  %vm18301_vm12 = vmmov %vm18294_vm0 }
0x274e   :  { %5747 = vadd.xlane.f32.xlu1 %v5746_v24  ;;  %4252 = vadd.xlane.f32.xlu0 %v4251_v37  ;;  %v5797_v24 = vld [vmem:[%s18295_s21] sm:$0xff]  ;;  %v5798_v37 = vld [vmem:[%s18295_s21 + $0x8] sm:$0xff] }
0x274f   :  { %v13574_v32 = vpack.c.bf16 %v5798_v37, %v5797_v24 }
0x2751   :  { %13575 = vmatpush3.bf16.msra.mxu0 %v13574_v32 }
0x2752   :  { %4255 = vadd.xlane.f32.xlu1 %v4254_v25  ;;  %4258 = vadd.xlane.f32.xlu0 %v4257_v51 }
0x2753   :  { %13576 = vmatprep.subr.bf16.mxu0 %v15212_v28 }
0x27d3   :  { %v5742_v60 = vpop.xlane.xlu1 %5741 }
0x27d4   :  { %v5749_v23 = vmul.f32 0.015625, %v5742_v60 }
0x27d6   :  { %v16934_v62 = vsub.f32 %v5737_v11, %v5749_v23 }
0x27d7   :  { %v5745_v39 = vpop.xlane.xlu0 %5744 }
0x27d8   :  { %v5750_v22 = vmul.f32 0.015625, %v5745_v39  ;;  %v5755_v1 = vmul.f32 %v16934_v62, %v16934_v62 }
0x27da   :  { %v16938_v20 = vsub.f32 %v5738_v48, %v5750_v22  ;;  %v5758_v56 = vsel %vm18293_vm11, %v5755_v1, 0.0  ;;  %vm18305_vm11 = vmmov %vm18304_vm8 }
0x27db   :  { %v4253_v43 = vpop.xlane.xlu0 %4252  ;;  %5759 = vadd.xlane.f32.xlu1 %v5758_v56  ;;  %v5748_v14 = vpop.xlane.xlu1 %5747 }
0x27dc   :  { %v4260_v63 = vmul.f32 0.015625, %v4253_v43  ;;  %v5751_v46 = vmul.f32 0.015625, %v5748_v14  ;;  %v5756_v4 = vmul.f32 %v16938_v20, %v16938_v20 }
0x27de   :  { %v4263_v17 = vadd.f32 1e-05, %v4260_v63  ;;  %v16943_v11 = vsub.f32 %v5739_v2, %v5751_v46  ;;  %v5761_v29 = vsel %vm18294_vm0, %v5756_v4, 0.0  ;;  %v11363_v4 = vld [vmem:[#allocation10] ss:$0 sm:$0xff]  ;;  %vm18306_vm0 = vmmov %vm18304_vm8 }
0x27df   :  { %5762 = vadd.xlane.f32.xlu0 %v5761_v29  ;;  %v4259_v34 = vpop.xlane.xlu0 %4258  ;;  %v4256_v36 = vpop.xlane.xlu1 %4255  ;;  %v11364_v29 = vld [vmem:[#allocation12] ss:$0 sm:$0xff] }
0x27e0   :  { %14328 = vrsqrt.f32 %v4263_v17  ;;  %v4262_v52 = vmul.f32 0.015625, %v4259_v34  ;;  %v4261_v18 = vmul.f32 0.015625, %v4256_v36  ;;  %v5757_v47 = vmul.f32 %v16943_v11, %v16943_v11 }
0x27e2   :  { %v4265_v38 = vadd.f32 1e-05, %v4262_v52  ;;  %v4264_v41 = vadd.f32 1e-05, %v4261_v18  ;;  %v5764_v48 = vsel %vm18296_vm2, %v5757_v47, 0.0  ;;  %vm18307_vm2 = vmmov %vm18306_vm0 }
0x27e3   :  { %5765 = vadd.xlane.f32.xlu1 %v5764_v48 }
0x27e4   :  { %14330 = vrsqrt.f32 %v4265_v38 }
0x27e5   :  { %14332 = vrsqrt.f32 %v4264_v41 }
0x27ea   :  { %v14329_v9 = vpop.eup %14328 }
0x27eb   :  { %v4269_v3 = vmul.f32 %v14329_v9, %v16899_v35  ;;  %v5799_v35 = vld [vmem:[%s18295_s21 + $0x10] sm:$0xff] }
0x27ec   :  { %v13577_v58 = vpack.c.bf16 %v5800_v49, %v5799_v35  ;;  %v11365_v35 = vld [vmem:[#allocation13] ss:$0 sm:$0xff] }
0x27ed   :  { %v4278_v2 = vmul.f32 %v11305_v26, %v4269_v3  ;;  %v11369_v3 = vld [vmem:[#allocation15] ss:$0 sm:$0xff] }
0x27ee   :  { %v14331_v53 = vpop.eup %14330  ;;  %13578 = vmatpush3.bf16.msra.mxu0 %v13577_v58 }
0x27ef   :  { %v14333_v25 = vpop.eup %14332  ;;  %v16952_v51 = vadd.f32 %v11306_v54, %v4278_v2  ;;  %v4271_v16 = vmul.f32 %v14331_v53, %v16908_v42  ;;  %13579 = vmatprep.subr.bf16.mxu0 %v15212_v28  ;;  %v5801_v42 = vld [vmem:[%s18295_s21 + $0x20] sm:$0xff] }
0x27f0   :  { %v4270_v19 = vmul.f32 %v14333_v25, %v16905_v40  ;;  %v13580_v27 = vpack.c.bf16 %v5802_v15, %v5801_v42 }
0x27f1   :  { %12735 = vmatmul.mubr.msk.f32.vlgmr.msra.gmra.mrb[120].mxu1 %vm18297_vm3, %v16952_v51  ;;  %v4280_v40 = vmul.f32 %v11305_v26, %v4271_v16  ;;  %vm18308_vm3 = vmmov %vm18306_vm0 }
0x27f2   :  { %12737 = vmatprep.mubr.msk.f32.mxu1 %vm18172_vm1, %v15211_v0  ;;  %v4279_v55 = vmul.f32 %v11305_v26, %v4270_v19  ;;  %13581 = vmatpush3.bf16.msra.mxu0 %v13580_v27 }
0x27f3   :  { %v16972_v44 = vadd.f32 %v11306_v54, %v4280_v40  ;;  %13582 = vmatprep.subr.bf16.mxu0 %v15212_v28 }
0x27f4   :  { %v16963_v30 = vadd.f32 %v11306_v54, %v4279_v55 }
0x27f6   :  { %12738 = vmatmul.mubr.msk.f32.gmra.mrb[122].mxu1 %vm18298_vm5, %v16963_v30  ;;  %13584 = vmatpush3.bf16.msra.mxu0 %v13583_v21  ;;  %vm18309_vm5 = vmmov %vm18306_vm0 }
0x27f7   :  { %12740 = vmatprep.mubr.msk.f32.mxu1 %vm18172_vm1, %v15211_v0  ;;  %13597 = vmatprep.subr.bf16.mxu0 %v15212_v28 }
0x27fa   :  { %12741 = vmatmul.mubr.msk.f32.gmra.mrb[124].mxu1 %vm18299_vm7, %v16972_v44  ;;  %vm18310_vm7 = vmmov %vm18306_vm0 }
0x27fb   :  { %12764 = vmatprep.mubr.msk.f32.mxu1 %vm18172_vm1, %v15211_v0 }
0x2868   :  { %v5760_v60 = vpop.xlane.xlu1 %5759 }
0x2869   :  { %v5767_v23 = vmul.f32 0.015625, %v5760_v60 }
0x286b   :  { %v5770_v39 = vadd.f32 1e-05, %v5767_v23 }
0x286c   :  { %v5763_v22 = vpop.xlane.xlu0 %5762 }
0x286d   :  { %14334 = vrsqrt.f32 %v5770_v39  ;;  %v5768_v1 = vmul.f32 0.015625, %v5763_v22 }
0x286f   :  { %v5771_v56 = vadd.f32 1e-05, %v5768_v1 }
0x2870   :  { %v5766_v43 = vpop.xlane.xlu1 %5765 }
0x2871   :  { %14336 = vrsqrt.f32 %v5771_v56  ;;  %v5769_v14 = vmul.f32 0.015625, %v5766_v43 }
0x2873   :  { %v5772_v63 = vadd.f32 1e-05, %v5769_v14 }
0x2875   :  { %14338 = vrsqrt.f32 %v5772_v63 }
0x2877   :  { %v14335_v46 = vpop.eup %14334 }
0x2878   :  { %v5776_v17 = vmul.f32 %v14335_v46, %v16934_v62 }
0x287a   :  { %v5785_v34 = vmul.f32 %v11363_v4, %v5776_v17 }
0x287b   :  { %v14337_v36 = vpop.eup %14336 }
0x287c   :  { %v16983_v52 = vadd.f32 %v11364_v29, %v5785_v34  ;;  %v5777_v18 = vmul.f32 %v14337_v36, %v16938_v20 }
0x287e   :  { %12710 = vmatmul.mubr.msk.f32.vlgmr.msra.gmra.mrb[138].mxu0 %vm18300_vm9, %v16983_v52  ;;  %v5786_v47 = vmul.f32 %v11363_v4, %v5777_v18  ;;  %vm645_vm9 = vcmp.ge.s32.totalorder %v15792_v8, 1 }
0x287f   :  { %v14339_v38 = vpop.eup %14338  ;;  %12712 = vmatprep.mubr.msk.f32.mxu0 %vm18172_vm1, %v15211_v0 }
0x2880   :  { %v16990_v41 = vadd.f32 %v11364_v29, %v5786_v47  ;;  %v5778_v48 = vmul.f32 %v14339_v38, %v16943_v11 }
0x2882   :  { %12713 = vmatmul.mubr.msk.f32.gmra.mrb[140].mxu0 %vm18301_vm12, %v16990_v41  ;;  %v5787_v62 = vmul.f32 %v11363_v4, %v5778_v48  ;;  %vm638_vm12 = vcmp.ge.s32.totalorder %v15783_v5, 1 }
0x2883   :  { %12715 = vmatprep.mubr.msk.f32.mxu0 %vm18172_vm1, %v15211_v0 }
0x2884   :  { %v16997_v20 = vadd.f32 %v11364_v29, %v5787_v62 }
0x2886   :  { %12716 = vmatmul.mubr.msk.f32.gmra.mrb[142].mxu0 %vm18302_vm13, %v16997_v20  ;;  %vm18311_vm13 = vcmp.lt.s32.totalorder %v15786_v6, 9 }
0x2887   :  { %12749 = vmatprep.mubr.msk.f32.mxu0 %vm18172_vm1, %v15211_v0 }
0x28c4   :  { %v6002_v9 = vpop.f32.mrb[120].mxu1 }
0x28c5   :  { %v12736_v26 = vpop.f32.mrb[121].mxu1  ;;  %v6003_v11 = vadd.f32 %v11369_v3, %v6002_v9 }
0x28c9   :  { %v6007_v54 = vpop.f32.mrb[122].mxu1 }
0x28ca   :  { %v6008_v2 = vadd.f32 %v11369_v3, %v6007_v54  ;;  %v12739_v24 = vpop.f32.mrb[123].mxu1 }
0x28cc   :  { %v17003_v37 = vpack.i.bf16 %v6008_v2, %v6003_v11  ;;  %v13598_v53 = vpack.c.bf16 %v6008_v2, %v6003_v11 }
0x28cd   :  { %v6012_v32 = vpop.f32.mrb[124].mxu1 }
0x28ce   :  { %v17005_v25 = vadd.f32 %v11369_v3, %v6012_v32  ;;  %14062 = vrot.lane.b32.xlu0 %v17003_v37, %s15216_s4  ;;  %v12742_v19 = vpop.f32.mrb[125].mxu1  ;;  %13600 = vmatpush3.bf16.xpose.msk.msra.mxu0 %vm15747_vm4, %v13598_v53 }
0x28cf   :  { %12747 = vmatprep.subr.mxu0 %v15211_v0 }
0x28d0   :  { %6259 = vrot.lane.b32.xlu1 %v17005_v25, %s15216_s4 }
0x28d6   :  { %12748 = vmatpush3.xpose.msk.msra.mxu0 %vm18303_vm14, %v17005_v25  ;;  %vm640_vm14 = vmand %vm18311_vm13, %vm638_vm12 }
0x28d7   :  { %13604 = vmatprep.subr.bf16.mxu0 %v15212_v28 }
0x2940   :  { %v14063_v16 = vpop.permute.xlu0 %14062 }
0x2941   :  { %v14065_v49 = vunpack.i.h.bf16 %v14063_v16  ;;  %v14064_v55 = vunpack.i.l.bf16 %v14063_v16 }
0x2942   :  { %v6260_v56 = vpop.permute.xlu1 %6259 }
0x2943   :  { %v13605_v27 = vpack.c.bf16 %v14065_v49, %v14064_v55 }
0x2951   :  { %v5907_v58 = vpop.f32.mrb[138].mxu0 }
0x2952   :  { %v5908_v40 = vadd.f32 %v11365_v35, %v5907_v58  ;;  %v12711_v42 = vpop.f32.mrb[139].mxu0 }
0x2954   :  { %v17017_v15 = vmul.f32 0.25, %v5908_v40 }
0x2955   :  { %v5912_v45 = vpop.f32.mrb[140].mxu0 }
0x2956   :  { %v5913_v12 = vadd.f32 %v11365_v35, %v5912_v45  ;;  %6249 = vrot.lane.b32.xlu1 %v17017_v15, %s15216_s4  ;;  %v12714_v21 = vpop.f32.mrb[141].mxu0  ;;  %12750 = vmatmul.mubr.msk.f32.vlgmr.msra.gmra.mrb[144].mxu0 %vm18304_vm8, %v17017_v15  ;;  %vm18312_vm8 = vcmp.ge.s32.totalorder %v15789_v7, 0 }
0x2957   :  { %13607 = vmatpush3.bf16.xpose.msk.msra.mxu0 %vm15747_vm4, %v13605_v27  ;;  %12752 = vmatprep.mubr.msk.f32.mxu0 %vm18172_vm1, %v15211_v0 }
0x2958   :  { %v17027_v60 = vmul.f32 0.25, %v5913_v12  ;;  %12777 = vmatprep.subr.mxu0 %v15211_v0 }
0x2959   :  { %v5917_v23 = vpop.f32.mrb[142].mxu0 }
0x295a   :  { %v5918_v39 = vadd.f32 %v11365_v35, %v5917_v23  ;;  %6251 = vrot.lane.b32.xlu0 %v17027_v60, %s15216_s4  ;;  %v12717_v22 = vpop.f32.mrb[143].mxu0  ;;  %12753 = vmatmul.mubr.msk.f32.gmra.mrb[146].mxu0 %vm18305_vm11, %v17027_v60  ;;  %vm647_vm11 = vmand %vm18312_vm8, %vm645_vm9  ;;  %vm18320_vm8 = vcmask 130048  }
0x295b   :  { %12755 = vmatprep.mubr.msk.f32.mxu0 %vm18172_vm1, %v15211_v0 }
0x295c   :  { %v17036_v1 = vmul.f32 0.25, %v5918_v39 }
0x295e   :  { %6253 = vrot.lane.b32.xlu1 %v17036_v1, %s15216_s4  ;;  %12756 = vmatmul.mubr.msk.f32.gmra.mrb[148].mxu0 %vm18306_vm0, %v17036_v1  ;;  %vm642_vm0 = vmand %vm638_vm12, %vm589_vm10 }
0x295f   :  { %12778 = vmatpush3.xpose.msk.msra.mxu0 %vm18307_vm2, %v6260_v56  ;;  %12779 = vmatprep.mubr.msk.f32.mxu0 %vm18172_vm1, %v15211_v0  ;;  %vm643_vm2 = vmand %vm640_vm14, %vm589_vm10  ;;  %v17068_v46 = vsel %vm642_vm0, 0.0, %v15217_v13 }
0x2960   :  { %13611 = vmatprep.subr.bf16.mxu0 %v15212_v28  ;;  %vm18322_vm0 = vmmov %vm18320_vm8 }
0x29c8   :  { %v6250_v43 = vpop.permute.xlu1 %6249 }
0x29c9   :  { %12780 = vmatmul.mubr.msk.f32.vlgmr.msra.gmra.mrb[150].mxu0 %vm18308_vm3, %v6250_v43  ;;  %vm18313_vm3 = vcmp.lt.s32.totalorder %v15792_v8, 9 }
0x29ca   :  { %12782 = vmatprep.mubr.msk.f32.mxu0 %vm18172_vm1, %v15211_v0  ;;  %vm18315_vm10 = vmmov %vm18313_vm3 }
0x29cc   :  { %v6252_v14 = vpop.permute.xlu0 %6251 }
0x29cd   :  { %12783 = vmatmul.mubr.msk.f32.gmra.mrb[152].mxu0 %vm18309_vm5, %v6252_v14  ;;  %vm650_vm5 = vmand %vm647_vm11, %vm18313_vm3 }
0x29ce   :  { %12785 = vmatprep.mubr.msk.f32.mxu0 %vm18172_vm1, %v15211_v0  ;;  %vm18321_vm11 = vmmov %vm18320_vm8 }
0x29cf   :  { %vm18324_vm3 = vmmov %vm18322_vm0 }
0x29d0   :  { %v6254_v63 = vpop.permute.xlu1 %6253 }
0x29d1   :  { %12786 = vmatmul.mubr.msk.f32.gmra.mrb[154].mxu0 %vm18310_vm7, %v6254_v63  ;;  %vm653_vm7 = vmor %vm643_vm2, %vm650_vm5 }
0x29d2   :  { %12807 = vmatprep.mubr.msk.f32.mxu0 %vm18172_vm1, %v15211_v0  ;;  %vm18314_vm1 = vcmp.lt.s32.totalorder %v15801_v10, 9  ;;  %v17074_v17 = vsel %vm653_vm7, 0.0, %v15217_v13  ;;  %vm18323_vm2 = vmmov %vm18322_vm0 }
0x29d3   :  { %vm648_vm13 = vmand %vm18314_vm1, %vm645_vm9  ;;  %vm18316_vm1 = vcmask 1041408   ;;  %vm18317_vm9 = vmmov 0  }
0x29d4   :  { %vm651_vm12 = vmand %vm648_vm13, %vm18315_vm10 }
0x29d5   :  { %v17081_v18 = vsel %vm651_vm12, 0.0, %v15217_v13  ;;  %vm18319_vm14 = vmmov %vm18316_vm1 }
0x29d6   :  { %vm18325_vm5 = vmmov %vm18322_vm0 }
0x29d7   :  { %vm18326_vm7 = vmmov %vm18322_vm0 }
0x29d8   :  { %vm18327_vm13 = vmmov %vm18322_vm0 }
0x29d9   :  { %vm18328_vm10 = vmmov %vm18322_vm0 }
0x29da   :  { %vm18329_vm12 = vmmov %vm18322_vm0 }
0x2a29   :  { %v6103_v4 = vpop.f32.mrb[144].mxu0 }
0x2a2a   :  { %v6104_v6 = vadd.f32 %v6103_v4, %v17068_v46  ;;  %v12751_v7 = vpop.f32.mrb[145].mxu0 }
0x2a2c   :  { %v6117_v5 = vsel %vm901_vm15, %v6104_v6, -inf }
0x2a2d   :  { %6118 = vmax.xlane.f32.xlu0 %v6117_v5  ;;  %v6108_v29 = vpop.f32.mrb[146].mxu0 }
0x2a2e   :  { %v6109_v34 = vadd.f32 %v6108_v29, %v17074_v17  ;;  %v12754_v36 = vpop.f32.mrb[147].mxu0 }
0x2a30   :  { %v6120_v10 = vsel %vm901_vm15, %v6109_v34, -inf }
0x2a31   :  { %6121 = vmax.xlane.f32.xlu1 %v6120_v10  ;;  %v6113_v47 = vpop.f32.mrb[148].mxu0 }
0x2a32   :  { %v6114_v38 = vadd.f32 %v6113_v47, %v17081_v18  ;;  %v12757_v48 = vpop.f32.mrb[149].mxu0 }
0x2a34   :  { %v6123_v62 = vsel %vm908_vm6, %v6114_v38, -inf }
0x2a35   :  { %6124 = vmax.xlane.f32.xlu0 %v6123_v62 }
0x2a9c   :  { %v6339_v8 = vpop.f32.mrb[150].mxu0 }
0x2a9d   :  { %v6340_v9 = vadd.f32 %v6339_v8, %v17068_v46  ;;  %v12781_v26 = vpop.f32.mrb[151].mxu0 }
0x2a9f   :  { %v6353_v3 = vsel %vm901_vm15, %v6340_v9, -inf }
0x2aa0   :  { %6354 = vmax.xlane.f32.xlu0 %v6353_v3  ;;  %v6344_v54 = vpop.f32.mrb[152].mxu0 }
0x2aa1   :  { %v6345_v13 = vadd.f32 %v6344_v54, %v17074_v17  ;;  %v12784_v11 = vpop.f32.mrb[153].mxu0 }
0x2aa3   :  { %v6356_v2 = vsel %vm901_vm15, %v6345_v13, -inf }
0x2aa4   :  { %6357 = vmax.xlane.f32.xlu1 %v6356_v2  ;;  %v6349_v24 = vpop.f32.mrb[154].mxu0 }
0x2aa5   :  { %v6350_v53 = vadd.f32 %v6349_v24, %v17081_v18  ;;  %v12787_v32 = vpop.f32.mrb[155].mxu0 }
0x2aa7   :  { %v6359_v19 = vsel %vm908_vm6, %v6350_v53, -inf }
0x2aa8   :  { %6360 = vmax.xlane.f32.xlu0 %v6359_v19 }
0x2ab5   :  { %6154 = vrot.lane.b32.xlu1 %v17005_v25, %s15214_s3 }
0x2aba   :  { %v6119_v16 = vpop.xlane.xlu0 %6118 }
0x2abb   :  { %v6126_v35 = vsub.f32 %v6104_v6, %v6119_v16 }
0x2abd   :  { %v6129_v40 = vmul.f32 1.442695, %v6126_v35 }
0x2abe   :  { %14067 = vrot.lane.b32.xlu0 %v17003_v37, %s15214_s3  ;;  %v6122_v49 = vpop.xlane.xlu1 %6121 }
0x2abf   :  { %v6127_v58 = vsub.f32 %v6109_v34, %v6122_v49  ;;  %14340 = vpow2.f32 %v6129_v40 }
0x2ac1   :  { %v6131_v27 = vmul.f32 1.442695, %v6127_v58 }
0x2ac2   :  { %v6125_v55 = vpop.xlane.xlu0 %6124 }
0x2ac3   :  { %v6128_v42 = vsub.f32 %v6114_v38, %v6125_v55  ;;  %14342 = vpow2.f32 %v6131_v27  ;;  %v5817_v27 = vld [vmem:[%s18318_s9 + $0x10] sm:$0xff] }
0x2ac5   :  { %v6133_v45 = vmul.f32 1.442695, %v6128_v42 }
0x2ac7   :  { %14344 = vpow2.f32 %v6133_v45  ;;  %v5818_v45 = vld [vmem:[%s18318_s9 + $0x18] sm:$0xff] }
0x2ac9   :  { %v14341_v12 = vpop.eup %14340 }
0x2aca   :  { %v6135_v23 = vsel %vm901_vm15, %v14341_v12, 0.0 }
0x2acd   :  { %v14343_v21 = vpop.eup %14342 }
0x2ace   :  { %v6138_v56 = vsel %vm901_vm15, %v14343_v21, 0.0 }
0x2ad1   :  { %v14345_v39 = vpop.eup %14344 }
0x2ad2   :  { %v6141_v22 = vsel %vm908_vm6, %v14345_v39, 0.0 }
0x2ad9   :  { %6136 = vadd.xlane.f32.xlu1 %v6135_v23 }
0x2add   :  { %6142 = vadd.xlane.f32.xlu1 %v6141_v22  ;;  %6139 = vadd.xlane.f32.xlu0 %v6138_v56  ;;  %v5815_v22 = vld [vmem:[%s18318_s9] sm:$0xff] }
0x2b2d   :  { %v6355_v43 = vpop.xlane.xlu0 %6354 }
0x2b2e   :  { %v6362_v14 = vsub.f32 %v6340_v9, %v6355_v43 }
0x2b30   :  { %v6365_v63 = vmul.f32 1.442695, %v6362_v14 }
0x2b31   :  { %v6358_v4 = vpop.xlane.xlu1 %6357 }
0x2b32   :  { %14346 = vpow2.f32 %v6365_v63  ;;  %v6363_v6 = vsub.f32 %v6345_v13, %v6358_v4 }
0x2b34   :  { %v6367_v7 = vmul.f32 1.442695, %v6363_v6 }
0x2b35   :  { %v6361_v5 = vpop.xlane.xlu0 %6360  ;;  %v6155_v9 = vpop.permute.xlu1 %6154 }
0x2b36   :  { %14348 = vpow2.f32 %v6367_v7  ;;  %v6364_v29 = vsub.f32 %v6350_v53, %v6361_v5 }
0x2b38   :  { %v6369_v34 = vmul.f32 1.442695, %v6364_v29 }
0x2b39   :  { %v14068_v36 = vpop.permute.xlu0 %14067 }
0x2b3a   :  { %14350 = vpow2.f32 %v6369_v34  ;;  %v14070_v10 = vunpack.i.h.bf16 %v14068_v36  ;;  %v14069_v47 = vunpack.i.l.bf16 %v14068_v36 }
0x2b3c   :  { %v14347_v38 = vpop.eup %14346  ;;  %v13602_v48 = vpack.c.bf16 %v14070_v10, %v14069_v47 }
0x2b3d   :  { %v6371_v62 = vsel %vm901_vm15, %v14347_v38, 0.0 }
0x2b3e   :  { %13603 = vmatpush3.bf16.msra.mxu1 %v13602_v48  ;;  %6372 = vadd.xlane.f32.xlu0 %v6371_v62 }
0x2b3f   :  { %12762 = vmatprep.subr.mxu1 %v15211_v0 }
0x2b40   :  { %v17101_v8 = vpop.eup %14348 }
0x2b41   :  { %v6374_v26 = vsel %vm901_vm15, %v17101_v8, 0.0 }
0x2b42   :  { %6375 = vadd.xlane.f32.xlu1 %v6374_v26  ;;  %12763 = vmatpush3.msk.msra.mxu1 %vm18316_vm1, %v6155_v9 }
0x2b43   :  { %13608 = vmatprep.subr.bf16.mxu1 %v15212_v28 }
0x2b44   :  { %v14351_v3 = vpop.eup %14350 }
0x2b45   :  { %v6377_v54 = vsel %vm908_vm6, %v14351_v3, 0.0 }
0x2b46   :  { %6378 = vadd.xlane.f32.xlu1 %v6377_v54 }
0x2b54   :  { %14072 = vrot.lane.b32.xlu0 %v17003_v37, %s15213_s16 }
0x2b57   :  { %6390 = vrot.lane.b32.xlu1 %v17005_v25, %s15213_s16 }
0x2b58   :  { %14077 = vrot.lane.b32.xlu0 %v17003_v37, %s15219_s8 }
0x2b5b   :  { %6673 = vrot.lane.b32.xlu1 %v17005_v25, %s15219_s8 }
0x2b5c   :  { %6663 = vrot.lane.b32.xlu0 %v17017_v15, %s15219_s8 }
0x2b5f   :  { %6665 = vrot.lane.b32.xlu1 %v17027_v60, %s15219_s8 }
0x2b60   :  { %6667 = vrot.lane.b32.xlu0 %v17036_v1, %s15219_s8 }
0x2b66   :  { %v6137_v13 = vpop.xlane.xlu1 %6136 }
0x2b67   :  { %14352 = vrcp.f32 %v6137_v13 }
0x2b6a   :  { %v6140_v11 = vpop.xlane.xlu0 %6139  ;;  %v6143_v2 = vpop.xlane.xlu1 %6142 }
0x2b6b   :  { %14354 = vrcp.f32 %v6140_v11 }
0x2b6c   :  { %14356 = vrcp.f32 %v6143_v2 }
0x2b71   :  { %v14353_v24 = vpop.eup %14352 }
0x2b72   :  { %v6147_v53 = vmul.f32 %v14353_v24, %v14341_v12  ;;  %v13612_v12 = vpack.c.bf16 %v5818_v45, %v5817_v27 }
0x2b74   :  { %12765 = vmatmul.mubr.msk.f32.vlgmr.msra.gmra.mrb[126].mxu1 %vm901_vm15, %v6147_v53  ;;  %13613 = vmatpush3.bf16.msra.mxu0 %v13612_v12 }
0x2b75   :  { %v14355_v32 = vpop.eup %14354  ;;  %12767 = vmatprep.mubr.msk.f32.mxu1 %vm18317_vm9, %v15211_v0  ;;  %13617 = vmatprep.subr.bf16.mxu0 %v15212_v28 }
0x2b76   :  { %v6148_v19 = vmul.f32 %v14355_v32, %v14343_v21  ;;  %v14357_v16 = vpop.eup %14356 }
0x2b77   :  { %v6149_v35 = vmul.f32 %v14357_v16, %v14345_v39  ;;  %v5816_v39 = vld [vmem:[%s18318_s9 + $0x8] sm:$0xff] }
0x2b78   :  { %12768 = vmatmul.mubr.msk.f32.gmra.mrb[128].mxu1 %vm901_vm15, %v6148_v19  ;;  %v13615_v43 = vpack.c.bf16 %v5816_v39, %v5815_v22 }
0x2b79   :  { %12770 = vmatprep.mubr.msk.f32.mxu1 %vm18317_vm9, %v15211_v0 }
0x2b7c   :  { %12771 = vmatmul.mubr.msk.f32.gmra.mrb[130].mxu1 %vm901_vm15, %v6149_v35 }
0x2b7d   :  { %12794 = vmatprep.mubr.msk.f32.mxu1 %vm18317_vm9, %v15211_v0 }
0x2bcb   :  { %v6373_v49 = vpop.xlane.xlu0 %6372 }
0x2bcc   :  { %14358 = vrcp.f32 %v6373_v49 }
0x2bcf   :  { %v14073_v55 = vpop.permute.xlu0 %14072  ;;  %v6376_v58 = vpop.xlane.xlu1 %6375 }
0x2bd0   :  { %v14075_v40 = vunpack.i.h.bf16 %v14073_v55  ;;  %v14074_v42 = vunpack.i.l.bf16 %v14073_v55  ;;  %14360 = vrcp.f32 %v6376_v58 }
0x2bd2   :  { %v13609_v21 = vpack.c.bf16 %v14075_v40, %v14074_v42 }
0x2bd3   :  { %v6379_v23 = vpop.xlane.xlu1 %6378  ;;  %v14078_v48 = vpop.permute.xlu0 %14077 }
0x2bd4   :  { %14362 = vrcp.f32 %v6379_v23  ;;  %13610 = vmatpush3.bf16.msra.mxu1 %v13609_v21  ;;  %v14080_v62 = vunpack.i.h.bf16 %v14078_v48 }
0x2bd5   :  { %12792 = vmatprep.subr.mxu1 %v15211_v0 }
0x2bd6   :  { %v14359_v56 = vpop.eup %14358 }
0x2bd7   :  { %v6383_v14 = vmul.f32 %v14359_v56, %v14347_v38  ;;  %v6391_v63 = vpop.permute.xlu1 %6390  ;;  %v6664_v53 = vpop.permute.xlu0 %6663 }
0x2bd8   :  { %12793 = vmatpush3.msk.msra.mxu1 %vm18319_vm14, %v6391_v63  ;;  %vm18330_vm14 = vmmov %vm18322_vm0 }
0x2bd9   :  { %12795 = vmatmul.mubr.msk.f32.vlgmr.msra.gmra.mrb[132].mxu1 %vm901_vm15, %v6383_v14  ;;  %13614 = vmatprep.subr.bf16.mxu1 %v15212_v28 }
0x2bda   :  { %v14361_v4 = vpop.eup %14360  ;;  %12797 = vmatprep.mubr.msk.f32.mxu1 %vm18317_vm9, %v15211_v0  ;;  %13616 = vmatpush3.bf16.msra.mxu1 %v13615_v43 }
0x2bdb   :  { %v6384_v6 = vmul.f32 %v14361_v4, %v17101_v8  ;;  %13621 = vmatprep.subr.bf16.mxu1 %v15212_v28  ;;  %v14079_v8 = vunpack.i.l.bf16 %v14078_v48  ;;  %v6674_v2 = vpop.permute.xlu1 %6673  ;;  %v6668_v19 = vpop.permute.xlu0 %6667 }
0x2bdd   :  { %12798 = vmatmul.mubr.msk.f32.gmra.mrb[134].mxu1 %vm901_vm15, %v6384_v6  ;;  %v13618_v9 = vpack.c.bf16 %v14080_v62, %v14079_v8 }
0x2bde   :  { %v14363_v7 = vpop.eup %14362  ;;  %12800 = vmatprep.mubr.msk.f32.mxu1 %vm18317_vm9, %v15211_v0 }
0x2bdf   :  { %v6385_v5 = vmul.f32 %v14363_v7, %v14351_v3  ;;  %v6666_v32 = vpop.permute.xlu1 %6665 }
0x2be1   :  { %12801 = vmatmul.mubr.msk.f32.gmra.mrb[136].mxu1 %vm901_vm15, %v6385_v5 }
0x2be2   :  { %12820 = vmatprep.mubr.msk.f32.mxu1 %vm18317_vm9, %v15211_v0 }
0x2c47   :  { %v6235_v29 = vpop.f32.mrb[126].mxu1 }
0x2c48   :  { %v12766_v34 = vpop.f32.mrb[127].mxu1  ;;  %12821 = vmatmul.mubr.msk.f32.vlgmr.msra.gmra.mrb[138].mxu1 %vm18320_vm8, %v6235_v29  ;;  %vm18331_vm8 = vmmov %vm18322_vm0 }
0x2c49   :  { %12823 = vmatprep.mubr.msk.f32.mxu1 %vm18317_vm9, %v15211_v0 }
0x2c4b   :  { %v6240_v36 = vpop.f32.mrb[128].mxu1 }
0x2c4c   :  { %v12769_v10 = vpop.f32.mrb[129].mxu1  ;;  %12824 = vmatmul.mubr.msk.f32.gmra.mrb[140].mxu1 %vm18321_vm11, %v6240_v36  ;;  %vm18332_vm11 = vmmov %vm18322_vm0 }
0x2c4d   :  { %12826 = vmatprep.mubr.msk.f32.mxu1 %vm18317_vm9, %v15211_v0 }
0x2c4f   :  { %v6245_v47 = vpop.f32.mrb[130].mxu1 }
0x2c50   :  { %v12772_v38 = vpop.f32.mrb[131].mxu1  ;;  %12827 = vmatmul.mubr.msk.f32.gmra.mrb[142].mxu1 %vm18322_vm0, %v6245_v47 }
0x2c51   :  { %12850 = vmatprep.mubr.msk.f32.mxu1 %vm18317_vm9, %v15211_v0 }
0x2cac   :  { %v6471_v26 = vpop.f32.mrb[132].mxu1 }
0x2cad   :  { %v12796_v3 = vpop.f32.mrb[133].mxu1  ;;  %12808 = vmatmul.mubr.msk.f32.vlgmr.msra.gmra.mrb[156].mxu0 %vm18323_vm2, %v6471_v26  ;;  %vm18333_vm2 = vmmov %vm18322_vm0 }
0x2cae   :  { %13620 = vmatpush3.bf16.xpose.msk.msra.mxu0 %vm15747_vm4, %v13618_v9  ;;  %12810 = vmatprep.mubr.msk.f32.mxu0 %vm18317_vm9, %v15211_v0 }
0x2caf   :  { %12833 = vmatprep.subr.mxu0 %v15211_v0 }
0x2cb0   :  { %v6476_v54 = vpop.f32.mrb[134].mxu1 }
0x2cb1   :  { %v12799_v13 = vpop.f32.mrb[135].mxu1  ;;  %12811 = vmatmul.mubr.msk.f32.gmra.mrb[158].mxu0 %vm18324_vm3, %v6476_v54  ;;  %vm18334_vm3 = vmmov %vm18322_vm0 }
0x2cb2   :  { %12813 = vmatprep.mubr.msk.f32.mxu0 %vm18317_vm9, %v15211_v0 }
0x2cb4   :  { %v6481_v11 = vpop.f32.mrb[136].mxu1 }
0x2cb5   :  { %v12802_v24 = vpop.f32.mrb[137].mxu1  ;;  %12814 = vmatmul.mubr.msk.f32.gmra.mrb[160].mxu0 %vm18325_vm5, %v6481_v11  ;;  %vm18335_vm5 = vmmov %vm18322_vm0 }
0x2cb6   :  { %12834 = vmatpush3.xpose.msk.msra.mxu0 %vm18326_vm7, %v6674_v2  ;;  %12835 = vmatprep.mubr.msk.f32.mxu0 %vm18317_vm9, %v15211_v0  ;;  %vm18336_vm7 = vmmov %vm18316_vm1 }
0x2cb7   :  { %13624 = vmatprep.subr.bf16.mxu0 %v15212_v28 }
0x2cb9   :  { %12836 = vmatmul.mubr.msk.f32.vlgmr.msra.gmra.mrb[162].mxu0 %vm18327_vm13, %v6664_v53  ;;  %vm18337_vm13 = vmmov %vm18322_vm0 }
0x2cba   :  { %12838 = vmatprep.mubr.msk.f32.mxu0 %vm18317_vm9, %v15211_v0 }
0x2cbd   :  { %12839 = vmatmul.mubr.msk.f32.gmra.mrb[164].mxu0 %vm18328_vm10, %v6666_v32  ;;  %vm18338_vm10 = vmmov %vm18322_vm0 }
0x2cbe   :  { %12841 = vmatprep.mubr.msk.f32.mxu0 %vm18317_vm9, %v15211_v0 }
0x2cc1   :  { %12842 = vmatmul.mubr.msk.f32.gmra.mrb[166].mxu0 %vm18329_vm12, %v6668_v19  ;;  %vm18339_vm12 = vmmov %vm18322_vm0 }
0x2cc2   :  { %12863 = vmatprep.mubr.msk.f32.mxu0 %vm18317_vm9, %v15211_v0 }
0x2d1b   :  { %v6649_v16 = vpop.f32.mrb[138].mxu1 }
0x2d1c   :  { %v12822_v35 = vpop.f32.mrb[139].mxu1 }
0x2d1d   :  { %v5820_v35 = vld [vmem:[%s18318_s9 + $0x28] sm:$0xff] }
0x2d1f   :  { %v6654_v49 = vpop.f32.mrb[140].mxu1 }
0x2d20   :  { %v12825_v55 = vpop.f32.mrb[141].mxu1 }
0x2d23   :  { %v6659_v58 = vpop.f32.mrb[142].mxu1 }
0x2d24   :  { %v12828_v40 = vpop.f32.mrb[143].mxu1 }
0x2d80   :  { %v6560_v42 = vpop.f32.mrb[156].mxu0 }
0x2d81   :  { %v17182_v27 = vadd.f32 %v6649_v16, %v6560_v42  ;;  %v12809_v45 = vpop.f32.mrb[157].mxu0  ;;  %v5819_v16 = vld [vmem:[%s18318_s9 + $0x20] sm:$0xff] }
0x2d84   :  { %v6565_v12 = vpop.f32.mrb[158].mxu0 }
0x2d85   :  { %v17184_v21 = vadd.f32 %v6654_v49, %v6565_v12  ;;  %v12812_v23 = vpop.f32.mrb[159].mxu0  ;;  %v13625_v49 = vpack.c.bf16 %v5820_v35, %v5819_v16 }
0x2d87   :  { %13626 = vmatpush3.bf16.msra.mxu0 %v13625_v49 }
0x2d88   :  { %v6570_v22 = vpop.f32.mrb[160].mxu0  ;;  %13631 = vmatprep.subr.bf16.mxu0 %v15212_v28 }
0x2d89   :  { %v17186_v39 = vadd.f32 %v6659_v58, %v6570_v22  ;;  %v12815_v56 = vpop.f32.mrb[161].mxu0 }
0x2d8c   :  { %v6753_v43 = vpop.f32.mrb[162].mxu0 }
0x2d8d   :  { %v6754_v14 = vadd.f32 %v6753_v43, %v17068_v46  ;;  %v12837_v63 = vpop.f32.mrb[163].mxu0 }
0x2d8f   :  { %v6767_v4 = vsel %vm901_vm15, %v6754_v14, -inf }
0x2d90   :  { %6768 = vmax.xlane.f32.xlu1 %v6767_v4  ;;  %v6758_v6 = vpop.f32.mrb[164].mxu0 }
0x2d91   :  { %v6759_v7 = vadd.f32 %v6758_v6, %v17074_v17  ;;  %v12840_v5 = vpop.f32.mrb[165].mxu0 }
0x2d93   :  { %v6770_v29 = vsel %vm901_vm15, %v6759_v7, -inf }
0x2d94   :  { %6771 = vmax.xlane.f32.xlu0 %v6770_v29  ;;  %v6763_v34 = vpop.f32.mrb[166].mxu0 }
0x2d95   :  { %v6764_v36 = vadd.f32 %v6763_v34, %v17081_v18  ;;  %v12843_v10 = vpop.f32.mrb[167].mxu0 }
0x2d97   :  { %v6773_v47 = vsel %vm908_vm6, %v6764_v36, -inf }
0x2d98   :  { %6774 = vmax.xlane.f32.xlu0 %v6773_v47 }
0x2e1d   :  { %v6769_v38 = vpop.xlane.xlu1 %6768 }
0x2e1e   :  { %v6776_v48 = vsub.f32 %v6754_v14, %v6769_v38 }
0x2e20   :  { %v6779_v62 = vmul.f32 1.442695, %v6776_v48 }
0x2e21   :  { %v6772_v8 = vpop.xlane.xlu0 %6771 }
0x2e22   :  { %14364 = vpow2.f32 %v6779_v62  ;;  %v6777_v9 = vsub.f32 %v6759_v7, %v6772_v8 }
0x2e24   :  { %v6781_v26 = vmul.f32 1.442695, %v6777_v9 }
0x2e25   :  { %v6775_v2 = vpop.xlane.xlu0 %6774 }
0x2e26   :  { %14366 = vpow2.f32 %v6781_v26  ;;  %v6778_v24 = vsub.f32 %v6764_v36, %v6775_v2 }
0x2e28   :  { %v6783_v53 = vmul.f32 1.442695, %v6778_v24 }
0x2e2a   :  { %14368 = vpow2.f32 %v6783_v53 }
0x2e2c   :  { %v14365_v3 = vpop.eup %14364 }
0x2e2d   :  { %v6785_v54 = vsel %vm901_vm15, %v14365_v3, 0.0 }
0x2e2e   :  { %6786 = vadd.xlane.f32.xlu1 %v6785_v54 }
0x2e30   :  { %v14367_v13 = vpop.eup %14366 }
0x2e31   :  { %v6788_v11 = vsel %vm901_vm15, %v14367_v13, 0.0 }
0x2e32   :  { %6789 = vadd.xlane.f32.xlu0 %v6788_v11 }
0x2e34   :  { %v14369_v32 = vpop.eup %14368 }
0x2e35   :  { %v6791_v19 = vsel %vm908_vm6, %v14369_v32, 0.0 }
0x2e3f   :  { %6804 = vrot.lane.b32.xlu1 %v17005_v25, %s15218_s18 }
0x2e43   :  { %14087 = vrot.lane.b32.xlu1 %v17003_v37, %s15221_s23 }
0x2e48   :  { %14082 = vrot.lane.b32.xlu0 %v17003_v37, %s15218_s18 }
0x2e4c   :  { %7001 = vrot.lane.b32.xlu0 %v17005_v25, %s15221_s23 }
0x2e50   :  { %6993 = vrot.lane.b32.xlu0 %v17027_v60, %s15221_s23 }
0x2e67   :  { %6792 = vadd.xlane.f32.xlu1 %v6791_v19 }
0x2e78   :  { %6991 = vrot.lane.b32.xlu1 %v17017_v15, %s15221_s23 }
0x2e7c   :  { %6995 = vrot.lane.b32.xlu1 %v17036_v1, %s15221_s23 }
0x2ebb   :  { %v6787_v60 = vpop.xlane.xlu1 %6786 }
0x2ebc   :  { %14370 = vrcp.f32 %v6787_v60 }
0x2ebf   :  { %v6790_v55 = vpop.xlane.xlu0 %6789  ;;  %v6805_v40 = vpop.permute.xlu1 %6804 }
0x2ec0   :  { %14372 = vrcp.f32 %v6790_v55 }
0x2ec3   :  { %v14083_v58 = vpop.permute.xlu0 %14082  ;;  %v14088_v15 = vpop.permute.xlu1 %14087 }
0x2ec4   :  { %v14085_v42 = vunpack.i.h.bf16 %v14083_v58  ;;  %v14084_v45 = vunpack.i.l.bf16 %v14083_v58  ;;  %v14090_v56 = vunpack.i.h.bf16 %v14088_v15  ;;  %v14089_v43 = vunpack.i.l.bf16 %v14088_v15 }
0x2ec6   :  { %v13622_v12 = vpack.c.bf16 %v14085_v42, %v14084_v45  ;;  %v14371_v23 = vpop.eup %14370  ;;  %v13628_v63 = vpack.c.bf16 %v14090_v56, %v14089_v43 }
0x2ec7   :  { %v6797_v1 = vmul.f32 %v14371_v23, %v14365_v3  ;;  %v7002_v4 = vpop.permute.xlu0 %7001 }
0x2ec8   :  { %13623 = vmatpush3.bf16.msra.mxu1 %v13622_v12 }
0x2ec9   :  { %12848 = vmatprep.subr.mxu1 %v15211_v0 }
0x2eca   :  { %v14373_v22 = vpop.eup %14372 }
0x2ecb   :  { %v6798_v14 = vmul.f32 %v14373_v22, %v14367_v13  ;;  %v6994_v34 = vpop.permute.xlu0 %6993 }
0x2ecc   :  { %12849 = vmatpush3.msk.msra.mxu1 %vm18316_vm1, %v6805_v40  ;;  %vm18340_vm1 = vcmask 523264  }
0x2ecd   :  { %12851 = vmatmul.mubr.msk.f32.vlgmr.msra.gmra.mrb[144].mxu1 %vm901_vm15, %v6797_v1  ;;  %13627 = vmatprep.subr.bf16.mxu1 %v15212_v28 }
0x2ece   :  { %12853 = vmatprep.mubr.msk.f32.mxu1 %vm18317_vm9, %v15211_v0 }
0x2ed1   :  { %12854 = vmatmul.mubr.msk.f32.gmra.mrb[146].mxu1 %vm901_vm15, %v6798_v14 }
0x2ed2   :  { %12856 = vmatprep.mubr.msk.f32.mxu1 %vm18317_vm9, %v15211_v0 }
0x2ed3   :  { %13630 = vmatpush3.bf16.xpose.msk.msra.mxu1 %vm15747_vm4, %v13628_v63 }
0x2ed4   :  { %12876 = vmatprep.subr.mxu1 %v15211_v0 }
0x2edb   :  { %12877 = vmatpush3.xpose.msk.msra.mxu1 %vm18330_vm14, %v7002_v4  ;;  %vm18341_vm14 = vmmov %vm18340_vm1 }
0x2edc   :  { %13634 = vmatprep.subr.bf16.mxu1 %v15212_v28 }
0x2ef4   :  { %v6793_v6 = vpop.xlane.xlu1 %6792 }
0x2ef5   :  { %14374 = vrcp.f32 %v6793_v6 }
0x2ef8   :  { %v6992_v29 = vpop.permute.xlu1 %6991 }
0x2efc   :  { %v6996_v36 = vpop.permute.xlu1 %6995 }
0x2eff   :  { %v14375_v7 = vpop.eup %14374 }
0x2f00   :  { %v6799_v5 = vmul.f32 %v14375_v7, %v14369_v32 }
0x2f02   :  { %12857 = vmatmul.mubr.msk.f32.gmra.mrb[148].mxu1 %vm901_vm15, %v6799_v5 }
0x2f03   :  { %12878 = vmatprep.mubr.msk.f32.mxu1 %vm18317_vm9, %v15211_v0 }
0x2f06   :  { %12879 = vmatmul.mubr.msk.f32.vlgmr.msra.gmra.mrb[150].mxu1 %vm18331_vm8, %v6992_v29  ;;  %vm18342_vm8 = vcmask 517120  }
0x2f07   :  { %12881 = vmatprep.mubr.msk.f32.mxu1 %vm18317_vm9, %v15211_v0 }
0x2f0a   :  { %12882 = vmatmul.mubr.msk.f32.gmra.mrb[152].mxu1 %vm18332_vm11, %v6994_v34  ;;  %vm18344_vm11 = vmmov %vm18340_vm1 }
0x2f0b   :  { %12884 = vmatprep.mubr.msk.f32.mxu1 %vm18317_vm9, %v15211_v0 }
0x2f0e   :  { %12885 = vmatmul.mubr.msk.f32.gmra.mrb[154].mxu1 %vm18322_vm0, %v6996_v36  ;;  %vm18345_vm0 = vmmov %vm18340_vm1 }
0x2f0f   :  { %12906 = vmatprep.mubr.msk.f32.mxu1 %vm18317_vm9, %v15211_v0 }
0x2fa0   :  { %v6885_v10 = vpop.f32.mrb[144].mxu1 }
0x2fa1   :  { %v12852_v47 = vpop.f32.mrb[145].mxu1  ;;  %12864 = vmatmul.mubr.msk.f32.vlgmr.msra.gmra.mrb[168].mxu0 %vm18333_vm2, %v6885_v10  ;;  %vm18346_vm2 = vmmov %vm18342_vm8 }
0x2fa2   :  { %12866 = vmatprep.mubr.msk.f32.mxu0 %vm18317_vm9, %v15211_v0 }
0x2fa4   :  { %v6890_v38 = vpop.f32.mrb[146].mxu1 }
0x2fa5   :  { %v12855_v48 = vpop.f32.mrb[147].mxu1  ;;  %12867 = vmatmul.mubr.msk.f32.gmra.mrb[170].mxu0 %vm18334_vm3, %v6890_v38  ;;  %vm18348_vm3 = vmmov %vm18345_vm0 }
0x2fa6   :  { %12869 = vmatprep.mubr.msk.f32.mxu0 %vm18317_vm9, %v15211_v0 }
0x2fd5   :  { %v6895_v62 = vpop.f32.mrb[148].mxu1 }
0x2fd6   :  { %v12858_v8 = vpop.f32.mrb[149].mxu1  ;;  %12870 = vmatmul.mubr.msk.f32.gmra.mrb[172].mxu0 %vm18335_vm5, %v6895_v62  ;;  %vm18349_vm5 = vmmov %vm18345_vm0 }
0x2fd7   :  { %12893 = vmatprep.mubr.msk.f32.mxu0 %vm18317_vm9, %v15211_v0 }
0x2fd9   :  { %v7081_v9 = vpop.f32.mrb[150].mxu1 }
0x2fda   :  { %v7082_v26 = vadd.f32 %v7081_v9, %v17068_v46  ;;  %v12880_v3 = vpop.f32.mrb[151].mxu1 }
0x2fdc   :  { %v7095_v54 = vsel %vm901_vm15, %v7082_v26, -inf }
0x2fdd   :  { %7096 = vmax.xlane.f32.xlu0 %v7095_v54  ;;  %v7086_v13 = vpop.f32.mrb[152].mxu1 }
0x2fde   :  { %v7087_v11 = vadd.f32 %v7086_v13, %v17074_v17  ;;  %v12883_v2 = vpop.f32.mrb[153].mxu1 }
0x2fe0   :  { %v7098_v24 = vsel %vm901_vm15, %v7087_v11, -inf }
0x2fe1   :  { %7099 = vmax.xlane.f32.xlu1 %v7098_v24  ;;  %v7091_v53 = vpop.f32.mrb[154].mxu1 }
0x2fe2   :  { %v7092_v32 = vadd.f32 %v7091_v53, %v17081_v18  ;;  %v12886_v19 = vpop.f32.mrb[155].mxu1 }
0x2fe4   :  { %v7101_v16 = vsel %vm908_vm6, %v7092_v32, -inf }
0x2fe5   :  { %7102 = vmax.xlane.f32.xlu0 %v7101_v16 }
0x306a   :  { %v7097_v35 = vpop.xlane.xlu0 %7096 }
0x306b   :  { %v7104_v49 = vsub.f32 %v7082_v26, %v7097_v35 }
0x306d   :  { %v7107_v60 = vmul.f32 1.442695, %v7104_v49 }
0x306e   :  { %v7100_v55 = vpop.xlane.xlu1 %7099 }
0x306f   :  { %14376 = vpow2.f32 %v7107_v60  ;;  %v7105_v58 = vsub.f32 %v7087_v11, %v7100_v55  ;;  %v11425_v55 = vld [vmem:[#allocation16] ss:$0 sm:$0xff] }
0x3071   :  { %v7109_v40 = vmul.f32 1.442695, %v7105_v58 }
0x3072   :  { %v7103_v42 = vpop.xlane.xlu0 %7102 }
0x3073   :  { %14378 = vpow2.f32 %v7109_v40  ;;  %v7106_v45 = vsub.f32 %v7092_v32, %v7103_v42 }
0x3074   :  { %v6974_v12 = vpop.f32.mrb[168].mxu0 }
0x3075   :  { %v7111_v23 = vmul.f32 1.442695, %v7106_v45  ;;  %v6988_v15 = vadd.f32 %v6974_v12, %v17182_v27  ;;  %v12865_v1 = vpop.f32.mrb[169].mxu0  ;;  %v5821_v27 = vld [vmem:[%s18318_s9 + $0x30] sm:$0xff] }
0x3077   :  { %14380 = vpow2.f32 %v7111_v23 }
0x3078   :  { %v6979_v22 = vpop.f32.mrb[170].mxu0 }
0x3079   :  { %v14377_v56 = vpop.eup %14376  ;;  %v6989_v43 = vadd.f32 %v6979_v22, %v17184_v21  ;;  %v12868_v14 = vpop.f32.mrb[171].mxu0  ;;  %v5822_v21 = vld [vmem:[%s18318_s9 + $0x38] sm:$0xff] }
0x307a   :  { %v7113_v63 = vsel %vm901_vm15, %v14377_v56, 0.0  ;;  %v13635_v29 = vpack.c.bf16 %v5822_v21, %v5821_v27 }
0x307b   :  { %7114 = vadd.xlane.f32.xlu0 %v7113_v63 }
0x307c   :  { %13636 = vmatpush3.bf16.msra.mxu1 %v13635_v29 }
0x307d   :  { %v14379_v4 = vpop.eup %14378 }
0x307e   :  { %v7116_v6 = vsel %vm901_vm15, %v14379_v4, 0.0 }
0x307f   :  { %7117 = vadd.xlane.f32.xlu1 %v7116_v6 }
0x3081   :  { %v14381_v7 = vpop.eup %14380 }
0x3082   :  { %v7119_v5 = vsel %vm908_vm6, %v14381_v7, 0.0 }
0x3083   :  { %7120 = vadd.xlane.f32.xlu0 %v7119_v5 }
0x3090   :  { %14092 = vrot.lane.b32.xlu1 %v17003_v37, %s15220_s22 }
0x3099   :  { %7132 = vrot.lane.b32.xlu0 %v17005_v25, %s15220_s22 }
0x30a9   :  { %v6984_v34 = vpop.f32.mrb[172].mxu0 }
0x30aa   :  { %v6990_v36 = vadd.f32 %v6984_v34, %v17186_v39  ;;  %v12871_v10 = vpop.f32.mrb[173].mxu0 }
0x3108   :  { %v7115_v47 = vpop.xlane.xlu0 %7114 }
0x3109   :  { %14382 = vrcp.f32 %v7115_v47 }
0x310c   :  { %v7118_v38 = vpop.xlane.xlu1 %7117 }
0x310d   :  { %14384 = vrcp.f32 %v7118_v38 }
0x3110   :  { %v14093_v48 = vpop.permute.xlu1 %14092  ;;  %v7121_v62 = vpop.xlane.xlu0 %7120 }
0x3111   :  { %v14095_v8 = vunpack.i.h.bf16 %v14093_v48  ;;  %v14094_v9 = vunpack.i.l.bf16 %v14093_v48  ;;  %14386 = vrcp.f32 %v7121_v62 }
0x3113   :  { %v13632_v37 = vpack.c.bf16 %v14095_v8, %v14094_v9  ;;  %v14383_v26 = vpop.eup %14382  ;;  %v7389_v8 = vld [vmem:[%s18343_s12 + $0x8] sm:$0xff]  ;;  %v7391_v9 = vld [vmem:[%s18343_s12 + $0x18] sm:$0xff] }
0x3114   :  { %v7125_v25 = vmul.f32 %v14383_v26, %v14377_v56  ;;  %v7133_v3 = vpop.permute.xlu0 %7132  ;;  %v7388_v26 = vld [vmem:[%s18343_s12] sm:$0xff] }
0x3115   :  { %13633 = vmatpush3.bf16.msra.mxu0 %v13632_v37  ;;  %v13637_v37 = vpack.c.bf16 %v7391_v9, %v7389_v8  ;;  %v7429_v8 = vld [vmem:[%s18347_s26 + $0xc0] sm:$0xff]  ;;  %v7430_v9 = vld [vmem:[%s18347_s26 + $0xc8] sm:$0xff] }
0x3116   :  { %12891 = vmatprep.subr.mxu0 %v15211_v0 }
0x3117   :  { %v14385_v54 = vpop.eup %14384 }
0x3118   :  { %v7126_v39 = vmul.f32 %v14385_v54, %v14379_v4  ;;  %v7393_v54 = vld [vmem:[%s18343_s12 + $0x28] sm:$0xff] }
0x3119   :  { %12892 = vmatpush3.msk.msra.mxu0 %vm18336_vm7, %v7133_v3  ;;  %vm18350_vm7 = vmmov %vm18345_vm0 }
0x311a   :  { %12894 = vmatmul.mubr.msk.f32.vlgmr.msra.gmra.mrb[174].mxu0 %vm901_vm15, %v7125_v25  ;;  %v7390_v25 = vld [vmem:[%s18343_s12 + $0x10] sm:$0xff]  ;;  %13638 = vmatprep.subr.bf16.mxu0 %v13637_v37 }
0x311b   :  { %12896 = vmatprep.mubr.msk.f32.mxu0 %vm18317_vm9, %v15211_v0  ;;  %v14387_v13 = vpop.eup %14386  ;;  %v13639_v3 = vpack.c.bf16 %v7390_v25, %v7388_v26  ;;  %v13669_v26 = vpack.c.bf16 %v7430_v9, %v7429_v8  ;;  %v7413_v25 = vld [vmem:[%s18347_s26 + $0x40] sm:$0xff] }
0x311c   :  { %v7127_v11 = vmul.f32 %v14387_v13, %v14381_v7 }
0x311d   :  { %13640 = vmatpush1.bf16.msra.mxu0 %v13639_v3  ;;  %v7414_v3 = vld [vmem:[%s18347_s26 + $0x48] sm:$0xff] }
0x311e   :  { %12897 = vmatmul.mubr.msk.f32.gmra.mrb[176].mxu0 %vm901_vm15, %v7126_v39  ;;  %v7395_v39 = vld [vmem:[%s18343_s12 + $0x38] sm:$0xff] }
0x311f   :  { %12899 = vmatprep.mubr.msk.f32.mxu0 %vm18317_vm9, %v15211_v0  ;;  %v13641_v13 = vpack.c.bf16 %v7395_v39, %v7393_v54  ;;  %v7431_v54 = vld [vmem:[%s18347_s26 + $0xd0] sm:$0xff]  ;;  %v7432_v39 = vld [vmem:[%s18347_s26 + $0xd8] sm:$0xff] }
0x3121   :  { %13642 = vmatprep.subr.bf16.mxu0 %v13641_v13  ;;  %v13671_v13 = vpack.c.bf16 %v7414_v3, %v7413_v25 }
0x3122   :  { %12900 = vmatmul.mubr.msk.f32.gmra.mrb[178].mxu0 %vm901_vm15, %v7127_v11  ;;  %v7392_v11 = vld [vmem:[%s18343_s12 + $0x20] sm:$0xff] }
0x3123   :  { %7524 = vmatprep.mubr.f32.mxu0 %v15211_v0 }
0x31ed   :  { %v7213_v2 = vpop.f32.mrb[174].mxu0 }
0x31ee   :  { %v12895_v24 = vpop.f32.mrb[175].mxu0  ;;  %12907 = vmatmul.mubr.msk.f32.vlgmr.msra.gmra.mrb[156].mxu1 %vm18337_vm13, %v7213_v2  ;;  %v7394_v2 = vld [vmem:[%s18343_s12 + $0x30] sm:$0xff]  ;;  %vm18352_vm13 = vmmov %vm18345_vm0 }
0x31ef   :  { %12909 = vmatprep.mubr.msk.f32.mxu1 %vm18317_vm9, %v15211_v0  ;;  %v13643_v24 = vpack.c.bf16 %v7394_v2, %v7392_v11  ;;  %v13673_v11 = vpack.c.bf16 %v7432_v39, %v7431_v54  ;;  %v7415_v2 = vld [vmem:[%s18347_s26 + $0x50] sm:$0xff] }
0x31f1   :  { %v7218_v53 = vpop.f32.mrb[176].mxu0  ;;  %13644 = vmatpush1.bf16.msra.mxu0 %v13643_v24  ;;  %v7416_v24 = vld [vmem:[%s18347_s26 + $0x58] sm:$0xff] }
0x31f2   :  { %v12898_v32 = vpop.f32.mrb[177].mxu0  ;;  %12910 = vmatmul.mubr.msk.f32.gmra.mrb[158].mxu1 %vm18338_vm10, %v7218_v53  ;;  %v7397_v53 = vld [vmem:[%s18343_s12 + $0x48] sm:$0xff]  ;;  %vm18353_vm10 = vmmov %vm18345_vm0 }
0x31f3   :  { %12912 = vmatprep.mubr.msk.f32.mxu1 %vm18317_vm9, %v15211_v0  ;;  %v7399_v32 = vld [vmem:[%s18343_s12 + $0x58] sm:$0xff] }
0x31f5   :  { %v7223_v19 = vpop.f32.mrb[178].mxu0 }
0x31f6   :  { %v12901_v16 = vpop.f32.mrb[179].mxu0  ;;  %12913 = vmatmul.mubr.msk.f32.gmra.mrb[160].mxu1 %vm18339_vm12, %v7223_v19  ;;  %v13645_v19 = vpack.c.bf16 %v7399_v32, %v7397_v53  ;;  %v7433_v53 = vld [vmem:[%s18347_s26 + $0xe0] sm:$0xff]  ;;  %v7434_v32 = vld [vmem:[%s18347_s26 + $0xe8] sm:$0xff]  ;;  %vm18354_vm12 = vmmov %vm18346_vm2 }
0x31f7   :  { %v7396_v16 = vld [vmem:[%s18343_s12 + $0x40] sm:$0xff] }
0x31f8   :  { %13646 = vmatprep.subr.bf16.mxu0 %v13645_v19  ;;  %v13675_v19 = vpack.c.bf16 %v7416_v24, %v7415_v2 }
0x32c1   :  { %v7302_v35 = vpop.f32.mrb[156].mxu1 }
0x32c2   :  { %v7316_v49 = vadd.f32 %v7302_v35, %v6988_v15  ;;  %v12908_v60 = vpop.f32.mrb[157].mxu1  ;;  %v7398_v35 = vld [vmem:[%s18343_s12 + $0x50] sm:$0xff] }
0x32c3   :  { %v7401_v60 = vld [vmem:[%s18343_s12 + $0x68] sm:$0xff] }
0x32c4   :  { %v7319_v58 = vadd.f32 %v7316_v49, %v16983_v52  ;;  %v13647_v49 = vpack.c.bf16 %v7398_v35, %v7396_v16  ;;  %v13677_v16 = vpack.c.bf16 %v7434_v32, %v7433_v53 }
0x32c5   :  { %v7307_v40 = vpop.f32.mrb[158].mxu1 }
0x32c6   :  { %v7317_v42 = vadd.f32 %v7307_v40, %v6989_v43  ;;  %v12911_v45 = vpop.f32.mrb[159].mxu1  ;;  %v7328_v12 = vadd.f32 %v11425_v55, %v7319_v58  ;;  %13648 = vmatpush1.bf16.msra.mxu0 %v13647_v49  ;;  %v7400_v40 = vld [vmem:[%s18343_s12 + $0x60] sm:$0xff] }
0x32c8   :  { %v7320_v23 = vadd.f32 %v7317_v42, %v16990_v41  ;;  %v7331_v1 = vsel %vm18340_vm1, %v7328_v12, 0.0  ;;  %v7402_v42 = vld [vmem:[%s18343_s12 + $0x70] sm:$0xff]  ;;  %vm18356_vm1 = vmmov %vm18345_vm0 }
0x32c9   :  { %7332 = vadd.xlane.f32.xlu1 %v7331_v1  ;;  %v7312_v22 = vpop.f32.mrb[160].mxu1  ;;  %v13651_v45 = vpack.c.bf16 %v7402_v42, %v7400_v40  ;;  %v7405_v1 = vld [vmem:[%s18347_s26] sm:$0xff] }
0x32ca   :  { %v7318_v56 = vadd.f32 %v7312_v22, %v6990_v36  ;;  %v12914_v14 = vpop.f32.mrb[161].mxu1  ;;  %v7329_v63 = vadd.f32 %v11425_v55, %v7320_v23  ;;  %v7422_v23 = vld [vmem:[%s18347_s26 + $0x88] sm:$0xff] }
0x32cb   :  { %v7423_v14 = vld [vmem:[%s18347_s26 + $0x90] sm:$0xff] }
0x32cc   :  { %v7321_v4 = vadd.f32 %v7318_v56, %v16997_v20  ;;  %v7334_v15 = vsel %vm18341_vm14, %v7329_v63, 0.0  ;;  %v7406_v56 = vld [vmem:[%s18347_s26 + $0x8] sm:$0xff]  ;;  %vm18357_vm14 = vmmov %vm18345_vm0 }
0x32cd   :  { %7335 = vadd.xlane.f32.xlu0 %v7334_v15 }
0x32ce   :  { %v7330_v6 = vadd.f32 %v11425_v55, %v7321_v4  ;;  %v7403_v55 = vld [vmem:[%s18343_s12 + $0x78] sm:$0xff]  ;;  %v13655_v4 = vpack.c.bf16 %v7406_v56, %v7405_v1  ;;  %v11426_v1 = vld [vmem:[#allocation18] ss:$0 sm:$0xff]  ;;  %v11427_v56 = vld [vmem:[#allocation19] ss:$0 sm:$0xff] }
0x32cf   :  { %v13649_v58 = vpack.c.bf16 %v7403_v55, %v7401_v60 }
0x32d0   :  { %v7337_v52 = vsel %vm18342_vm8, %v7330_v6, 0.0  ;;  %vm18358_vm8 = vmmov %vm18346_vm2 }
0x32d1   :  { %7338 = vadd.xlane.f32.xlu1 %v7337_v52  ;;  %13650 = vmatprep.subr.bf16.mxu0 %v13649_v58  ;;  %v7408_v52 = vld [vmem:[%s18347_s26 + $0x18] sm:$0xff] }
0x32d2   :  { %13652 = vmatpush1.bf16.msra.mxu0 %v13651_v45 }
0x3356   :  { %v7333_v43 = vpop.xlane.xlu1 %7332 }
0x3357   :  { %v7340_v7 = vmul.f32 0.015625, %v7333_v43  ;;  %v7425_v43 = vld [vmem:[%s18347_s26 + $0xa0] sm:$0xff] }
0x3359   :  { %v17290_v5 = vsub.f32 %v7328_v12, %v7340_v7  ;;  %v7421_v12 = vld [vmem:[%s18347_s26 + $0x80] sm:$0xff]  ;;  %v7426_v7 = vld [vmem:[%s18347_s26 + $0xa8] sm:$0xff] }
0x335a   :  { %v7336_v41 = vpop.xlane.xlu0 %7335  ;;  %v13653_v22 = vpack.c.bf16 %v7422_v23, %v7421_v12 }
0x335b   :  { %v7341_v27 = vmul.f32 0.015625, %v7336_v41  ;;  %v7346_v21 = vmul.f32 %v17290_v5, %v17290_v5 }
0x335c   :  { %13654 = vmatprep.subr.bf16.mxu1 %v13653_v22 }
0x335d   :  { %v17294_v20 = vsub.f32 %v7329_v63, %v7341_v27  ;;  %v7349_v29 = vsel %vm18344_vm11, %v7346_v21, 0.0  ;;  %v7424_v63 = vld [vmem:[%s18347_s26 + $0x98] sm:$0xff]  ;;  %13656 = vmatpush3.bf16.msra.mxu1 %v13655_v4  ;;  %v13661_v27 = vpack.c.bf16 %v7426_v7, %v7425_v43  ;;  %v7409_v21 = vld [vmem:[%s18347_s26 + $0x20] sm:$0xff]  ;;  %vm18360_vm11 = vmmov %vm18345_vm0 }
0x335e   :  { %7350 = vadd.xlane.f32.xlu0 %v7349_v29  ;;  %v7339_v34 = vpop.xlane.xlu1 %7338  ;;  %v13657_v15 = vpack.c.bf16 %v7424_v63, %v7423_v14  ;;  %v7410_v29 = vld [vmem:[%s18347_s26 + $0x28] sm:$0xff] }
0x335f   :  { %v7342_v36 = vmul.f32 0.015625, %v7339_v34  ;;  %v7347_v10 = vmul.f32 %v17294_v20, %v17294_v20  ;;  %v7427_v34 = vld [vmem:[%s18347_s26 + $0xb0] sm:$0xff] }
0x3360   :  { %13658 = vmatprep.subr.bf16.mxu1 %v13657_v15 }
0x3361   :  { %v17299_v47 = vsub.f32 %v7330_v6, %v7342_v36  ;;  %v7352_v38 = vsel %vm18345_vm0, %v7347_v10, 0.0  ;;  %v7407_v6 = vld [vmem:[%s18347_s26 + $0x10] sm:$0xff]  ;;  %v7428_v36 = vld [vmem:[%s18347_s26 + $0xb8] sm:$0xff]  ;;  %v13663_v10 = vpack.c.bf16 %v7410_v29, %v7409_v21 }
0x3362   :  { %7353 = vadd.xlane.f32.xlu1 %v7352_v38  ;;  %v13659_v41 = vpack.c.bf16 %v7408_v52, %v7407_v6  ;;  %v13665_v38 = vpack.c.bf16 %v7428_v36, %v7427_v34  ;;  %v7435_v29 = vld [vmem:[%s18347_s26 + $0xf0] sm:$0xff] }
0x3363   :  { %v7348_v48 = vmul.f32 %v17299_v47, %v17299_v47  ;;  %v7419_v36 = vld [vmem:[%s18347_s26 + $0x70] sm:$0xff] }
0x3364   :  { %13660 = vmatpush3.bf16.msra.mxu1 %v13659_v41  ;;  %v7417_v41 = vld [vmem:[%s18347_s26 + $0x60] sm:$0xff] }
0x3365   :  { %v7355_v62 = vsel %vm18346_vm2, %v7348_v48, 0.0  ;;  %13662 = vmatprep.subr.bf16.mxu1 %v13661_v27  ;;  %v7411_v48 = vld [vmem:[%s18347_s26 + $0x30] sm:$0xff]  ;;  %v7418_v27 = vld [vmem:[%s18347_s26 + $0x68] sm:$0xff]  ;;  %vm18361_vm2 = vmmov %vm18345_vm0 }
0x3366   :  { %7356 = vadd.xlane.f32.xlu0 %v7355_v62  ;;  %v7412_v62 = vld [vmem:[%s18347_s26 + $0x38] sm:$0xff]  ;;  %v13679_v21 = vpack.c.bf16 %v7418_v27, %v7417_v41 }
0x3367   :  { %v13667_v37 = vpack.c.bf16 %v7412_v62, %v7411_v48  ;;  %v7404_v48 = vld [vmem:[%s18351_s29] sm:$0x3] }
0x3368   :  { %13664 = vmatpush3.bf16.msra.mxu1 %v13663_v10  ;;  %v7420_v10 = vld [vmem:[%s18347_s26 + $0x78] sm:$0xff]  ;;  %v7444_v62 = vrot.slane %v7404_v48, %v15700_v31  ;;  %v7448_v8 = vrot.slane %v7404_v48, %v15704_v33 }
0x3369   :  { %13666 = vmatprep.subr.bf16.mxu1 %v13665_v38  ;;  %v13683_v38 = vpack.c.bf16 %v7420_v10, %v7419_v36 }
0x336c   :  { %13668 = vmatpush3.bf16.msra.mxu1 %v13667_v37 }
0x336d   :  { %13670 = vmatprep.subr.bf16.mxu1 %v13669_v26 }
0x3370   :  { %13672 = vmatpush3.bf16.msra.mxu1 %v13671_v13 }
0x3371   :  { %13674 = vmatprep.subr.bf16.mxu1 %v13673_v11 }
0x3374   :  { %13676 = vmatpush3.bf16.msra.mxu1 %v13675_v19 }
0x3375   :  { %13678 = vmatprep.subr.bf16.mxu1 %v13677_v16 }
0x3378   :  { %13680 = vmatpush3.bf16.msra.mxu1 %v13679_v21 }
0x33eb   :  { %v7351_v35 = vpop.xlane.xlu0 %7350 }
0x33ec   :  { %v7358_v49 = vmul.f32 0.015625, %v7351_v35 }
0x33ee   :  { %v7361_v60 = vadd.f32 1e-05, %v7358_v49 }
0x33ef   :  { %v7354_v55 = vpop.xlane.xlu1 %7353 }
0x33f0   :  { %14388 = vrsqrt.f32 %v7361_v60  ;;  %v7359_v58 = vmul.f32 0.015625, %v7354_v55 }
0x33f2   :  { %v7362_v40 = vadd.f32 1e-05, %v7359_v58  ;;  %v11431_v58 = vld [vmem:[#allocation21] ss:$0 sm:$0xff] }
0x33f3   :  { %v7357_v42 = vpop.xlane.xlu0 %7356 }
0x33f4   :  { %14390 = vrsqrt.f32 %v7362_v40  ;;  %v7360_v45 = vmul.f32 0.015625, %v7357_v42 }
0x33f6   :  { %v7363_v12 = vadd.f32 1e-05, %v7360_v45 }
0x33f8   :  { %14392 = vrsqrt.f32 %v7363_v12 }
0x33fa   :  { %v14389_v23 = vpop.eup %14388 }
0x33fb   :  { %v7367_v22 = vmul.f32 %v14389_v23, %v17290_v5 }
0x33fd   :  { %v7376_v14 = vmul.f32 %v11426_v1, %v7367_v22 }
0x33fe   :  { %v14391_v63 = vpop.eup %14390 }
0x33ff   :  { %v17348_v4 = vadd.f32 %v11427_v56, %v7376_v14  ;;  %v7368_v15 = vmul.f32 %v14391_v63, %v17294_v20 }
0x3401   :  { %11428 = vmatmul.mubr.msk.f32.vlgmr.msra.gmra.mrb[180].mxu0 %vm18348_vm3, %v17348_v4  ;;  %v7377_v6 = vmul.f32 %v11426_v1, %v7368_v15  ;;  %vm18362_vm3 = vcmask 1041408  }
0x3402   :  { %v14393_v52 = vpop.eup %14392  ;;  %7530 = vmatprep.mubr.f32.mxu0 %v15211_v0 }
0x3403   :  { %v17354_v5 = vadd.f32 %v11427_v56, %v7377_v6  ;;  %v7369_v43 = vmul.f32 %v14393_v52, %v17299_v47  ;;  %v7436_v47 = vld [vmem:[%s18347_s26 + $0xf8] sm:$0xff] }
0x3404   :  { %v13681_v34 = vpack.c.bf16 %v7436_v47, %v7435_v29 }
0x3405   :  { %11429 = vmatmul.mubr.msk.f32.gmra.mrb[182].mxu0 %vm18349_vm5, %v17354_v5  ;;  %v7378_v7 = vmul.f32 %v11426_v1, %v7369_v43  ;;  %vm18363_vm5 = vcmask 130048  }
0x3406   :  { %7536 = vmatprep.mubr.f32.mxu0 %v15211_v0  ;;  %13682 = vmatprep.subr.bf16.mxu1 %v13681_v34 }
0x3407   :  { %v17360_v20 = vadd.f32 %v11427_v56, %v7378_v7  ;;  %13684 = vmatpush3.bf16.msra.mxu1 %v13683_v38 }
0x3408   :  { %13705 = vmatprep.subr.bf16.mxu1 %v15212_v28 }
0x3409   :  { %11430 = vmatmul.mubr.msk.f32.gmra.mrb[184].mxu0 %vm18350_vm7, %v17360_v20  ;;  %vm18364_vm7 = vmmov %vm18363_vm5 }
0x340a   :  { %7807 = vmatprep.mubr.f32.mxu0 %v15211_v0 }
0x34d4   :  { %v7526_v9 = vpop.f32.mrb[180].mxu0 }
0x34d5   :  { %v7527_v37 = vadd.f32 %v7526_v9, %v7444_v62  ;;  %v7528_v26 = vpop.f32.mrb[181].mxu0 }
0x34d6   :  { %v7529_v25 = vadd.f32 %v7528_v26, %v7448_v8  ;;  %v7696_v26 = vld [vmem:[%s18355_s28 + $0x8] sm:$0xff] }
0x34d7   :  { %v7543_v39 = vmax.f32 %v7527_v37, 0.0 }
0x34d8   :  { %v7544_v3 = vmax.f32 %v7529_v25, 0.0  ;;  %v7532_v54 = vpop.f32.mrb[182].mxu0  ;;  %v7698_v25 = vld [vmem:[%s18355_s28 + $0x18] sm:$0xff] }
0x34d9   :  { %v7533_v13 = vadd.f32 %v7532_v54, %v7444_v62  ;;  %v7534_v11 = vpop.f32.mrb[183].mxu0  ;;  %v7695_v54 = vld [vmem:[%s18355_s28] sm:$0xff] }
0x34da   :  { %v7535_v2 = vadd.f32 %v7534_v11, %v7448_v8  ;;  %7619 = vmatprep.mubr.f32.mxu1 %v7544_v3  ;;  %v13685_v3 = vpack.c.bf16 %v7698_v25, %v7696_v26  ;;  %v7700_v11 = vld [vmem:[%s18355_s28 + $0x28] sm:$0xff] }
0x34db   :  { %7620 = vmatmul.mubr.f32.vlgmr.msra.gmra.mrb[162].mxu1 %v7543_v39  ;;  %v7545_v32 = vmax.f32 %v7533_v13, 0.0  ;;  %v7697_v39 = vld [vmem:[%s18355_s28 + $0x10] sm:$0xff] }
0x34dc   :  { %v7546_v24 = vmax.f32 %v7535_v2, 0.0  ;;  %v7538_v53 = vpop.f32.mrb[184].mxu0  ;;  %v13687_v13 = vpack.c.bf16 %v7697_v39, %v7695_v54  ;;  %13686 = vmatprep.subr.bf16.mxu0 %v13685_v3  ;;  %v7702_v2 = vld [vmem:[%s18355_s28 + $0x38] sm:$0xff] }
0x34dd   :  { %v7539_v19 = vadd.f32 %v7538_v53, %v7444_v62  ;;  %v7540_v16 = vpop.f32.mrb[185].mxu0  ;;  %v7699_v53 = vld [vmem:[%s18355_s28 + $0x20] sm:$0xff] }
0x34de   :  { %v7541_v35 = vadd.f32 %v7540_v16, %v7448_v8  ;;  %7624 = vmatprep.mubr.f32.mxu1 %v7546_v24  ;;  %13688 = vmatpush1.bf16.msra.mxu0 %v13687_v13  ;;  %v13689_v24 = vpack.c.bf16 %v7702_v2, %v7700_v11  ;;  %v7704_v16 = vld [vmem:[%s18355_s28 + $0x48] sm:$0xff] }
0x34df   :  { %7625 = vmatmul.mubr.f32.gmra.mrb[164].mxu1 %v7545_v32  ;;  %v7547_v60 = vmax.f32 %v7539_v19, 0.0  ;;  %v7701_v32 = vld [vmem:[%s18355_s28 + $0x30] sm:$0xff] }
0x34e0   :  { %v7548_v49 = vmax.f32 %v7541_v35, 0.0  ;;  %v13691_v19 = vpack.c.bf16 %v7701_v32, %v7699_v53  ;;  %13690 = vmatprep.subr.bf16.mxu0 %v13689_v24  ;;  %v7706_v35 = vld [vmem:[%s18355_s28 + $0x58] sm:$0xff] }
0x34e2   :  { %7629 = vmatprep.mubr.f32.mxu1 %v7548_v49  ;;  %13692 = vmatpush1.bf16.msra.mxu0 %v13691_v19  ;;  %v13693_v49 = vpack.c.bf16 %v7706_v35, %v7704_v16 }
0x34e3   :  { %7630 = vmatmul.mubr.f32.gmra.mrb[166].mxu1 %v7547_v60  ;;  %v7703_v60 = vld [vmem:[%s18355_s28 + $0x40] sm:$0xff] }
0x34e4   :  { %12936 = vmatprep.mubr.msk.f32.mxu1 %vm18317_vm9, %v15211_v0  ;;  %13694 = vmatprep.subr.bf16.mxu0 %v13693_v49 }
0x35ae   :  { %v11969_v55 = vpop.f32.mrb[162].mxu1 }
0x35af   :  { %v11970_v40 = vpop.f32.mrb[163].mxu1 }
0x35b0   :  { %v11971_v42 = vadd.f32 %v11970_v40, %v11969_v55  ;;  %v7705_v55 = vld [vmem:[%s18355_s28 + $0x50] sm:$0xff]  ;;  %v7708_v40 = vld [vmem:[%s18355_s28 + $0x68] sm:$0xff] }
0x35b2   :  { %v7622_v45 = vadd.f32 %v11971_v42, %v11431_v58  ;;  %v11972_v12 = vpop.f32.mrb[164].mxu1  ;;  %v7710_v42 = vld [vmem:[%s18355_s28 + $0x78] sm:$0xff] }
0x35b3   :  { %v11973_v23 = vpop.f32.mrb[165].mxu1 }
0x35b4   :  { %v11974_v1 = vadd.f32 %v11973_v23, %v11972_v12  ;;  %v7635_v22 = vadd.f32 %v7622_v45, %v17348_v4  ;;  %v13697_v45 = vpack.c.bf16 %v7710_v42, %v7708_v40  ;;  %v7707_v12 = vld [vmem:[%s18355_s28 + $0x60] sm:$0xff]  ;;  %v7709_v23 = vld [vmem:[%s18355_s28 + $0x70] sm:$0xff] }
0x35b6   :  { %v7627_v56 = vadd.f32 %v11974_v1, %v11431_v58  ;;  %v11975_v14 = vpop.f32.mrb[166].mxu1  ;;  %v7638_v63 = vsel %vm18352_vm13, %v7635_v22, 0.0  ;;  %v13699_v1 = vpack.c.bf16 %v7709_v23, %v7707_v12  ;;  %vm18365_vm13 = vmmov %vm18363_vm5 }
0x35b7   :  { %v11976_v15 = vpop.f32.mrb[167].mxu1  ;;  %7639 = vadd.xlane.f32.xlu1 %v7638_v63 }
0x35b8   :  { %v11977_v6 = vadd.f32 %v11976_v15, %v11975_v14  ;;  %v7636_v52 = vadd.f32 %v7627_v56, %v17354_v5 }
0x35ba   :  { %v7632_v43 = vadd.f32 %v11977_v6, %v11431_v58  ;;  %v7641_v7 = vsel %vm18353_vm10, %v7636_v52, 0.0  ;;  %v13695_v58 = vpack.c.bf16 %v7705_v55, %v7703_v60  ;;  %vm18366_vm10 = vmmov %vm18363_vm5 }
0x35bb   :  { %7642 = vadd.xlane.f32.xlu0 %v7641_v7 }
0x35bc   :  { %v7637_v41 = vadd.f32 %v7632_v43, %v17360_v20  ;;  %13696 = vmatpush1.bf16.msra.mxu0 %v13695_v58 }
0x35bd   :  { %13698 = vmatprep.subr.bf16.mxu0 %v13697_v45 }
0x35be   :  { %v7644_v27 = vsel %vm18354_vm12, %v7637_v41, 0.0  ;;  %vm18367_vm12 = vmmov %vm18363_vm5 }
0x35bf   :  { %7645 = vadd.xlane.f32.xlu1 %v7644_v27  ;;  %v11432_v27 = vld [vmem:[#allocation22] ss:$0 sm:$0xff] }
0x35c0   :  { %13700 = vmatpush1.bf16.msra.mxu0 %v13699_v1 }
0x35c1   :  { %13701 = vmatprep.subr.bf16.mxu0 %v15212_v28 }
0x3644   :  { %v7640_v21 = vpop.xlane.xlu1 %7639 }
0x3645   :  { %v7647_v4 = vmul.f32 0.015625, %v7640_v21 }
0x3647   :  { %v17383_v29 = vsub.f32 %v7635_v22, %v7647_v4  ;;  %v11433_v4 = vld [vmem:[#allocation24] ss:$0 sm:$0xff] }
0x3648   :  { %v7643_v47 = vpop.xlane.xlu0 %7642 }
0x3649   :  { %v7648_v34 = vmul.f32 0.015625, %v7643_v47  ;;  %v7653_v5 = vmul.f32 %v17383_v29, %v17383_v29 }
0x364b   :  { %v17387_v36 = vsub.f32 %v7636_v52, %v7648_v34  ;;  %v7656_v20 = vsel %vm18356_vm1, %v7653_v5, 0.0  ;;  %vm18368_vm1 = vmmov %vm18363_vm5 }
0x364c   :  { %7657 = vadd.xlane.f32.xlu0 %v7656_v20  ;;  %v7646_v10 = vpop.xlane.xlu1 %7645 }
0x364d   :  { %v7649_v38 = vmul.f32 0.015625, %v7646_v10  ;;  %v7654_v48 = vmul.f32 %v17387_v36, %v17387_v36 }
0x364f   :  { %v17392_v62 = vsub.f32 %v7637_v41, %v7649_v38  ;;  %v7659_v8 = vsel %vm18357_vm14, %v7654_v48, 0.0  ;;  %vm18369_vm14 = vmmov %vm18368_vm1 }
0x3650   :  { %7660 = vadd.xlane.f32.xlu1 %v7659_v8 }
0x3651   :  { %v7655_v9 = vmul.f32 %v17392_v62, %v17392_v62 }
0x3653   :  { %v7662_v37 = vsel %vm18358_vm8, %v7655_v9, 0.0  ;;  %vm18370_vm8 = vmmov %vm18368_vm1 }
0x3654   :  { %7663 = vadd.xlane.f32.xlu0 %v7662_v37 }
0x36d9   :  { %v7658_v22 = vpop.xlane.xlu0 %7657 }
0x36da   :  { %v7665_v56 = vmul.f32 0.015625, %v7658_v22 }
0x36dc   :  { %v7668_v14 = vadd.f32 1e-05, %v7665_v56 }
0x36dd   :  { %v7661_v63 = vpop.xlane.xlu1 %7660 }
0x36de   :  { %14394 = vrsqrt.f32 %v7668_v14  ;;  %v7666_v15 = vmul.f32 0.015625, %v7661_v63 }
0x36e0   :  { %v7669_v6 = vadd.f32 1e-05, %v7666_v15 }
0x36e1   :  { %v7664_v52 = vpop.xlane.xlu0 %7663 }
0x36e2   :  { %14396 = vrsqrt.f32 %v7669_v6  ;;  %v7667_v43 = vmul.f32 0.015625, %v7664_v52 }
0x36e4   :  { %v7670_v7 = vadd.f32 1e-05, %v7667_v43 }
0x36e6   :  { %14398 = vrsqrt.f32 %v7670_v7 }
0x36e8   :  { %v14395_v41 = vpop.eup %14394 }
0x36e9   :  { %v7674_v21 = vmul.f32 %v14395_v41, %v17383_v29 }
0x36eb   :  { %v7683_v47 = vmul.f32 %v11432_v27, %v7674_v21 }
0x36ec   :  { %v14397_v34 = vpop.eup %14396 }
0x36ed   :  { %v17416_v5 = vadd.f32 %v11433_v4, %v7683_v47  ;;  %v7675_v20 = vmul.f32 %v14397_v34, %v17387_v36  ;;  %v7711_v36 = vld [vmem:[%s18359_s1] sm:$0x3] }
0x36ee   :  { %v7727_v26 = vrot.slane %v7711_v36, %v15700_v31 }
0x36ef   :  { %11434 = vmatmul.mubr.msk.f32.vlgmr.msra.gmra.mrb[186].mxu0 %vm18360_vm11, %v17416_v5  ;;  %v7684_v10 = vmul.f32 %v11432_v27, %v7675_v20  ;;  %vm18372_vm11 = vmmov %vm18362_vm3 }
0x36f0   :  { %v14399_v38 = vpop.eup %14398  ;;  %7813 = vmatprep.mubr.f32.mxu0 %v15211_v0 }
0x36f1   :  { %v17422_v48 = vadd.f32 %v11433_v4, %v7684_v10  ;;  %v7676_v8 = vmul.f32 %v14399_v38, %v17392_v62  ;;  %v7731_v62 = vrot.slane %v7711_v36, %v15704_v33 }
0x36f3   :  { %11435 = vmatmul.mubr.msk.f32.gmra.mrb[188].mxu0 %vm18345_vm0, %v17422_v48  ;;  %v7685_v29 = vmul.f32 %v11432_v27, %v7676_v8  ;;  %vm18373_vm0 = vmmov %vm18368_vm1 }
0x36f4   :  { %7819 = vmatprep.mubr.f32.mxu0 %v15211_v0 }
0x36f5   :  { %v17428_v9 = vadd.f32 %v11433_v4, %v7685_v29 }
0x36f7   :  { %11436 = vmatmul.mubr.msk.f32.gmra.mrb[190].mxu0 %vm18361_vm2, %v17428_v9  ;;  %vm18374_vm2 = vmmov %vm18373_vm0 }
0x36f8   :  { %12921 = vmatprep.mubr.msk.f32.mxu0 %vm18317_vm9, %v15211_v0 }
0x37c2   :  { %v7809_v37 = vpop.f32.mrb[186].mxu0 }
0x37c3   :  { %v7811_v25 = vpop.f32.mrb[187].mxu0  ;;  %v7810_v54 = vadd.f32 %v7809_v37, %v7727_v26 }
0x37c4   :  { %v7812_v11 = vadd.f32 %v7811_v25, %v7731_v62 }
0x37c5   :  { %v17452_v60 = vmul.f32 0.25, %v7810_v54 }
0x37c6   :  { %v7815_v3 = vpop.f32.mrb[188].mxu0 }
0x37c7   :  { %v7816_v39 = vadd.f32 %v7815_v3, %v7727_v26  ;;  %v7817_v13 = vpop.f32.mrb[189].mxu0 }
0x37c8   :  { %v7818_v2 = vadd.f32 %v7817_v13, %v7731_v62 }
0x37c9   :  { %v17437_v24 = vpack.i.bf16 %v7816_v39, %v7810_v54  ;;  %v17466_v58 = vmul.f32 0.25, %v7816_v39 }
0x37ca   :  { %v7821_v53 = vpop.f32.mrb[190].mxu0  ;;  %v13706_v32 = vpack.c.bf16 %v7818_v2, %v7812_v11  ;;  %v17439_v19 = vpack.i.bf16 %v7818_v2, %v7812_v11 }
0x37cb   :  { %v17441_v16 = vadd.f32 %v7821_v53, %v7727_v26  ;;  %v7823_v35 = vpop.f32.mrb[191].mxu0  ;;  %14097 = vrot.lane.b32.xlu1 %v17437_v24, %s15214_s3 }
0x37cc   :  { %13707 = vmatpush3.bf16.msra.mxu1 %v13706_v32  ;;  %v17448_v49 = vadd.f32 %v7823_v35, %v7731_v62 }
0x37cd   :  { %7836 = vrot.lane.b32.xlu0 %v17441_v16, %s15214_s3  ;;  %12934 = vmatprep.subr.mxu1 %v15211_v0  ;;  %v17462_v55 = vmul.f32 0.25, %v17441_v16 }
0x37cf   :  { %14102 = vrot.lane.b32.xlu1 %v17437_v24, %s15213_s16 }
0x37d0   :  { %12935 = vmatpush3.msk.msra.mxu1 %vm18362_vm3, %v17448_v49  ;;  %vm18375_vm3 = vmmov %vm18373_vm0 }
0x37d1   :  { %8058 = vrot.lane.b32.xlu0 %v17452_v60, %s15216_s4  ;;  %13712 = vmatprep.subr.bf16.mxu1 %v15212_v28 }
0x37d3   :  { %8068 = vrot.lane.b32.xlu1 %v17441_v16, %s15213_s16 }
0x37d5   :  { %8062 = vrot.lane.b32.xlu0 %v17462_v55, %s15216_s4 }
0x37d7   :  { %8060 = vrot.lane.b32.xlu1 %v17466_v58, %s15216_s4 }
0x383d   :  { %v14098_v40 = vpop.permute.xlu1 %14097 }
0x383e   :  { %v14100_v42 = vunpack.i.h.bf16 %v14098_v40  ;;  %v14099_v45 = vunpack.i.l.bf16 %v14098_v40 }
0x383f   :  { %v7837_v56 = vpop.permute.xlu0 %7836 }
0x3840   :  { %v13702_v12 = vpack.c.bf16 %v14100_v42, %v14099_v45 }
0x3841   :  { %v14103_v23 = vpop.permute.xlu1 %14102 }
0x3842   :  { %13704 = vmatpush3.bf16.xpose.msk.msra.mxu0 %vm15747_vm4, %v13702_v12  ;;  %v14105_v1 = vunpack.i.h.bf16 %v14103_v23  ;;  %v14104_v22 = vunpack.i.l.bf16 %v14103_v23 }
0x3843   :  { %12919 = vmatprep.subr.mxu0 %v15211_v0  ;;  %v8059_v15 = vpop.permute.xlu0 %8058 }
0x3844   :  { %v13709_v14 = vpack.c.bf16 %v14105_v1, %v14104_v22 }
0x3845   :  { %v8069_v63 = vpop.permute.xlu1 %8068 }
0x3847   :  { %v8063_v52 = vpop.permute.xlu0 %8062 }
0x3849   :  { %v8061_v6 = vpop.permute.xlu1 %8060 }
0x384a   :  { %12920 = vmatpush3.xpose.msk.msra.mxu0 %vm18363_vm5, %v7837_v56  ;;  %vm18376_vm5 = vmmov %vm18373_vm0 }
0x384b   :  { %13708 = vmatprep.subr.bf16.mxu0 %v15212_v28 }
0x384d   :  { %12922 = vmatmul.mubr.msk.f32.vlgmr.msra.gmra.mrb[192].mxu0 %vm18364_vm7, %v17452_v60  ;;  %vm18377_vm7 = vmmov %vm18373_vm0 }
0x384e   :  { %13711 = vmatpush3.bf16.xpose.msk.msra.mxu0 %vm15747_vm4, %v13709_v14  ;;  %12924 = vmatprep.mubr.msk.f32.mxu0 %vm18317_vm9, %v15211_v0 }
0x384f   :  { %12949 = vmatprep.subr.mxu0 %v15211_v0 }
0x3851   :  { %12925 = vmatmul.mubr.msk.f32.gmra.mrb[194].mxu0 %vm18365_vm13, %v17466_v58  ;;  %vm18378_vm13 = vmmov %vm18373_vm0 }
0x3852   :  { %12927 = vmatprep.mubr.msk.f32.mxu0 %vm18317_vm9, %v15211_v0 }
0x3855   :  { %12928 = vmatmul.mubr.msk.f32.gmra.mrb[196].mxu0 %vm18366_vm10, %v17462_v55  ;;  %vm18379_vm10 = vmmov %vm18373_vm0 }
0x3856   :  { %12950 = vmatpush3.xpose.msk.msra.mxu0 %vm18367_vm12, %v8069_v63  ;;  %12951 = vmatprep.mubr.msk.f32.mxu0 %vm18317_vm9, %v15211_v0  ;;  %vm18380_vm12 = vmmov %vm18373_vm0 }
0x3857   :  { %13715 = vmatprep.subr.bf16.mxu0 %v15212_v28 }
0x3859   :  { %12952 = vmatmul.mubr.msk.f32.vlgmr.msra.gmra.mrb[198].mxu0 %vm18368_vm1, %v8059_v15  ;;  %vm18381_vm1 = vmmov %vm18373_vm0 }
0x385a   :  { %12954 = vmatprep.mubr.msk.f32.mxu0 %vm18317_vm9, %v15211_v0 }
0x385d   :  { %12955 = vmatmul.mubr.msk.f32.gmra.mrb[200].mxu0 %vm18369_vm14, %v8061_v6  ;;  %vm18382_vm14 = vmmov %vm18373_vm0 }
0x385e   :  { %12957 = vmatprep.mubr.msk.f32.mxu0 %vm18317_vm9, %v15211_v0 }
0x3861   :  { %12958 = vmatmul.mubr.msk.f32.gmra.mrb[202].mxu0 %vm18370_vm8, %v8063_v52  ;;  %vm18383_vm8 = vmmov %vm18372_vm11 }
0x3862   :  { %12979 = vmatprep.mubr.msk.f32.mxu0 %vm18317_vm9, %v15211_v0 }
0x3920   :  { %v7919_v43 = vpop.f32.mrb[192].mxu0 }
0x3921   :  { %v7920_v7 = vadd.f32 %v7919_v43, %v16661_v50  ;;  %v12923_v41 = vpop.f32.mrb[193].mxu0 }
0x3923   :  { %v7933_v27 = vsel %vm901_vm15, %v7920_v7, -inf }
0x3924   :  { %7934 = vmax.xlane.f32.xlu1 %v7933_v27  ;;  %v7924_v21 = vpop.f32.mrb[194].mxu0 }
0x3925   :  { %v7925_v4 = vadd.f32 %v7924_v21, %v16667_v59  ;;  %v12926_v47 = vpop.f32.mrb[195].mxu0 }
0x3927   :  { %v7936_v34 = vsel %vm901_vm15, %v7925_v4, -inf }
0x3928   :  { %7937 = vmax.xlane.f32.xlu0 %v7936_v34  ;;  %v7929_v20 = vpop.f32.mrb[196].mxu0 }
0x3929   :  { %v7930_v10 = vadd.f32 %v7929_v20, %v16674_v61  ;;  %v12929_v38 = vpop.f32.mrb[197].mxu0 }
0x392b   :  { %v7939_v8 = vsel %vm908_vm6, %v7930_v10, -inf }
0x392c   :  { %7940 = vmax.xlane.f32.xlu0 %v7939_v8  ;;  %v8148_v29 = vpop.f32.mrb[198].mxu0 }
0x392d   :  { %v8149_v36 = vadd.f32 %v8148_v29, %v16661_v50  ;;  %v12953_v37 = vpop.f32.mrb[199].mxu0 }
0x392f   :  { %v8162_v26 = vsel %vm901_vm15, %v8149_v36, -inf }
0x3930   :  { %8163 = vmax.xlane.f32.xlu1 %v8162_v26  ;;  %v8153_v25 = vpop.f32.mrb[200].mxu0 }
0x3931   :  { %v8154_v62 = vadd.f32 %v8153_v25, %v16667_v59  ;;  %v12956_v3 = vpop.f32.mrb[201].mxu0 }
0x3933   :  { %v8165_v54 = vsel %vm901_vm15, %v8154_v62, -inf }
0x3934   :  { %8166 = vmax.xlane.f32.xlu0 %v8165_v54  ;;  %v8158_v39 = vpop.f32.mrb[202].mxu0 }
0x3935   :  { %v8159_v13 = vadd.f32 %v8158_v39, %v16674_v61  ;;  %v12959_v11 = vpop.f32.mrb[203].mxu0 }
0x3937   :  { %v8168_v2 = vsel %vm908_vm6, %v8159_v13, -inf }
0x3938   :  { %8169 = vmax.xlane.f32.xlu1 %v8168_v2 }
0x39b1   :  { %v7935_v53 = vpop.xlane.xlu1 %7934 }
0x39b2   :  { %v7942_v32 = vsub.f32 %v7920_v7, %v7935_v53 }
0x39b4   :  { %v7945_v35 = vmul.f32 1.442695, %v7942_v32 }
0x39b5   :  { %v7938_v40 = vpop.xlane.xlu0 %7937 }
0x39b6   :  { %14400 = vpow2.f32 %v7945_v35  ;;  %v7943_v42 = vsub.f32 %v7925_v4, %v7938_v40 }
0x39b8   :  { %v7947_v45 = vmul.f32 1.442695, %v7943_v42 }
0x39b9   :  { %v7941_v12 = vpop.xlane.xlu0 %7940 }
0x39ba   :  { %14402 = vpow2.f32 %v7947_v45  ;;  %v7944_v23 = vsub.f32 %v7930_v10, %v7941_v12  ;;  %v7712_v12 = vld [vmem:[%s18371_s2] sm:$0xff] }
0x39bc   :  { %v7949_v1 = vmul.f32 1.442695, %v7944_v23  ;;  %v7713_v23 = vld [vmem:[%s18371_s2 + $0x8] sm:$0xff] }
0x39bd   :  { %v8164_v22 = vpop.xlane.xlu1 %8163 }
0x39be   :  { %14404 = vpow2.f32 %v7949_v1  ;;  %v8171_v56 = vsub.f32 %v8149_v36, %v8164_v22  ;;  %v13719_v22 = vpack.c.bf16 %v7713_v23, %v7712_v12 }
0x39c0   :  { %v14401_v14 = vpop.eup %14400  ;;  %v8174_v63 = vmul.f32 1.442695, %v8171_v56 }
0x39c1   :  { %v8167_v15 = vpop.xlane.xlu0 %8166  ;;  %v7951_v6 = vsel %vm901_vm15, %v14401_v14, 0.0 }
0x39c2   :  { %14406 = vpow2.f32 %v8174_v63  ;;  %v8172_v52 = vsub.f32 %v8154_v62, %v8167_v15  ;;  %7952 = vadd.xlane.f32.xlu0 %v7951_v6 }
0x39c4   :  { %v14403_v43 = vpop.eup %14402  ;;  %v8176_v7 = vmul.f32 1.442695, %v8172_v52 }
0x39c5   :  { %v8170_v41 = vpop.xlane.xlu1 %8169  ;;  %v7954_v27 = vsel %vm901_vm15, %v14403_v43, 0.0 }
0x39c6   :  { %14408 = vpow2.f32 %v8176_v7  ;;  %v8173_v21 = vsub.f32 %v8159_v13, %v8170_v41  ;;  %7955 = vadd.xlane.f32.xlu1 %v7954_v27  ;;  %v7715_v7 = vld [vmem:[%s18371_s2 + $0x18] sm:$0xff] }
0x39c8   :  { %v14405_v4 = vpop.eup %14404  ;;  %v8178_v47 = vmul.f32 1.442695, %v8173_v21 }
0x39c9   :  { %v7957_v34 = vsel %vm908_vm6, %v14405_v4, 0.0 }
0x39ca   :  { %14410 = vpow2.f32 %v8178_v47  ;;  %7958 = vadd.xlane.f32.xlu0 %v7957_v34 }
0x39cc   :  { %v14407_v20 = vpop.eup %14406 }
0x39cd   :  { %v8180_v10 = vsel %vm901_vm15, %v14407_v20, 0.0 }
0x39ce   :  { %8181 = vadd.xlane.f32.xlu1 %v8180_v10 }
0x39d0   :  { %v14409_v38 = vpop.eup %14408 }
0x39d1   :  { %v8183_v8 = vsel %vm901_vm15, %v14409_v38, 0.0 }
0x39d2   :  { %8184 = vadd.xlane.f32.xlu0 %v8183_v8 }
0x39d4   :  { %v14411_v29 = vpop.eup %14410 }
0x39d5   :  { %v8186_v36 = vsel %vm908_vm6, %v14411_v29, 0.0 }
0x39d6   :  { %8187 = vadd.xlane.f32.xlu1 %v8186_v36 }
0x39e7   :  { %8201 = vrot.lane.b32.xlu1 %v17448_v49, %s15216_s4 }
0x39e8   :  { %14107 = vrot.lane.b32.xlu0 %v17439_v19, %s15216_s4 }
0x39eb   :  { %14112 = vrot.lane.b32.xlu1 %v17437_v24, %s15218_s18 }
0x39ec   :  { %8484 = vrot.lane.b32.xlu0 %v17441_v16, %s15218_s18 }
0x39ef   :  { %8474 = vrot.lane.b32.xlu1 %v17452_v60, %s15219_s8 }
0x39f0   :  { %8476 = vrot.lane.b32.xlu0 %v17466_v58, %s15219_s8 }
0x39f3   :  { %8478 = vrot.lane.b32.xlu1 %v17462_v55, %s15219_s8 }
0x3a4f   :  { %v7953_v37 = vpop.xlane.xlu0 %7952 }
0x3a50   :  { %14412 = vrcp.f32 %v7953_v37 }
0x3a53   :  { %v7956_v26 = vpop.xlane.xlu1 %7955 }
0x3a54   :  { %14414 = vrcp.f32 %v7956_v26 }
0x3a57   :  { %v7959_v25 = vpop.xlane.xlu0 %7958 }
0x3a58   :  { %14416 = vrcp.f32 %v7959_v25 }
0x3a5a   :  { %v14413_v62 = vpop.eup %14412 }
0x3a5b   :  { %v7963_v3 = vmul.f32 %v14413_v62, %v14401_v14  ;;  %v8182_v54 = vpop.xlane.xlu1 %8181 }
0x3a5c   :  { %14418 = vrcp.f32 %v8182_v54 }
0x3a5d   :  { %12937 = vmatmul.mubr.msk.f32.vlgmr.msra.gmra.mrb[168].mxu1 %vm901_vm15, %v7963_v3 }
0x3a5e   :  { %v14415_v39 = vpop.eup %14414  ;;  %12939 = vmatprep.mubr.msk.f32.mxu1 %vm18317_vm9, %v15211_v0 }
0x3a5f   :  { %v8185_v13 = vpop.xlane.xlu0 %8184  ;;  %v7964_v11 = vmul.f32 %v14415_v39, %v14403_v43  ;;  %v7714_v43 = vld [vmem:[%s18371_s2 + $0x10] sm:$0xff] }
0x3a60   :  { %14420 = vrcp.f32 %v8185_v13  ;;  %v13716_v41 = vpack.c.bf16 %v7715_v7, %v7714_v43 }
0x3a61   :  { %12940 = vmatmul.mubr.msk.f32.gmra.mrb[170].mxu1 %vm901_vm15, %v7964_v11 }
0x3a62   :  { %v14417_v2 = vpop.eup %14416  ;;  %12942 = vmatprep.mubr.msk.f32.mxu1 %vm18317_vm9, %v15211_v0  ;;  %13717 = vmatpush3.bf16.msra.mxu0 %v13716_v41 }
0x3a63   :  { %v14108_v53 = vpop.permute.xlu0 %14107  ;;  %v8188_v32 = vpop.xlane.xlu1 %8187  ;;  %v7965_v35 = vmul.f32 %v14417_v2, %v14405_v4  ;;  %13721 = vmatprep.subr.bf16.mxu0 %v15212_v28 }
0x3a64   :  { %v14110_v40 = vunpack.i.h.bf16 %v14108_v53  ;;  %v14109_v42 = vunpack.i.l.bf16 %v14108_v53  ;;  %14422 = vrcp.f32 %v8188_v32 }
0x3a65   :  { %12943 = vmatmul.mubr.msk.f32.gmra.mrb[172].mxu1 %vm901_vm15, %v7965_v35 }
0x3a66   :  { %v13713_v45 = vpack.c.bf16 %v14110_v40, %v14109_v42  ;;  %12966 = vmatprep.mubr.msk.f32.mxu1 %vm18317_vm9, %v15211_v0  ;;  %v14419_v1 = vpop.eup %14418 }
0x3a67   :  { %v8192_v56 = vmul.f32 %v14419_v1, %v14407_v20  ;;  %v8202_v14 = vpop.permute.xlu1 %8201  ;;  %v8485_v3 = vpop.permute.xlu0 %8484 }
0x3a68   :  { %13714 = vmatpush3.bf16.msra.mxu1 %v13713_v45 }
0x3a69   :  { %12964 = vmatprep.subr.mxu1 %v15211_v0 }
0x3a6a   :  { %v14421_v63 = vpop.eup %14420 }
0x3a6b   :  { %v8193_v15 = vmul.f32 %v14421_v63, %v14409_v38  ;;  %v14113_v20 = vpop.permute.xlu1 %14112  ;;  %v8477_v13 = vpop.permute.xlu0 %8476 }
0x3a6c   :  { %12965 = vmatpush3.msk.msra.mxu1 %vm18372_vm11, %v8202_v14  ;;  %v14115_v38 = vunpack.i.h.bf16 %v14113_v20  ;;  %v14114_v8 = vunpack.i.l.bf16 %v14113_v20  ;;  %vm18384_vm11 = vmmov %vm18373_vm0 }
0x3a6d   :  { %12967 = vmatmul.mubr.msk.f32.vlgmr.msra.gmra.mrb[174].mxu1 %vm901_vm15, %v8192_v56  ;;  %13718 = vmatprep.subr.bf16.mxu1 %v15212_v28 }
0x3a6e   :  { %12969 = vmatprep.mubr.msk.f32.mxu1 %vm18317_vm9, %v15211_v0  ;;  %13720 = vmatpush3.bf16.msra.mxu1 %v13719_v22  ;;  %v14423_v6 = vpop.eup %14422 }
0x3a6f   :  { %13725 = vmatprep.subr.bf16.mxu1 %v15212_v28  ;;  %v8194_v52 = vmul.f32 %v14423_v6, %v14411_v29  ;;  %v13722_v29 = vpack.c.bf16 %v14115_v38, %v14114_v8  ;;  %v8475_v39 = vpop.permute.xlu1 %8474 }
0x3a71   :  { %12970 = vmatmul.mubr.msk.f32.gmra.mrb[176].mxu1 %vm901_vm15, %v8193_v15 }
0x3a72   :  { %12972 = vmatprep.mubr.msk.f32.mxu1 %vm18317_vm9, %v15211_v0 }
0x3a73   :  { %v8479_v11 = vpop.permute.xlu1 %8478 }
0x3a75   :  { %12973 = vmatmul.mubr.msk.f32.gmra.mrb[178].mxu1 %vm901_vm15, %v8194_v52 }
0x3a76   :  { %12992 = vmatprep.mubr.msk.f32.mxu1 %vm18317_vm9, %v15211_v0 }
0x3b30   :  { %v8044_v27 = vpop.f32.mrb[168].mxu1 }
0x3b31   :  { %v12938_v21 = vpop.f32.mrb[169].mxu1  ;;  %12993 = vmatmul.mubr.msk.f32.vlgmr.msra.gmra.mrb[180].mxu1 %vm18373_vm0, %v8044_v27 }
0x3b32   :  { %12995 = vmatprep.mubr.msk.f32.mxu1 %vm18317_vm9, %v15211_v0 }
0x3b34   :  { %v8049_v4 = vpop.f32.mrb[170].mxu1 }
0x3b35   :  { %v12941_v47 = vpop.f32.mrb[171].mxu1  ;;  %12996 = vmatmul.mubr.msk.f32.gmra.mrb[182].mxu1 %vm18374_vm2, %v8049_v4  ;;  %vm18385_vm2 = vmmov %vm18373_vm0 }
0x3b36   :  { %12998 = vmatprep.mubr.msk.f32.mxu1 %vm18317_vm9, %v15211_v0 }
0x3b38   :  { %v8054_v34 = vpop.f32.mrb[172].mxu1 }
0x3b39   :  { %v12944_v10 = vpop.f32.mrb[173].mxu1  ;;  %12999 = vmatmul.mubr.msk.f32.gmra.mrb[184].mxu1 %vm18375_vm3, %v8054_v34  ;;  %vm18386_vm3 = vmmov %vm18373_vm0 }
0x3b3a   :  { %13022 = vmatprep.mubr.msk.f32.mxu1 %vm18317_vm9, %v15211_v0 }
0x3b40   :  { %v8282_v36 = vpop.f32.mrb[174].mxu1 }
0x3b41   :  { %v12968_v37 = vpop.f32.mrb[175].mxu1  ;;  %12980 = vmatmul.mubr.msk.f32.vlgmr.msra.gmra.mrb[204].mxu0 %vm18376_vm5, %v8282_v36  ;;  %vm18387_vm5 = vmmov %vm18373_vm0 }
0x3b42   :  { %13724 = vmatpush3.bf16.xpose.msk.msra.mxu0 %vm15747_vm4, %v13722_v29  ;;  %12982 = vmatprep.mubr.msk.f32.mxu0 %vm18317_vm9, %v15211_v0 }
0x3b43   :  { %13005 = vmatprep.subr.mxu0 %v15211_v0 }
0x3b44   :  { %v8287_v26 = vpop.f32.mrb[176].mxu1 }
0x3b45   :  { %v12971_v25 = vpop.f32.mrb[177].mxu1  ;;  %12983 = vmatmul.mubr.msk.f32.gmra.mrb[206].mxu0 %vm18377_vm7, %v8287_v26  ;;  %vm18388_vm7 = vmmov %vm18373_vm0 }
0x3b46   :  { %12985 = vmatprep.mubr.msk.f32.mxu0 %vm18317_vm9, %v15211_v0 }
0x3b48   :  { %v8292_v62 = vpop.f32.mrb[178].mxu1 }
0x3b49   :  { %v12974_v54 = vpop.f32.mrb[179].mxu1  ;;  %12986 = vmatmul.mubr.msk.f32.gmra.mrb[208].mxu0 %vm18378_vm13, %v8292_v62  ;;  %vm18389_vm13 = vmmov %vm18373_vm0 }
0x3b4a   :  { %13006 = vmatpush3.xpose.msk.msra.mxu0 %vm18379_vm10, %v8485_v3  ;;  %13007 = vmatprep.mubr.msk.f32.mxu0 %vm18317_vm9, %v15211_v0  ;;  %vm18391_vm10 = vmmov %vm18383_vm8 }
0x3b4b   :  { %13728 = vmatprep.subr.bf16.mxu0 %v15212_v28 }
0x3b4d   :  { %13008 = vmatmul.mubr.msk.f32.vlgmr.msra.gmra.mrb[210].mxu0 %vm18380_vm12, %v8475_v39  ;;  %vm18392_vm12 = vmmov %vm18373_vm0 }
0x3b4e   :  { %13010 = vmatprep.mubr.msk.f32.mxu0 %vm18317_vm9, %v15211_v0 }
0x3b51   :  { %13011 = vmatmul.mubr.msk.f32.gmra.mrb[212].mxu0 %vm18381_vm1, %v8477_v13  ;;  %vm18393_vm1 = vmmov %vm18373_vm0 }
0x3b52   :  { %13013 = vmatprep.mubr.msk.f32.mxu0 %vm18317_vm9, %v15211_v0 }
0x3b55   :  { %13014 = vmatmul.mubr.msk.f32.gmra.mrb[214].mxu0 %vm18382_vm14, %v8479_v11  ;;  %vm18394_vm14 = vmmov %vm18373_vm0 }
0x3b56   :  { %13035 = vmatprep.mubr.msk.f32.mxu0 %vm18317_vm9, %v15211_v0 }
0x3c04   :  { %v8460_v2 = vpop.f32.mrb[180].mxu1 }
0x3c05   :  { %v12994_v53 = vpop.f32.mrb[181].mxu1 }
0x3c08   :  { %v8465_v32 = vpop.f32.mrb[182].mxu1 }
0x3c09   :  { %v12997_v35 = vpop.f32.mrb[183].mxu1 }
0x3c0c   :  { %v8470_v40 = vpop.f32.mrb[184].mxu1 }
0x3c0d   :  { %v13000_v42 = vpop.f32.mrb[185].mxu1 }
0x3c0e   :  { %v7717_v42 = vld [vmem:[%s18371_s2 + $0x28] sm:$0xff] }
0x3c14   :  { %v8371_v45 = vpop.f32.mrb[204].mxu0 }
0x3c15   :  { %v17592_v12 = vadd.f32 %v8460_v2, %v8371_v45  ;;  %v12981_v23 = vpop.f32.mrb[205].mxu0 }
0x3c18   :  { %v8376_v1 = vpop.f32.mrb[206].mxu0 }
0x3c19   :  { %v17594_v22 = vadd.f32 %v8465_v32, %v8376_v1  ;;  %v12984_v56 = vpop.f32.mrb[207].mxu0 }
0x3c1c   :  { %v8381_v14 = vpop.f32.mrb[208].mxu0 }
0x3c1d   :  { %v17596_v63 = vadd.f32 %v8470_v40, %v8381_v14  ;;  %v12987_v15 = vpop.f32.mrb[209].mxu0 }
0x3c20   :  { %v8564_v6 = vpop.f32.mrb[210].mxu0 }
0x3c21   :  { %v8565_v52 = vadd.f32 %v8564_v6, %v16661_v50  ;;  %v13009_v43 = vpop.f32.mrb[211].mxu0 }
0x3c23   :  { %v8578_v7 = vsel %vm901_vm15, %v8565_v52, -inf }
0x3c24   :  { %8579 = vmax.xlane.f32.xlu0 %v8578_v7  ;;  %v8569_v41 = vpop.f32.mrb[212].mxu0 }
0x3c25   :  { %v8570_v27 = vadd.f32 %v8569_v41, %v16667_v59  ;;  %v13012_v21 = vpop.f32.mrb[213].mxu0 }
0x3c27   :  { %v8581_v4 = vsel %vm901_vm15, %v8570_v27, -inf }
0x3c28   :  { %8582 = vmax.xlane.f32.xlu1 %v8581_v4  ;;  %v8574_v47 = vpop.f32.mrb[214].mxu0 }
0x3c29   :  { %v8575_v34 = vadd.f32 %v8574_v47, %v16674_v61  ;;  %v13015_v20 = vpop.f32.mrb[215].mxu0 }
0x3c2b   :  { %v8584_v10 = vsel %vm908_vm6, %v8575_v34, -inf }
0x3c2c   :  { %8585 = vmax.xlane.f32.xlu0 %v8584_v10 }
0x3c39   :  { %14117 = vrot.lane.b32.xlu1 %v17439_v19, %s15219_s8 }
0x3c3d   :  { %14122 = vrot.lane.b32.xlu1 %v17437_v24, %s15220_s22 }
0x3cb1   :  { %v8580_v38 = vpop.xlane.xlu0 %8579 }
0x3cb2   :  { %v8587_v8 = vsub.f32 %v8565_v52, %v8580_v38 }
0x3cb4   :  { %v8590_v29 = vmul.f32 1.442695, %v8587_v8 }
0x3cb5   :  { %v8583_v36 = vpop.xlane.xlu1 %8582 }
0x3cb6   :  { %14424 = vpow2.f32 %v8590_v29  ;;  %v8588_v37 = vsub.f32 %v8570_v27, %v8583_v36 }
0x3cb8   :  { %v8592_v26 = vmul.f32 1.442695, %v8588_v37 }
0x3cb9   :  { %v14118_v25 = vpop.permute.xlu1 %14117  ;;  %v8586_v2 = vpop.xlane.xlu0 %8585 }
0x3cba   :  { %14426 = vpow2.f32 %v8592_v26  ;;  %v14120_v62 = vunpack.i.h.bf16 %v14118_v25  ;;  %v14119_v3 = vunpack.i.l.bf16 %v14118_v25  ;;  %v8589_v53 = vsub.f32 %v8575_v34, %v8586_v2 }
0x3cbc   :  { %v13726_v54 = vpack.c.bf16 %v14120_v62, %v14119_v3  ;;  %v8594_v32 = vmul.f32 1.442695, %v8589_v53 }
0x3cbe   :  { %13727 = vmatpush3.bf16.msra.mxu1 %v13726_v54  ;;  %14428 = vpow2.f32 %v8594_v32 }
0x3cbf   :  { %13020 = vmatprep.subr.mxu1 %v15211_v0 }
0x3cc0   :  { %v14425_v39 = vpop.eup %14424 }
0x3cc1   :  { %v8596_v13 = vsel %vm901_vm15, %v14425_v39, 0.0 }
0x3cc2   :  { %8597 = vadd.xlane.f32.xlu0 %v8596_v13 }
0x3cc4   :  { %v14427_v24 = vpop.eup %14426 }
0x3cc5   :  { %v8599_v11 = vsel %vm901_vm15, %v14427_v24, 0.0 }
0x3cc6   :  { %8600 = vadd.xlane.f32.xlu1 %v8599_v11 }
0x3cc8   :  { %v14429_v35 = vpop.eup %14428 }
0x3cc9   :  { %v8602_v40 = vsel %vm908_vm6, %v14429_v35, 0.0 }
0x3cd7   :  { %8812 = vrot.lane.b32.xlu1 %v17441_v16, %s15220_s22  ;;  %v7716_v16 = vld [vmem:[%s18371_s2 + $0x20] sm:$0xff] }
0x3cd8   :  { %8615 = vrot.lane.b32.xlu0 %v17448_v49, %s15219_s8  ;;  %v13729_v45 = vpack.c.bf16 %v7717_v42, %v7716_v16 }
0x3cda   :  { %13730 = vmatpush3.bf16.msra.mxu0 %v13729_v45 }
0x3cdb   :  { %8804 = vrot.lane.b32.xlu1 %v17466_v58, %s15221_s23  ;;  %13735 = vmatprep.subr.bf16.mxu0 %v15212_v28  ;;  %v14123_v58 = vpop.permute.xlu1 %14122 }
0x3cdc   :  { %v14124_v14 = vunpack.i.l.bf16 %v14123_v58 }
0x3cf7   :  { %8603 = vadd.xlane.f32.xlu0 %v8602_v40 }
0x3d0d   :  { %8802 = vrot.lane.b32.xlu0 %v17452_v60, %s15221_s23  ;;  %v14125_v60 = vunpack.i.h.bf16 %v14123_v58 }
0x3d0f   :  { %v13732_v6 = vpack.c.bf16 %v14125_v60, %v14124_v14 }
0x3d11   :  { %8806 = vrot.lane.b32.xlu0 %v17462_v55, %s15221_s23 }
0x3d4f   :  { %v8598_v23 = vpop.xlane.xlu0 %8597 }
0x3d50   :  { %14430 = vrcp.f32 %v8598_v23 }
0x3d53   :  { %v8601_v1 = vpop.xlane.xlu1 %8600  ;;  %v8616_v56 = vpop.permute.xlu0 %8615 }
0x3d54   :  { %14432 = vrcp.f32 %v8601_v1  ;;  %13021 = vmatpush3.msk.msra.mxu1 %vm18383_vm8, %v8616_v56  ;;  %vm18395_vm8 = vcmask 523264  }
0x3d55   :  { %13731 = vmatprep.subr.bf16.mxu1 %v15212_v28 }
0x3d57   :  { %v8813_v7 = vpop.permute.xlu1 %8812 }
0x3d5a   :  { %v14431_v15 = vpop.eup %14430 }
0x3d5b   :  { %v8608_v55 = vmul.f32 %v14431_v15, %v14425_v39  ;;  %v8805_v47 = vpop.permute.xlu1 %8804 }
0x3d5d   :  { %13023 = vmatmul.mubr.msk.f32.vlgmr.msra.gmra.mrb[186].mxu1 %vm901_vm15, %v8608_v55 }
0x3d5e   :  { %v14433_v52 = vpop.eup %14432  ;;  %13734 = vmatpush3.bf16.xpose.msk.msra.mxu1 %vm15747_vm4, %v13732_v6  ;;  %13025 = vmatprep.mubr.msk.f32.mxu1 %vm18317_vm9, %v15211_v0 }
0x3d5f   :  { %v8609_v43 = vmul.f32 %v14433_v52, %v14427_v24  ;;  %13048 = vmatprep.subr.mxu1 %v15211_v0 }
0x3d61   :  { %13026 = vmatmul.mubr.msk.f32.gmra.mrb[188].mxu1 %vm901_vm15, %v8609_v43 }
0x3d62   :  { %13028 = vmatprep.mubr.msk.f32.mxu1 %vm18317_vm9, %v15211_v0 }
0x3d66   :  { %13049 = vmatpush3.xpose.msk.msra.mxu1 %vm18384_vm11, %v8813_v7  ;;  %v7719_v7 = vld [vmem:[%s18371_s2 + $0x38] sm:$0xff]  ;;  %vm18396_vm11 = vmmov %vm18395_vm8 }
0x3d67   :  { %13738 = vmatprep.subr.bf16.mxu1 %v15212_v28 }
0x3d84   :  { %v8604_v41 = vpop.xlane.xlu0 %8603 }
0x3d85   :  { %14434 = vrcp.f32 %v8604_v41 }
0x3d88   :  { %v8803_v4 = vpop.permute.xlu0 %8802 }
0x3d8c   :  { %v8807_v34 = vpop.permute.xlu0 %8806 }
0x3d8f   :  { %v14435_v27 = vpop.eup %14434 }
0x3d90   :  { %v8610_v21 = vmul.f32 %v14435_v27, %v14429_v35 }
0x3d92   :  { %13029 = vmatmul.mubr.msk.f32.gmra.mrb[190].mxu1 %vm901_vm15, %v8610_v21 }
0x3d93   :  { %13050 = vmatprep.mubr.msk.f32.mxu1 %vm18317_vm9, %v15211_v0 }
0x3d96   :  { %13051 = vmatmul.mubr.msk.f32.vlgmr.msra.gmra.mrb[192].mxu1 %vm18373_vm0, %v8803_v4  ;;  %vm18397_vm0 = vmmov %vm18395_vm8 }
0x3d97   :  { %13053 = vmatprep.mubr.msk.f32.mxu1 %vm18317_vm9, %v15211_v0 }
0x3d9a   :  { %13054 = vmatmul.mubr.msk.f32.gmra.mrb[194].mxu1 %vm18385_vm2, %v8805_v47  ;;  %vm18398_vm2 = vmmov %vm18397_vm0 }
0x3d9b   :  { %13056 = vmatprep.mubr.msk.f32.mxu1 %vm18317_vm9, %v15211_v0 }
0x3d9e   :  { %13057 = vmatmul.mubr.msk.f32.gmra.mrb[196].mxu1 %vm18386_vm3, %v8807_v34  ;;  %vm18399_vm3 = vmmov %vm18397_vm0 }
0x3d9f   :  { %13078 = vmatprep.mubr.msk.f32.mxu1 %vm18317_vm9, %v15211_v0 }
0x3e30   :  { %v8696_v20 = vpop.f32.mrb[186].mxu1 }
0x3e31   :  { %v13024_v10 = vpop.f32.mrb[187].mxu1  ;;  %13036 = vmatmul.mubr.msk.f32.vlgmr.msra.gmra.mrb[216].mxu0 %vm18387_vm5, %v8696_v20  ;;  %vm18400_vm5 = vcmask 517120  }
0x3e32   :  { %13038 = vmatprep.mubr.msk.f32.mxu0 %vm18317_vm9, %v15211_v0 }
0x3e34   :  { %v8701_v38 = vpop.f32.mrb[188].mxu1 }
0x3e35   :  { %v13027_v8 = vpop.f32.mrb[189].mxu1  ;;  %13039 = vmatmul.mubr.msk.f32.gmra.mrb[218].mxu0 %vm18388_vm7, %v8701_v38  ;;  %vm18402_vm7 = vmmov %vm18397_vm0 }
0x3e36   :  { %13041 = vmatprep.mubr.msk.f32.mxu0 %vm18317_vm9, %v15211_v0 }
0x3e65   :  { %v8706_v29 = vpop.f32.mrb[190].mxu1 }
0x3e66   :  { %v13030_v36 = vpop.f32.mrb[191].mxu1  ;;  %13042 = vmatmul.mubr.msk.f32.gmra.mrb[220].mxu0 %vm18389_vm13, %v8706_v29  ;;  %vm18403_vm13 = vmmov %vm18397_vm0 }
0x3e67   :  { %13065 = vmatprep.mubr.msk.f32.mxu0 %vm18317_vm9, %v15211_v0 }
0x3e69   :  { %v8892_v37 = vpop.f32.mrb[192].mxu1 }
0x3e6a   :  { %v8893_v26 = vadd.f32 %v8892_v37, %v16661_v50  ;;  %v13052_v25 = vpop.f32.mrb[193].mxu1 }
0x3e6c   :  { %v8906_v62 = vsel %vm901_vm15, %v8893_v26, -inf }
0x3e6d   :  { %8907 = vmax.xlane.f32.xlu1 %v8906_v62  ;;  %v8897_v3 = vpop.f32.mrb[194].mxu1  ;;  %v9208_v62 = vld [vmem:[%s18390_s20] sm:$0xff] }
0x3e6e   :  { %v8898_v54 = vadd.f32 %v8897_v3, %v16667_v59  ;;  %v13055_v39 = vpop.f32.mrb[195].mxu1  ;;  %v9209_v3 = vld [vmem:[%s18390_s20 + $0x8] sm:$0xff] }
0x3e6f   :  { %v9210_v39 = vld [vmem:[%s18390_s20 + $0x10] sm:$0xff] }
0x3e70   :  { %v8909_v13 = vsel %vm901_vm15, %v8898_v54, -inf }
0x3e71   :  { %8910 = vmax.xlane.f32.xlu0 %v8909_v13  ;;  %v8902_v24 = vpop.f32.mrb[196].mxu1  ;;  %v9211_v13 = vld [vmem:[%s18390_s20 + $0x18] sm:$0xff] }
0x3e72   :  { %v8903_v11 = vadd.f32 %v8902_v24, %v16674_v61  ;;  %v13058_v2 = vpop.f32.mrb[197].mxu1 }
0x3e73   :  { %v13757_v2 = vpack.c.bf16 %v9211_v13, %v9210_v39 }
0x3e74   :  { %v8912_v53 = vsel %vm908_vm6, %v8903_v11, -inf }
0x3e75   :  { %8913 = vmax.xlane.f32.xlu0 %v8912_v53  ;;  %v9212_v53 = vld [vmem:[%s18390_s20 + $0x20] sm:$0xff] }
0x3efa   :  { %v8908_v32 = vpop.xlane.xlu1 %8907 }
0x3efb   :  { %v8915_v50 = vsub.f32 %v8893_v26, %v8908_v32  ;;  %v9213_v32 = vld [vmem:[%s18390_s20 + $0x28] sm:$0xff] }
0x3efd   :  { %v8918_v35 = vmul.f32 1.442695, %v8915_v50 }
0x3efe   :  { %v8911_v40 = vpop.xlane.xlu0 %8910 }
0x3eff   :  { %14436 = vpow2.f32 %v8918_v35  ;;  %v8916_v16 = vsub.f32 %v8898_v54, %v8911_v40  ;;  %v13754_v54 = vpack.c.bf16 %v9209_v3, %v9208_v62  ;;  %v13760_v40 = vpack.c.bf16 %v9213_v32, %v9212_v53  ;;  %v9200_v53 = vld [vmem:[%s18401_s7 + $0x8] sm:$0xff] }
0x3f01   :  { %v8920_v42 = vmul.f32 1.442695, %v8916_v16  ;;  %v9214_v16 = vld [vmem:[%s18390_s20 + $0x30] sm:$0xff] }
0x3f02   :  { %v8914_v45 = vpop.xlane.xlu0 %8913 }
0x3f03   :  { %14438 = vpow2.f32 %v8920_v42  ;;  %v8917_v59 = vsub.f32 %v8903_v11, %v8914_v45  ;;  %v9215_v42 = vld [vmem:[%s18390_s20 + $0x38] sm:$0xff] }
0x3f04   :  { %v8785_v58 = vpop.f32.mrb[216].mxu0 }
0x3f05   :  { %v8922_v23 = vmul.f32 1.442695, %v8917_v59  ;;  %v17666_v1 = vadd.f32 %v8785_v58, %v17592_v12  ;;  %v13037_v61 = vpop.f32.mrb[217].mxu0  ;;  %v13763_v58 = vpack.c.bf16 %v9215_v42, %v9214_v16  ;;  %v9203_v16 = vld [vmem:[%s18401_s7 + $0x20] sm:$0xff]  ;;  %v9204_v42 = vld [vmem:[%s18401_s7 + $0x28] sm:$0xff] }
0x3f07   :  { %14440 = vpow2.f32 %v8922_v23 }
0x3f08   :  { %v8790_v56 = vpop.f32.mrb[218].mxu0 }
0x3f09   :  { %v14437_v60 = vpop.eup %14436  ;;  %v17669_v14 = vadd.f32 %v8790_v56, %v17594_v22  ;;  %v13040_v15 = vpop.f32.mrb[219].mxu0  ;;  %v7718_v22 = vld [vmem:[%s18371_s2 + $0x30] sm:$0xff] }
0x3f0a   :  { %v8924_v55 = vsel %vm901_vm15, %v14437_v60, 0.0  ;;  %v13739_v41 = vpack.c.bf16 %v7719_v7, %v7718_v22 }
0x3f0b   :  { %8925 = vadd.xlane.f32.xlu1 %v8924_v55 }
0x3f0c   :  { %13740 = vmatpush3.bf16.msra.mxu1 %v13739_v41 }
0x3f0d   :  { %v14439_v6 = vpop.eup %14438  ;;  %13753 = vmatprep.subr.bf16.mxu1 %v15212_v28 }
0x3f0e   :  { %v8927_v52 = vsel %vm901_vm15, %v14439_v6, 0.0 }
0x3f0f   :  { %8928 = vadd.xlane.f32.xlu0 %v8927_v52 }
0x3f11   :  { %v14441_v43 = vpop.eup %14440 }
0x3f12   :  { %v8930_v12 = vsel %vm908_vm6, %v14441_v43, 0.0 }
0x3f13   :  { %8931 = vadd.xlane.f32.xlu1 %v8930_v12 }
0x3f24   :  { %8943 = vrot.lane.b32.xlu1 %v17448_v49, %s15221_s23 }
0x3f25   :  { %14127 = vrot.lane.b32.xlu0 %v17439_v19, %s15221_s23 }
0x3f39   :  { %v8795_v27 = vpop.f32.mrb[220].mxu0 }
0x3f3a   :  { %v17682_v21 = vadd.f32 %v8795_v27, %v17596_v63  ;;  %v13043_v4 = vpop.f32.mrb[221].mxu0 }
0x3f98   :  { %v8926_v47 = vpop.xlane.xlu1 %8925 }
0x3f99   :  { %14442 = vrcp.f32 %v8926_v47 }
0x3f9c   :  { %v8929_v34 = vpop.xlane.xlu0 %8928 }
0x3f9d   :  { %14444 = vrcp.f32 %v8929_v34 }
0x3fa0   :  { %v8932_v20 = vpop.xlane.xlu1 %8931  ;;  %v14128_v49 = vpop.permute.xlu0 %14127 }
0x3fa1   :  { %v14130_v10 = vunpack.i.h.bf16 %v14128_v49  ;;  %v14129_v38 = vunpack.i.l.bf16 %v14128_v49  ;;  %14446 = vrcp.f32 %v8932_v20 }
0x3fa3   :  { %v13736_v19 = vpack.c.bf16 %v14130_v10, %v14129_v38  ;;  %v14443_v8 = vpop.eup %14442 }
0x3fa4   :  { %v8936_v29 = vmul.f32 %v14443_v8, %v14437_v60  ;;  %v8944_v63 = vpop.permute.xlu1 %8943 }
0x3fa5   :  { %13737 = vmatpush3.bf16.msra.mxu0 %v13736_v19 }
0x3fa6   :  { %13063 = vmatprep.subr.mxu0 %v15211_v0 }
0x3fa7   :  { %v14445_v36 = vpop.eup %14444 }
0x3fa8   :  { %v8937_v37 = vmul.f32 %v14445_v36, %v14439_v6 }
0x3fa9   :  { %13064 = vmatpush3.msk.msra.mxu0 %vm18391_vm10, %v8944_v63  ;;  %vm18404_vm10 = vmmov %vm18400_vm5 }
0x3faa   :  { %13066 = vmatmul.mubr.msk.f32.vlgmr.msra.gmra.mrb[222].mxu0 %vm901_vm15, %v8936_v29  ;;  %13741 = vmatprep.subr.bf16.mxu0 %v15212_v28 }
0x3fab   :  { %13068 = vmatprep.mubr.msk.f32.mxu0 %vm18317_vm9, %v15211_v0  ;;  %v14447_v26 = vpop.eup %14446 }
0x3fac   :  { %v8938_v25 = vmul.f32 %v14447_v26, %v14441_v43 }
0x3fae   :  { %13069 = vmatmul.mubr.msk.f32.gmra.mrb[224].mxu0 %vm901_vm15, %v8937_v37 }
0x3faf   :  { %13071 = vmatprep.mubr.msk.f32.mxu0 %vm18317_vm9, %v15211_v0 }
0x3fb2   :  { %13072 = vmatmul.mubr.msk.f32.gmra.mrb[226].mxu0 %vm901_vm15, %v8938_v25 }
0x3fb3   :  { %13103 = vmatprep.mubr.msk.f32.mxu0 %vm18317_vm9, %v15211_v0 }
0x407d   :  { %v9024_v24 = vpop.f32.mrb[222].mxu0 }
0x407e   :  { %v13067_v11 = vpop.f32.mrb[223].mxu0  ;;  %13079 = vmatmul.mubr.msk.f32.vlgmr.msra.gmra.mrb[198].mxu1 %vm18392_vm12, %v9024_v24  ;;  %vm18405_vm12 = vmmov %vm18397_vm0 }
0x407f   :  { %13755 = vmatpush3.bf16.msra.mxu1 %v13754_v54  ;;  %13081 = vmatprep.mubr.msk.f32.mxu1 %vm18317_vm9, %v15211_v0 }
0x4080   :  { %13756 = vmatprep.subr.bf16.mxu1 %v15212_v28 }
0x4081   :  { %v9029_v50 = vpop.f32.mrb[224].mxu0 }
0x4082   :  { %v13070_v35 = vpop.f32.mrb[225].mxu0  ;;  %13082 = vmatmul.mubr.msk.f32.gmra.mrb[200].mxu1 %vm18393_vm1, %v9029_v50  ;;  %v9201_v50 = vld [vmem:[%s18401_s7 + $0x10] sm:$0xff]  ;;  %vm18406_vm1 = vmmov %vm18397_vm0 }
0x4083   :  { %13758 = vmatpush3.bf16.msra.mxu1 %v13757_v2  ;;  %13084 = vmatprep.mubr.msk.f32.mxu1 %vm18317_vm9, %v15211_v0  ;;  %v9199_v2 = vld [vmem:[%s18401_s7] sm:$0xff]  ;;  %v9202_v35 = vld [vmem:[%s18401_s7 + $0x18] sm:$0xff] }
0x4084   :  { %13759 = vmatprep.subr.bf16.mxu1 %v15212_v28  ;;  %v13742_v32 = vpack.c.bf16 %v9200_v53, %v9199_v2 }
0x4085   :  { %v9034_v45 = vpop.f32.mrb[226].mxu0 }
0x4086   :  { %v13073_v59 = vpop.f32.mrb[227].mxu0  ;;  %13085 = vmatmul.mubr.msk.f32.gmra.mrb[202].mxu1 %vm18394_vm14, %v9034_v45  ;;  %13743 = vmatpush3.bf16.msra.mxu0 %v13742_v32  ;;  %v13748_v45 = vpack.c.bf16 %v9204_v42, %v9203_v16  ;;  %vm18407_vm14 = vmmov %vm18397_vm0 }
0x4087   :  { %13761 = vmatpush3.bf16.msra.mxu1 %v13760_v40  ;;  %13128 = vmatprep.mubr.msk.f32.mxu1 %vm18317_vm9, %v15211_v0  ;;  %v13745_v40 = vpack.c.bf16 %v9202_v35, %v9201_v50 }
0x4088   :  { %13762 = vmatprep.subr.bf16.mxu1 %v15212_v28  ;;  %13744 = vmatprep.subr.bf16.mxu0 %v15212_v28 }
0x408a   :  { %13746 = vmatpush3.bf16.msra.mxu0 %v13745_v40 }
0x408b   :  { %13764 = vmatpush3.bf16.msra.mxu1 %v13763_v58  ;;  %13747 = vmatprep.subr.bf16.mxu0 %v15212_v28  ;;  %v9205_v58 = vld [vmem:[%s18401_s7 + $0x30] sm:$0xff] }
0x408c   :  { %13769 = vmatprep.subr.bf16.mxu1 %v15212_v28 }
0x408e   :  { %13129 = vmatmul.mubr.msk.f32.vlgmr.msra.gmra.mrb[204].mxu1 %vm18395_vm8, %v16952_v51  ;;  %v11489_v51 = vld [vmem:[#allocation25] ss:$0 sm:$0xff]  ;;  %13749 = vmatpush3.bf16.msra.mxu0 %v13748_v45  ;;  %vm18408_vm8 = vcmask 130048  }
0x408f   :  { %13131 = vmatprep.mubr.msk.f32.mxu1 %vm18317_vm9, %v15211_v0  ;;  %13750 = vmatprep.subr.bf16.mxu0 %v15212_v28 }
0x4092   :  { %13132 = vmatmul.mubr.msk.f32.gmra.mrb[206].mxu1 %vm18396_vm11, %v16963_v30  ;;  %vm18409_vm11 = vmmov %vm18408_vm8 }
0x4093   :  { %13134 = vmatprep.mubr.msk.f32.mxu1 %vm18317_vm9, %v15211_v0 }
0x4096   :  { %13135 = vmatmul.mubr.msk.f32.gmra.mrb[208].mxu1 %vm18397_vm0, %v16972_v44  ;;  %vm18410_vm0 = vmmov %vm18408_vm8 }
0x4097   :  { %13158 = vmatprep.mubr.msk.f32.mxu1 %vm18317_vm9, %v15211_v0 }
0x4151   :  { %v9113_v23 = vpop.f32.mrb[198].mxu1 }
0x4152   :  { %v9127_v61 = vadd.f32 %v9113_v23, %v17666_v1  ;;  %v13080_v56 = vpop.f32.mrb[199].mxu1  ;;  %v9206_v23 = vld [vmem:[%s18401_s7 + $0x38] sm:$0xff] }
0x4154   :  { %v9130_v60 = vadd.f32 %v9127_v61, %v17416_v5  ;;  %v13751_v61 = vpack.c.bf16 %v9206_v23, %v9205_v58 }
0x4155   :  { %v9118_v15 = vpop.f32.mrb[200].mxu1 }
0x4156   :  { %v9128_v55 = vadd.f32 %v9118_v15, %v17669_v14  ;;  %v13083_v30 = vpop.f32.mrb[201].mxu1  ;;  %v9139_v6 = vadd.f32 %v11489_v51, %v9130_v60  ;;  %13752 = vmatpush3.bf16.msra.mxu0 %v13751_v61 }
0x4157   :  { %13765 = vmatprep.subr.bf16.mxu0 %v15212_v28 }
0x4158   :  { %v9131_v52 = vadd.f32 %v9128_v55, %v17422_v48  ;;  %v9142_v43 = vsel %vm18398_vm2, %v9139_v6, 0.0  ;;  %v11496_v48 = vld [vmem:[#allocation31] ss:$0 sm:$0xff]  ;;  %vm18411_vm2 = vmmov %vm18410_vm0 }
0x4159   :  { %9143 = vadd.xlane.f32.xlu1 %v9142_v43  ;;  %v9123_v44 = vpop.f32.mrb[202].mxu1 }
0x415a   :  { %v9129_v12 = vadd.f32 %v9123_v44, %v17682_v21  ;;  %v13086_v22 = vpop.f32.mrb[203].mxu1  ;;  %v9140_v7 = vadd.f32 %v11489_v51, %v9131_v52 }
0x415c   :  { %v9132_v1 = vadd.f32 %v9129_v12, %v17428_v9  ;;  %v9145_v41 = vsel %vm18399_vm3, %v9140_v7, 0.0  ;;  %v11490_v12 = vld [vmem:[#allocation27] ss:$0 sm:$0xff]  ;;  %vm18412_vm3 = vmmov %vm18410_vm0 }
0x415d   :  { %9146 = vadd.xlane.f32.xlu0 %v9145_v41 }
0x415e   :  { %v9141_v5 = vadd.f32 %v11489_v51, %v9132_v1 }
0x4160   :  { %v9148_v14 = vsel %vm18400_vm5, %v9141_v5, 0.0  ;;  %vm18413_vm5 = vmmov %vm18410_vm0 }
0x4161   :  { %v9395_v27 = vpop.f32.mrb[204].mxu1  ;;  %9149 = vadd.xlane.f32.xlu0 %v9148_v14 }
0x4162   :  { %v13130_v4 = vpop.f32.mrb[205].mxu1  ;;  %v17738_v34 = vadd.f32 %v11496_v48, %v9395_v27 }
0x4165   :  { %v9400_v47 = vpop.f32.mrb[206].mxu1 }
0x4166   :  { %v17740_v20 = vadd.f32 %v11496_v48, %v9400_v47  ;;  %v13133_v21 = vpop.f32.mrb[207].mxu1 }
0x4168   :  { %v17744_v49 = vpack.i.bf16 %v17740_v20, %v17738_v34  ;;  %v13766_v9 = vpack.c.bf16 %v17740_v20, %v17738_v34  ;;  %v11492_v20 = vld [vmem:[#allocation30] ss:$0 sm:$0xff] }
0x4169   :  { %v9405_v10 = vpop.f32.mrb[208].mxu1 }
0x416a   :  { %v13136_v38 = vpop.f32.mrb[209].mxu1  ;;  %v17759_v59 = vadd.f32 %v11496_v48, %v9405_v10 }
0x41e6   :  { %v9144_v19 = vpop.xlane.xlu1 %9143 }
0x41e7   :  { %v9151_v8 = vmul.f32 0.015625, %v9144_v19 }
0x41e9   :  { %v9154_v29 = vsub.f32 %v9139_v6, %v9151_v8 }
0x41ea   :  { %v9147_v63 = vpop.xlane.xlu0 %9146 }
0x41eb   :  { %v9152_v36 = vmul.f32 0.015625, %v9147_v63  ;;  %v9157_v37 = vmul.f32 %v9154_v29, %v9154_v29 }
0x41ed   :  { %v9155_v26 = vsub.f32 %v9140_v7, %v9152_v36  ;;  %v9160_v25 = vsel %vm18402_vm7, %v9157_v37, 0.0  ;;  %v11491_v7 = vld [vmem:[#allocation28] ss:$0 sm:$0xff]  ;;  %vm18414_vm7 = vmmov %vm18410_vm0 }
0x41ee   :  { %9161 = vadd.xlane.f32.xlu1 %v9160_v25  ;;  %v9150_v62 = vpop.xlane.xlu0 %9149 }
0x41ef   :  { %v9153_v3 = vmul.f32 0.015625, %v9150_v62  ;;  %v9158_v54 = vmul.f32 %v9155_v26, %v9155_v26 }
0x41f1   :  { %v9156_v39 = vsub.f32 %v9141_v5, %v9153_v3  ;;  %v9163_v13 = vsel %vm18403_vm13, %v9158_v54, 0.0  ;;  %vm18415_vm13 = vmmov %vm18410_vm0 }
0x41f2   :  { %9164 = vadd.xlane.f32.xlu0 %v9163_v13 }
0x41f3   :  { %v9159_v24 = vmul.f32 %v9156_v39, %v9156_v39 }
0x41f5   :  { %v9166_v11 = vsel %vm18404_vm10, %v9159_v24, 0.0  ;;  %vm18416_vm10 = vcmask 1041408  }
0x41f6   :  { %9167 = vadd.xlane.f32.xlu1 %v9166_v11 }
0x4207   :  { %9652 = vrot.lane.b32.xlu1 %v17759_v59, %s15216_s4 }
0x4208   :  { %14132 = vrot.lane.b32.xlu0 %v17744_v49, %s15216_s4 }
0x427b   :  { %v9162_v56 = vpop.xlane.xlu1 %9161 }
0x427c   :  { %v9169_v51 = vmul.f32 0.015625, %v9162_v56 }
0x427e   :  { %v9172_v60 = vadd.f32 1e-05, %v9169_v51 }
0x427f   :  { %v9165_v15 = vpop.xlane.xlu0 %9164 }
0x4280   :  { %14448 = vrsqrt.f32 %v9172_v60  ;;  %v9170_v55 = vmul.f32 0.015625, %v9165_v15 }
0x4282   :  { %v9173_v30 = vadd.f32 1e-05, %v9170_v55 }
0x4283   :  { %v9168_v6 = vpop.xlane.xlu1 %9167  ;;  %v14133_v34 = vpop.permute.xlu0 %14132 }
0x4284   :  { %14450 = vrsqrt.f32 %v9173_v30  ;;  %v9171_v52 = vmul.f32 0.015625, %v9168_v6  ;;  %v14134_v38 = vunpack.i.l.bf16 %v14133_v34 }
0x4286   :  { %v9174_v43 = vadd.f32 1e-05, %v9171_v52 }
0x4287   :  { %v9653_v24 = vpop.permute.xlu1 %9652 }
0x4288   :  { %14452 = vrsqrt.f32 %v9174_v43 }
0x428a   :  { %v14449_v44 = vpop.eup %14448 }
0x428b   :  { %v9178_v22 = vmul.f32 %v14449_v44, %v9154_v29 }
0x428d   :  { %v9187_v1 = vmul.f32 %v11490_v12, %v9178_v22 }
0x428e   :  { %v14451_v41 = vpop.eup %14450 }
0x428f   :  { %v17769_v5 = vadd.f32 %v11491_v7, %v9187_v1  ;;  %v9179_v14 = vmul.f32 %v14451_v41, %v9155_v26 }
0x4291   :  { %13104 = vmatmul.mubr.msk.f32.vlgmr.msra.gmra.mrb[228].mxu0 %vm18405_vm12, %v17769_v5  ;;  %v9188_v27 = vmul.f32 %v11490_v12, %v9179_v14  ;;  %vm18418_vm12 = vmmov %vm18416_vm10 }
0x4292   :  { %v14453_v4 = vpop.eup %14452  ;;  %13768 = vmatpush3.bf16.xpose.msk.msra.mxu0 %vm15747_vm4, %v13766_v9  ;;  %13106 = vmatprep.mubr.msk.f32.mxu0 %vm18317_vm9, %v15211_v0  ;;  %v14135_v9 = vunpack.i.h.bf16 %v14133_v34 }
0x4293   :  { %v17780_v48 = vadd.f32 %v11491_v7, %v9188_v27  ;;  %13141 = vmatprep.subr.mxu0 %v15211_v0  ;;  %v9180_v47 = vmul.f32 %v14453_v4, %v9156_v39 }
0x4294   :  { %v13773_v36 = vpack.c.bf16 %v14135_v9, %v14134_v38 }
0x4295   :  { %13107 = vmatmul.mubr.msk.f32.gmra.mrb[230].mxu0 %vm18406_vm1, %v17780_v48  ;;  %v9189_v21 = vmul.f32 %v11490_v12, %v9180_v47  ;;  %vm18419_vm1 = vmmov %vm18410_vm0 }
0x4296   :  { %13109 = vmatprep.mubr.msk.f32.mxu0 %vm18317_vm9, %v15211_v0 }
0x4297   :  { %v17787_v10 = vadd.f32 %v11491_v7, %v9189_v21 }
0x4299   :  { %13110 = vmatmul.mubr.msk.f32.gmra.mrb[232].mxu0 %vm18407_vm14, %v17787_v10  ;;  %vm18420_vm14 = vmmov %vm18410_vm0 }
0x429a   :  { %13142 = vmatpush3.xpose.msk.msra.mxu0 %vm18408_vm8, %v17759_v59  ;;  %13143 = vmatprep.mubr.msk.f32.mxu0 %vm18317_vm9, %v15211_v0  ;;  %vm18421_vm8 = vmmov %vm18410_vm0 }
0x429b   :  { %13772 = vmatprep.subr.bf16.mxu0 %v15212_v28 }
0x4364   :  { %v9309_v19 = vpop.f32.mrb[228].mxu0 }
0x4365   :  { %v9310_v8 = vadd.f32 %v11492_v20, %v9309_v19  ;;  %v13105_v29 = vpop.f32.mrb[229].mxu0 }
0x4367   :  { %v17796_v63 = vmul.f32 0.25, %v9310_v8 }
0x4368   :  { %v9314_v37 = vpop.f32.mrb[230].mxu0 }
0x4369   :  { %v9315_v26 = vadd.f32 %v11492_v20, %v9314_v37  ;;  %9642 = vrot.lane.b32.xlu1 %v17796_v63, %s15216_s4  ;;  %v13108_v25 = vpop.f32.mrb[231].mxu0  ;;  %13144 = vmatmul.mubr.msk.f32.vlgmr.msra.gmra.mrb[234].mxu0 %vm18409_vm11, %v17796_v63  ;;  %vm18422_vm11 = vmmov %vm18410_vm0 }
0x436a   :  { %13775 = vmatpush3.bf16.xpose.msk.msra.mxu0 %vm15747_vm4, %v13773_v36  ;;  %13146 = vmatprep.mubr.msk.f32.mxu0 %vm18317_vm9, %v15211_v0 }
0x436b   :  { %v17806_v62 = vmul.f32 0.25, %v9315_v26  ;;  %13171 = vmatprep.subr.mxu0 %v15211_v0 }
0x436c   :  { %v9319_v3 = vpop.f32.mrb[232].mxu0 }
0x436d   :  { %v9320_v54 = vadd.f32 %v11492_v20, %v9319_v3  ;;  %9644 = vrot.lane.b32.xlu0 %v17806_v62, %s15216_s4  ;;  %v13111_v39 = vpop.f32.mrb[233].mxu0  ;;  %13147 = vmatmul.mubr.msk.f32.gmra.mrb[236].mxu0 %vm18410_vm0, %v17806_v62 }
0x436e   :  { %13149 = vmatprep.mubr.msk.f32.mxu0 %vm18317_vm9, %v15211_v0 }
0x436f   :  { %v17815_v13 = vmul.f32 0.25, %v9320_v54 }
0x4371   :  { %9646 = vrot.lane.b32.xlu1 %v17815_v13, %s15216_s4  ;;  %13150 = vmatmul.mubr.msk.f32.gmra.mrb[238].mxu0 %vm18411_vm2, %v17815_v13  ;;  %vm18423_vm2 = vmmov %vm18410_vm0  ;;  %s18445_s4 = sld [smem:[#allocation104_spill]] }
0x4372   :  { %13172 = vmatpush3.xpose.msk.msra.mxu0 %vm18412_vm3, %v9653_v24  ;;  %13173 = vmatprep.mubr.msk.f32.mxu0 %vm18317_vm9, %v15211_v0  ;;  %vm18424_vm3 = vmmov %vm18410_vm0 }
0x4373   :  { %13779 = vmatprep.subr.bf16.mxu0 %v15212_v28 }
0x43db   :  { %v9643_v11 = vpop.permute.xlu1 %9642 }
0x43dc   :  { %13174 = vmatmul.mubr.msk.f32.vlgmr.msra.gmra.mrb[240].mxu0 %vm18413_vm5, %v9643_v11  ;;  %vm18425_vm5 = vmmov %vm18410_vm0 }
0x43dd   :  { %13176 = vmatprep.mubr.msk.f32.mxu0 %vm18317_vm9, %v15211_v0 }
0x43df   :  { %v9645_v2 = vpop.permute.xlu0 %9644 }
0x43e0   :  { %13177 = vmatmul.mubr.msk.f32.gmra.mrb[242].mxu0 %vm18414_vm7, %v9645_v2  ;;  %vm18426_vm7 = vmmov %vm18410_vm0 }
0x43e1   :  { %13179 = vmatprep.mubr.msk.f32.mxu0 %vm18317_vm9, %v15211_v0 }
0x43e3   :  { %v9647_v53 = vpop.permute.xlu1 %9646 }
0x43e4   :  { %13180 = vmatmul.mubr.msk.f32.gmra.mrb[244].mxu0 %vm18415_vm13, %v9647_v53  ;;  %vm18427_vm13 = vmmov %vm18410_vm0 }
0x43e5   :  { %13201 = vmatprep.mubr.msk.f32.mxu0 %vm18317_vm9, %v15211_v0 }
0x443c   :  { %v9496_v32 = vpop.f32.mrb[234].mxu0 }
0x443d   :  { %v9497_v50 = vadd.f32 %v9496_v32, %v17068_v46  ;;  %v13145_v35 = vpop.f32.mrb[235].mxu0 }
0x443f   :  { %v9510_v40 = vsel %vm901_vm15, %v9497_v50, -inf }
0x4440   :  { %9511 = vmax.xlane.f32.xlu0 %v9510_v40  ;;  %v9501_v16 = vpop.f32.mrb[236].mxu0 }
0x4441   :  { %v9502_v42 = vadd.f32 %v9501_v16, %v17074_v17  ;;  %v13148_v45 = vpop.f32.mrb[237].mxu0 }
0x4443   :  { %v9513_v58 = vsel %vm901_vm15, %v9502_v42, -inf }
0x4444   :  { %9514 = vmax.xlane.f32.xlu1 %v9513_v58  ;;  %v9506_v23 = vpop.f32.mrb[238].mxu0 }
0x4445   :  { %v9507_v61 = vadd.f32 %v9506_v23, %v17081_v18  ;;  %v13151_v56 = vpop.f32.mrb[239].mxu0 }
0x4447   :  { %v9516_v51 = vsel %vm908_vm6, %v9507_v61, -inf }
0x4448   :  { %9517 = vmax.xlane.f32.xlu0 %v9516_v51 }
0x44af   :  { %v9732_v60 = vpop.f32.mrb[240].mxu0 }
0x44b0   :  { %v9733_v15 = vadd.f32 %v9732_v60, %v17068_v46  ;;  %v13175_v55 = vpop.f32.mrb[241].mxu0 }
0x44b2   :  { %v9746_v30 = vsel %vm901_vm15, %v9733_v15, -inf }
0x44b3   :  { %9747 = vmax.xlane.f32.xlu0 %v9746_v30  ;;  %v9737_v6 = vpop.f32.mrb[242].mxu0 }
0x44b4   :  { %v9738_v52 = vadd.f32 %v9737_v6, %v17074_v17  ;;  %v13178_v43 = vpop.f32.mrb[243].mxu0 }
0x44b6   :  { %v9749_v44 = vsel %vm901_vm15, %v9738_v52, -inf }
0x44b7   :  { %9750 = vmax.xlane.f32.xlu1 %v9749_v44  ;;  %v9742_v12 = vpop.f32.mrb[244].mxu0 }
0x44b8   :  { %v9743_v22 = vadd.f32 %v9742_v12, %v17081_v18  ;;  %v13181_v7 = vpop.f32.mrb[245].mxu0 }
0x44ba   :  { %v9752_v1 = vsel %vm908_vm6, %v9743_v22, -inf }
0x44bb   :  { %9753 = vmax.xlane.f32.xlu0 %v9752_v1 }
0x44c8   :  { %9547 = vrot.lane.b32.xlu1 %v17759_v59, %s15214_s3 }
0x44cd   :  { %v9512_v41 = vpop.xlane.xlu0 %9511 }
0x44ce   :  { %v9519_v14 = vsub.f32 %v9497_v50, %v9512_v41 }
0x44d0   :  { %v9522_v21 = vmul.f32 1.442695, %v9519_v14 }
0x44d1   :  { %14137 = vrot.lane.b32.xlu0 %v17744_v49, %s15214_s3  ;;  %v9515_v27 = vpop.xlane.xlu1 %9514  ;;  %s18441_s3 = sld [smem:[#allocation102_spill]] }
0x44d2   :  { %v9520_v47 = vsub.f32 %v9502_v42, %v9515_v27  ;;  %14454 = vpow2.f32 %v9522_v21 }
0x44d4   :  { %v9524_v20 = vmul.f32 1.442695, %v9520_v47 }
0x44d5   :  { %v9518_v4 = vpop.xlane.xlu0 %9517 }
0x44d6   :  { %v9521_v34 = vsub.f32 %v9507_v61, %v9518_v4  ;;  %14456 = vpow2.f32 %v9524_v20 }
0x44d8   :  { %v9526_v9 = vmul.f32 1.442695, %v9521_v34 }
0x44da   :  { %14458 = vpow2.f32 %v9526_v9 }
0x44dc   :  { %v14455_v38 = vpop.eup %14454 }
0x44dd   :  { %v9528_v8 = vsel %vm901_vm15, %v14455_v38, 0.0 }
0x44e0   :  { %v14457_v19 = vpop.eup %14456 }
0x44e1   :  { %v9531_v37 = vsel %vm901_vm15, %v14457_v19, 0.0 }
0x44e4   :  { %v14459_v29 = vpop.eup %14458 }
0x44e5   :  { %v9534_v36 = vsel %vm908_vm6, %v14459_v29, 0.0 }
0x44ec   :  { %9529 = vadd.xlane.f32.xlu1 %v9528_v8 }
0x44f0   :  { %9535 = vadd.xlane.f32.xlu1 %v9534_v36  ;;  %9532 = vadd.xlane.f32.xlu0 %v9531_v37 }
0x4540   :  { %v9748_v26 = vpop.xlane.xlu0 %9747 }
0x4541   :  { %v9755_v25 = vsub.f32 %v9733_v15, %v9748_v26 }
0x4543   :  { %v9758_v3 = vmul.f32 1.442695, %v9755_v25 }
0x4544   :  { %v9751_v54 = vpop.xlane.xlu1 %9750 }
0x4545   :  { %14460 = vpow2.f32 %v9758_v3  ;;  %v9756_v39 = vsub.f32 %v9738_v52, %v9751_v54 }
0x4547   :  { %v9760_v24 = vmul.f32 1.442695, %v9756_v39 }
0x4548   :  { %v9754_v11 = vpop.xlane.xlu0 %9753  ;;  %v9548_v58 = vpop.permute.xlu1 %9547 }
0x4549   :  { %14462 = vpow2.f32 %v9760_v24  ;;  %v9757_v2 = vsub.f32 %v9743_v22, %v9754_v11 }
0x454b   :  { %v9762_v53 = vmul.f32 1.442695, %v9757_v2 }
0x454c   :  { %v14138_v32 = vpop.permute.xlu0 %14137 }
0x454d   :  { %14464 = vpow2.f32 %v9762_v53  ;;  %v14140_v50 = vunpack.i.h.bf16 %v14138_v32  ;;  %v14139_v35 = vunpack.i.l.bf16 %v14138_v32 }
0x454f   :  { %v14461_v40 = vpop.eup %14460  ;;  %v13770_v16 = vpack.c.bf16 %v14140_v50, %v14139_v35 }
0x4550   :  { %v9764_v42 = vsel %vm901_vm15, %v14461_v40, 0.0 }
0x4551   :  { %9765 = vadd.xlane.f32.xlu0 %v9764_v42  ;;  %13771 = vmatpush3.bf16.msra.mxu1 %v13770_v16 }
0x4552   :  { %13156 = vmatprep.subr.mxu1 %v15211_v0 }
0x4553   :  { %v17855_v45 = vpop.eup %14462 }
0x4554   :  { %v9767_v23 = vsel %vm901_vm15, %v17855_v45, 0.0 }
0x4555   :  { %9768 = vadd.xlane.f32.xlu1 %v9767_v23  ;;  %13157 = vmatpush3.msk.msra.mxu1 %vm18416_vm10, %v9548_v58 }
0x4556   :  { %13776 = vmatprep.subr.bf16.mxu1 %v15212_v28 }
0x4557   :  { %v14465_v61 = vpop.eup %14464 }
0x4558   :  { %v9770_v56 = vsel %vm908_vm6, %v14465_v61, 0.0 }
0x4559   :  { %9771 = vadd.xlane.f32.xlu1 %v9770_v56 }
0x4567   :  { %14142 = vrot.lane.b32.xlu0 %v17744_v49, %s15213_s16 }
0x456a   :  { %9783 = vrot.lane.b32.xlu1 %v17759_v59, %s15213_s16  ;;  %s18417_s16 = sld [smem:[#allocation99_spill]] }
0x456b   :  { %14147 = vrot.lane.b32.xlu0 %v17744_v49, %s15219_s8 }
0x456e   :  { %10066 = vrot.lane.b32.xlu1 %v17759_v59, %s15219_s8 }
0x456f   :  { %10056 = vrot.lane.b32.xlu0 %v17796_v63, %s15219_s8 }
0x4570   :  { %v9219_v14 = vld [vmem:[%s18417_s16 + $0x10] sm:$0xff]  ;;  %v9220_v27 = vld [vmem:[%s18417_s16 + $0x18] sm:$0xff]  ;;  %v9217_v34 = vld [vmem:[%s18417_s16] sm:$0xff] }
0x4571   :  { %v13780_v47 = vpack.c.bf16 %v9220_v27, %v9219_v14  ;;  %v9218_v20 = vld [vmem:[%s18417_s16 + $0x8] sm:$0xff] }
0x4572   :  { %10058 = vrot.lane.b32.xlu1 %v17806_v62, %s15219_s8 }
0x4573   :  { %10060 = vrot.lane.b32.xlu0 %v17815_v13, %s15219_s8  ;;  %13781 = vmatpush3.bf16.msra.mxu0 %v13780_v47 }
0x4574   :  { %13785 = vmatprep.subr.bf16.mxu0 %v15212_v28 }
0x4579   :  { %v9530_v51 = vpop.xlane.xlu1 %9529 }
0x457a   :  { %14466 = vrcp.f32 %v9530_v51 }
0x457d   :  { %v9533_v60 = vpop.xlane.xlu0 %9532  ;;  %v9536_v15 = vpop.xlane.xlu1 %9535 }
0x457e   :  { %14468 = vrcp.f32 %v9533_v60 }
0x457f   :  { %14470 = vrcp.f32 %v9536_v15 }
0x4584   :  { %v14467_v55 = vpop.eup %14466 }
0x4585   :  { %v9540_v30 = vmul.f32 %v14467_v55, %v14455_v38  ;;  %v13783_v38 = vpack.c.bf16 %v9218_v20, %v9217_v34 }
0x4587   :  { %13159 = vmatmul.mubr.msk.f32.vlgmr.msra.gmra.mrb[210].mxu1 %vm901_vm15, %v9540_v30 }
0x4588   :  { %13161 = vmatprep.mubr.msk.f32.mxu1 %vm18317_vm9, %v15211_v0  ;;  %v14469_v6 = vpop.eup %14468 }
0x4589   :  { %v9541_v52 = vmul.f32 %v14469_v6, %v14457_v19  ;;  %v14471_v43 = vpop.eup %14470 }
0x458a   :  { %v9542_v44 = vmul.f32 %v14471_v43, %v14459_v29 }
0x458b   :  { %13162 = vmatmul.mubr.msk.f32.gmra.mrb[212].mxu1 %vm901_vm15, %v9541_v52 }
0x458c   :  { %13164 = vmatprep.mubr.msk.f32.mxu1 %vm18317_vm9, %v15211_v0 }
0x458f   :  { %13165 = vmatmul.mubr.msk.f32.gmra.mrb[214].mxu1 %vm901_vm15, %v9542_v44 }
0x4590   :  { %13188 = vmatprep.mubr.msk.f32.mxu1 %vm18317_vm9, %v15211_v0 }
0x45de   :  { %v9766_v12 = vpop.xlane.xlu0 %9765 }
0x45df   :  { %14472 = vrcp.f32 %v9766_v12 }
0x45e2   :  { %v9769_v22 = vpop.xlane.xlu1 %9768  ;;  %v14143_v7 = vpop.permute.xlu0 %14142 }
0x45e3   :  { %14474 = vrcp.f32 %v9769_v22  ;;  %v14145_v1 = vunpack.i.h.bf16 %v14143_v7  ;;  %v14144_v41 = vunpack.i.l.bf16 %v14143_v7 }
0x45e5   :  { %v13777_v4 = vpack.c.bf16 %v14145_v1, %v14144_v41 }
0x45e6   :  { %v9772_v21 = vpop.xlane.xlu1 %9771  ;;  %v14148_v2 = vpop.permute.xlu0 %14147 }
0x45e7   :  { %14476 = vrcp.f32 %v9772_v21  ;;  %13778 = vmatpush3.bf16.msra.mxu1 %v13777_v4  ;;  %v14150_v53 = vunpack.i.h.bf16 %v14148_v2  ;;  %v14149_v32 = vunpack.i.l.bf16 %v14148_v2 }
0x45e8   :  { %13186 = vmatprep.subr.mxu1 %v15211_v0 }
0x45e9   :  { %v14473_v9 = vpop.eup %14472  ;;  %v13786_v50 = vpack.c.bf16 %v14150_v53, %v14149_v32 }
0x45ea   :  { %v9776_v19 = vmul.f32 %v14473_v9, %v14461_v40  ;;  %v9784_v8 = vpop.permute.xlu1 %9783 }
0x45eb   :  { %13187 = vmatpush3.msk.msra.mxu1 %vm18418_vm12, %v9784_v8  ;;  %vm18428_vm12 = vmmov %vm18410_vm0 }
0x45ec   :  { %13189 = vmatmul.mubr.msk.f32.vlgmr.msra.gmra.mrb[216].mxu1 %vm901_vm15, %v9776_v19  ;;  %13782 = vmatprep.subr.bf16.mxu1 %v15212_v28 }
0x45ed   :  { %v14475_v29 = vpop.eup %14474  ;;  %13191 = vmatprep.mubr.msk.f32.mxu1 %vm18317_vm9, %v15211_v0  ;;  %13784 = vmatpush3.bf16.msra.mxu1 %v13783_v38 }
0x45ee   :  { %v9777_v36 = vmul.f32 %v14475_v29, %v17855_v45  ;;  %13789 = vmatprep.subr.bf16.mxu1 %v15212_v28  ;;  %v10067_v58 = vpop.permute.xlu1 %10066 }
0x45f0   :  { %13192 = vmatmul.mubr.msk.f32.gmra.mrb[218].mxu1 %vm901_vm15, %v9777_v36 }
0x45f1   :  { %v14477_v37 = vpop.eup %14476  ;;  %13194 = vmatprep.mubr.msk.f32.mxu1 %vm18317_vm9, %v15211_v0 }
0x45f2   :  { %v9778_v26 = vmul.f32 %v14477_v37, %v14465_v61  ;;  %v10057_v61 = vpop.permute.xlu0 %10056  ;;  %v10059_v56 = vpop.permute.xlu1 %10058 }
0x45f4   :  { %13195 = vmatmul.mubr.msk.f32.gmra.mrb[220].mxu1 %vm901_vm15, %v9778_v26 }
0x45f5   :  { %13214 = vmatprep.mubr.msk.f32.mxu1 %vm18317_vm9, %v15211_v0 }
0x45f6   :  { %v10061_v51 = vpop.permute.xlu0 %10060 }
0x465a   :  { %v9628_v25 = vpop.f32.mrb[210].mxu1 }
0x465b   :  { %v13160_v3 = vpop.f32.mrb[211].mxu1  ;;  %13215 = vmatmul.mubr.msk.f32.vlgmr.msra.gmra.mrb[222].mxu1 %vm18419_vm1, %v9628_v25  ;;  %vm18429_vm1 = vmmov %vm18410_vm0 }
0x465c   :  { %13217 = vmatprep.mubr.msk.f32.mxu1 %vm18317_vm9, %v15211_v0 }
0x465e   :  { %v9633_v54 = vpop.f32.mrb[212].mxu1 }
0x465f   :  { %v13163_v39 = vpop.f32.mrb[213].mxu1  ;;  %13218 = vmatmul.mubr.msk.f32.gmra.mrb[224].mxu1 %vm18420_vm14, %v9633_v54  ;;  %vm18431_vm14 = vmmov %vm18410_vm0 }
0x4660   :  { %13220 = vmatprep.mubr.msk.f32.mxu1 %vm18317_vm9, %v15211_v0 }
0x4662   :  { %v9638_v24 = vpop.f32.mrb[214].mxu1 }
0x4663   :  { %v13166_v11 = vpop.f32.mrb[215].mxu1  ;;  %13221 = vmatmul.mubr.msk.f32.gmra.mrb[226].mxu1 %vm18421_vm8, %v9638_v24  ;;  %vm18432_vm8 = vmmov %vm18410_vm0 }
0x4664   :  { %13244 = vmatprep.mubr.msk.f32.mxu1 %vm18317_vm9, %v15211_v0 }
0x46bf   :  { %v9864_v35 = vpop.f32.mrb[216].mxu1 }
0x46c0   :  { %v13190_v40 = vpop.f32.mrb[217].mxu1  ;;  %13202 = vmatmul.mubr.msk.f32.vlgmr.msra.gmra.mrb[246].mxu0 %vm18422_vm11, %v9864_v35  ;;  %vm18433_vm11 = vmmov %vm18410_vm0 }
0x46c1   :  { %13788 = vmatpush3.bf16.xpose.msk.msra.mxu0 %vm15747_vm4, %v13786_v50  ;;  %13204 = vmatprep.mubr.msk.f32.mxu0 %vm18317_vm9, %v15211_v0 }
0x46c2   :  { %13227 = vmatprep.subr.mxu0 %v15211_v0 }
0x46c3   :  { %v9869_v16 = vpop.f32.mrb[218].mxu1 }
0x46c4   :  { %v13193_v42 = vpop.f32.mrb[219].mxu1  ;;  %13205 = vmatmul.mubr.msk.f32.gmra.mrb[248].mxu0 %vm18410_vm0, %v9869_v16 }
0x46c5   :  { %13207 = vmatprep.mubr.msk.f32.mxu0 %vm18317_vm9, %v15211_v0 }
0x46c7   :  { %v9874_v45 = vpop.f32.mrb[220].mxu1 }
0x46c8   :  { %v13196_v23 = vpop.f32.mrb[221].mxu1  ;;  %13208 = vmatmul.mubr.msk.f32.gmra.mrb[250].mxu0 %vm18423_vm2, %v9874_v45  ;;  %v9221_v45 = vld [vmem:[%s18417_s16 + $0x20] sm:$0xff]  ;;  %vm18435_vm2 = vmmov %vm18410_vm0 }
0x46c9   :  { %13228 = vmatpush3.xpose.msk.msra.mxu0 %vm18424_vm3, %v10067_v58  ;;  %13229 = vmatprep.mubr.msk.f32.mxu0 %vm18317_vm9, %v15211_v0  ;;  %v9222_v58 = vld [vmem:[%s18417_s16 + $0x28] sm:$0xff]  ;;  %vm18436_vm3 = vmmov %vm18410_vm0 }
0x46ca   :  { %13792 = vmatprep.subr.bf16.mxu0 %v15212_v28  ;;  %v13793_v23 = vpack.c.bf16 %v9222_v58, %v9221_v45 }
0x46cc   :  { %13230 = vmatmul.mubr.msk.f32.vlgmr.msra.gmra.mrb[252].mxu0 %vm18425_vm5, %v10057_v61  ;;  %vm18437_vm5 = vmmov %vm18410_vm0 }
0x46cd   :  { %13232 = vmatprep.mubr.msk.f32.mxu0 %vm18317_vm9, %v15211_v0  ;;  %13794 = vmatpush3.bf16.msra.mxu0 %v13793_v23 }
0x46ce   :  { %13799 = vmatprep.subr.bf16.mxu0 %v15212_v28 }
0x46d0   :  { %13233 = vmatmul.mubr.msk.f32.gmra.mrb[254].mxu0 %vm18426_vm7, %v10059_v56  ;;  %vm18440_vm7 = vcmask 517120  }
0x46d1   :  { %13235 = vmatprep.mubr.msk.f32.mxu0 %vm18317_vm9, %v15211_v0 }
0x46d4   :  { %13236 = vmatmul.mubr.msk.f32.gmra.mrb[0].mxu0 %vm18427_vm13, %v10061_v51 }
0x46d5   :  { %13257 = vmatprep.mubr.msk.f32.mxu0 %vm18317_vm9, %v15211_v0 }
0x472e   :  { %v10042_v60 = vpop.f32.mrb[222].mxu1 }
0x472f   :  { %v13216_v15 = vpop.f32.mrb[223].mxu1 }
0x4732   :  { %v10047_v55 = vpop.f32.mrb[224].mxu1 }
0x4733   :  { %v13219_v30 = vpop.f32.mrb[225].mxu1 }
0x4736   :  { %v10052_v6 = vpop.f32.mrb[226].mxu1 }
0x4737   :  { %v13222_v52 = vpop.f32.mrb[227].mxu1 }
0x4793   :  { %v9953_v43 = vpop.f32.mrb[246].mxu0 }
0x4794   :  { %v17936_v44 = vadd.f32 %v10042_v60, %v9953_v43  ;;  %v13203_v12 = vpop.f32.mrb[247].mxu0 }
0x4797   :  { %v9958_v22 = vpop.f32.mrb[248].mxu0 }
0x4798   :  { %v17938_v7 = vadd.f32 %v10047_v55, %v9958_v22  ;;  %v13206_v1 = vpop.f32.mrb[249].mxu0 }
0x479b   :  { %v9963_v41 = vpop.f32.mrb[250].mxu0 }
0x479c   :  { %v17940_v14 = vadd.f32 %v10052_v6, %v9963_v41  ;;  %v13209_v27 = vpop.f32.mrb[251].mxu0 }
0x479f   :  { %v10146_v4 = vpop.f32.mrb[252].mxu0 }
0x47a0   :  { %v10147_v47 = vadd.f32 %v10146_v4, %v17068_v46  ;;  %v13231_v21 = vpop.f32.mrb[253].mxu0 }
0x47a2   :  { %v10160_v34 = vsel %vm901_vm15, %v10147_v47, -inf }
0x47a3   :  { %10161 = vmax.xlane.f32.xlu1 %v10160_v34  ;;  %v10151_v20 = vpop.f32.mrb[254].mxu0 }
0x47a4   :  { %v10152_v9 = vadd.f32 %v10151_v20, %v17074_v17  ;;  %v13234_v38 = vpop.f32.mrb[255].mxu0 }
0x47a6   :  { %v10163_v19 = vsel %vm901_vm15, %v10152_v9, -inf }
0x47a7   :  { %10164 = vmax.xlane.f32.xlu0 %v10163_v19  ;;  %v10156_v8 = vpop.f32.mrb[0].mxu0 }
0x47a8   :  { %v10157_v29 = vadd.f32 %v10156_v8, %v17081_v18  ;;  %v13237_v36 = vpop.f32.mrb[1].mxu0 }
0x47aa   :  { %v10166_v37 = vsel %vm908_vm6, %v10157_v29, -inf }
0x47ab   :  { %10167 = vmax.xlane.f32.xlu0 %v10166_v37 }
0x4830   :  { %v10162_v26 = vpop.xlane.xlu1 %10161 }
0x4831   :  { %v10169_v25 = vsub.f32 %v10147_v47, %v10162_v26 }
0x4833   :  { %v10172_v3 = vmul.f32 1.442695, %v10169_v25 }
0x4834   :  { %v10165_v54 = vpop.xlane.xlu0 %10164 }
0x4835   :  { %14478 = vpow2.f32 %v10172_v3  ;;  %v10170_v39 = vsub.f32 %v10152_v9, %v10165_v54 }
0x4837   :  { %v10174_v24 = vmul.f32 1.442695, %v10170_v39 }
0x4838   :  { %v10168_v50 = vpop.xlane.xlu0 %10167 }
0x4839   :  { %14480 = vpow2.f32 %v10174_v24  ;;  %v10171_v35 = vsub.f32 %v10157_v29, %v10168_v50 }
0x483b   :  { %v10176_v40 = vmul.f32 1.442695, %v10171_v35 }
0x483d   :  { %14482 = vpow2.f32 %v10176_v40 }
0x483f   :  { %v14479_v11 = vpop.eup %14478 }
0x4840   :  { %v10178_v2 = vsel %vm901_vm15, %v14479_v11, 0.0 }
0x4841   :  { %10179 = vadd.xlane.f32.xlu1 %v10178_v2 }
0x4843   :  { %v14481_v53 = vpop.eup %14480 }
0x4844   :  { %v10181_v32 = vsel %vm901_vm15, %v14481_v53, 0.0 }
0x4845   :  { %10182 = vadd.xlane.f32.xlu0 %v10181_v32 }
0x4847   :  { %v14483_v16 = vpop.eup %14482 }
0x4848   :  { %v10184_v42 = vsel %vm908_vm6, %v14483_v16, 0.0 }
0x4852   :  { %10197 = vrot.lane.b32.xlu1 %v17759_v59, %s15218_s18 }
0x4856   :  { %14157 = vrot.lane.b32.xlu1 %v17744_v49, %s15221_s23 }
0x485b   :  { %14152 = vrot.lane.b32.xlu0 %v17744_v49, %s15218_s18  ;;  %s18448_s18 = sld [smem:[#allocation103_spill]] }
0x485f   :  { %10394 = vrot.lane.b32.xlu0 %v17759_v59, %s15221_s23 }
0x4863   :  { %10386 = vrot.lane.b32.xlu0 %v17806_v62, %s15221_s23 }
0x487a   :  { %10185 = vadd.xlane.f32.xlu1 %v10184_v42 }
0x488b   :  { %10384 = vrot.lane.b32.xlu1 %v17796_v63, %s15221_s23 }
0x488f   :  { %10388 = vrot.lane.b32.xlu1 %v17815_v13, %s15221_s23 }
0x48ce   :  { %v10180_v62 = vpop.xlane.xlu1 %10179 }
0x48cf   :  { %14484 = vrcp.f32 %v10180_v62 }
0x48d2   :  { %v10183_v61 = vpop.xlane.xlu0 %10182  ;;  %v10198_v51 = vpop.permute.xlu1 %10197 }
0x48d3   :  { %14486 = vrcp.f32 %v10183_v61 }
0x48d6   :  { %v14153_v56 = vpop.permute.xlu0 %14152  ;;  %v14158_v63 = vpop.permute.xlu1 %14157 }
0x48d7   :  { %v14155_v60 = vunpack.i.h.bf16 %v14153_v56  ;;  %v14154_v15 = vunpack.i.l.bf16 %v14153_v56  ;;  %v14160_v52 = vunpack.i.h.bf16 %v14158_v63  ;;  %v14159_v43 = vunpack.i.l.bf16 %v14158_v63 }
0x48d9   :  { %v13790_v55 = vpack.c.bf16 %v14155_v60, %v14154_v15  ;;  %v14485_v30 = vpop.eup %14484  ;;  %v13796_v22 = vpack.c.bf16 %v14160_v52, %v14159_v43 }
0x48da   :  { %v10190_v13 = vmul.f32 %v14485_v30, %v14479_v11  ;;  %v10395_v1 = vpop.permute.xlu0 %10394 }
0x48db   :  { %13791 = vmatpush3.bf16.msra.mxu1 %v13790_v55 }
0x48dc   :  { %13242 = vmatprep.subr.mxu1 %v15211_v0 }
0x48dd   :  { %v14487_v6 = vpop.eup %14486 }
0x48de   :  { %v10191_v12 = vmul.f32 %v14487_v6, %v14481_v53  ;;  %v10387_v57 = vpop.permute.xlu0 %10386 }
0x48df   :  { %13243 = vmatpush3.msk.msra.mxu1 %vm18416_vm10, %v10198_v51 }
0x48e0   :  { %13245 = vmatmul.mubr.msk.f32.vlgmr.msra.gmra.mrb[228].mxu1 %vm901_vm15, %v10190_v13  ;;  %13795 = vmatprep.subr.bf16.mxu1 %v15212_v28 }
0x48e1   :  { %13247 = vmatprep.mubr.msk.f32.mxu1 %vm18317_vm9, %v15211_v0 }
0x48e4   :  { %13248 = vmatmul.mubr.msk.f32.gmra.mrb[230].mxu1 %vm901_vm15, %v10191_v12 }
0x48e5   :  { %13250 = vmatprep.mubr.msk.f32.mxu1 %vm18317_vm9, %v15211_v0 }
0x48e6   :  { %13798 = vmatpush3.bf16.xpose.msk.msra.mxu1 %vm15747_vm4, %v13796_v22  ;;  %vm18430_vm4 = vmmov %vm18410_vm0 }
0x48e7   :  { %13270 = vmatprep.subr.mxu1 %v15211_v0 }
0x48ee   :  { %13271 = vmatpush3.xpose.msk.msra.mxu1 %vm18428_vm12, %v10395_v1  ;;  %vm18444_vm12 = vmmov %vm18440_vm7 }
0x48ef   :  { %13802 = vmatprep.subr.bf16.mxu1 %v15212_v28 }
0x4907   :  { %v10186_v41 = vpop.xlane.xlu1 %10185 }
0x4908   :  { %14488 = vrcp.f32 %v10186_v41 }
0x490b   :  { %v10385_v47 = vpop.permute.xlu1 %10384 }
0x490f   :  { %v10389_v28 = vpop.permute.xlu1 %10388 }
0x4912   :  { %v14489_v27 = vpop.eup %14488 }
0x4913   :  { %v10192_v4 = vmul.f32 %v14489_v27, %v14483_v16 }
0x4915   :  { %13251 = vmatmul.mubr.msk.f32.gmra.mrb[232].mxu1 %vm901_vm15, %v10192_v4 }
0x4916   :  { %13272 = vmatprep.mubr.msk.f32.mxu1 %vm18317_vm9, %v15211_v0 }
0x4919   :  { %13273 = vmatmul.mubr.msk.f32.vlgmr.msra.gmra.mrb[234].mxu1 %vm18429_vm1, %v10385_v47 }
0x491a   :  { %13275 = vmatprep.mubr.msk.f32.mxu1 %vm18317_vm9, %v15211_v0 }
0x491d   :  { %13276 = vmatmul.mubr.msk.f32.gmra.mrb[236].mxu1 %vm18430_vm4, %v10387_v57 }
0x491e   :  { %13278 = vmatprep.mubr.msk.f32.mxu1 %vm18317_vm9, %v15211_v0 }
0x4921   :  { %13279 = vmatmul.mubr.msk.f32.gmra.mrb[238].mxu1 %vm18431_vm14, %v10389_v28 }
0x4922   :  { %13300 = vmatprep.mubr.msk.f32.mxu1 %vm18317_vm9, %v15211_v0 }
0x49b3   :  { %v10278_v21 = vpop.f32.mrb[228].mxu1 }
0x49b4   :  { %v13246_v34 = vpop.f32.mrb[229].mxu1  ;;  %13258 = vmatmul.mubr.msk.f32.vlgmr.msra.gmra.mrb[2].mxu0 %vm18432_vm8, %v10278_v21 }
0x49b5   :  { %13260 = vmatprep.mubr.msk.f32.mxu0 %vm18317_vm9, %v15211_v0 }
0x49b7   :  { %v10283_v20 = vpop.f32.mrb[230].mxu1 }
0x49b8   :  { %v13249_v9 = vpop.f32.mrb[231].mxu1  ;;  %13261 = vmatmul.mubr.msk.f32.gmra.mrb[4].mxu0 %vm18433_vm11, %v10283_v20 }
0x49b9   :  { %13263 = vmatprep.mubr.msk.f32.mxu0 %vm18317_vm9, %v15211_v0 }
0x49e8   :  { %v10288_v38 = vpop.f32.mrb[232].mxu1 }
0x49e9   :  { %v13252_v19 = vpop.f32.mrb[233].mxu1  ;;  %13264 = vmatmul.mubr.msk.f32.gmra.mrb[6].mxu0 %vm18410_vm0, %v10288_v38  ;;  %vm18452_vm0 = vmmov %vm18440_vm7 }
0x49ea   :  { %13287 = vmatprep.mubr.msk.f32.mxu0 %vm18317_vm9, %v15211_v0 }
0x49ec   :  { %v10474_v8 = vpop.f32.mrb[234].mxu1 }
0x49ed   :  { %v10475_v29 = vadd.f32 %v10474_v8, %v17068_v46  ;;  %v13274_v36 = vpop.f32.mrb[235].mxu1 }
0x49ef   :  { %v10488_v37 = vsel %vm901_vm15, %v10475_v29, -inf }
0x49f0   :  { %10489 = vmax.xlane.f32.xlu0 %v10488_v37  ;;  %v10479_v26 = vpop.f32.mrb[236].mxu1 }
0x49f1   :  { %v10480_v25 = vadd.f32 %v10479_v26, %v17074_v17  ;;  %v13277_v3 = vpop.f32.mrb[237].mxu1  ;;  %v11552_v26 = vld [vmem:[#allocation33] ss:$0 sm:$0xff] }
0x49f3   :  { %v10491_v54 = vsel %vm901_vm15, %v10480_v25, -inf }
0x49f4   :  { %10492 = vmax.xlane.f32.xlu1 %v10491_v54  ;;  %v10484_v39 = vpop.f32.mrb[238].mxu1 }
0x49f5   :  { %v10485_v24 = vadd.f32 %v10484_v39, %v17081_v18  ;;  %v13280_v11 = vpop.f32.mrb[239].mxu1 }
0x49f7   :  { %v10494_v2 = vsel %vm908_vm6, %v10485_v24, -inf }
0x49f8   :  { %10495 = vmax.xlane.f32.xlu0 %v10494_v2 }
0x4a7d   :  { %v10490_v53 = vpop.xlane.xlu0 %10489 }
0x4a7e   :  { %v10497_v46 = vsub.f32 %v10475_v29, %v10490_v53 }
0x4a80   :  { %v10500_v32 = vmul.f32 1.442695, %v10497_v46 }
0x4a81   :  { %v10493_v50 = vpop.xlane.xlu1 %10492 }
0x4a82   :  { %14490 = vpow2.f32 %v10500_v32  ;;  %v10498_v35 = vsub.f32 %v10480_v25, %v10493_v50 }
0x4a84   :  { %v10502_v40 = vmul.f32 1.442695, %v10498_v35 }
0x4a85   :  { %v10496_v16 = vpop.xlane.xlu0 %10495 }
0x4a86   :  { %14492 = vpow2.f32 %v10502_v40  ;;  %v10499_v17 = vsub.f32 %v10485_v24, %v10496_v16 }
0x4a87   :  { %v10367_v42 = vpop.f32.mrb[2].mxu0 }
0x4a88   :  { %v10504_v45 = vmul.f32 1.442695, %v10499_v17  ;;  %v10381_v58 = vadd.f32 %v10367_v42, %v17936_v44  ;;  %v13259_v23 = vpop.f32.mrb[3].mxu0  ;;  %v9223_v44 = vld [vmem:[%s18417_s16 + $0x30] sm:$0xff] }
0x4a8a   :  { %14494 = vpow2.f32 %v10504_v45 }
0x4a8b   :  { %v10372_v18 = vpop.f32.mrb[4].mxu0 }
0x4a8c   :  { %v14491_v62 = vpop.eup %14490  ;;  %v10382_v61 = vadd.f32 %v10372_v18, %v17938_v7  ;;  %v13262_v56 = vpop.f32.mrb[5].mxu0  ;;  %v9224_v7 = vld [vmem:[%s18417_s16 + $0x38] sm:$0xff] }
0x4a8d   :  { %v10506_v51 = vsel %vm901_vm15, %v14491_v62, 0.0  ;;  %v13803_v63 = vpack.c.bf16 %v9224_v7, %v9223_v44  ;;  %v10784_v44 = vld [vmem:[%s18441_s3 + $0x18] sm:$0xff] }
0x4a8e   :  { %10507 = vadd.xlane.f32.xlu0 %v10506_v51 }
0x4a8f   :  { %13804 = vmatpush3.bf16.msra.mxu1 %v13803_v63  ;;  %v10781_v63 = vld [vmem:[%s18441_s3] sm:$0xff] }
0x4a90   :  { %v14493_v60 = vpop.eup %14492 }
0x4a91   :  { %v10509_v15 = vsel %vm901_vm15, %v14493_v60, 0.0 }
0x4a92   :  { %10510 = vadd.xlane.f32.xlu1 %v10509_v15 }
0x4a94   :  { %v14495_v55 = vpop.eup %14494 }
0x4a95   :  { %v10512_v30 = vsel %vm908_vm6, %v14495_v55, 0.0  ;;  %vm18434_vm6 = vmmov %vm18416_vm10 }
0x4a96   :  { %10513 = vadd.xlane.f32.xlu0 %v10512_v30  ;;  %v10782_v30 = vld [vmem:[%s18441_s3 + $0x8] sm:$0xff] }
0x4a97   :  { %v13805_v7 = vpack.c.bf16 %v10784_v44, %v10782_v30  ;;  %v10809_v30 = vld [vmem:[%s18445_s4 + $0x58] sm:$0xff]  ;;  %v10826_v44 = vld [vmem:[%s18445_s4 + $0xe0] sm:$0xff] }
0x4aa3   :  { %14162 = vrot.lane.b32.xlu1 %v17744_v49, %s15220_s22 }
0x4aac   :  { %10525 = vrot.lane.b32.xlu0 %v17759_v59, %s15220_s22 }
0x4abc   :  { %v10377_v13 = vpop.f32.mrb[6].mxu0 }
0x4abd   :  { %v10383_v6 = vadd.f32 %v10377_v13, %v17940_v14  ;;  %v13265_v52 = vpop.f32.mrb[7].mxu0  ;;  %v10783_v13 = vld [vmem:[%s18441_s3 + $0x10] sm:$0xff] }
0x4abe   :  { %v10786_v52 = vld [vmem:[%s18441_s3 + $0x28] sm:$0xff] }
0x4b1b   :  { %v10508_v43 = vpop.xlane.xlu0 %10507 }
0x4b1c   :  { %14496 = vrcp.f32 %v10508_v43  ;;  %v10788_v43 = vld [vmem:[%s18441_s3 + $0x38] sm:$0xff] }
0x4b1f   :  { %v10511_v12 = vpop.xlane.xlu1 %10510 }
0x4b20   :  { %14498 = vrcp.f32 %v10511_v12  ;;  %v13809_v12 = vpack.c.bf16 %v10788_v43, %v10786_v52 }
0x4b23   :  { %v14163_v22 = vpop.permute.xlu1 %14162  ;;  %v10514_v1 = vpop.xlane.xlu0 %10513 }
0x4b24   :  { %v14165_v41 = vunpack.i.h.bf16 %v14163_v22  ;;  %v14164_v27 = vunpack.i.l.bf16 %v14163_v22  ;;  %14500 = vrcp.f32 %v10514_v1  ;;  %v10785_v22 = vld [vmem:[%s18441_s3 + $0x20] sm:$0xff]  ;;  %v10787_v1 = vld [vmem:[%s18441_s3 + $0x30] sm:$0xff] }
0x4b26   :  { %v13800_v49 = vpack.c.bf16 %v14165_v41, %v14164_v27  ;;  %v14497_v4 = vpop.eup %14496  ;;  %v13811_v41 = vpack.c.bf16 %v10787_v1, %v10785_v22  ;;  %v10790_v27 = vld [vmem:[%s18441_s3 + $0x48] sm:$0xff] }
0x4b27   :  { %v10518_v59 = vmul.f32 %v14497_v4, %v14491_v62  ;;  %v10526_v47 = vpop.permute.xlu0 %10525 }
0x4b28   :  { %13801 = vmatpush3.bf16.msra.mxu0 %v13800_v49  ;;  %v10792_v49 = vld [vmem:[%s18441_s3 + $0x58] sm:$0xff] }
0x4b29   :  { %13285 = vmatprep.subr.mxu0 %v15211_v0  ;;  %v13813_v4 = vpack.c.bf16 %v10792_v49, %v10790_v27 }
0x4b2a   :  { %v14499_v57 = vpop.eup %14498 }
0x4b2b   :  { %v10519_v14 = vmul.f32 %v14499_v57, %v14493_v60 }
0x4b2c   :  { %13286 = vmatpush3.msk.msra.mxu0 %vm18434_vm6, %v10526_v47  ;;  %v10791_v47 = vld [vmem:[%s18441_s3 + $0x50] sm:$0xff] }
0x4b2d   :  { %13288 = vmatmul.mubr.msk.f32.vlgmr.msra.gmra.mrb[8].mxu0 %vm901_vm15, %v10518_v59  ;;  %13806 = vmatprep.subr.bf16.mxu0 %v13805_v7  ;;  %v10789_v59 = vld [vmem:[%s18441_s3 + $0x40] sm:$0xff]  ;;  %v10827_v7 = vld [vmem:[%s18445_s4 + $0xe8] sm:$0xff] }
0x4b2e   :  { %13290 = vmatprep.mubr.msk.f32.mxu0 %vm18317_vm9, %v15211_v0  ;;  %v14501_v28 = vpop.eup %14500  ;;  %v13815_v57 = vpack.c.bf16 %v10791_v47, %v10789_v59  ;;  %v11553_v59 = vld [vmem:[#allocation34] ss:$0 sm:$0xff] }
0x4b2f   :  { %v10520_v21 = vmul.f32 %v14501_v28, %v14495_v55  ;;  %v10796_v28 = vld [vmem:[%s18441_s3 + $0x78] sm:$0xff] }
0x4b31   :  { %13291 = vmatmul.mubr.msk.f32.gmra.mrb[10].mxu0 %vm901_vm15, %v10519_v14  ;;  %v10794_v14 = vld [vmem:[%s18441_s3 + $0x68] sm:$0xff] }
0x4b32   :  { %13293 = vmatprep.mubr.msk.f32.mxu0 %vm18317_vm9, %v15211_v0 }
0x4b35   :  { %13294 = vmatmul.mubr.msk.f32.gmra.mrb[12].mxu0 %vm901_vm15, %v10520_v21  ;;  %vm18438_vm15 = vcmask 523264   ;;  %v13817_v21 = vpack.c.bf16 %v10796_v28, %v10794_v14 }
0x4b36   :  { %10917 = vmatprep.mubr.f32.mxu0 %v15211_v0 }
0x4c00   :  { %v10606_v34 = vpop.f32.mrb[8].mxu0 }
0x4c01   :  { %v13289_v20 = vpop.f32.mrb[9].mxu0  ;;  %13301 = vmatmul.mubr.msk.f32.vlgmr.msra.gmra.mrb[240].mxu1 %vm18435_vm2, %v10606_v34  ;;  %v10793_v34 = vld [vmem:[%s18441_s3 + $0x60] sm:$0xff] }
0x4c02   :  { %13303 = vmatprep.mubr.msk.f32.mxu1 %vm18317_vm9, %v15211_v0  ;;  %v10795_v20 = vld [vmem:[%s18441_s3 + $0x70] sm:$0xff] }
0x4c04   :  { %v10611_v9 = vpop.f32.mrb[10].mxu0 }
0x4c05   :  { %v13292_v38 = vpop.f32.mrb[11].mxu0  ;;  %13304 = vmatmul.mubr.msk.f32.gmra.mrb[242].mxu1 %vm18436_vm3, %v10611_v9  ;;  %v13819_v9 = vpack.c.bf16 %v10795_v20, %v10793_v34  ;;  %vm18455_vm3 = vmmov %vm18452_vm0 }
0x4c06   :  { %13306 = vmatprep.mubr.msk.f32.mxu1 %vm18317_vm9, %v15211_v0  ;;  %vm18439_vm9 = vmmov %vm18438_vm15  ;;  %v10814_v38 = vld [vmem:[%s18445_s4 + $0x80] sm:$0xff] }
0x4c07   :  { %vm18442_vm13 = vmmov %vm18439_vm9 }
0x4c08   :  { %v10616_v19 = vpop.f32.mrb[12].mxu0  ;;  %vm18443_vm10 = vmmov %vm18439_vm9 }
0x4c09   :  { %v13295_v8 = vpop.f32.mrb[13].mxu0  ;;  %13307 = vmatmul.mubr.msk.f32.gmra.mrb[244].mxu1 %vm18437_vm5, %v10616_v19  ;;  %v10815_v19 = vld [vmem:[%s18445_s4 + $0x88] sm:$0xff]  ;;  %vm18446_vm1 = vmmov %vm18439_vm9 }
0x4c0a   :  { %v10798_v8 = vld [vmem:[%s18445_s4] sm:$0xff]  ;;  %vm18447_vm4 = vmmov %vm18446_vm1 }
0x4c0b   :  { %vm18449_vm14 = vmmov %vm18446_vm1 }
0x4c0c   :  { %vm18450_vm8 = vmmov %vm18446_vm1 }
0x4c0d   :  { %vm18451_vm11 = vmmov %vm18446_vm1 }
0x4c0e   :  { %vm18453_vm6 = vmmov %vm18446_vm1 }
0x4c0f   :  { %vm18454_vm2 = vmmov %vm18446_vm1 }
0x4c10   :  { %vm18456_vm5 = vmmov %vm18446_vm1 }
0x4cd4   :  { %v10695_v29 = vpop.f32.mrb[240].mxu1 }
0x4cd5   :  { %v10709_v36 = vadd.f32 %v10695_v29, %v10381_v58  ;;  %v13302_v37 = vpop.f32.mrb[241].mxu1  ;;  %v13821_v29 = vpack.c.bf16 %v10815_v19, %v10814_v38 }
0x4cd6   :  { %v10816_v37 = vld [vmem:[%s18445_s4 + $0x90] sm:$0xff] }
0x4cd7   :  { %v10712_v25 = vadd.f32 %v10709_v36, %v17769_v5  ;;  %v10799_v36 = vld [vmem:[%s18445_s4 + $0x8] sm:$0xff]  ;;  %13822 = vmatprep.subr.bf16.mxu1 %v13821_v29 }
0x4cd8   :  { %v10700_v3 = vpop.f32.mrb[242].mxu1  ;;  %v10811_v29 = vld [vmem:[%s18445_s4 + $0x68] sm:$0xff] }
0x4cd9   :  { %v10710_v54 = vadd.f32 %v10700_v3, %v10382_v61  ;;  %v13305_v39 = vpop.f32.mrb[243].mxu1  ;;  %v10721_v24 = vadd.f32 %v11552_v26, %v10712_v25  ;;  %v13823_v25 = vpack.c.bf16 %v10799_v36, %v10798_v8  ;;  %v10810_v8 = vld [vmem:[%s18445_s4 + $0x60] sm:$0xff] }
0x4cda   :  { %v10801_v39 = vld [vmem:[%s18445_s4 + $0x18] sm:$0xff]  ;;  %v13847_v36 = vpack.c.bf16 %v10811_v29, %v10810_v8 }
0x4cdb   :  { %v10713_v11 = vadd.f32 %v10710_v54, %v17780_v48  ;;  %v10724_v2 = vsel %vm18438_vm15, %v10721_v24, 0.0  ;;  %v10800_v54 = vld [vmem:[%s18445_s4 + $0x10] sm:$0xff]  ;;  %13824 = vmatpush3.bf16.msra.mxu1 %v13823_v25  ;;  %vm18457_vm15 = vmmov %vm18446_vm1 }
0x4cdc   :  { %10725 = vadd.xlane.f32.xlu1 %v10724_v2  ;;  %v10705_v53 = vpop.f32.mrb[244].mxu1  ;;  %v13827_v2 = vpack.c.bf16 %v10801_v39, %v10800_v54  ;;  %v10813_v54 = vld [vmem:[%s18445_s4 + $0x78] sm:$0xff] }
0x4cdd   :  { %v10711_v46 = vadd.f32 %v10705_v53, %v10383_v6  ;;  %v13308_v32 = vpop.f32.mrb[245].mxu1  ;;  %v10722_v50 = vadd.f32 %v11552_v26, %v10713_v11  ;;  %v13807_v6 = vpack.c.bf16 %v10783_v13, %v10781_v63  ;;  %v10819_v11 = vld [vmem:[%s18445_s4 + $0xa8] sm:$0xff]  ;;  %v13845_v13 = vpack.c.bf16 %v10827_v7, %v10826_v44 }
0x4cde   :  { %v10803_v32 = vld [vmem:[%s18445_s4 + $0x28] sm:$0xff] }
0x4cdf   :  { %v10714_v35 = vadd.f32 %v10711_v46, %v17787_v10  ;;  %v10727_v40 = vsel %vm18439_vm9, %v10722_v50, 0.0  ;;  %13808 = vmatpush1.bf16.msra.mxu0 %v13807_v6  ;;  %v10802_v46 = vld [vmem:[%s18445_s4 + $0x20] sm:$0xff]  ;;  %vm18458_vm9 = vmmov %vm18452_vm0 }
0x4ce0   :  { %10728 = vadd.xlane.f32.xlu0 %v10727_v40  ;;  %13810 = vmatprep.subr.bf16.mxu0 %v13809_v12  ;;  %v13831_v40 = vpack.c.bf16 %v10803_v32, %v10802_v46 }
0x4ce1   :  { %v10723_v16 = vadd.f32 %v11552_v26, %v10714_v35  ;;  %v10817_v26 = vld [vmem:[%s18445_s4 + $0x98] sm:$0xff] }
0x4ce2   :  { %v13825_v3 = vpack.c.bf16 %v10817_v26, %v10816_v37  ;;  %v10821_v35 = vld [vmem:[%s18445_s4 + $0xb8] sm:$0xff]  ;;  %v10828_v37 = vld [vmem:[%s18445_s4 + $0xf0] sm:$0xff] }
0x4ce3   :  { %v10730_v5 = vsel %vm18440_vm7, %v10723_v16, 0.0  ;;  %13812 = vmatpush1.bf16.msra.mxu0 %v13811_v41  ;;  %v10829_v26 = vld [vmem:[%s18445_s4 + $0xf8] sm:$0xff] }
0x4ce4   :  { %10731 = vadd.xlane.f32.xlu1 %v10730_v5  ;;  %13814 = vmatprep.subr.bf16.mxu0 %v13813_v4  ;;  %v10804_v5 = vld [vmem:[%s18445_s4 + $0x30] sm:$0xff]  ;;  %v13849_v25 = vpack.c.bf16 %v10829_v26, %v10828_v37 }
0x4ce5   :  { %13826 = vmatprep.subr.bf16.mxu1 %v13825_v3  ;;  %v10812_v3 = vld [vmem:[%s18445_s4 + $0x70] sm:$0xff] }
0x4ce6   :  { %13828 = vmatpush3.bf16.msra.mxu1 %v13827_v2  ;;  %v13851_v39 = vpack.c.bf16 %v10813_v54, %v10812_v3 }
0x4ce7   :  { %13816 = vmatpush1.bf16.msra.mxu0 %v13815_v57  ;;  %v11554_v57 = vld [vmem:[#allocation36] ss:$0 sm:$0xff] }
0x4ce8   :  { %13818 = vmatprep.subr.bf16.mxu0 %v13817_v21 }
0x4ceb   :  { %13820 = vmatpush1.bf16.msra.mxu0 %v13819_v9 }
0x4d69   :  { %v10726_v17 = vpop.xlane.xlu1 %10725 }
0x4d6a   :  { %v10733_v42 = vmul.f32 0.015625, %v10726_v17  ;;  %v10805_v17 = vld [vmem:[%s18445_s4 + $0x38] sm:$0xff] }
0x4d6c   :  { %v18044_v45 = vsub.f32 %v10721_v24, %v10733_v42  ;;  %v10818_v24 = vld [vmem:[%s18445_s4 + $0xa0] sm:$0xff] }
0x4d6d   :  { %v10729_v48 = vpop.xlane.xlu0 %10728  ;;  %v13829_v53 = vpack.c.bf16 %v10819_v11, %v10818_v24  ;;  %v10822_v42 = vld [vmem:[%s18445_s4 + $0xc0] sm:$0xff] }
0x4d6e   :  { %v10734_v58 = vmul.f32 0.015625, %v10729_v48  ;;  %v10739_v23 = vmul.f32 %v18044_v45, %v18044_v45  ;;  %v10823_v48 = vld [vmem:[%s18445_s4 + $0xc8] sm:$0xff] }
0x4d6f   :  { %13830 = vmatprep.subr.bf16.mxu1 %v13829_v53 }
0x4d70   :  { %v18048_v10 = vsub.f32 %v10722_v50, %v10734_v58  ;;  %v10742_v18 = vsel %vm18442_vm13, %v10739_v23, 0.0  ;;  %v10820_v50 = vld [vmem:[%s18445_s4 + $0xb0] sm:$0xff]  ;;  %13832 = vmatpush3.bf16.msra.mxu1 %v13831_v40  ;;  %v13835_v58 = vpack.c.bf16 %v10805_v17, %v10804_v5  ;;  %v13837_v23 = vpack.c.bf16 %v10823_v48, %v10822_v42 }
0x4d71   :  { %10743 = vadd.xlane.f32.xlu0 %v10742_v18  ;;  %v10732_v62 = vpop.xlane.xlu1 %10731  ;;  %v10806_v18 = vld [vmem:[%s18445_s4 + $0x40] sm:$0xff] }
0x4d72   :  { %v10735_v61 = vmul.f32 0.015625, %v10732_v62  ;;  %v10740_v56 = vmul.f32 %v18048_v10, %v18048_v10  ;;  %v10807_v62 = vld [vmem:[%s18445_s4 + $0x48] sm:$0xff] }
0x4d74   :  { %v18053_v51 = vsub.f32 %v10723_v16, %v10735_v61  ;;  %v10745_v60 = vsel %vm18443_vm10, %v10740_v56, 0.0  ;;  %v13833_v16 = vpack.c.bf16 %v10821_v35, %v10820_v50  ;;  %v10824_v61 = vld [vmem:[%s18445_s4 + $0xd0] sm:$0xff]  ;;  %v10825_v56 = vld [vmem:[%s18445_s4 + $0xd8] sm:$0xff] }
0x4d75   :  { %10746 = vadd.xlane.f32.xlu1 %v10745_v60  ;;  %v13839_v60 = vpack.c.bf16 %v10807_v62, %v10806_v18 }
0x4d76   :  { %v10741_v15 = vmul.f32 %v18053_v51, %v18053_v51  ;;  %13834 = vmatprep.subr.bf16.mxu1 %v13833_v16 }
0x4d77   :  { %13836 = vmatpush3.bf16.msra.mxu1 %v13835_v58 }
0x4d78   :  { %v10748_v55 = vsel %vm18444_vm12, %v10741_v15, 0.0  ;;  %13838 = vmatprep.subr.bf16.mxu1 %v13837_v23  ;;  %v13841_v15 = vpack.c.bf16 %v10825_v56, %v10824_v61  ;;  %v11558_v61 = vld [vmem:[#allocation37] ss:$0 sm:$0xff] }
0x4d79   :  { %10749 = vadd.xlane.f32.xlu0 %v10748_v55  ;;  %v10808_v55 = vld [vmem:[%s18445_s4 + $0x50] sm:$0xff] }
0x4d7a   :  { %v13843_v63 = vpack.c.bf16 %v10809_v30, %v10808_v55 }
0x4d7b   :  { %13840 = vmatpush3.bf16.msra.mxu1 %v13839_v60 }
0x4d7c   :  { %13842 = vmatprep.subr.bf16.mxu1 %v13841_v15 }
0x4d7f   :  { %13844 = vmatpush3.bf16.msra.mxu1 %v13843_v63 }
0x4d80   :  { %13846 = vmatprep.subr.bf16.mxu1 %v13845_v13 }
0x4d83   :  { %13848 = vmatpush3.bf16.msra.mxu1 %v13847_v36 }
0x4d84   :  { %13850 = vmatprep.subr.bf16.mxu1 %v13849_v25 }
0x4d87   :  { %13852 = vmatpush3.bf16.msra.mxu1 %v13851_v39 }
0x4dfe   :  { %v10744_v6 = vpop.xlane.xlu0 %10743 }
0x4dff   :  { %v10751_v52 = vmul.f32 0.015625, %v10744_v6 }
0x4e01   :  { %v10754_v43 = vadd.f32 1e-05, %v10751_v52 }
0x4e02   :  { %v10747_v12 = vpop.xlane.xlu1 %10746 }
0x4e03   :  { %14502 = vrsqrt.f32 %v10754_v43  ;;  %v10752_v22 = vmul.f32 0.015625, %v10747_v12 }
0x4e05   :  { %v10755_v1 = vadd.f32 1e-05, %v10752_v22 }
0x4e06   :  { %v10750_v41 = vpop.xlane.xlu0 %10749 }
0x4e07   :  { %14504 = vrsqrt.f32 %v10755_v1  ;;  %v10753_v27 = vmul.f32 0.015625, %v10750_v41 }
0x4e09   :  { %v10756_v49 = vadd.f32 1e-05, %v10753_v27 }
0x4e0b   :  { %14506 = vrsqrt.f32 %v10756_v49 }
0x4e0d   :  { %v14503_v4 = vpop.eup %14502 }
0x4e0e   :  { %v10760_v47 = vmul.f32 %v14503_v4, %v18044_v45 }
0x4e10   :  { %v10769_v14 = vmul.f32 %v11553_v59, %v10760_v47 }
0x4e11   :  { %v14505_v28 = vpop.eup %14504 }
0x4e12   :  { %v10778_v21 = vadd.f32 %v11554_v57, %v10769_v14  ;;  %v10761_v34 = vmul.f32 %v14505_v28, %v18048_v10 }
0x4e14   :  { %v10770_v20 = vmul.f32 %v11553_v59, %v10761_v34  ;;  %11555 = vmatmul.mubr.msk.f32.vlgmr.msra.gmra.mrb[14].mxu0 %vm18446_vm1, %v10778_v21 }
0x4e15   :  { %v14507_v9 = vpop.eup %14506  ;;  %10923 = vmatprep.mubr.f32.mxu0 %v15211_v0 }
0x4e16   :  { %v10779_v38 = vadd.f32 %v11554_v57, %v10770_v20  ;;  %v10762_v45 = vmul.f32 %v14507_v9, %v18053_v51  ;;  %v10797_v51 = vld [vmem:[%s18448_s18] sm:$0x3] }
0x4e17   :  { %v10837_v24 = vrot.slane %v10797_v51, %v15700_v31 }
0x4e18   :  { %v10771_v19 = vmul.f32 %v11553_v59, %v10762_v45  ;;  %11556 = vmatmul.mubr.msk.f32.gmra.mrb[16].mxu0 %vm18447_vm4, %v10779_v38 }
0x4e19   :  { %10929 = vmatprep.mubr.f32.mxu0 %v15211_v0  ;;  %v10841_v0 = vrot.slane %v10797_v51, %v15704_v33 }
0x4e1a   :  { %v10780_v10 = vadd.f32 %v11554_v57, %v10771_v19 }
0x4e1c   :  { %11557 = vmatmul.mubr.msk.f32.gmra.mrb[18].mxu0 %vm18449_vm14, %v10780_v10 }
0x4ee7   :  { %v10919_v11 = vpop.f32.mrb[14].mxu0 }
0x4ee8   :  { %v10920_v2 = vadd.f32 %v10919_v11, %v10837_v24  ;;  %v10921_v53 = vpop.f32.mrb[15].mxu0  ;;  %v11560_v11 = vld [vmem:[#allocation40] ss:$0 sm:$0xff] }
0x4ee9   :  { %v10922_v46 = vadd.f32 %v10921_v53, %v10841_v0 }
0x4eea   :  { %v10936_v35 = vmax.f32 %v10920_v2, 0.0 }
0x4eeb   :  { %v10937_v32 = vmax.f32 %v10922_v46, 0.0  ;;  %v10925_v50 = vpop.f32.mrb[16].mxu0 }
0x4eec   :  { %v10926_v40 = vadd.f32 %v10925_v50, %v10837_v24  ;;  %v10927_v16 = vpop.f32.mrb[17].mxu0 }
0x4eed   :  { %v10928_v5 = vadd.f32 %v10927_v16, %v10841_v0  ;;  %11012 = vmatprep.mubr.f32.mxu1 %v10937_v32 }
0x4eee   :  { %11013 = vmatmul.mubr.f32.vlgmr.msra.gmra.mrb[246].mxu1 %v10936_v35  ;;  %v10938_v48 = vmax.f32 %v10926_v40, 0.0 }
0x4eef   :  { %v10939_v17 = vmax.f32 %v10928_v5, 0.0  ;;  %v10931_v42 = vpop.f32.mrb[18].mxu0 }
0x4ef0   :  { %v10932_v58 = vadd.f32 %v10931_v42, %v10837_v24  ;;  %v10933_v23 = vpop.f32.mrb[19].mxu0  ;;  %v11559_v24 = vld [vmem:[#allocation39] ss:$0 sm:$0xff] }
0x4ef1   :  { %v10934_v31 = vadd.f32 %v10933_v23, %v10841_v0  ;;  %11017 = vmatprep.mubr.f32.mxu1 %v10939_v17 }
0x4ef2   :  { %11018 = vmatmul.mubr.f32.gmra.mrb[248].mxu1 %v10938_v48  ;;  %v10940_v18 = vmax.f32 %v10932_v58, 0.0 }
0x4ef3   :  { %v10941_v33 = vmax.f32 %v10934_v31, 0.0 }
0x4ef5   :  { %11022 = vmatprep.mubr.f32.mxu1 %v10941_v33 }
0x4ef6   :  { %11023 = vmatmul.mubr.f32.gmra.mrb[250].mxu1 %v10940_v18 }
0x4fc1   :  { %v12168_v62 = vpop.f32.mrb[246].mxu1 }
0x4fc2   :  { %v12169_v56 = vpop.f32.mrb[247].mxu1 }
0x4fc3   :  { %v12170_v60 = vadd.f32 %v12169_v56, %v12168_v62 }
0x4fc5   :  { %v11015_v15 = vadd.f32 %v12170_v60, %v11558_v61  ;;  %v12171_v55 = vpop.f32.mrb[248].mxu1 }
0x4fc6   :  { %v12172_v30 = vpop.f32.mrb[249].mxu1 }
0x4fc7   :  { %v12173_v44 = vadd.f32 %v12172_v30, %v12171_v55  ;;  %v11028_v7 = vadd.f32 %v11015_v15, %v10778_v21 }
0x4fc9   :  { %v11020_v63 = vadd.f32 %v12173_v44, %v11558_v61  ;;  %v12174_v13 = vpop.f32.mrb[250].mxu1  ;;  %v11031_v6 = vsel %vm18450_vm8, %v11028_v7, 0.0 }
0x4fca   :  { %v12175_v52 = vpop.f32.mrb[251].mxu1  ;;  %11032 = vadd.xlane.f32.xlu1 %v11031_v6 }
0x4fcb   :  { %v12176_v43 = vadd.f32 %v12175_v52, %v12174_v13  ;;  %v11029_v12 = vadd.f32 %v11020_v63, %v10779_v38 }
0x4fcd   :  { %v11025_v22 = vadd.f32 %v12176_v43, %v11558_v61  ;;  %v11034_v1 = vsel %vm18451_vm11, %v11029_v12, 0.0 }
0x4fce   :  { %11035 = vadd.xlane.f32.xlu0 %v11034_v1 }
0x4fcf   :  { %v11030_v41 = vadd.f32 %v11025_v22, %v10780_v10 }
0x4fd1   :  { %v11037_v27 = vsel %vm18452_vm0, %v11030_v41, 0.0 }
0x4fd2   :  { %11038 = vadd.xlane.f32.xlu1 %v11037_v27 }
0x5057   :  { %v11033_v49 = vpop.xlane.xlu1 %11032 }
0x5058   :  { %v11040_v4 = vmul.f32 0.015625, %v11033_v49 }
0x505a   :  { %v11043_v59 = vsub.f32 %v11028_v7, %v11040_v4 }
0x505b   :  { %v11036_v47 = vpop.xlane.xlu0 %11035 }
0x505c   :  { %v11041_v57 = vmul.f32 0.015625, %v11036_v47  ;;  %v11046_v14 = vmul.f32 %v11043_v59, %v11043_v59 }
0x505e   :  { %v11044_v28 = vsub.f32 %v11029_v12, %v11041_v57  ;;  %v11049_v21 = vsel %vm18453_vm6, %v11046_v14, 0.0 }
0x505f   :  { %11050 = vadd.xlane.f32.xlu0 %v11049_v21  ;;  %v11039_v34 = vpop.xlane.xlu1 %11038 }
0x5060   :  { %v11042_v20 = vmul.f32 0.015625, %v11039_v34  ;;  %v11047_v9 = vmul.f32 %v11044_v28, %v11044_v28 }
0x5062   :  { %v11045_v38 = vsub.f32 %v11030_v41, %v11042_v20  ;;  %v11052_v45 = vsel %vm18454_vm2, %v11047_v9, 0.0 }
0x5063   :  { %11053 = vadd.xlane.f32.xlu1 %v11052_v45 }
0x5064   :  { %v11048_v19 = vmul.f32 %v11045_v38, %v11045_v38 }
0x5066   :  { %v11055_v10 = vsel %vm18455_vm3, %v11048_v19, 0.0 }
0x5067   :  { %11056 = vadd.xlane.f32.xlu0 %v11055_v10 }
0x50ec   :  { %v11051_v8 = vpop.xlane.xlu0 %11050 }
0x50ed   :  { %v11058_v29 = vmul.f32 0.015625, %v11051_v8 }
0x50ef   :  { %v11061_v36 = vadd.f32 1e-05, %v11058_v29 }
0x50f0   :  { %v11054_v37 = vpop.xlane.xlu1 %11053 }
0x50f1   :  { %14508 = vrsqrt.f32 %v11061_v36  ;;  %v11059_v26 = vmul.f32 0.015625, %v11054_v37 }
0x50f3   :  { %v11062_v25 = vadd.f32 1e-05, %v11059_v26 }
0x50f4   :  { %v11057_v3 = vpop.xlane.xlu0 %11056 }
0x50f5   :  { %14510 = vrsqrt.f32 %v11062_v25  ;;  %v11060_v54 = vmul.f32 0.015625, %v11057_v3 }
0x50f7   :  { %v11063_v39 = vadd.f32 1e-05, %v11060_v54 }
0x50f9   :  { %14512 = vrsqrt.f32 %v11063_v39 }
0x50fb   :  { %v14509_v51 = vpop.eup %14508 }
0x50fc   :  { %v11067_v0 = vmul.f32 %v14509_v51, %v11043_v59 }
0x50fe   :  { %v11076_v2 = vmul.f32 %v11559_v24, %v11067_v0 }
0x50ff   :  { %v14511_v53 = vpop.eup %14510 }
0x5100   :  { %v11085_v46 = vadd.f32 %v11560_v11, %v11076_v2  ;;  %v11068_v32 = vmul.f32 %v14511_v53, %v11044_v28 }
0x5102   :  { %11088 = vst.msk [vmem:[%s15560_s30] sm:$0xff] %vm18456_vm5, %v11085_v46  ;;  %v11077_v50 = vmul.f32 %v11559_v24, %v11068_v32 }
0x5103   :  { %v14513_v35 = vpop.eup %14512 }
0x5104   :  { %v11086_v40 = vadd.f32 %v11560_v11, %v11077_v50  ;;  %v11069_v16 = vmul.f32 %v14513_v35, %v11045_v38 }
0x5106   :  { %11089 = vst.msk [vmem:[%s15560_s30 + $0x8] sm:$0xff] %vm18457_vm15, %v11086_v40  ;;  %v11078_v5 = vmul.f32 %v11559_v24, %v11069_v16 }
0x5108   :  { %v11087_v17 = vadd.f32 %v11560_v11, %v11078_v5 }
0x510a   :  { %11090 = vst.msk [vmem:[%s15560_s30 + $0x10] sm:$0x3] %vm18458_vm9, %v11087_v17 }
0x510b   :  { %11095 = vsyncpa [#allocation3], 1 }
0x510c   :  { %11096 = vsyncpa [#allocation5], 1 }
0x510d   :  { %11097 = vsyncpa [#allocation8], 1 }
0x510e   :  { %11098 = vsyncpa [#allocation11], 1 }
0x510f   :  { %11099 = vsyncpa [#allocation14], 1 }
0x5110   :  { %11100 = vsyncpa [#allocation17], 1 }
0x5111   :  { %11101 = vsyncpa [#allocation20], 1 }
0x5112   :  { %11102 = vsyncpa [#allocation23], 1 }
0x5113   :  { %11103 = vsyncpa [#allocation26], 1 }
0x5114   :  { %11104 = vsyncpa [#allocation29], 1 }
0x5115   :  { %11105 = vsyncpa [#allocation32], 1 }
0x5116   :  { %11106 = vsyncpa [#allocation35], 1 }
0x5117   :  { %11107 = vsyncpa [#allocation38], 1 }
0x5118   :  { %11108 = vsyncpa [#allocation41], 1 }

</bundles_post_ra>
